<compile_context>
chip_gen: v7x
topology: tpu7x:2x2x1
jax: 0.10.0
libtpu: 0.0.40
codegen_flags: <defaults>
</compile_context>

<pallas_src>
import functools

import jax
import jax.numpy as jnp
from jax.experimental import pallas as pl
from jax.experimental.pallas import tpu as pltpu


# ----------------------------- small in-kernel helpers ------------------------
def _leaky(x):
    return jnp.where(x > 0, x, 0.01 * x)


def _sigmoid(x):
    # exact identity 1/(1+e^-x) == 0.5*(tanh(x/2)+1); tanh runs on the EUP slot.
    return 0.5 * (jnp.tanh(0.5 * x) + 1.0)


# ==============================================================================
# Kernel 1: DoubleAxisAttention conv(3x3)+LeakyReLU pair, fused, im2col in-kernel
# ==============================================================================
def _dattn_conv_kernel(xp_ref, w1_ref, b1_ref, w2_ref, b2_ref, o_ref,
                       hpad_ref, tmp_ref, *, H, W, Cin, C):
    Wp = W + 2
    M = H * Wp
    # ---- conv1 (Cin -> C), taps accumulated from the flattened padded input
    acc = jnp.zeros((M, C), jnp.float32) + b1_ref[...]
    for di in range(3):
        for dj in range(3):
            s = di * Wp + dj
            wt = w1_ref[(di * 3 + dj) * Cin:(di * 3 + dj + 1) * Cin, :]
            acc = acc + jnp.dot(xp_ref[s:s + M, :], wt,
                                preferred_element_type=jnp.float32)
    tmp_ref[...] = _leaky(acc)

    # ---- re-pad conv1 output inside VMEM for the second conv
    hpad_ref[...] = jnp.zeros_like(hpad_ref)
    for h in range(H):
        hpad_ref[(h + 1) * Wp + 1:(h + 1) * Wp + 1 + W, :] = \
            tmp_ref[h * Wp:h * Wp + W, :]

    # ---- conv2 (C -> C)
    acc2 = jnp.zeros((M, C), jnp.float32) + b2_ref[...]
    for di in range(3):
        for dj in range(3):
            s = di * Wp + dj
            wt = w2_ref[(di * 3 + dj) * C:(di * 3 + dj + 1) * C, :]
            acc2 = acc2 + jnp.dot(hpad_ref[s:s + M, :], wt,
                                  preferred_element_type=jnp.float32)
    tmp_ref[...] = _leaky(acc2)
    for h in range(H):
        o_ref[h] = tmp_ref[h * Wp:h * Wp + W, :]


def dattn_convs(spec, p, H, W, C):
    B, _, _, Cin = spec.shape
    Wp = W + 2
    F = (H + 2) * Wp + 2                       # flattened padded rows (+slack)
    xp = jnp.pad(spec, ((0, 0), (1, 1), (1, 1), (0, 0)))
    xp = xp.reshape(B, (H + 2) * Wp, Cin)
    xp = jnp.pad(xp, ((0, 0), (0, 2), (0, 0)))
    kern = functools.partial(_dattn_conv_kernel, H=H, W=W, Cin=Cin, C=C)
    return pl.pallas_call(
        kern,
        out_shape=jax.ShapeDtypeStruct((B, H, W, C), jnp.float32),
        grid=(B,),
        in_specs=[
            pl.BlockSpec((None, F, Cin), lambda b: (b, 0, 0)),
            pl.BlockSpec((9 * Cin, C), lambda b: (0, 0)),
            pl.BlockSpec((1, C), lambda b: (0, 0)),
            pl.BlockSpec((9 * C, C), lambda b: (0, 0)),
            pl.BlockSpec((1, C), lambda b: (0, 0)),
        ],
        out_specs=pl.BlockSpec((None, H, W, C), lambda b: (b, 0, 0, 0)),
        scratch_shapes=[pltpu.VMEM((F, C), jnp.float32),
                        pltpu.VMEM((H * Wp, C), jnp.float32)],
        compiler_params=pltpu.CompilerParams(dimension_semantics=("parallel",)),
    )(xp, p['conv1_w'], p['conv1_b'], p['conv2_w'], p['conv2_b'])


# ==============================================================================
# Kernel 2: fused single-head MultiHeadAttention over all packed sequences
#   one QKV matmul + block-diagonal-masked attention + output projection
# ==============================================================================
def _mha_kernel(x_ref, mask_ref, wqkv_ref, bqkv_ref, wo_ref, bo_ref, o_ref,
                *, C, scale):
    qkv = jnp.dot(x_ref[...], wqkv_ref[...],
                  preferred_element_type=jnp.float32) + bqkv_ref[...]
    q = qkv[:, 0:C] * scale
    k = qkv[:, C:2 * C]
    v = qkv[:, 2 * C:3 * C]
    s = jax.lax.dot_general(q, k, (((1,), (1,)), ((), ())),
                            preferred_element_type=jnp.float32) + mask_ref[...]
    m = jnp.max(s, axis=-1, keepdims=True)
    e = jnp.exp(s - m)
    p = e * pl.reciprocal(jnp.sum(e, axis=-1, keepdims=True), approx=True)
    attn = jnp.dot(p, v, preferred_element_type=jnp.float32)
    o_ref[...] = jnp.dot(attn, wo_ref[...],
                         preferred_element_type=jnp.float32) + bo_ref[...]


def fused_mha(x_flat, p, n_seq, S, C):
    M = n_seq * S
    ids = jnp.repeat(jnp.arange(n_seq, dtype=jnp.int32), S)
    mask = jnp.where(ids[:, None] == ids[None, :], 0.0, -1e9).astype(jnp.float32)
    kern = functools.partial(_mha_kernel, C=C, scale=float(C) ** -0.5)
    return pl.pallas_call(
        kern,
        out_shape=jax.ShapeDtypeStruct((M, C), jnp.float32),
        grid=(1,),
        in_specs=[
            pl.BlockSpec((M, C), lambda i: (0, 0)),
            pl.BlockSpec((M, M), lambda i: (0, 0)),
            pl.BlockSpec((C, 3 * C), lambda i: (0, 0)),
            pl.BlockSpec((1, 3 * C), lambda i: (0, 0)),
            pl.BlockSpec((C, C), lambda i: (0, 0)),
            pl.BlockSpec((1, C), lambda i: (0, 0)),
        ],
        out_specs=pl.BlockSpec((M, C), lambda i: (0, 0)),
    )(x_flat, mask, p['wqkv'], p['bqkv'], p['wo'], p['bo'])


# ==============================================================================
# Kernel 3: dense(spec) + time_attn + freq_attn, then mean over frames
# ==============================================================================
def _mix_mean_kernel(spec_ref, ta_ref, fa_ref, w_ref, b_ref, o_ref, *, B, nf, nb):
    x = jnp.dot(spec_ref[...], w_ref[...], preferred_element_type=jnp.float32)
    x = x + b_ref[...] + ta_ref[...] + fa_ref[...]
    inv = 1.0 / float(nf)
    for b in range(B):
        base = b * nf * nb
        acc = x[base:base + nb, :]
        for f in range(1, nf):
            acc = acc + x[base + f * nb:base + (f + 1) * nb, :]
        o_ref[b * nb:(b + 1) * nb, :] = acc * inv


def mix_mean(spec_flat, ta_flat, fa_flat, w, b, B, nf, nb):
    C = w.shape[-1]
    kern = functools.partial(_mix_mean_kernel, B=B, nf=nf, nb=nb)
    return pl.pallas_call(
        kern,
        out_shape=jax.ShapeDtypeStruct((B * nb, C), jnp.float32),
        grid=(1,),
        in_specs=[
            pl.BlockSpec((B * nf * nb, 2), lambda i: (0, 0)),
            pl.BlockSpec((B * nf * nb, C), lambda i: (0, 0)),
            pl.BlockSpec((B * nf * nb, C), lambda i: (0, 0)),
            pl.BlockSpec((2, C), lambda i: (0, 0)),
            pl.BlockSpec((1, C), lambda i: (0, 0)),
        ],
        out_specs=pl.BlockSpec((B * nb, C), lambda i: (0, 0)),
    )(spec_flat, ta_flat, fa_flat, w, b)


# ==============================================================================
# Kernel 4: fused U-Net double conv1d (k=3, pad=1, ReLU) x2, taps in-kernel
# ==============================================================================
def _double_conv1d_kernel(xp_ref, w1_ref, b1_ref, w2_ref, b2_ref, o_ref,
                          hpad_ref, *, L, Cin, Cout):
    acc = jnp.zeros((L, Cout), jnp.float32) + b1_ref[...]
    for d in range(3):
        acc = acc + jnp.dot(xp_ref[d:d + L, :], w1_ref[d * Cin:(d + 1) * Cin, :],
                            preferred_element_type=jnp.float32)
    hpad_ref[...] = jnp.zeros_like(hpad_ref)
    hpad_ref[1:1 + L, :] = jnp.maximum(acc, 0.0)
    acc2 = jnp.zeros((L, Cout), jnp.float32) + b2_ref[...]
    for d in range(3):
        acc2 = acc2 + jnp.dot(hpad_ref[d:d + L, :],
                              w2_ref[d * Cout:(d + 1) * Cout, :],
                              preferred_element_type=jnp.float32)
    o_ref[...] = jnp.maximum(acc2, 0.0)


def double_conv1d(x, p):
    B, L, Cin = x.shape
    Cout = p['w1'].shape[-1]
    xp = jnp.pad(x, ((0, 0), (1, 1), (0, 0)))
    kern = functools.partial(_double_conv1d_kernel, L=L, Cin=Cin, Cout=Cout)
    return pl.pallas_call(
        kern,
        out_shape=jax.ShapeDtypeStruct((B, L, Cout), jnp.float32),
        grid=(B,),
        in_specs=[
            pl.BlockSpec((None, L + 2, Cin), lambda b: (b, 0, 0)),
            pl.BlockSpec((3 * Cin, Cout), lambda b: (0, 0)),
            pl.BlockSpec((1, Cout), lambda b: (0, 0)),
            pl.BlockSpec((3 * Cout, Cout), lambda b: (0, 0)),
            pl.BlockSpec((1, Cout), lambda b: (0, 0)),
        ],
        out_specs=pl.BlockSpec((None, L, Cout), lambda b: (b, 0, 0)),
        scratch_shapes=[pltpu.VMEM((L + 2, Cout), jnp.float32)],
        compiler_params=pltpu.CompilerParams(dimension_semantics=("parallel",)),
    )(xp, p['w1'], p['b1'], p['w2'], p['b2'])


# ==============================================================================
# Kernel 5: causal dilated conv1d (+ folded BatchNorm + LeakyReLU), taps in-kernel
# ==============================================================================
def _causal_conv_kernel(xp_ref, w_ref, b_ref, o_ref, *, L, Cin, k, dilation):
    Cout = o_ref.shape[-1]
    acc = jnp.zeros((L, Cout), jnp.float32) + b_ref[...]
    for d in range(k):
        s = d * dilation
        xs = xp_ref[s:s + L, :]
        if Cin == 1:
            acc = acc + xs * w_ref[d:d + 1, :]            # broadcast, K=1 case
        else:
            acc = acc + jnp.dot(xs, w_ref[d * Cin:(d + 1) * Cin, :],
                                preferred_element_type=jnp.float32)
    o_ref[...] = _leaky(acc)


def causal_conv1d_leaky(x, w, b, k, dilation):
    B, L, Cin = x.shape
    Cout = w.shape[-1]
    pad = (k - 1) * dilation
    xp = jnp.pad(x, ((0, 0), (pad, 0), (0, 0)))
    kern = functools.partial(_causal_conv_kernel, L=L, Cin=Cin, k=k,
                             dilation=dilation)
    return pl.pallas_call(
        kern,
        out_shape=jax.ShapeDtypeStruct((B, L, Cout), jnp.float32),
        grid=(B,),
        in_specs=[
            pl.BlockSpec((None, L + pad, Cin), lambda b: (b, 0, 0)),
            pl.BlockSpec((k * Cin, Cout), lambda b: (0, 0)),
            pl.BlockSpec((1, Cout), lambda b: (0, 0)),
        ],
        out_specs=pl.BlockSpec((None, L, Cout), lambda b: (b, 0, 0)),
        compiler_params=pltpu.CompilerParams(dimension_semantics=("parallel",)),
    )(xp, w, b)


# ==============================================================================
# Kernel 6: fused 2-layer LSTM + feat/value heads + weight/feat convs + fusion
# ==============================================================================
def _time_fuse_kernel(x_ref, wih1_ref, whh1_ref, b1_ref,
                      wih2_ref, whh2_ref, b2_ref,
                      fvw_ref, fvb_ref, xb_ref,
                      wcw_ref, wcb_ref, fcw_ref, fcb_ref,
                      o_ref, *, T, B, H, cb):
    wih1 = wih1_ref[...]; whh1 = whh1_ref[...]; b1 = b1_ref[...]
    wih2 = wih2_ref[...]; whh2 = whh2_ref[...]; b2 = b2_ref[...]

    def cell(x_t, h, c, wih, whh, bias):
        g = (jnp.dot(x_t, wih, preferred_element_type=jnp.float32)
             + jnp.dot(h, whh, preferred_element_type=jnp.float32) + bias)
        i = _sigmoid(g[:, 0:H])
        f = _sigmoid(g[:, H:2 * H])
        gg = jnp.tanh(g[:, 2 * H:3 * H])
        o = _sigmoid(g[:, 3 * H:4 * H])
        c_new = f * c + i * gg
        return o * jnp.tanh(c_new), c_new

    h1 = jnp.zeros((B, H), jnp.float32); c1 = jnp.zeros((B, H), jnp.float32)
    h2 = jnp.zeros((B, H), jnp.float32); c2 = jnp.zeros((B, H), jnp.float32)
    for t in range(T):                         # recurrence stays in VMEM/vregs
        x_t = x_ref[t]                         # (B, I)
        h1, c1 = cell(x_t, h1, c1, wih1, whh1, b1)
        h2, c2 = cell(h1, h2, c2, wih2, whh2, b2)

    # feat & value heads (fused into one lane-dense matmul) + LeakyReLU
    fv = jnp.dot(h2, fvw_ref[...], preferred_element_type=jnp.float32) + fvb_ref[...]
    fv = _leaky(fv)                            # (B, 2*cb): [:, :cb]=feat, [:, cb:]=value

    # bottleneck fusion with the k=2 weight/feat convs
    for bi in range(B):
        xb = xb_ref[bi]                        # (2, cb)
        wb = fv[bi:bi + 1, 0:cb]
        fb = fv[bi:bi + 1, cb:2 * cb]
        w_first = jnp.concatenate([wb, xb[0:1, :]], axis=0)   # rows [wb, x0]
        f_first = jnp.concatenate([fb, xb[0:1, :]], axis=0)
        w_out = jnp.tanh(
            jnp.dot(w_first, wcw_ref[0:cb, :], preferred_element_type=jnp.float32)
            + jnp.dot(xb, wcw_ref[cb:2 * cb, :], preferred_element_type=jnp.float32)
            + wcb_ref[...])
        f_out = jnp.maximum(
            jnp.dot(f_first, fcw_ref[0:cb, :], preferred_element_type=jnp.float32)
            + jnp.dot(xb, fcw_ref[cb:2 * cb, :], preferred_element_type=jnp.float32)
            + fcb_ref[...], 0.0)
        o_ref[bi] = xb + w_out * f_out


def time_fuse(x_seq_tbi, xbott, p):
    T, B, I = x_seq_tbi.shape
    H = 64
    cb = xbott.shape[-1]
    kern = functools.partial(_time_fuse_kernel, T=T, B=B, H=H, cb=cb)
    return pl.pallas_call(
        kern,
        out_shape=jax.ShapeDtypeStruct((B, 2, cb), jnp.float32),
        grid=(1,),
        in_specs=[
            pl.BlockSpec((T, B, I), lambda i: (0, 0, 0)),
            pl.BlockSpec((I, 4 * H), lambda i: (0, 0)),
            pl.BlockSpec((H, 4 * H), lambda i: (0, 0)),
            pl.BlockSpec((1, 4 * H), lambda i: (0, 0)),
            pl.BlockSpec((H, 4 * H), lambda i: (0, 0)),
            pl.BlockSpec((H, 4 * H), lambda i: (0, 0)),
            pl.BlockSpec((1, 4 * H), lambda i: (0, 0)),
            pl.BlockSpec((H, 2 * cb), lambda i: (0, 0)),
            pl.BlockSpec((1, 2 * cb), lambda i: (0, 0)),
            pl.BlockSpec((B, 2, cb), lambda i: (0, 0, 0)),
            pl.BlockSpec((2 * cb, cb), lambda i: (0, 0)),
            pl.BlockSpec((1, cb), lambda i: (0, 0)),
            pl.BlockSpec((2 * cb, cb), lambda i: (0, 0)),
            pl.BlockSpec((1, cb), lambda i: (0, 0)),
        ],
        out_specs=pl.BlockSpec((B, 2, cb), lambda i: (0, 0, 0)),
    )(x_seq_tbi, p['l1_wih'], p['l1_whh'], p['l1_b'],
      p['l2_wih'], p['l2_whh'], p['l2_b'],
      p['fv_w'], p['fv_b'], xbott,
      p['wconv_w'], p['wconv_b'], p['fconv_w'], p['fconv_b'])


# ==============================================================================
# Kernel 7: UpsampleFusion attention gate + fused double conv
# ==============================================================================
def _upfuse_kernel(up_ref, y_ref, w1_ref, b1_ref, w2_ref, b2_ref, ww_ref, bw_ref,
                   cw1_ref, cb1_ref, cw2_ref, cb2_ref, o_ref,
                   cat_ref, mid_ref, *, L, xch, ych, outch):
    up = up_ref[...]                                          # (L, xch)
    y = y_ref[...]                                            # (L, ych)
    theta = jnp.dot(y, w1_ref[...], preferred_element_type=jnp.float32) + b1_ref[...]
    phi = jnp.dot(up, w2_ref[...], preferred_element_type=jnp.float32) + b2_ref[...]
    psi = jnp.maximum(theta + phi, 0.0)                       # (L, inter)
    z = jnp.sum(psi * ww_ref[...], axis=1, keepdims=True) + bw_ref[...]
    rate = _sigmoid(z)                                        # (L, 1)
    att_y = y * rate

    cc = xch + ych
    cat_ref[...] = jnp.zeros_like(cat_ref)
    cat_ref[1:1 + L, 0:xch] = up
    cat_ref[1:1 + L, xch:cc] = att_y

    acc = jnp.zeros((L, outch), jnp.float32) + cb1_ref[...]
    for d in range(3):
        acc = acc + jnp.dot(cat_ref[d:d + L, :], cw1_ref[d * cc:(d + 1) * cc, :],
                            preferred_element_type=jnp.float32)
    mid_ref[...] = jnp.zeros_like(mid_ref)
    mid_ref[1:1 + L, :] = jnp.maximum(acc, 0.0)

    acc2 = jnp.zeros((L, outch), jnp.float32) + cb2_ref[...]
    for d in range(3):
        acc2 = acc2 + jnp.dot(mid_ref[d:d + L, :],
                              cw2_ref[d * outch:(d + 1) * outch, :],
                              preferred_element_type=jnp.float32)
    o_ref[...] = jnp.maximum(acc2, 0.0)


def upsample_fuse_block(x, skip, pu, pc, factor):
    B, Ls, ych = skip.shape
    xch = x.shape[-1]
    inter = pu['w1'].shape[-1]
    outch = pc['w1'].shape[-1]
    up = jnp.repeat(x, factor, axis=1)                        # nearest upsample
    kern = functools.partial(_upfuse_kernel, L=Ls, xch=xch, ych=ych, outch=outch)
    return pl.pallas_call(
        kern,
        out_shape=jax.ShapeDtypeStruct((B, Ls, outch), jnp.float32),
        grid=(B,),
        in_specs=[
            pl.BlockSpec((None, Ls, xch), lambda b: (b, 0, 0)),
            pl.BlockSpec((None, Ls, ych), lambda b: (b, 0, 0)),
            pl.BlockSpec((ych, inter), lambda b: (0, 0)),
            pl.BlockSpec((1, inter), lambda b: (0, 0)),
            pl.BlockSpec((xch, inter), lambda b: (0, 0)),
            pl.BlockSpec((1, inter), lambda b: (0, 0)),
            pl.BlockSpec((1, inter), lambda b: (0, 0)),
            pl.BlockSpec((1, 1), lambda b: (0, 0)),
            pl.BlockSpec((3 * (xch + ych), outch), lambda b: (0, 0)),
            pl.BlockSpec((1, outch), lambda b: (0, 0)),
            pl.BlockSpec((3 * outch, outch), lambda b: (0, 0)),
            pl.BlockSpec((1, outch), lambda b: (0, 0)),
        ],
        out_specs=pl.BlockSpec((None, Ls, outch), lambda b: (b, 0, 0)),
        scratch_shapes=[pltpu.VMEM((Ls + 2, xch + ych), jnp.float32),
                        pltpu.VMEM((Ls + 2, outch), jnp.float32)],
        compiler_params=pltpu.CompilerParams(dimension_semantics=("parallel",)),
    )(up, skip, pu['w1'], pu['b1'], pu['w2'], pu['b2'], pu['ww'], pu['bw'],
      pc['w1'], pc['b1'], pc['w2'], pc['b2'])


# ==============================================================================
# Kernel 8: final 1x1 conv + softmax, fused
# ==============================================================================
def _final_softmax_kernel(xt_ref, w_ref, b_ref, o_ref, *, C):
    logits = jnp.zeros(o_ref.shape, jnp.float32) + b_ref[...]
    for c in range(C):
        logits = logits + xt_ref[c] * w_ref[c]
    m = jnp.max(logits, axis=-1, keepdims=True)
    e = jnp.exp(logits - m)
    o_ref[...] = e / jnp.sum(e, axis=-1, keepdims=True)       # exact normalization


def final_softmax(x, w, b):
    B, L, C = x.shape
    xt = jnp.transpose(x, (2, 0, 1))                          # (C, B, L)
    kern = functools.partial(_final_softmax_kernel, C=C)
    return pl.pallas_call(
        kern,
        out_shape=jax.ShapeDtypeStruct((B, L), jnp.float32),
        grid=(1,),
        in_specs=[
            pl.BlockSpec((C, B, L), lambda i: (0, 0, 0)),
            pl.BlockSpec((C, 1, 1), lambda i: (0, 0, 0)),
            pl.BlockSpec((1, 1), lambda i: (0, 0)),
        ],
        out_specs=pl.BlockSpec((B, L), lambda i: (0, 0)),
    )(xt, w, b)


# ----------------------------- host-side glue ---------------------------------
def maxpool1d(x, k):
    B, L, C = x.shape
    return jnp.max(x.reshape(B, L // k, k, C), axis=2)


def positional_encoding(length, d_model):
    half = d_model // 2
    positions = jnp.arange(length, dtype=jnp.float32)[:, None]
    depths = jnp.arange(half, dtype=jnp.float32)[None, :] / float(half)
    angle_rates = 1.0 / (10000.0 ** depths)
    angle_rads = positions * angle_rates
    return jnp.concatenate([jnp.sin(angle_rads), jnp.cos(angle_rads)], axis=-1)


# ----------------------------- full forward -----------------------------------
def beliefppg_forward(spec, time_in, params, cfg):
    depth = cfg['depth']
    C = cfg['attn_channels']
    df = cfg['down_fac']
    nf = cfg['n_frames']
    nb = cfg['n_bins']
    B = spec.shape[0]

    # ---- spectral frontend: fused 3x3-conv pair + two fused attentions
    h = dattn_convs(spec, params['dattn'], nf, nb, C)          # (B, nf, nb, C)

    pe_freq = positional_encoding(nb, C)
    pe_time = positional_encoding(nf, C)

    xf = (h + pe_freq[None, None, :, :]).reshape(B * nf * nb, C)
    fa_flat = fused_mha(xf, params['dattn']['attn_freq'], n_seq=B * nf, S=nb, C=C)

    xt = (jnp.transpose(h, (0, 2, 1, 3)) + pe_time[None, None, :, :])
    xt = xt.reshape(B * nb * nf, C)
    ta_raw = fused_mha(xt, params['dattn']['attn_time'], n_seq=B * nb, S=nf, C=C)
    ta_flat = ta_raw.reshape(B, nb, nf, C).transpose(0, 2, 1, 3).reshape(B * nf * nb, C)

    x = mix_mean(spec.reshape(B * nf * nb, 2), ta_flat, fa_flat,
                 params['dense_w'], params['dense_b'], B, nf, nb)
    x = x.reshape(B, nb, C)                                    # AveragePooling1D(dim=1)

    # ---- U-Net encoder (fused conv pairs)
    skips = []
    for i in range(depth):
        x = double_conv1d(x, params['down'][i])
        skips.append(x)
        x = maxpool1d(x, df)

    # ---- time-domain backbone + bottleneck fusion
    tp = params['time']
    t = causal_conv1d_leaky(time_in, tp['c1_w'], tp['c1_b'], k=10, dilation=2)
    t = maxpool1d(t, 4)
    t = causal_conv1d_leaky(t, tp['c2_w'], tp['c2_b'], k=10, dilation=2)
    t = maxpool1d(t, 4)                                        # (B, T, 16)
    x = time_fuse(jnp.transpose(t, (1, 0, 2)), x, tp)          # (B, 2, cb)

    # ---- U-Net decoder (fused gate + conv pairs)
    for i in reversed(range(depth)):
        x = upsample_fuse_block(x, skips[i], params['upsample'][i],
                                params['upconv'][i], df)

    # ---- final 1x1 conv + softmax (F.softmax(logits, dim=-1))
    return final_softmax(x, params['final_w'], params['final_b'])


# ----------------------------- parameter init ----------------------------------
def init_params(key, cfg):
    depth = cfg['depth']
    C = cfg['attn_channels']
    ic = cfg['init_channels']

    keys = iter(jax.random.split(key, 128))

    def w(shape, scale=0.1):
        return scale * jax.random.normal(next(keys), shape, dtype=jnp.float32)

    def z(shape):
        return jnp.zeros(shape, jnp.float32)

    def attn_params():
        return dict(wqkv=w((C, 3 * C)), bqkv=z((1, 3 * C)),
                    wo=w((C, C)), bo=z((1, C)))

    params = {}
    params['dattn'] = dict(
        conv1_w=w((9 * 2, C)), conv1_b=z((1, C)),
        conv2_w=w((9 * C, C)), conv2_b=z((1, C)),
        attn_freq=attn_params(), attn_time=attn_params())
    params['dense_w'] = w((2, C))
    params['dense_b'] = z((1, C))

    cb = ic * 2 ** (depth - 1)          # time_embed_dim == bottleneck channels
    H = 64                              # LSTM hidden size (fixed in reference)
    bn_scale = (1.0 + 1e-5) ** -0.5     # eval-mode BatchNorm1d folded into conv
    params['time'] = dict(
        c1_w=w((10 * 1, 16)) * bn_scale, c1_b=z((1, 16)),
        c2_w=w((10 * 16, 16)) * bn_scale, c2_b=z((1, 16)),
        l1_wih=w((16, 4 * H)), l1_whh=w((H, 4 * H)), l1_b=z((1, 4 * H)),
        l2_wih=w((H, 4 * H)), l2_whh=w((H, 4 * H)), l2_b=z((1, 4 * H)),
        fv_w=w((H, 2 * cb)), fv_b=z((1, 2 * cb)),          # [feat | value] heads
        wconv_w=w((2 * cb, cb)), wconv_b=z((1, cb)),
        fconv_w=w((2 * cb, cb)), fconv_b=z((1, cb)))

    down = []
    ch = ic
    for i in range(depth):
        cin = C if i == 0 else ch // 2
        down.append(dict(w1=w((3 * cin, ch)), b1=z((1, ch)),
                         w2=w((3 * ch, ch)), b2=z((1, ch))))
        ch *= 2
    params['down'] = down

    channels = ic * 2 ** depth // 2
    up_cfgs = [None] * depth
    for idx in range(depth):
        if idx == 0:
            x_ch, y_ch = channels, channels
            inter = channels // 4
            out = (x_ch + y_ch) // 2
        elif idx == 1:
            x_ch, y_ch = channels, channels // 2
            inter = channels // 4
            out = (x_ch + y_ch) // 3
        else:
            channels //= 2
            x_ch, y_ch = channels, channels // 2
            inter = channels // 4
            out = (x_ch + y_ch) // 3
        up_cfgs[depth - 1 - idx] = (x_ch, y_ch, inter, out)

    ups, upconvs = [], []
    for (x_ch, y_ch, inter, out) in up_cfgs:
        ups.append(dict(w1=w((y_ch, inter)), b1=z((1, inter)),
                        w2=w((x_ch, inter)), b2=z((1, inter)),
                        ww=w((1, inter)), bw=z((1, 1))))
        upconvs.append(dict(w1=w((3 * (x_ch + y_ch), out)), b1=z((1, out)),
                            w2=w((3 * out, out)), b2=z((1, out))))
    params['upsample'] = ups
    params['upconv'] = upconvs
    params['final_w'] = w((ic, 1, 1))
    params['final_b'] = z((1, 1))
    return params


# ----------------------------- main --------------------------------------------
if __name__ == "__main__":
    cfg = dict(depth=3, attn_channels=8, init_channels=4, down_fac=2,
               n_frames=4, n_bins=16)
    key = jax.random.PRNGKey(0)
    kp, ks, kt = jax.random.split(key, 3)

    params = init_params(kp, cfg)

    B, T = 2, 64
    spec_input = jax.random.normal(ks, (B, cfg['n_frames'], cfg['n_bins'], 2),
                                   jnp.float32)
    time_input = jax.random.normal(kt, (B, T, 1), jnp.float32)

    forward = jax.jit(functools.partial(beliefppg_forward, cfg=cfg))
    out = forward(spec_input, time_input, params)
    out = jax.block_until_ready(out)

    assert out.shape == (B, cfg['n_bins'])
    assert bool(jnp.all(jnp.isfinite(out)))
    assert bool(jnp.allclose(jnp.sum(out, axis=-1), 1.0, atol=1e-4))
    print("KERNEL_OK")
</pallas_src>

<mosaic_0001>
module attributes {stable_mosaic.version = 11 : i64} {
  func.func @_dattn_conv_kernel(%arg0: i32, %arg1: memref<1x110x2xf32, #tpu.memory_space<vmem>>, %arg2: memref<18x8xf32, #tpu.memory_space<vmem>>, %arg3: memref<1x8xf32, #tpu.memory_space<vmem>>, %arg4: memref<72x8xf32, #tpu.memory_space<vmem>>, %arg5: memref<1x8xf32, #tpu.memory_space<vmem>>, %arg6: memref<1x4x16x8xf32, #tpu.memory_space<vmem>>, %arg7: memref<110x8xf32, #tpu.memory_space<vmem>>, %arg8: memref<72x8xf32, #tpu.memory_space<vmem>>) attributes {dimension_semantics = [#tpu.dimension_semantics<parallel>], iteration_bounds = array<i64: 2>, scalar_prefetch = 0 : i64, scratch_operands = 2 : i64, tpu.core_type = #tpu.core_type<tc>, window_params = [{transform_indices = @transform_0, window_bounds = array<i64: 1, 110, 2>}, {pipeline_mode = #tpu.pipeline_mode<synchronous>, transform_indices = @transform_1, window_bounds = array<i64: 18, 8>}, {pipeline_mode = #tpu.pipeline_mode<synchronous>, transform_indices = @transform_2, window_bounds = array<i64: 1, 8>}, {pipeline_mode = #tpu.pipeline_mode<synchronous>, transform_indices = @transform_3, window_bounds = array<i64: 72, 8>}, {pipeline_mode = #tpu.pipeline_mode<synchronous>, transform_indices = @transform_4, window_bounds = array<i64: 1, 8>}, {transform_indices = @transform_5, window_bounds = array<i64: 1, 4, 16, 8>}]} {
    %cst = arith.constant 0.000000e+00 : f32
    %0 = vector.broadcast %cst : f32 to vector<72x8xf32>
    %c0 = arith.constant 0 : index
    %c0_0 = arith.constant 0 : index
    %1 = vector.load %arg3[%c0, %c0_0] : memref<1x8xf32, #tpu.memory_space<vmem>>, vector<1x8xf32>
    %2 = vector.broadcast %1 : vector<1x8xf32> to vector<72x8xf32>
    %3 = arith.addf %0, %2 : vector<72x8xf32>
    %c0_1 = arith.constant 0 : index
    %c0_2 = arith.constant 0 : index
    %4 = vector.load %arg2[%c0_1, %c0_2] : memref<18x8xf32, #tpu.memory_space<vmem>>, vector<2x8xf32>
    %c0_3 = arith.constant 0 : index
    %c0_4 = arith.constant 0 : index
    %c0_5 = arith.constant 0 : index
    %5 = vector.load %arg1[%c0_3, %c0_4, %c0_5] : memref<1x110x2xf32, #tpu.memory_space<vmem>>, vector<1x72x2xf32>
    %6 = vector.shape_cast %5 : vector<1x72x2xf32> to vector<72x2xf32>
    %cst_6 = arith.constant dense<0.000000e+00> : vector<72x8xf32>
    %7 = tpu.matmul %6, %4, %cst_6 {dimension_numbers = #tpu.dot_dimension_numbers<[1], [0], [0], [1], [0, 0, 1, 1], [], []>} : vector<72x2xf32>, vector<2x8xf32>, vector<72x8xf32> -> vector<72x8xf32>
    %8 = arith.addf %3, %7 : vector<72x8xf32>
    %c2 = arith.constant 2 : index
    %c0_7 = arith.constant 0 : index
    %9 = vector.load %arg2[%c2, %c0_7] : memref<18x8xf32, #tpu.memory_space<vmem>>, vector<2x8xf32>
    %c0_8 = arith.constant 0 : index
    %c1 = arith.constant 1 : index
    %c0_9 = arith.constant 0 : index
    %10 = vector.load %arg1[%c0_8, %c1, %c0_9] : memref<1x110x2xf32, #tpu.memory_space<vmem>>, vector<1x72x2xf32>
    %11 = vector.shape_cast %10 : vector<1x72x2xf32> to vector<72x2xf32>
    %cst_10 = arith.constant dense<0.000000e+00> : vector<72x8xf32>
    %12 = tpu.matmul %11, %9, %cst_10 {dimension_numbers = #tpu.dot_dimension_numbers<[1], [0], [0], [1], [0, 0, 1, 1], [], []>} : vector<72x2xf32>, vector<2x8xf32>, vector<72x8xf32> -> vector<72x8xf32>
    %13 = arith.addf %8, %12 : vector<72x8xf32>
    %c4 = arith.constant 4 : index
    %c0_11 = arith.constant 0 : index
    %14 = vector.load %arg2[%c4, %c0_11] : memref<18x8xf32, #tpu.memory_space<vmem>>, vector<2x8xf32>
    %c0_12 = arith.constant 0 : index
    %c2_13 = arith.constant 2 : index
    %c0_14 = arith.constant 0 : index
    %15 = vector.load %arg1[%c0_12, %c2_13, %c0_14] : memref<1x110x2xf32, #tpu.memory_space<vmem>>, vector<1x72x2xf32>
    %16 = vector.shape_cast %15 : vector<1x72x2xf32> to vector<72x2xf32>
    %cst_15 = arith.constant dense<0.000000e+00> : vector<72x8xf32>
    %17 = tpu.matmul %16, %14, %cst_15 {dimension_numbers = #tpu.dot_dimension_numbers<[1], [0], [0], [1], [0, 0, 1, 1], [], []>} : vector<72x2xf32>, vector<2x8xf32>, vector<72x8xf32> -> vector<72x8xf32>
    %18 = arith.addf %13, %17 : vector<72x8xf32>
    %c6 = arith.constant 6 : index
    %c0_16 = arith.constant 0 : index
    %19 = vector.load %arg2[%c6, %c0_16] : memref<18x8xf32, #tpu.memory_space<vmem>>, vector<2x8xf32>
    %c0_17 = arith.constant 0 : index
    %c18 = arith.constant 18 : index
    %c0_18 = arith.constant 0 : index
    %20 = vector.load %arg1[%c0_17, %c18, %c0_18] : memref<1x110x2xf32, #tpu.memory_space<vmem>>, vector<1x72x2xf32>
    %21 = vector.shape_cast %20 : vector<1x72x2xf32> to vector<72x2xf32>
    %cst_19 = arith.constant dense<0.000000e+00> : vector<72x8xf32>
    %22 = tpu.matmul %21, %19, %cst_19 {dimension_numbers = #tpu.dot_dimension_numbers<[1], [0], [0], [1], [0, 0, 1, 1], [], []>} : vector<72x2xf32>, vector<2x8xf32>, vector<72x8xf32> -> vector<72x8xf32>
    %23 = arith.addf %18, %22 : vector<72x8xf32>
    %c8 = arith.constant 8 : index
    %c0_20 = arith.constant 0 : index
    %24 = vector.load %arg2[%c8, %c0_20] : memref<18x8xf32, #tpu.memory_space<vmem>>, vector<2x8xf32>
    %c0_21 = arith.constant 0 : index
    %c19 = arith.constant 19 : index
    %c0_22 = arith.constant 0 : index
    %25 = vector.load %arg1[%c0_21, %c19, %c0_22] : memref<1x110x2xf32, #tpu.memory_space<vmem>>, vector<1x72x2xf32>
    %26 = vector.shape_cast %25 : vector<1x72x2xf32> to vector<72x2xf32>
    %cst_23 = arith.constant dense<0.000000e+00> : vector<72x8xf32>
    %27 = tpu.matmul %26, %24, %cst_23 {dimension_numbers = #tpu.dot_dimension_numbers<[1], [0], [0], [1], [0, 0, 1, 1], [], []>} : vector<72x2xf32>, vector<2x8xf32>, vector<72x8xf32> -> vector<72x8xf32>
    %28 = arith.addf %23, %27 : vector<72x8xf32>
    %c10 = arith.constant 10 : index
    %c0_24 = arith.constant 0 : index
    %29 = vector.load %arg2[%c10, %c0_24] : memref<18x8xf32, #tpu.memory_space<vmem>>, vector<2x8xf32>
    %c0_25 = arith.constant 0 : index
    %c20 = arith.constant 20 : index
    %c0_26 = arith.constant 0 : index
    %30 = vector.load %arg1[%c0_25, %c20, %c0_26] : memref<1x110x2xf32, #tpu.memory_space<vmem>>, vector<1x72x2xf32>
    %31 = vector.shape_cast %30 : vector<1x72x2xf32> to vector<72x2xf32>
    %cst_27 = arith.constant dense<0.000000e+00> : vector<72x8xf32>
    %32 = tpu.matmul %31, %29, %cst_27 {dimension_numbers = #tpu.dot_dimension_numbers<[1], [0], [0], [1], [0, 0, 1, 1], [], []>} : vector<72x2xf32>, vector<2x8xf32>, vector<72x8xf32> -> vector<72x8xf32>
    %33 = arith.addf %28, %32 : vector<72x8xf32>
    %c12 = arith.constant 12 : index
    %c0_28 = arith.constant 0 : index
    %34 = vector.load %arg2[%c12, %c0_28] : memref<18x8xf32, #tpu.memory_space<vmem>>, vector<2x8xf32>
    %c0_29 = arith.constant 0 : index
    %c36 = arith.constant 36 : index
    %c0_30 = arith.constant 0 : index
    %35 = vector.load %arg1[%c0_29, %c36, %c0_30] : memref<1x110x2xf32, #tpu.memory_space<vmem>>, vector<1x72x2xf32>
    %36 = vector.shape_cast %35 : vector<1x72x2xf32> to vector<72x2xf32>
    %cst_31 = arith.constant dense<0.000000e+00> : vector<72x8xf32>
    %37 = tpu.matmul %36, %34, %cst_31 {dimension_numbers = #tpu.dot_dimension_numbers<[1], [0], [0], [1], [0, 0, 1, 1], [], []>} : vector<72x2xf32>, vector<2x8xf32>, vector<72x8xf32> -> vector<72x8xf32>
    %38 = arith.addf %33, %37 : vector<72x8xf32>
    %c14 = arith.constant 14 : index
    %c0_32 = arith.constant 0 : index
    %39 = vector.load %arg2[%c14, %c0_32] : memref<18x8xf32, #tpu.memory_space<vmem>>, vector<2x8xf32>
    %c0_33 = arith.constant 0 : index
    %c37 = arith.constant 37 : index
    %c0_34 = arith.constant 0 : index
    %40 = vector.load %arg1[%c0_33, %c37, %c0_34] : memref<1x110x2xf32, #tpu.memory_space<vmem>>, vector<1x72x2xf32>
    %41 = vector.shape_cast %40 : vector<1x72x2xf32> to vector<72x2xf32>
    %cst_35 = arith.constant dense<0.000000e+00> : vector<72x8xf32>
    %42 = tpu.matmul %41, %39, %cst_35 {dimension_numbers = #tpu.dot_dimension_numbers<[1], [0], [0], [1], [0, 0, 1, 1], [], []>} : vector<72x2xf32>, vector<2x8xf32>, vector<72x8xf32> -> vector<72x8xf32>
    %43 = arith.addf %38, %42 : vector<72x8xf32>
    %c16 = arith.constant 16 : index
    %c0_36 = arith.constant 0 : index
    %44 = vector.load %arg2[%c16, %c0_36] : memref<18x8xf32, #tpu.memory_space<vmem>>, vector<2x8xf32>
    %c0_37 = arith.constant 0 : index
    %c38 = arith.constant 38 : index
    %c0_38 = arith.constant 0 : index
    %45 = vector.load %arg1[%c0_37, %c38, %c0_38] : memref<1x110x2xf32, #tpu.memory_space<vmem>>, vector<1x72x2xf32>
    %46 = vector.shape_cast %45 : vector<1x72x2xf32> to vector<72x2xf32>
    %cst_39 = arith.constant dense<0.000000e+00> : vector<72x8xf32>
    %47 = tpu.matmul %46, %44, %cst_39 {dimension_numbers = #tpu.dot_dimension_numbers<[1], [0], [0], [1], [0, 0, 1, 1], [], []>} : vector<72x2xf32>, vector<2x8xf32>, vector<72x8xf32> -> vector<72x8xf32>
    %48 = arith.addf %43, %47 : vector<72x8xf32>
    %cst_40 = arith.constant 0.000000e+00 : f32
    %49 = vector.broadcast %cst_40 : f32 to vector<72x8xf32>
    %50 = arith.cmpf ogt, %48, %49 : vector<72x8xf32>
    %cst_41 = arith.constant 0.00999999977 : f32
    %51 = vector.broadcast %cst_41 : f32 to vector<72x8xf32>
    %52 = arith.mulf %51, %48 : vector<72x8xf32>
    %53 = arith.select %50, %48, %52 : vector<72x8xi1>, vector<72x8xf32>
    %c0_42 = arith.constant 0 : index
    %c0_43 = arith.constant 0 : index
    %54 = vector.load %arg8[%c0_42, %c0_43] : memref<72x8xf32, #tpu.memory_space<vmem>>, vector<72x8xf32>
    tpu.vector_store %arg8[%c0_42, %c0_43], %53 {strides = array<i32>} : memref<72x8xf32, #tpu.memory_space<vmem>>, vector<72x8xf32>,
    %cst_44 = arith.constant 0.000000e+00 : f32
    %55 = vector.broadcast %cst_44 : f32 to vector<110x8xf32>
    %c0_45 = arith.constant 0 : index
    %c0_46 = arith.constant 0 : index
    %56 = vector.load %arg7[%c0_45, %c0_46] : memref<110x8xf32, #tpu.memory_space<vmem>>, vector<110x8xf32>
    tpu.vector_store %arg7[%c0_45, %c0_46], %55 {strides = array<i32>} : memref<110x8xf32, #tpu.memory_space<vmem>>, vector<110x8xf32>,
    %c0_47 = arith.constant 0 : index
    %c0_48 = arith.constant 0 : index
    %57 = vector.load %arg8[%c0_47, %c0_48] : memref<72x8xf32, #tpu.memory_space<vmem>>, vector<16x8xf32>
    %c19_49 = arith.constant 19 : index
    %c0_50 = arith.constant 0 : index
    %58 = vector.load %arg7[%c19_49, %c0_50] : memref<110x8xf32, #tpu.memory_space<vmem>>, vector<16x8xf32>
    tpu.vector_store %arg7[%c19_49, %c0_50], %57 {strides = array<i32>} : memref<110x8xf32, #tpu.memory_space<vmem>>, vector<16x8xf32>,
    %c18_51 = arith.constant 18 : index
    %c0_52 = arith.constant 0 : index
    %59 = vector.load %arg8[%c18_51, %c0_52] : memref<72x8xf32, #tpu.memory_space<vmem>>, vector<16x8xf32>
    %c37_53 = arith.constant 37 : index
    %c0_54 = arith.constant 0 : index
    %60 = vector.load %arg7[%c37_53, %c0_54] : memref<110x8xf32, #tpu.memory_space<vmem>>, vector<16x8xf32>
    tpu.vector_store %arg7[%c37_53, %c0_54], %59 {strides = array<i32>} : memref<110x8xf32, #tpu.memory_space<vmem>>, vector<16x8xf32>,
    %c36_55 = arith.constant 36 : index
    %c0_56 = arith.constant 0 : index
    %61 = vector.load %arg8[%c36_55, %c0_56] : memref<72x8xf32, #tpu.memory_space<vmem>>, vector<16x8xf32>
    %c55 = arith.constant 55 : index
    %c0_57 = arith.constant 0 : index
    %62 = vector.load %arg7[%c55, %c0_57] : memref<110x8xf32, #tpu.memory_space<vmem>>, vector<16x8xf32>
    tpu.vector_store %arg7[%c55, %c0_57], %61 {strides = array<i32>} : memref<110x8xf32, #tpu.memory_space<vmem>>, vector<16x8xf32>,
    %c54 = arith.constant 54 : index
    %c0_58 = arith.constant 0 : index
    %63 = vector.load %arg8[%c54, %c0_58] : memref<72x8xf32, #tpu.memory_space<vmem>>, vector<16x8xf32>
    %c73 = arith.constant 73 : index
    %c0_59 = arith.constant 0 : index
    %64 = vector.load %arg7[%c73, %c0_59] : memref<110x8xf32, #tpu.memory_space<vmem>>, vector<16x8xf32>
    tpu.vector_store %arg7[%c73, %c0_59], %63 {strides = array<i32>} : memref<110x8xf32, #tpu.memory_space<vmem>>, vector<16x8xf32>,
    %cst_60 = arith.constant 0.000000e+00 : f32
    %65 = vector.broadcast %cst_60 : f32 to vector<72x8xf32>
    %c0_61 = arith.constant 0 : index
    %c0_62 = arith.constant 0 : index
    %66 = vector.load %arg5[%c0_61, %c0_62] : memref<1x8xf32, #tpu.memory_space<vmem>>, vector<1x8xf32>
    %67 = vector.broadcast %66 : vector<1x8xf32> to vector<72x8xf32>
    %68 = arith.addf %65, %67 : vector<72x8xf32>
    %c0_63 = arith.constant 0 : index
    %c0_64 = arith.constant 0 : index
    %69 = vector.load %arg4[%c0_63, %c0_64] : memref<72x8xf32, #tpu.memory_space<vmem>>, vector<8x8xf32>
    %c0_65 = arith.constant 0 : index
    %c0_66 = arith.constant 0 : index
    %70 = vector.load %arg7[%c0_65, %c0_66] : memref<110x8xf32, #tpu.memory_space<vmem>>, vector<72x8xf32>
    %cst_67 = arith.constant dense<0.000000e+00> : vector<72x8xf32>
    %71 = tpu.matmul %70, %69, %cst_67 {dimension_numbers = #tpu.dot_dimension_numbers<[1], [0], [0], [1], [0, 0, 1, 1], [], []>} : vector<72x8xf32>, vector<8x8xf32>, vector<72x8xf32> -> vector<72x8xf32>
    %72 = arith.addf %68, %71 : vector<72x8xf32>
    %c8_68 = arith.constant 8 : index
    %c0_69 = arith.constant 0 : index
    %73 = vector.load %arg4[%c8_68, %c0_69] : memref<72x8xf32, #tpu.memory_space<vmem>>, vector<8x8xf32>
    %c1_70 = arith.constant 1 : index
    %c0_71 = arith.constant 0 : index
    %74 = vector.load %arg7[%c1_70, %c0_71] : memref<110x8xf32, #tpu.memory_space<vmem>>, vector<72x8xf32>
    %cst_72 = arith.constant dense<0.000000e+00> : vector<72x8xf32>
    %75 = tpu.matmul %74, %73, %cst_72 {dimension_numbers = #tpu.dot_dimension_numbers<[1], [0], [0], [1], [0, 0, 1, 1], [], []>} : vector<72x8xf32>, vector<8x8xf32>, vector<72x8xf32> -> vector<72x8xf32>
    %76 = arith.addf %72, %75 : vector<72x8xf32>
    %c16_73 = arith.constant 16 : index
    %c0_74 = arith.constant 0 : index
    %77 = vector.load %arg4[%c16_73, %c0_74] : memref<72x8xf32, #tpu.memory_space<vmem>>, vector<8x8xf32>
    %c2_75 = arith.constant 2 : index
    %c0_76 = arith.constant 0 : index
    %78 = vector.load %arg7[%c2_75, %c0_76] : memref<110x8xf32, #tpu.memory_space<vmem>>, vector<72x8xf32>
    %cst_77 = arith.constant dense<0.000000e+00> : vector<72x8xf32>
    %79 = tpu.matmul %78, %77, %cst_77 {dimension_numbers = #tpu.dot_dimension_numbers<[1], [0], [0], [1], [0, 0, 1, 1], [], []>} : vector<72x8xf32>, vector<8x8xf32>, vector<72x8xf32> -> vector<72x8xf32>
    %80 = arith.addf %76, %79 : vector<72x8xf32>
    %c24 = arith.constant 24 : index
    %c0_78 = arith.constant 0 : index
    %81 = vector.load %arg4[%c24, %c0_78] : memref<72x8xf32, #tpu.memory_space<vmem>>, vector<8x8xf32>
    %c18_79 = arith.constant 18 : index
    %c0_80 = arith.constant 0 : index
    %82 = vector.load %arg7[%c18_79, %c0_80] : memref<110x8xf32, #tpu.memory_space<vmem>>, vector<72x8xf32>
    %cst_81 = arith.constant dense<0.000000e+00> : vector<72x8xf32>
    %83 = tpu.matmul %82, %81, %cst_81 {dimension_numbers = #tpu.dot_dimension_numbers<[1], [0], [0], [1], [0, 0, 1, 1], [], []>} : vector<72x8xf32>, vector<8x8xf32>, vector<72x8xf32> -> vector<72x8xf32>
    %84 = arith.addf %80, %83 : vector<72x8xf32>
    %c32 = arith.constant 32 : index
    %c0_82 = arith.constant 0 : index
    %85 = vector.load %arg4[%c32, %c0_82] : memref<72x8xf32, #tpu.memory_space<vmem>>, vector<8x8xf32>
    %c19_83 = arith.constant 19 : index
    %c0_84 = arith.constant 0 : index
    %86 = vector.load %arg7[%c19_83, %c0_84] : memref<110x8xf32, #tpu.memory_space<vmem>>, vector<72x8xf32>
    %cst_85 = arith.constant dense<0.000000e+00> : vector<72x8xf32>
    %87 = tpu.matmul %86, %85, %cst_85 {dimension_numbers = #tpu.dot_dimension_numbers<[1], [0], [0], [1], [0, 0, 1, 1], [], []>} : vector<72x8xf32>, vector<8x8xf32>, vector<72x8xf32> -> vector<72x8xf32>
    %88 = arith.addf %84, %87 : vector<72x8xf32>
    %c40 = arith.constant 40 : index
    %c0_86 = arith.constant 0 : index
    %89 = vector.load %arg4[%c40, %c0_86] : memref<72x8xf32, #tpu.memory_space<vmem>>, vector<8x8xf32>
    %c20_87 = arith.constant 20 : index
    %c0_88 = arith.constant 0 : index
    %90 = vector.load %arg7[%c20_87, %c0_88] : memref<110x8xf32, #tpu.memory_space<vmem>>, vector<72x8xf32>
    %cst_89 = arith.constant dense<0.000000e+00> : vector<72x8xf32>
    %91 = tpu.matmul %90, %89, %cst_89 {dimension_numbers = #tpu.dot_dimension_numbers<[1], [0], [0], [1], [0, 0, 1, 1], [], []>} : vector<72x8xf32>, vector<8x8xf32>, vector<72x8xf32> -> vector<72x8xf32>
    %92 = arith.addf %88, %91 : vector<72x8xf32>
    %c48 = arith.constant 48 : index
    %c0_90 = arith.constant 0 : index
    %93 = vector.load %arg4[%c48, %c0_90] : memref<72x8xf32, #tpu.memory_space<vmem>>, vector<8x8xf32>
    %c36_91 = arith.constant 36 : index
    %c0_92 = arith.constant 0 : index
    %94 = vector.load %arg7[%c36_91, %c0_92] : memref<110x8xf32, #tpu.memory_space<vmem>>, vector<72x8xf32>
    %cst_93 = arith.constant dense<0.000000e+00> : vector<72x8xf32>
    %95 = tpu.matmul %94, %93, %cst_93 {dimension_numbers = #tpu.dot_dimension_numbers<[1], [0], [0], [1], [0, 0, 1, 1], [], []>} : vector<72x8xf32>, vector<8x8xf32>, vector<72x8xf32> -> vector<72x8xf32>
    %96 = arith.addf %92, %95 : vector<72x8xf32>
    %c56 = arith.constant 56 : index
    %c0_94 = arith.constant 0 : index
    %97 = vector.load %arg4[%c56, %c0_94] : memref<72x8xf32, #tpu.memory_space<vmem>>, vector<8x8xf32>
    %c37_95 = arith.constant 37 : index
    %c0_96 = arith.constant 0 : index
    %98 = vector.load %arg7[%c37_95, %c0_96] : memref<110x8xf32, #tpu.memory_space<vmem>>, vector<72x8xf32>
    %cst_97 = arith.constant dense<0.000000e+00> : vector<72x8xf32>
    %99 = tpu.matmul %98, %97, %cst_97 {dimension_numbers = #tpu.dot_dimension_numbers<[1], [0], [0], [1], [0, 0, 1, 1], [], []>} : vector<72x8xf32>, vector<8x8xf32>, vector<72x8xf32> -> vector<72x8xf32>
    %100 = arith.addf %96, %99 : vector<72x8xf32>
    %c64 = arith.constant 64 : index
    %c0_98 = arith.constant 0 : index
    %101 = vector.load %arg4[%c64, %c0_98] : memref<72x8xf32, #tpu.memory_space<vmem>>, vector<8x8xf32>
    %c38_99 = arith.constant 38 : index
    %c0_100 = arith.constant 0 : index
    %102 = vector.load %arg7[%c38_99, %c0_100] : memref<110x8xf32, #tpu.memory_space<vmem>>, vector<72x8xf32>
    %cst_101 = arith.constant dense<0.000000e+00> : vector<72x8xf32>
    %103 = tpu.matmul %102, %101, %cst_101 {dimension_numbers = #tpu.dot_dimension_numbers<[1], [0], [0], [1], [0, 0, 1, 1], [], []>} : vector<72x8xf32>, vector<8x8xf32>, vector<72x8xf32> -> vector<72x8xf32>
    %104 = arith.addf %100, %103 : vector<72x8xf32>
    %cst_102 = arith.constant 0.000000e+00 : f32
    %105 = vector.broadcast %cst_102 : f32 to vector<72x8xf32>
    %106 = arith.cmpf ogt, %104, %105 : vector<72x8xf32>
    %cst_103 = arith.constant 0.00999999977 : f32
    %107 = vector.broadcast %cst_103 : f32 to vector<72x8xf32>
    %108 = arith.mulf %107, %104 : vector<72x8xf32>
    %109 = arith.select %106, %104, %108 : vector<72x8xi1>, vector<72x8xf32>
    %c0_104 = arith.constant 0 : index
    %c0_105 = arith.constant 0 : index
    %110 = vector.load %arg8[%c0_104, %c0_105] : memref<72x8xf32, #tpu.memory_space<vmem>>, vector<72x8xf32>
    tpu.vector_store %arg8[%c0_104, %c0_105], %109 {strides = array<i32>} : memref<72x8xf32, #tpu.memory_space<vmem>>, vector<72x8xf32>,
    %c0_106 = arith.constant 0 : index
    %c0_107 = arith.constant 0 : index
    %111 = vector.load %arg8[%c0_106, %c0_107] : memref<72x8xf32, #tpu.memory_space<vmem>>, vector<16x8xf32>
    %c0_108 = arith.constant 0 : index
    %c0_109 = arith.constant 0 : index
    %c0_110 = arith.constant 0 : index
    %c0_111 = arith.constant 0 : index
    %112 = vector.load %arg6[%c0_108, %c0_109, %c0_110, %c0_111] : memref<1x4x16x8xf32, #tpu.memory_space<vmem>>, vector<1x1x16x8xf32>
    %113 = vector.shape_cast %112 : vector<1x1x16x8xf32> to vector<16x8xf32>
    %114 = vector.shape_cast %111 : vector<16x8xf32> to vector<1x1x16x8xf32>
    tpu.vector_store %arg6[%c0_108, %c0_109, %c0_110, %c0_111], %114 {strides = array<i32>} : memref<1x4x16x8xf32, #tpu.memory_space<vmem>>, vector<1x1x16x8xf32>,
    %c18_112 = arith.constant 18 : index
    %c0_113 = arith.constant 0 : index
    %115 = vector.load %arg8[%c18_112, %c0_113] : memref<72x8xf32, #tpu.memory_space<vmem>>, vector<16x8xf32>
    %c0_114 = arith.constant 0 : index
    %c1_115 = arith.constant 1 : index
    %c0_116 = arith.constant 0 : index
    %c0_117 = arith.constant 0 : index
    %116 = vector.load %arg6[%c0_114, %c1_115, %c0_116, %c0_117] : memref<1x4x16x8xf32, #tpu.memory_space<vmem>>, vector<1x1x16x8xf32>
    %117 = vector.shape_cast %116 : vector<1x1x16x8xf32> to vector<16x8xf32>
    %118 = vector.shape_cast %115 : vector<16x8xf32> to vector<1x1x16x8xf32>
    tpu.vector_store %arg6[%c0_114, %c1_115, %c0_116, %c0_117], %118 {strides = array<i32>} : memref<1x4x16x8xf32, #tpu.memory_space<vmem>>, vector<1x1x16x8xf32>,
    %c36_118 = arith.constant 36 : index
    %c0_119 = arith.constant 0 : index
    %119 = vector.load %arg8[%c36_118, %c0_119] : memref<72x8xf32, #tpu.memory_space<vmem>>, vector<16x8xf32>
    %c0_120 = arith.constant 0 : index
    %c2_121 = arith.constant 2 : index
    %c0_122 = arith.constant 0 : index
    %c0_123 = arith.constant 0 : index
    %120 = vector.load %arg6[%c0_120, %c2_121, %c0_122, %c0_123] : memref<1x4x16x8xf32, #tpu.memory_space<vmem>>, vector<1x1x16x8xf32>
    %121 = vector.shape_cast %120 : vector<1x1x16x8xf32> to vector<16x8xf32>
    %122 = vector.shape_cast %119 : vector<16x8xf32> to vector<1x1x16x8xf32>
    tpu.vector_store %arg6[%c0_120, %c2_121, %c0_122, %c0_123], %122 {strides = array<i32>} : memref<1x4x16x8xf32, #tpu.memory_space<vmem>>, vector<1x1x16x8xf32>,
    %c54_124 = arith.constant 54 : index
    %c0_125 = arith.constant 0 : index
    %123 = vector.load %arg8[%c54_124, %c0_125] : memref<72x8xf32, #tpu.memory_space<vmem>>, vector<16x8xf32>
    %c0_126 = arith.constant 0 : index
    %c3 = arith.constant 3 : index
    %c0_127 = arith.constant 0 : index
    %c0_128 = arith.constant 0 : index
    %124 = vector.load %arg6[%c0_126, %c3, %c0_127, %c0_128] : memref<1x4x16x8xf32, #tpu.memory_space<vmem>>, vector<1x1x16x8xf32>
    %125 = vector.shape_cast %124 : vector<1x1x16x8xf32> to vector<16x8xf32>
    %126 = vector.shape_cast %123 : vector<16x8xf32> to vector<1x1x16x8xf32>
    tpu.vector_store %arg6[%c0_126, %c3, %c0_127, %c0_128], %126 {strides = array<i32>} : memref<1x4x16x8xf32, #tpu.memory_space<vmem>>, vector<1x1x16x8xf32>,
    return
  }
  func.func @transform_0(%arg0: i32) -> (i32, i32, i32) {
    %c0_i32 = arith.constant 0 : i32
    %c0_i32_0 = arith.constant 0 : i32
    %c0_i32_1 = arith.constant 0 : i32
    return %arg0, %c0_i32, %c0_i32_0 : i32, i32, i32
  }
  func.func @transform_1(%arg0: i32) -> (i32, i32) {
    %c0_i32 = arith.constant 0 : i32
    %c0_i32_0 = arith.constant 0 : i32
    %c0_i32_1 = arith.constant 0 : i32
    return %c0_i32, %c0_i32_0 : i32, i32
  }
  func.func @transform_2(%arg0: i32) -> (i32, i32) {
    %c0_i32 = arith.constant 0 : i32
    %c0_i32_0 = arith.constant 0 : i32
    %c0_i32_1 = arith.constant 0 : i32
    return %c0_i32, %c0_i32_0 : i32, i32
  }
  func.func @transform_3(%arg0: i32) -> (i32, i32) {
    %c0_i32 = arith.constant 0 : i32
    %c0_i32_0 = arith.constant 0 : i32
    %c0_i32_1 = arith.constant 0 : i32
    return %c0_i32, %c0_i32_0 : i32, i32
  }
  func.func @transform_4(%arg0: i32) -> (i32, i32) {
    %c0_i32 = arith.constant 0 : i32
    %c0_i32_0 = arith.constant 0 : i32
    %c0_i32_1 = arith.constant 0 : i32
    return %c0_i32, %c0_i32_0 : i32, i32
  }
  func.func @transform_5(%arg0: i32) -> (i32, i32, i32, i32) {
    %c0_i32 = arith.constant 0 : i32
    %c0_i32_0 = arith.constant 0 : i32
    %c0_i32_1 = arith.constant 0 : i32
    %c0_i32_2 = arith.constant 0 : i32
    return %arg0, %c0_i32, %c0_i32_0, %c0_i32_1 : i32, i32, i32, i32
  }
}

module attributes {stable_mosaic.version = 11 : i64} {
  func.func @_mha_kernel(%arg0: i32, %arg1: memref<128x8xf32, #tpu.memory_space<vmem>>, %arg2: memref<128x128xf32, #tpu.memory_space<vmem>>, %arg3: memref<8x24xf32, #tpu.memory_space<vmem>>, %arg4: memref<1x24xf32, #tpu.memory_space<vmem>>, %arg5: memref<8x8xf32, #tpu.memory_space<vmem>>, %arg6: memref<1x8xf32, #tpu.memory_space<vmem>>, %arg7: memref<128x8xf32, #tpu.memory_space<vmem>>) attributes {dimension_semantics = [#tpu.dimension_semantics<arbitrary>], iteration_bounds = array<i64: 1>, scalar_prefetch = 0 : i64, scratch_operands = 0 : i64, tpu.core_type = #tpu.core_type<tc>, window_params = [{pipeline_mode = #tpu.pipeline_mode<synchronous>, transform_indices = @transform_0, window_bounds = array<i64: 128, 8>}, {pipeline_mode = #tpu.pipeline_mode<synchronous>, transform_indices = @transform_1, window_bounds = array<i64: 128, 128>}, {pipeline_mode = #tpu.pipeline_mode<synchronous>, transform_indices = @transform_2, window_bounds = array<i64: 8, 24>}, {pipeline_mode = #tpu.pipeline_mode<synchronous>, transform_indices = @transform_3, window_bounds = array<i64: 1, 24>}, {pipeline_mode = #tpu.pipeline_mode<synchronous>, transform_indices = @transform_4, window_bounds = array<i64: 8, 8>}, {pipeline_mode = #tpu.pipeline_mode<synchronous>, transform_indices = @transform_5, window_bounds = array<i64: 1, 8>}, {pipeline_mode = #tpu.pipeline_mode<synchronous>, transform_indices = @transform_6, window_bounds = array<i64: 128, 8>}]} {
    %c0 = arith.constant 0 : index
    %c0_0 = arith.constant 0 : index
    %0 = vector.load %arg1[%c0, %c0_0] : memref<128x8xf32, #tpu.memory_space<vmem>>, vector<128x8xf32>
    %c0_1 = arith.constant 0 : index
    %c0_2 = arith.constant 0 : index
    %1 = vector.load %arg3[%c0_1, %c0_2] : memref<8x24xf32, #tpu.memory_space<vmem>>, vector<8x24xf32>
    %cst = arith.constant dense<0.000000e+00> : vector<128x24xf32>
    %2 = tpu.matmul %0, %1, %cst {dimension_numbers = #tpu.dot_dimension_numbers<[1], [0], [0], [1], [0, 0, 1, 1], [], []>} : vector<128x8xf32>, vector<8x24xf32>, vector<128x24xf32> -> vector<128x24xf32>
    %c0_3 = arith.constant 0 : index
    %c0_4 = arith.constant 0 : index
    %3 = vector.load %arg4[%c0_3, %c0_4] : memref<1x24xf32, #tpu.memory_space<vmem>>, vector<1x24xf32>
    %4 = vector.broadcast %3 : vector<1x24xf32> to vector<128x24xf32>
    %5 = arith.addf %2, %4 : vector<128x24xf32>
    %6 = vector.extract_strided_slice %5 {offsets = [0, 0], sizes = [128, 8], strides = [1, 1]} : vector<128x24xf32> to vector<128x8xf32>
    %cst_5 = arith.constant 0.353553385 : f32
    %7 = vector.broadcast %cst_5 : f32 to vector<128x8xf32>
    %8 = arith.mulf %6, %7 : vector<128x8xf32>
    %9 = vector.extract_strided_slice %5 {offsets = [0, 8], sizes = [128, 8], strides = [1, 1]} : vector<128x24xf32> to vector<128x8xf32>
    %10 = vector.extract_strided_slice %5 {offsets = [0, 16], sizes = [128, 8], strides = [1, 1]} : vector<128x24xf32> to vector<128x8xf32>
    %cst_6 = arith.constant dense<0.000000e+00> : vector<128x128xf32>
    %11 = tpu.matmul %8, %9, %cst_6 {dimension_numbers = #tpu.dot_dimension_numbers<[1], [1], [0], [0], [0, 0, 1, 0], [], []>} : vector<128x8xf32>, vector<128x8xf32>, vector<128x128xf32> -> vector<128x128xf32>
    %c0_7 = arith.constant 0 : index
    %c0_8 = arith.constant 0 : index
    %12 = vector.load %arg2[%c0_7, %c0_8] : memref<128x128xf32, #tpu.memory_space<vmem>>, vector<128x128xf32>
    %13 = arith.addf %11, %12 : vector<128x128xf32>
    %cst_9 = arith.constant dense<0xFF800000> : vector<128xf32>
    %14 = vector.multi_reduction <maximumf>, %13, %cst_9 [1] : vector<128x128xf32> to vector<128xf32>
    %15 = vector.shape_cast %14 : vector<128xf32> to vector<128x1xf32>
    %16 = vector.broadcast %15 : vector<128x1xf32> to vector<128x128xf32>
    %17 = arith.subf %13, %16 : vector<128x128xf32>
    %18 = math.exp %17 : vector<128x128xf32>
    %cst_10 = arith.constant dense<0.000000e+00> : vector<128xf32>
    %19 = vector.multi_reduction <add>, %18, %cst_10 [1] : vector<128x128xf32> to vector<128xf32>
    %20 = vector.shape_cast %19 : vector<128xf32> to vector<128x1xf32>
    %21 = tpu.reciprocal %20 {approx = true} : vector<128x1xf32> -> vector<128x1xf32>
    %22 = vector.broadcast %21 : vector<128x1xf32> to vector<128x128xf32>
    %23 = arith.mulf %18, %22 : vector<128x128xf32>
    %cst_11 = arith.constant dense<0.000000e+00> : vector<128x8xf32>
    %24 = tpu.matmul %23, %10, %cst_11 {dimension_numbers = #tpu.dot_dimension_numbers<[1], [0], [0], [1], [0, 0, 1, 1], [], []>} : vector<128x128xf32>, vector<128x8xf32>, vector<128x8xf32> -> vector<128x8xf32>
    %c0_12 = arith.constant 0 : index
    %c0_13 = arith.constant 0 : index
    %25 = vector.load %arg5[%c0_12, %c0_13] : memref<8x8xf32, #tpu.memory_space<vmem>>, vector<8x8xf32>
    %cst_14 = arith.constant dense<0.000000e+00> : vector<128x8xf32>
    %26 = tpu.matmul %24, %25, %cst_14 {dimension_numbers = #tpu.dot_dimension_numbers<[1], [0], [0], [1], [0, 0, 1, 1], [], []>} : vector<128x8xf32>, vector<8x8xf32>, vector<128x8xf32> -> vector<128x8xf32>
    %c0_15 = arith.constant 0 : index
    %c0_16 = arith.constant 0 : index
    %27 = vector.load %arg6[%c0_15, %c0_16] : memref<1x8xf32, #tpu.memory_space<vmem>>, vector<1x8xf32>
    %28 = vector.broadcast %27 : vector<1x8xf32> to vector<128x8xf32>
    %29 = arith.addf %26, %28 : vector<128x8xf32>
    %c0_17 = arith.constant 0 : index
    %c0_18 = arith.constant 0 : index
    %30 = vector.load %arg7[%c0_17, %c0_18] : memref<128x8xf32, #tpu.memory_space<vmem>>, vector<128x8xf32>
    tpu.vector_store %arg7[%c0_17, %c0_18], %29 {strides = array<i32>} : memref<128x8xf32, #tpu.memory_space<vmem>>, vector<128x8xf32>,
    return
  }
  func.func @transform_0(%arg0: i32) -> (i32, i32) {
    %c0_i32 = arith.constant 0 : i32
    %c0_i32_0 = arith.constant 0 : i32
    %c0_i32_1 = arith.constant 0 : i32
    return %c0_i32, %c0_i32_0 : i32, i32
  }
  func.func @transform_1(%arg0: i32) -> (i32, i32) {
    %c0_i32 = arith.constant 0 : i32
    %c0_i32_0 = arith.constant 0 : i32
    %c0_i32_1 = arith.constant 0 : i32
    return %c0_i32, %c0_i32_0 : i32, i32
  }
  func.func @transform_2(%arg0: i32) -> (i32, i32) {
    %c0_i32 = arith.constant 0 : i32
    %c0_i32_0 = arith.constant 0 : i32
    %c0_i32_1 = arith.constant 0 : i32
    return %c0_i32, %c0_i32_0 : i32, i32
  }
  func.func @transform_3(%arg0: i32) -> (i32, i32) {
    %c0_i32 = arith.constant 0 : i32
    %c0_i32_0 = arith.constant 0 : i32
    %c0_i32_1 = arith.constant 0 : i32
    return %c0_i32, %c0_i32_0 : i32, i32
  }
  func.func @transform_4(%arg0: i32) -> (i32, i32) {
    %c0_i32 = arith.constant 0 : i32
    %c0_i32_0 = arith.constant 0 : i32
    %c0_i32_1 = arith.constant 0 : i32
    return %c0_i32, %c0_i32_0 : i32, i32
  }
  func.func @transform_5(%arg0: i32) -> (i32, i32) {
    %c0_i32 = arith.constant 0 : i32
    %c0_i32_0 = arith.constant 0 : i32
    %c0_i32_1 = arith.constant 0 : i32
    return %c0_i32, %c0_i32_0 : i32, i32
  }
  func.func @transform_6(%arg0: i32) -> (i32, i32) {
    %c0_i32 = arith.constant 0 : i32
    %c0_i32_0 = arith.constant 0 : i32
    %c0_i32_1 = arith.constant 0 : i32
    return %c0_i32, %c0_i32_0 : i32, i32
  }
}

module attributes {stable_mosaic.version = 11 : i64} {
  func.func @_mix_mean_kernel(%arg0: i32, %arg1: memref<128x2xf32, #tpu.memory_space<vmem>>, %arg2: memref<128x8xf32, #tpu.memory_space<vmem>>, %arg3: memref<128x8xf32, #tpu.memory_space<vmem>>, %arg4: memref<2x8xf32, #tpu.memory_space<vmem>>, %arg5: memref<1x8xf32, #tpu.memory_space<vmem>>, %arg6: memref<32x8xf32, #tpu.memory_space<vmem>>) attributes {dimension_semantics = [#tpu.dimension_semantics<arbitrary>], iteration_bounds = array<i64: 1>, scalar_prefetch = 0 : i64, scratch_operands = 0 : i64, tpu.core_type = #tpu.core_type<tc>, window_params = [{pipeline_mode = #tpu.pipeline_mode<synchronous>, transform_indices = @transform_0, window_bounds = array<i64: 128, 2>}, {pipeline_mode = #tpu.pipeline_mode<synchronous>, transform_indices = @transform_1, window_bounds = array<i64: 128, 8>}, {pipeline_mode = #tpu.pipeline_mode<synchronous>, transform_indices = @transform_2, window_bounds = array<i64: 128, 8>}, {pipeline_mode = #tpu.pipeline_mode<synchronous>, transform_indices = @transform_3, window_bounds = array<i64: 2, 8>}, {pipeline_mode = #tpu.pipeline_mode<synchronous>, transform_indices = @transform_4, window_bounds = array<i64: 1, 8>}, {pipeline_mode = #tpu.pipeline_mode<synchronous>, transform_indices = @transform_5, window_bounds = array<i64: 32, 8>}]} {
    %c0 = arith.constant 0 : index
    %c0_0 = arith.constant 0 : index
    %0 = vector.load %arg1[%c0, %c0_0] : memref<128x2xf32, #tpu.memory_space<vmem>>, vector<128x2xf32>
    %c0_1 = arith.constant 0 : index
    %c0_2 = arith.constant 0 : index
    %1 = vector.load %arg4[%c0_1, %c0_2] : memref<2x8xf32, #tpu.memory_space<vmem>>, vector<2x8xf32>
    %cst = arith.constant dense<0.000000e+00> : vector<128x8xf32>
    %2 = tpu.matmul %0, %1, %cst {dimension_numbers = #tpu.dot_dimension_numbers<[1], [0], [0], [1], [0, 0, 1, 1], [], []>} : vector<128x2xf32>, vector<2x8xf32>, vector<128x8xf32> -> vector<128x8xf32>
    %c0_3 = arith.constant 0 : index
    %c0_4 = arith.constant 0 : index
    %3 = vector.load %arg5[%c0_3, %c0_4] : memref<1x8xf32, #tpu.memory_space<vmem>>, vector<1x8xf32>
    %4 = vector.broadcast %3 : vector<1x8xf32> to vector<128x8xf32>
    %5 = arith.addf %2, %4 : vector<128x8xf32>
    %c0_5 = arith.constant 0 : index
    %c0_6 = arith.constant 0 : index
    %6 = vector.load %arg2[%c0_5, %c0_6] : memref<128x8xf32, #tpu.memory_space<vmem>>, vector<128x8xf32>
    %7 = arith.addf %5, %6 : vector<128x8xf32>
    %c0_7 = arith.constant 0 : index
    %c0_8 = arith.constant 0 : index
    %8 = vector.load %arg3[%c0_7, %c0_8] : memref<128x8xf32, #tpu.memory_space<vmem>>, vector<128x8xf32>
    %9 = arith.addf %7, %8 : vector<128x8xf32>
    %10 = vector.extract_strided_slice %9 {offsets = [0, 0], sizes = [16, 8], strides = [1, 1]} : vector<128x8xf32> to vector<16x8xf32>
    %11 = vector.extract_strided_slice %9 {offsets = [16, 0], sizes = [16, 8], strides = [1, 1]} : vector<128x8xf32> to vector<16x8xf32>
    %12 = arith.addf %10, %11 : vector<16x8xf32>
    %13 = vector.extract_strided_slice %9 {offsets = [32, 0], sizes = [16, 8], strides = [1, 1]} : vector<128x8xf32> to vector<16x8xf32>
    %14 = arith.addf %12, %13 : vector<16x8xf32>
    %15 = vector.extract_strided_slice %9 {offsets = [48, 0], sizes = [16, 8], strides = [1, 1]} : vector<128x8xf32> to vector<16x8xf32>
    %16 = arith.addf %14, %15 : vector<16x8xf32>
    %cst_9 = arith.constant 2.500000e-01 : f32
    %17 = vector.broadcast %cst_9 : f32 to vector<16x8xf32>
    %18 = arith.mulf %16, %17 : vector<16x8xf32>
    %c0_10 = arith.constant 0 : index
    %c0_11 = arith.constant 0 : index
    %19 = vector.load %arg6[%c0_10, %c0_11] : memref<32x8xf32, #tpu.memory_space<vmem>>, vector<16x8xf32>
    tpu.vector_store %arg6[%c0_10, %c0_11], %18 {strides = array<i32>} : memref<32x8xf32, #tpu.memory_space<vmem>>, vector<16x8xf32>,
    %20 = vector.extract_strided_slice %9 {offsets = [64, 0], sizes = [16, 8], strides = [1, 1]} : vector<128x8xf32> to vector<16x8xf32>
    %21 = vector.extract_strided_slice %9 {offsets = [80, 0], sizes = [16, 8], strides = [1, 1]} : vector<128x8xf32> to vector<16x8xf32>
    %22 = arith.addf %20, %21 : vector<16x8xf32>
    %23 = vector.extract_strided_slice %9 {offsets = [96, 0], sizes = [16, 8], strides = [1, 1]} : vector<128x8xf32> to vector<16x8xf32>
    %24 = arith.addf %22, %23 : vector<16x8xf32>
    %25 = vector.extract_strided_slice %9 {offsets = [112, 0], sizes = [16, 8], strides = [1, 1]} : vector<128x8xf32> to vector<16x8xf32>
    %26 = arith.addf %24, %25 : vector<16x8xf32>
    %cst_12 = arith.constant 2.500000e-01 : f32
    %27 = vector.broadcast %cst_12 : f32 to vector<16x8xf32>
    %28 = arith.mulf %26, %27 : vector<16x8xf32>
    %c16 = arith.constant 16 : index
    %c0_13 = arith.constant 0 : index
    %29 = vector.load %arg6[%c16, %c0_13] : memref<32x8xf32, #tpu.memory_space<vmem>>, vector<16x8xf32>
    tpu.vector_store %arg6[%c16, %c0_13], %28 {strides = array<i32>} : memref<32x8xf32, #tpu.memory_space<vmem>>, vector<16x8xf32>,
    return
  }
  func.func @transform_0(%arg0: i32) -> (i32, i32) {
    %c0_i32 = arith.constant 0 : i32
    %c0_i32_0 = arith.constant 0 : i32
    %c0_i32_1 = arith.constant 0 : i32
    return %c0_i32, %c0_i32_0 : i32, i32
  }
  func.func @transform_1(%arg0: i32) -> (i32, i32) {
    %c0_i32 = arith.constant 0 : i32
    %c0_i32_0 = arith.constant 0 : i32
    %c0_i32_1 = arith.constant 0 : i32
    return %c0_i32, %c0_i32_0 : i32, i32
  }
  func.func @transform_2(%arg0: i32) -> (i32, i32) {
    %c0_i32 = arith.constant 0 : i32
    %c0_i32_0 = arith.constant 0 : i32
    %c0_i32_1 = arith.constant 0 : i32
    return %c0_i32, %c0_i32_0 : i32, i32
  }
  func.func @transform_3(%arg0: i32) -> (i32, i32) {
    %c0_i32 = arith.constant 0 : i32
    %c0_i32_0 = arith.constant 0 : i32
    %c0_i32_1 = arith.constant 0 : i32
    return %c0_i32, %c0_i32_0 : i32, i32
  }
  func.func @transform_4(%arg0: i32) -> (i32, i32) {
    %c0_i32 = arith.constant 0 : i32
    %c0_i32_0 = arith.constant 0 : i32
    %c0_i32_1 = arith.constant 0 : i32
    return %c0_i32, %c0_i32_0 : i32, i32
  }
  func.func @transform_5(%arg0: i32) -> (i32, i32) {
    %c0_i32 = arith.constant 0 : i32
    %c0_i32_0 = arith.constant 0 : i32
    %c0_i32_1 = arith.constant 0 : i32
    return %c0_i32, %c0_i32_0 : i32, i32
  }
}

module attributes {stable_mosaic.version = 11 : i64} {
  func.func @_double_conv1d_kernel(%arg0: i32, %arg1: memref<1x18x8xf32, #tpu.memory_space<vmem>>, %arg2: memref<24x4xf32, #tpu.memory_space<vmem>>, %arg3: memref<1x4xf32, #tpu.memory_space<vmem>>, %arg4: memref<12x4xf32, #tpu.memory_space<vmem>>, %arg5: memref<1x4xf32, #tpu.memory_space<vmem>>, %arg6: memref<1x16x4xf32, #tpu.memory_space<vmem>>, %arg7: memref<18x4xf32, #tpu.memory_space<vmem>>) attributes {dimension_semantics = [#tpu.dimension_semantics<parallel>], iteration_bounds = array<i64: 2>, scalar_prefetch = 0 : i64, scratch_operands = 1 : i64, tpu.core_type = #tpu.core_type<tc>, window_params = [{transform_indices = @transform_0, window_bounds = array<i64: 1, 18, 8>}, {pipeline_mode = #tpu.pipeline_mode<synchronous>, transform_indices = @transform_1, window_bounds = array<i64: 24, 4>}, {pipeline_mode = #tpu.pipeline_mode<synchronous>, transform_indices = @transform_2, window_bounds = array<i64: 1, 4>}, {pipeline_mode = #tpu.pipeline_mode<synchronous>, transform_indices = @transform_3, window_bounds = array<i64: 12, 4>}, {pipeline_mode = #tpu.pipeline_mode<synchronous>, transform_indices = @transform_4, window_bounds = array<i64: 1, 4>}, {transform_indices = @transform_5, window_bounds = array<i64: 1, 16, 4>}]} {
    %cst = arith.constant 0.000000e+00 : f32
    %0 = vector.broadcast %cst : f32 to vector<16x4xf32>
    %c0 = arith.constant 0 : index
    %c0_0 = arith.constant 0 : index
    %1 = vector.load %arg3[%c0, %c0_0] : memref<1x4xf32, #tpu.memory_space<vmem>>, vector<1x4xf32>
    %2 = vector.broadcast %1 : vector<1x4xf32> to vector<16x4xf32>
    %3 = arith.addf %0, %2 : vector<16x4xf32>
    %c0_1 = arith.constant 0 : index
    %c0_2 = arith.constant 0 : index
    %c0_3 = arith.constant 0 : index
    %4 = vector.load %arg1[%c0_1, %c0_2, %c0_3] : memref<1x18x8xf32, #tpu.memory_space<vmem>>, vector<1x16x8xf32>
    %5 = vector.shape_cast %4 : vector<1x16x8xf32> to vector<16x8xf32>
    %c0_4 = arith.constant 0 : index
    %c0_5 = arith.constant 0 : index
    %6 = vector.load %arg2[%c0_4, %c0_5] : memref<24x4xf32, #tpu.memory_space<vmem>>, vector<8x4xf32>
    %cst_6 = arith.constant dense<0.000000e+00> : vector<16x4xf32>
    %7 = tpu.matmul %5, %6, %cst_6 {dimension_numbers = #tpu.dot_dimension_numbers<[1], [0], [0], [1], [0, 0, 1, 1], [], []>} : vector<16x8xf32>, vector<8x4xf32>, vector<16x4xf32> -> vector<16x4xf32>
    %8 = arith.addf %3, %7 : vector<16x4xf32>
    %c0_7 = arith.constant 0 : index
    %c1 = arith.constant 1 : index
    %c0_8 = arith.constant 0 : index
    %9 = vector.load %arg1[%c0_7, %c1, %c0_8] : memref<1x18x8xf32, #tpu.memory_space<vmem>>, vector<1x16x8xf32>
    %10 = vector.shape_cast %9 : vector<1x16x8xf32> to vector<16x8xf32>
    %c8 = arith.constant 8 : index
    %c0_9 = arith.constant 0 : index
    %11 = vector.load %arg2[%c8, %c0_9] : memref<24x4xf32, #tpu.memory_space<vmem>>, vector<8x4xf32>
    %cst_10 = arith.constant dense<0.000000e+00> : vector<16x4xf32>
    %12 = tpu.matmul %10, %11, %cst_10 {dimension_numbers = #tpu.dot_dimension_numbers<[1], [0], [0], [1], [0, 0, 1, 1], [], []>} : vector<16x8xf32>, vector<8x4xf32>, vector<16x4xf32> -> vector<16x4xf32>
    %13 = arith.addf %8, %12 : vector<16x4xf32>
    %c0_11 = arith.constant 0 : index
    %c2 = arith.constant 2 : index
    %c0_12 = arith.constant 0 : index
    %14 = vector.load %arg1[%c0_11, %c2, %c0_12] : memref<1x18x8xf32, #tpu.memory_space<vmem>>, vector<1x16x8xf32>
    %15 = vector.shape_cast %14 : vector<1x16x8xf32> to vector<16x8xf32>
    %c16 = arith.constant 16 : index
    %c0_13 = arith.constant 0 : index
    %16 = vector.load %arg2[%c16, %c0_13] : memref<24x4xf32, #tpu.memory_space<vmem>>, vector<8x4xf32>
    %cst_14 = arith.constant dense<0.000000e+00> : vector<16x4xf32>
    %17 = tpu.matmul %15, %16, %cst_14 {dimension_numbers = #tpu.dot_dimension_numbers<[1], [0], [0], [1], [0, 0, 1, 1], [], []>} : vector<16x8xf32>, vector<8x4xf32>, vector<16x4xf32> -> vector<16x4xf32>
    %18 = arith.addf %13, %17 : vector<16x4xf32>
    %cst_15 = arith.constant 0.000000e+00 : f32
    %19 = vector.broadcast %cst_15 : f32 to vector<18x4xf32>
    %c0_16 = arith.constant 0 : index
    %c0_17 = arith.constant 0 : index
    %20 = vector.load %arg7[%c0_16, %c0_17] : memref<18x4xf32, #tpu.memory_space<vmem>>, vector<18x4xf32>
    tpu.vector_store %arg7[%c0_16, %c0_17], %19 {strides = array<i32>} : memref<18x4xf32, #tpu.memory_space<vmem>>, vector<18x4xf32>,
    %cst_18 = arith.constant 0.000000e+00 : f32
    %21 = vector.broadcast %cst_18 : f32 to vector<16x4xf32>
    %22 = arith.maximumf %18, %21 : vector<16x4xf32>
    %c1_19 = arith.constant 1 : index
    %c0_20 = arith.constant 0 : index
    %23 = vector.load %arg7[%c1_19, %c0_20] : memref<18x4xf32, #tpu.memory_space<vmem>>, vector<16x4xf32>
    tpu.vector_store %arg7[%c1_19, %c0_20], %22 {strides = array<i32>} : memref<18x4xf32, #tpu.memory_space<vmem>>, vector<16x4xf32>,
    %cst_21 = arith.constant 0.000000e+00 : f32
    %24 = vector.broadcast %cst_21 : f32 to vector<16x4xf32>
    %c0_22 = arith.constant 0 : index
    %c0_23 = arith.constant 0 : index
    %25 = vector.load %arg5[%c0_22, %c0_23] : memref<1x4xf32, #tpu.memory_space<vmem>>, vector<1x4xf32>
    %26 = vector.broadcast %25 : vector<1x4xf32> to vector<16x4xf32>
    %27 = arith.addf %24, %26 : vector<16x4xf32>
    %c0_24 = arith.constant 0 : index
    %c0_25 = arith.constant 0 : index
    %28 = vector.load %arg7[%c0_24, %c0_25] : memref<18x4xf32, #tpu.memory_space<vmem>>, vector<16x4xf32>
    %c0_26 = arith.constant 0 : index
    %c0_27 = arith.constant 0 : index
    %29 = vector.load %arg4[%c0_26, %c0_27] : memref<12x4xf32, #tpu.memory_space<vmem>>, vector<4x4xf32>
    %cst_28 = arith.constant dense<0.000000e+00> : vector<16x4xf32>
    %30 = tpu.matmul %28, %29, %cst_28 {dimension_numbers = #tpu.dot_dimension_numbers<[1], [0], [0], [1], [0, 0, 1, 1], [], []>} : vector<16x4xf32>, vector<4x4xf32>, vector<16x4xf32> -> vector<16x4xf32>
    %31 = arith.addf %27, %30 : vector<16x4xf32>
    %c1_29 = arith.constant 1 : index
    %c0_30 = arith.constant 0 : index
    %32 = vector.load %arg7[%c1_29, %c0_30] : memref<18x4xf32, #tpu.memory_space<vmem>>, vector<16x4xf32>
    %c4 = arith.constant 4 : index
    %c0_31 = arith.constant 0 : index
    %33 = vector.load %arg4[%c4, %c0_31] : memref<12x4xf32, #tpu.memory_space<vmem>>, vector<4x4xf32>
    %cst_32 = arith.constant dense<0.000000e+00> : vector<16x4xf32>
    %34 = tpu.matmul %32, %33, %cst_32 {dimension_numbers = #tpu.dot_dimension_numbers<[1], [0], [0], [1], [0, 0, 1, 1], [], []>} : vector<16x4xf32>, vector<4x4xf32>, vector<16x4xf32> -> vector<16x4xf32>
    %35 = arith.addf %31, %34 : vector<16x4xf32>
    %c2_33 = arith.constant 2 : index
    %c0_34 = arith.constant 0 : index
    %36 = vector.load %arg7[%c2_33, %c0_34] : memref<18x4xf32, #tpu.memory_space<vmem>>, vector<16x4xf32>
    %c8_35 = arith.constant 8 : index
    %c0_36 = arith.constant 0 : index
    %37 = vector.load %arg4[%c8_35, %c0_36] : memref<12x4xf32, #tpu.memory_space<vmem>>, vector<4x4xf32>
    %cst_37 = arith.constant dense<0.000000e+00> : vector<16x4xf32>
    %38 = tpu.matmul %36, %37, %cst_37 {dimension_numbers = #tpu.dot_dimension_numbers<[1], [0], [0], [1], [0, 0, 1, 1], [], []>} : vector<16x4xf32>, vector<4x4xf32>, vector<16x4xf32> -> vector<16x4xf32>
    %39 = arith.addf %35, %38 : vector<16x4xf32>
    %cst_38 = arith.constant 0.000000e+00 : f32
    %40 = vector.broadcast %cst_38 : f32 to vector<16x4xf32>
    %41 = arith.maximumf %39, %40 : vector<16x4xf32>
    %c0_39 = arith.constant 0 : index
    %c0_40 = arith.constant 0 : index
    %c0_41 = arith.constant 0 : index
    %42 = vector.load %arg6[%c0_39, %c0_40, %c0_41] : memref<1x16x4xf32, #tpu.memory_space<vmem>>, vector<1x16x4xf32>
    %43 = vector.shape_cast %42 : vector<1x16x4xf32> to vector<16x4xf32>
    %44 = vector.shape_cast %41 : vector<16x4xf32> to vector<1x16x4xf32>
    tpu.vector_store %arg6[%c0_39, %c0_40, %c0_41], %44 {strides = array<i32>} : memref<1x16x4xf32, #tpu.memory_space<vmem>>, vector<1x16x4xf32>,
    return
  }
  func.func @transform_0(%arg0: i32) -> (i32, i32, i32) {
    %c0_i32 = arith.constant 0 : i32
    %c0_i32_0 = arith.constant 0 : i32
    %c0_i32_1 = arith.constant 0 : i32
    return %arg0, %c0_i32, %c0_i32_0 : i32, i32, i32
  }
  func.func @transform_1(%arg0: i32) -> (i32, i32) {
    %c0_i32 = arith.constant 0 : i32
    %c0_i32_0 = arith.constant 0 : i32
    %c0_i32_1 = arith.constant 0 : i32
    return %c0_i32, %c0_i32_0 : i32, i32
  }
  func.func @transform_2(%arg0: i32) -> (i32, i32) {
    %c0_i32 = arith.constant 0 : i32
    %c0_i32_0 = arith.constant 0 : i32
    %c0_i32_1 = arith.constant 0 : i32
    return %c0_i32, %c0_i32_0 : i32, i32
  }
  func.func @transform_3(%arg0: i32) -> (i32, i32) {
    %c0_i32 = arith.constant 0 : i32
    %c0_i32_0 = arith.constant 0 : i32
    %c0_i32_1 = arith.constant 0 : i32
    return %c0_i32, %c0_i32_0 : i32, i32
  }
  func.func @transform_4(%arg0: i32) -> (i32, i32) {
    %c0_i32 = arith.constant 0 : i32
    %c0_i32_0 = arith.constant 0 : i32
    %c0_i32_1 = arith.constant 0 : i32
    return %c0_i32, %c0_i32_0 : i32, i32
  }
  func.func @transform_5(%arg0: i32) -> (i32, i32, i32) {
    %c0_i32 = arith.constant 0 : i32
    %c0_i32_0 = arith.constant 0 : i32
    %c0_i32_1 = arith.constant 0 : i32
    return %arg0, %c0_i32, %c0_i32_0 : i32, i32, i32
  }
}

module attributes {stable_mosaic.version = 11 : i64} {
  func.func @_double_conv1d_kernel(%arg0: i32, %arg1: memref<1x10x4xf32, #tpu.memory_space<vmem>>, %arg2: memref<12x8xf32, #tpu.memory_space<vmem>>, %arg3: memref<1x8xf32, #tpu.memory_space<vmem>>, %arg4: memref<24x8xf32, #tpu.memory_space<vmem>>, %arg5: memref<1x8xf32, #tpu.memory_space<vmem>>, %arg6: memref<1x8x8xf32, #tpu.memory_space<vmem>>, %arg7: memref<10x8xf32, #tpu.memory_space<vmem>>) attributes {dimension_semantics = [#tpu.dimension_semantics<parallel>], iteration_bounds = array<i64: 2>, scalar_prefetch = 0 : i64, scratch_operands = 1 : i64, tpu.core_type = #tpu.core_type<tc>, window_params = [{transform_indices = @transform_0, window_bounds = array<i64: 1, 10, 4>}, {pipeline_mode = #tpu.pipeline_mode<synchronous>, transform_indices = @transform_1, window_bounds = array<i64: 12, 8>}, {pipeline_mode = #tpu.pipeline_mode<synchronous>, transform_indices = @transform_2, window_bounds = array<i64: 1, 8>}, {pipeline_mode = #tpu.pipeline_mode<synchronous>, transform_indices = @transform_3, window_bounds = array<i64: 24, 8>}, {pipeline_mode = #tpu.pipeline_mode<synchronous>, transform_indices = @transform_4, window_bounds = array<i64: 1, 8>}, {transform_indices = @transform_5, window_bounds = array<i64: 1, 8, 8>}]} {
    %cst = arith.constant 0.000000e+00 : f32
    %0 = vector.broadcast %cst : f32 to vector<8x8xf32>
    %c0 = arith.constant 0 : index
    %c0_0 = arith.constant 0 : index
    %1 = vector.load %arg3[%c0, %c0_0] : memref<1x8xf32, #tpu.memory_space<vmem>>, vector<1x8xf32>
    %2 = vector.broadcast %1 : vector<1x8xf32> to vector<8x8xf32>
    %3 = arith.addf %0, %2 : vector<8x8xf32>
    %c0_1 = arith.constant 0 : index
    %c0_2 = arith.constant 0 : index
    %c0_3 = arith.constant 0 : index
    %4 = vector.load %arg1[%c0_1, %c0_2, %c0_3] : memref<1x10x4xf32, #tpu.memory_space<vmem>>, vector<1x8x4xf32>
    %5 = vector.shape_cast %4 : vector<1x8x4xf32> to vector<8x4xf32>
    %c0_4 = arith.constant 0 : index
    %c0_5 = arith.constant 0 : index
    %6 = vector.load %arg2[%c0_4, %c0_5] : memref<12x8xf32, #tpu.memory_space<vmem>>, vector<4x8xf32>
    %cst_6 = arith.constant dense<0.000000e+00> : vector<8x8xf32>
    %7 = tpu.matmul %5, %6, %cst_6 {dimension_numbers = #tpu.dot_dimension_numbers<[1], [0], [0], [1], [0, 0, 1, 1], [], []>} : vector<8x4xf32>, vector<4x8xf32>, vector<8x8xf32> -> vector<8x8xf32>
    %8 = arith.addf %3, %7 : vector<8x8xf32>
    %c0_7 = arith.constant 0 : index
    %c1 = arith.constant 1 : index
    %c0_8 = arith.constant 0 : index
    %9 = vector.load %arg1[%c0_7, %c1, %c0_8] : memref<1x10x4xf32, #tpu.memory_space<vmem>>, vector<1x8x4xf32>
    %10 = vector.shape_cast %9 : vector<1x8x4xf32> to vector<8x4xf32>
    %c4 = arith.constant 4 : index
    %c0_9 = arith.constant 0 : index
    %11 = vector.load %arg2[%c4, %c0_9] : memref<12x8xf32, #tpu.memory_space<vmem>>, vector<4x8xf32>
    %cst_10 = arith.constant dense<0.000000e+00> : vector<8x8xf32>
    %12 = tpu.matmul %10, %11, %cst_10 {dimension_numbers = #tpu.dot_dimension_numbers<[1], [0], [0], [1], [0, 0, 1, 1], [], []>} : vector<8x4xf32>, vector<4x8xf32>, vector<8x8xf32> -> vector<8x8xf32>
    %13 = arith.addf %8, %12 : vector<8x8xf32>
    %c0_11 = arith.constant 0 : index
    %c2 = arith.constant 2 : index
    %c0_12 = arith.constant 0 : index
    %14 = vector.load %arg1[%c0_11, %c2, %c0_12] : memref<1x10x4xf32, #tpu.memory_space<vmem>>, vector<1x8x4xf32>
    %15 = vector.shape_cast %14 : vector<1x8x4xf32> to vector<8x4xf32>
    %c8 = arith.constant 8 : index
    %c0_13 = arith.constant 0 : index
    %16 = vector.load %arg2[%c8, %c0_13] : memref<12x8xf32, #tpu.memory_space<vmem>>, vector<4x8xf32>
    %cst_14 = arith.constant dense<0.000000e+00> : vector<8x8xf32>
    %17 = tpu.matmul %15, %16, %cst_14 {dimension_numbers = #tpu.dot_dimension_numbers<[1], [0], [0], [1], [0, 0, 1, 1], [], []>} : vector<8x4xf32>, vector<4x8xf32>, vector<8x8xf32> -> vector<8x8xf32>
    %18 = arith.addf %13, %17 : vector<8x8xf32>
    %cst_15 = arith.constant 0.000000e+00 : f32
    %19 = vector.broadcast %cst_15 : f32 to vector<10x8xf32>
    %c0_16 = arith.constant 0 : index
    %c0_17 = arith.constant 0 : index
    %20 = vector.load %arg7[%c0_16, %c0_17] : memref<10x8xf32, #tpu.memory_space<vmem>>, vector<10x8xf32>
    tpu.vector_store %arg7[%c0_16, %c0_17], %19 {strides = array<i32>} : memref<10x8xf32, #tpu.memory_space<vmem>>, vector<10x8xf32>,
    %cst_18 = arith.constant 0.000000e+00 : f32
    %21 = vector.broadcast %cst_18 : f32 to vector<8x8xf32>
    %22 = arith.maximumf %18, %21 : vector<8x8xf32>
    %c1_19 = arith.constant 1 : index
    %c0_20 = arith.constant 0 : index
    %23 = vector.load %arg7[%c1_19, %c0_20] : memref<10x8xf32, #tpu.memory_space<vmem>>, vector<8x8xf32>
    tpu.vector_store %arg7[%c1_19, %c0_20], %22 {strides = array<i32>} : memref<10x8xf32, #tpu.memory_space<vmem>>, vector<8x8xf32>,
    %cst_21 = arith.constant 0.000000e+00 : f32
    %24 = vector.broadcast %cst_21 : f32 to vector<8x8xf32>
    %c0_22 = arith.constant 0 : index
    %c0_23 = arith.constant 0 : index
    %25 = vector.load %arg5[%c0_22, %c0_23] : memref<1x8xf32, #tpu.memory_space<vmem>>, vector<1x8xf32>
    %26 = vector.broadcast %25 : vector<1x8xf32> to vector<8x8xf32>
    %27 = arith.addf %24, %26 : vector<8x8xf32>
    %c0_24 = arith.constant 0 : index
    %c0_25 = arith.constant 0 : index
    %28 = vector.load %arg7[%c0_24, %c0_25] : memref<10x8xf32, #tpu.memory_space<vmem>>, vector<8x8xf32>
    %c0_26 = arith.constant 0 : index
    %c0_27 = arith.constant 0 : index
    %29 = vector.load %arg4[%c0_26, %c0_27] : memref<24x8xf32, #tpu.memory_space<vmem>>, vector<8x8xf32>
    %cst_28 = arith.constant dense<0.000000e+00> : vector<8x8xf32>
    %30 = tpu.matmul %28, %29, %cst_28 {dimension_numbers = #tpu.dot_dimension_numbers<[1], [0], [0], [1], [0, 0, 1, 1], [], []>} : vector<8x8xf32>, vector<8x8xf32>, vector<8x8xf32> -> vector<8x8xf32>
    %31 = arith.addf %27, %30 : vector<8x8xf32>
    %c1_29 = arith.constant 1 : index
    %c0_30 = arith.constant 0 : index
    %32 = vector.load %arg7[%c1_29, %c0_30] : memref<10x8xf32, #tpu.memory_space<vmem>>, vector<8x8xf32>
    %c8_31 = arith.constant 8 : index
    %c0_32 = arith.constant 0 : index
    %33 = vector.load %arg4[%c8_31, %c0_32] : memref<24x8xf32, #tpu.memory_space<vmem>>, vector<8x8xf32>
    %cst_33 = arith.constant dense<0.000000e+00> : vector<8x8xf32>
    %34 = tpu.matmul %32, %33, %cst_33 {dimension_numbers = #tpu.dot_dimension_numbers<[1], [0], [0], [1], [0, 0, 1, 1], [], []>} : vector<8x8xf32>, vector<8x8xf32>, vector<8x8xf32> -> vector<8x8xf32>
    %35 = arith.addf %31, %34 : vector<8x8xf32>
    %c2_34 = arith.constant 2 : index
    %c0_35 = arith.constant 0 : index
    %36 = vector.load %arg7[%c2_34, %c0_35] : memref<10x8xf32, #tpu.memory_space<vmem>>, vector<8x8xf32>
    %c16 = arith.constant 16 : index
    %c0_36 = arith.constant 0 : index
    %37 = vector.load %arg4[%c16, %c0_36] : memref<24x8xf32, #tpu.memory_space<vmem>>, vector<8x8xf32>
    %cst_37 = arith.constant dense<0.000000e+00> : vector<8x8xf32>
    %38 = tpu.matmul %36, %37, %cst_37 {dimension_numbers = #tpu.dot_dimension_numbers<[1], [0], [0], [1], [0, 0, 1, 1], [], []>} : vector<8x8xf32>, vector<8x8xf32>, vector<8x8xf32> -> vector<8x8xf32>
    %39 = arith.addf %35, %38 : vector<8x8xf32>
    %cst_38 = arith.constant 0.000000e+00 : f32
    %40 = vector.broadcast %cst_38 : f32 to vector<8x8xf32>
    %41 = arith.maximumf %39, %40 : vector<8x8xf32>
    %c0_39 = arith.constant 0 : index
    %c0_40 = arith.constant 0 : index
    %c0_41 = arith.constant 0 : index
    %42 = vector.load %arg6[%c0_39, %c0_40, %c0_41] : memref<1x8x8xf32, #tpu.memory_space<vmem>>, vector<1x8x8xf32>
    %43 = vector.shape_cast %42 : vector<1x8x8xf32> to vector<8x8xf32>
    %44 = vector.shape_cast %41 : vector<8x8xf32> to vector<1x8x8xf32>
    tpu.vector_store %arg6[%c0_39, %c0_40, %c0_41], %44 {strides = array<i32>} : memref<1x8x8xf32, #tpu.memory_space<vmem>>, vector<1x8x8xf32>,
    return
  }
  func.func @transform_0(%arg0: i32) -> (i32, i32, i32) {
    %c0_i32 = arith.constant 0 : i32
    %c0_i32_0 = arith.constant 0 : i32
    %c0_i32_1 = arith.constant 0 : i32
    return %arg0, %c0_i32, %c0_i32_0 : i32, i32, i32
  }
  func.func @transform_1(%arg0: i32) -> (i32, i32) {
    %c0_i32 = arith.constant 0 : i32
    %c0_i32_0 = arith.constant 0 : i32
    %c0_i32_1 = arith.constant 0 : i32
    return %c0_i32, %c0_i32_0 : i32, i32
  }
  func.func @transform_2(%arg0: i32) -> (i32, i32) {
    %c0_i32 = arith.constant 0 : i32
    %c0_i32_0 = arith.constant 0 : i32
    %c0_i32_1 = arith.constant 0 : i32
    return %c0_i32, %c0_i32_0 : i32, i32
  }
  func.func @transform_3(%arg0: i32) -> (i32, i32) {
    %c0_i32 = arith.constant 0 : i32
    %c0_i32_0 = arith.constant 0 : i32
    %c0_i32_1 = arith.constant 0 : i32
    return %c0_i32, %c0_i32_0 : i32, i32
  }
  func.func @transform_4(%arg0: i32) -> (i32, i32) {
    %c0_i32 = arith.constant 0 : i32
    %c0_i32_0 = arith.constant 0 : i32
    %c0_i32_1 = arith.constant 0 : i32
    return %c0_i32, %c0_i32_0 : i32, i32
  }
  func.func @transform_5(%arg0: i32) -> (i32, i32, i32) {
    %c0_i32 = arith.constant 0 : i32
    %c0_i32_0 = arith.constant 0 : i32
    %c0_i32_1 = arith.constant 0 : i32
    return %arg0, %c0_i32, %c0_i32_0 : i32, i32, i32
  }
}

module attributes {stable_mosaic.version = 11 : i64} {
  func.func @_double_conv1d_kernel(%arg0: i32, %arg1: memref<1x6x8xf32, #tpu.memory_space<vmem>>, %arg2: memref<24x16xf32, #tpu.memory_space<vmem>>, %arg3: memref<1x16xf32, #tpu.memory_space<vmem>>, %arg4: memref<48x16xf32, #tpu.memory_space<vmem>>, %arg5: memref<1x16xf32, #tpu.memory_space<vmem>>, %arg6: memref<1x4x16xf32, #tpu.memory_space<vmem>>, %arg7: memref<6x16xf32, #tpu.memory_space<vmem>>) attributes {dimension_semantics = [#tpu.dimension_semantics<parallel>], iteration_bounds = array<i64: 2>, scalar_prefetch = 0 : i64, scratch_operands = 1 : i64, tpu.core_type = #tpu.core_type<tc>, window_params = [{transform_indices = @transform_0, window_bounds = array<i64: 1, 6, 8>}, {pipeline_mode = #tpu.pipeline_mode<synchronous>, transform_indices = @transform_1, window_bounds = array<i64: 24, 16>}, {pipeline_mode = #tpu.pipeline_mode<synchronous>, transform_indices = @transform_2, window_bounds = array<i64: 1, 16>}, {pipeline_mode = #tpu.pipeline_mode<synchronous>, transform_indices = @transform_3, window_bounds = array<i64: 48, 16>}, {pipeline_mode = #tpu.pipeline_mode<synchronous>, transform_indices = @transform_4, window_bounds = array<i64: 1, 16>}, {transform_indices = @transform_5, window_bounds = array<i64: 1, 4, 16>}]} {
    %cst = arith.constant 0.000000e+00 : f32
    %0 = vector.broadcast %cst : f32 to vector<4x16xf32>
    %c0 = arith.constant 0 : index
    %c0_0 = arith.constant 0 : index
    %1 = vector.load %arg3[%c0, %c0_0] : memref<1x16xf32, #tpu.memory_space<vmem>>, vector<1x16xf32>
    %2 = vector.broadcast %1 : vector<1x16xf32> to vector<4x16xf32>
    %3 = arith.addf %0, %2 : vector<4x16xf32>
    %c0_1 = arith.constant 0 : index
    %c0_2 = arith.constant 0 : index
    %c0_3 = arith.constant 0 : index
    %4 = vector.load %arg1[%c0_1, %c0_2, %c0_3] : memref<1x6x8xf32, #tpu.memory_space<vmem>>, vector<1x4x8xf32>
    %5 = vector.shape_cast %4 : vector<1x4x8xf32> to vector<4x8xf32>
    %c0_4 = arith.constant 0 : index
    %c0_5 = arith.constant 0 : index
    %6 = vector.load %arg2[%c0_4, %c0_5] : memref<24x16xf32, #tpu.memory_space<vmem>>, vector<8x16xf32>
    %cst_6 = arith.constant dense<0.000000e+00> : vector<4x16xf32>
    %7 = tpu.matmul %5, %6, %cst_6 {dimension_numbers = #tpu.dot_dimension_numbers<[1], [0], [0], [1], [0, 0, 1, 1], [], []>} : vector<4x8xf32>, vector<8x16xf32>, vector<4x16xf32> -> vector<4x16xf32>
    %8 = arith.addf %3, %7 : vector<4x16xf32>
    %c0_7 = arith.constant 0 : index
    %c1 = arith.constant 1 : index
    %c0_8 = arith.constant 0 : index
    %9 = vector.load %arg1[%c0_7, %c1, %c0_8] : memref<1x6x8xf32, #tpu.memory_space<vmem>>, vector<1x4x8xf32>
    %10 = vector.shape_cast %9 : vector<1x4x8xf32> to vector<4x8xf32>
    %c8 = arith.constant 8 : index
    %c0_9 = arith.constant 0 : index
    %11 = vector.load %arg2[%c8, %c0_9] : memref<24x16xf32, #tpu.memory_space<vmem>>, vector<8x16xf32>
    %cst_10 = arith.constant dense<0.000000e+00> : vector<4x16xf32>
    %12 = tpu.matmul %10, %11, %cst_10 {dimension_numbers = #tpu.dot_dimension_numbers<[1], [0], [0], [1], [0, 0, 1, 1], [], []>} : vector<4x8xf32>, vector<8x16xf32>, vector<4x16xf32> -> vector<4x16xf32>
    %13 = arith.addf %8, %12 : vector<4x16xf32>
    %c0_11 = arith.constant 0 : index
    %c2 = arith.constant 2 : index
    %c0_12 = arith.constant 0 : index
    %14 = vector.load %arg1[%c0_11, %c2, %c0_12] : memref<1x6x8xf32, #tpu.memory_space<vmem>>, vector<1x4x8xf32>
    %15 = vector.shape_cast %14 : vector<1x4x8xf32> to vector<4x8xf32>
    %c16 = arith.constant 16 : index
    %c0_13 = arith.constant 0 : index
    %16 = vector.load %arg2[%c16, %c0_13] : memref<24x16xf32, #tpu.memory_space<vmem>>, vector<8x16xf32>
    %cst_14 = arith.constant dense<0.000000e+00> : vector<4x16xf32>
    %17 = tpu.matmul %15, %16, %cst_14 {dimension_numbers = #tpu.dot_dimension_numbers<[1], [0], [0], [1], [0, 0, 1, 1], [], []>} : vector<4x8xf32>, vector<8x16xf32>, vector<4x16xf32> -> vector<4x16xf32>
    %18 = arith.addf %13, %17 : vector<4x16xf32>
    %cst_15 = arith.constant 0.000000e+00 : f32
    %19 = vector.broadcast %cst_15 : f32 to vector<6x16xf32>
    %c0_16 = arith.constant 0 : index
    %c0_17 = arith.constant 0 : index
    %20 = vector.load %arg7[%c0_16, %c0_17] : memref<6x16xf32, #tpu.memory_space<vmem>>, vector<6x16xf32>
    tpu.vector_store %arg7[%c0_16, %c0_17], %19 {strides = array<i32>} : memref<6x16xf32, #tpu.memory_space<vmem>>, vector<6x16xf32>,
    %cst_18 = arith.constant 0.000000e+00 : f32
    %21 = vector.broadcast %cst_18 : f32 to vector<4x16xf32>
    %22 = arith.maximumf %18, %21 : vector<4x16xf32>
    %c1_19 = arith.constant 1 : index
    %c0_20 = arith.constant 0 : index
    %23 = vector.load %arg7[%c1_19, %c0_20] : memref<6x16xf32, #tpu.memory_space<vmem>>, vector<4x16xf32>
    tpu.vector_store %arg7[%c1_19, %c0_20], %22 {strides = array<i32>} : memref<6x16xf32, #tpu.memory_space<vmem>>, vector<4x16xf32>,
    %cst_21 = arith.constant 0.000000e+00 : f32
    %24 = vector.broadcast %cst_21 : f32 to vector<4x16xf32>
    %c0_22 = arith.constant 0 : index
    %c0_23 = arith.constant 0 : index
    %25 = vector.load %arg5[%c0_22, %c0_23] : memref<1x16xf32, #tpu.memory_space<vmem>>, vector<1x16xf32>
    %26 = vector.broadcast %25 : vector<1x16xf32> to vector<4x16xf32>
    %27 = arith.addf %24, %26 : vector<4x16xf32>
    %c0_24 = arith.constant 0 : index
    %c0_25 = arith.constant 0 : index
    %28 = vector.load %arg7[%c0_24, %c0_25] : memref<6x16xf32, #tpu.memory_space<vmem>>, vector<4x16xf32>
    %c0_26 = arith.constant 0 : index
    %c0_27 = arith.constant 0 : index
    %29 = vector.load %arg4[%c0_26, %c0_27] : memref<48x16xf32, #tpu.memory_space<vmem>>, vector<16x16xf32>
    %cst_28 = arith.constant dense<0.000000e+00> : vector<4x16xf32>
    %30 = tpu.matmul %28, %29, %cst_28 {dimension_numbers = #tpu.dot_dimension_numbers<[1], [0], [0], [1], [0, 0, 1, 1], [], []>} : vector<4x16xf32>, vector<16x16xf32>, vector<4x16xf32> -> vector<4x16xf32>
    %31 = arith.addf %27, %30 : vector<4x16xf32>
    %c1_29 = arith.constant 1 : index
    %c0_30 = arith.constant 0 : index
    %32 = vector.load %arg7[%c1_29, %c0_30] : memref<6x16xf32, #tpu.memory_space<vmem>>, vector<4x16xf32>
    %c16_31 = arith.constant 16 : index
    %c0_32 = arith.constant 0 : index
    %33 = vector.load %arg4[%c16_31, %c0_32] : memref<48x16xf32, #tpu.memory_space<vmem>>, vector<16x16xf32>
    %cst_33 = arith.constant dense<0.000000e+00> : vector<4x16xf32>
    %34 = tpu.matmul %32, %33, %cst_33 {dimension_numbers = #tpu.dot_dimension_numbers<[1], [0], [0], [1], [0, 0, 1, 1], [], []>} : vector<4x16xf32>, vector<16x16xf32>, vector<4x16xf32> -> vector<4x16xf32>
    %35 = arith.addf %31, %34 : vector<4x16xf32>
    %c2_34 = arith.constant 2 : index
    %c0_35 = arith.constant 0 : index
    %36 = vector.load %arg7[%c2_34, %c0_35] : memref<6x16xf32, #tpu.memory_space<vmem>>, vector<4x16xf32>
    %c32 = arith.constant 32 : index
    %c0_36 = arith.constant 0 : index
    %37 = vector.load %arg4[%c32, %c0_36] : memref<48x16xf32, #tpu.memory_space<vmem>>, vector<16x16xf32>
    %cst_37 = arith.constant dense<0.000000e+00> : vector<4x16xf32>
    %38 = tpu.matmul %36, %37, %cst_37 {dimension_numbers = #tpu.dot_dimension_numbers<[1], [0], [0], [1], [0, 0, 1, 1], [], []>} : vector<4x16xf32>, vector<16x16xf32>, vector<4x16xf32> -> vector<4x16xf32>
    %39 = arith.addf %35, %38 : vector<4x16xf32>
    %cst_38 = arith.constant 0.000000e+00 : f32
    %40 = vector.broadcast %cst_38 : f32 to vector<4x16xf32>
    %41 = arith.maximumf %39, %40 : vector<4x16xf32>
    %c0_39 = arith.constant 0 : index
    %c0_40 = arith.constant 0 : index
    %c0_41 = arith.constant 0 : index
    %42 = vector.load %arg6[%c0_39, %c0_40, %c0_41] : memref<1x4x16xf32, #tpu.memory_space<vmem>>, vector<1x4x16xf32>
    %43 = vector.shape_cast %42 : vector<1x4x16xf32> to vector<4x16xf32>
    %44 = vector.shape_cast %41 : vector<4x16xf32> to vector<1x4x16xf32>
    tpu.vector_store %arg6[%c0_39, %c0_40, %c0_41], %44 {strides = array<i32>} : memref<1x4x16xf32, #tpu.memory_space<vmem>>, vector<1x4x16xf32>,
    return
  }
  func.func @transform_0(%arg0: i32) -> (i32, i32, i32) {
    %c0_i32 = arith.constant 0 : i32
    %c0_i32_0 = arith.constant 0 : i32
    %c0_i32_1 = arith.constant 0 : i32
    return %arg0, %c0_i32, %c0_i32_0 : i32, i32, i32
  }
  func.func @transform_1(%arg0: i32) -> (i32, i32) {
    %c0_i32 = arith.constant 0 : i32
    %c0_i32_0 = arith.constant 0 : i32
    %c0_i32_1 = arith.constant 0 : i32
    return %c0_i32, %c0_i32_0 : i32, i32
  }
  func.func @transform_2(%arg0: i32) -> (i32, i32) {
    %c0_i32 = arith.constant 0 : i32
    %c0_i32_0 = arith.constant 0 : i32
    %c0_i32_1 = arith.constant 0 : i32
    return %c0_i32, %c0_i32_0 : i32, i32
  }
  func.func @transform_3(%arg0: i32) -> (i32, i32) {
    %c0_i32 = arith.constant 0 : i32
    %c0_i32_0 = arith.constant 0 : i32
    %c0_i32_1 = arith.constant 0 : i32
    return %c0_i32, %c0_i32_0 : i32, i32
  }
  func.func @transform_4(%arg0: i32) -> (i32, i32) {
    %c0_i32 = arith.constant 0 : i32
    %c0_i32_0 = arith.constant 0 : i32
    %c0_i32_1 = arith.constant 0 : i32
    return %c0_i32, %c0_i32_0 : i32, i32
  }
  func.func @transform_5(%arg0: i32) -> (i32, i32, i32) {
    %c0_i32 = arith.constant 0 : i32
    %c0_i32_0 = arith.constant 0 : i32
    %c0_i32_1 = arith.constant 0 : i32
    return %arg0, %c0_i32, %c0_i32_0 : i32, i32, i32
  }
}

module attributes {stable_mosaic.version = 11 : i64} {
  func.func @_causal_conv_kernel(%arg0: i32, %arg1: memref<1x82x1xf32, #tpu.memory_space<vmem>>, %arg2: memref<10x16xf32, #tpu.memory_space<vmem>>, %arg3: memref<1x16xf32, #tpu.memory_space<vmem>>, %arg4: memref<1x64x16xf32, #tpu.memory_space<vmem>>) attributes {dimension_semantics = [#tpu.dimension_semantics<parallel>], iteration_bounds = array<i64: 2>, scalar_prefetch = 0 : i64, scratch_operands = 0 : i64, tpu.core_type = #tpu.core_type<tc>, window_params = [{transform_indices = @transform_0, window_bounds = array<i64: 1, 82, 1>}, {pipeline_mode = #tpu.pipeline_mode<synchronous>, transform_indices = @transform_1, window_bounds = array<i64: 10, 16>}, {pipeline_mode = #tpu.pipeline_mode<synchronous>, transform_indices = @transform_2, window_bounds = array<i64: 1, 16>}, {transform_indices = @transform_3, window_bounds = array<i64: 1, 64, 16>}]} {
    %cst = arith.constant 0.000000e+00 : f32
    %0 = vector.broadcast %cst : f32 to vector<64x16xf32>
    %c0 = arith.constant 0 : index
    %c0_0 = arith.constant 0 : index
    %1 = vector.load %arg3[%c0, %c0_0] : memref<1x16xf32, #tpu.memory_space<vmem>>, vector<1x16xf32>
    %2 = vector.broadcast %1 : vector<1x16xf32> to vector<64x16xf32>
    %3 = arith.addf %0, %2 : vector<64x16xf32>
    %c0_1 = arith.constant 0 : index
    %c0_2 = arith.constant 0 : index
    %c0_3 = arith.constant 0 : index
    %4 = vector.load %arg1[%c0_1, %c0_2, %c0_3] : memref<1x82x1xf32, #tpu.memory_space<vmem>>, vector<1x64x1xf32>
    %5 = vector.shape_cast %4 : vector<1x64x1xf32> to vector<64x1xf32>
    %c0_4 = arith.constant 0 : index
    %c0_5 = arith.constant 0 : index
    %6 = vector.load %arg2[%c0_4, %c0_5] : memref<10x16xf32, #tpu.memory_space<vmem>>, vector<1x16xf32>
    %7 = vector.broadcast %5 : vector<64x1xf32> to vector<64x16xf32>
    %8 = vector.broadcast %6 : vector<1x16xf32> to vector<64x16xf32>
    %9 = arith.mulf %7, %8 : vector<64x16xf32>
    %10 = arith.addf %3, %9 : vector<64x16xf32>
    %c0_6 = arith.constant 0 : index
    %c2 = arith.constant 2 : index
    %c0_7 = arith.constant 0 : index
    %11 = vector.load %arg1[%c0_6, %c2, %c0_7] : memref<1x82x1xf32, #tpu.memory_space<vmem>>, vector<1x64x1xf32>
    %12 = vector.shape_cast %11 : vector<1x64x1xf32> to vector<64x1xf32>
    %c1 = arith.constant 1 : index
    %c0_8 = arith.constant 0 : index
    %13 = vector.load %arg2[%c1, %c0_8] : memref<10x16xf32, #tpu.memory_space<vmem>>, vector<1x16xf32>
    %14 = vector.broadcast %12 : vector<64x1xf32> to vector<64x16xf32>
    %15 = vector.broadcast %13 : vector<1x16xf32> to vector<64x16xf32>
    %16 = arith.mulf %14, %15 : vector<64x16xf32>
    %17 = arith.addf %10, %16 : vector<64x16xf32>
    %c0_9 = arith.constant 0 : index
    %c4 = arith.constant 4 : index
    %c0_10 = arith.constant 0 : index
    %18 = vector.load %arg1[%c0_9, %c4, %c0_10] : memref<1x82x1xf32, #tpu.memory_space<vmem>>, vector<1x64x1xf32>
    %19 = vector.shape_cast %18 : vector<1x64x1xf32> to vector<64x1xf32>
    %c2_11 = arith.constant 2 : index
    %c0_12 = arith.constant 0 : index
    %20 = vector.load %arg2[%c2_11, %c0_12] : memref<10x16xf32, #tpu.memory_space<vmem>>, vector<1x16xf32>
    %21 = vector.broadcast %19 : vector<64x1xf32> to vector<64x16xf32>
    %22 = vector.broadcast %20 : vector<1x16xf32> to vector<64x16xf32>
    %23 = arith.mulf %21, %22 : vector<64x16xf32>
    %24 = arith.addf %17, %23 : vector<64x16xf32>
    %c0_13 = arith.constant 0 : index
    %c6 = arith.constant 6 : index
    %c0_14 = arith.constant 0 : index
    %25 = vector.load %arg1[%c0_13, %c6, %c0_14] : memref<1x82x1xf32, #tpu.memory_space<vmem>>, vector<1x64x1xf32>
    %26 = vector.shape_cast %25 : vector<1x64x1xf32> to vector<64x1xf32>
    %c3 = arith.constant 3 : index
    %c0_15 = arith.constant 0 : index
    %27 = vector.load %arg2[%c3, %c0_15] : memref<10x16xf32, #tpu.memory_space<vmem>>, vector<1x16xf32>
    %28 = vector.broadcast %26 : vector<64x1xf32> to vector<64x16xf32>
    %29 = vector.broadcast %27 : vector<1x16xf32> to vector<64x16xf32>
    %30 = arith.mulf %28, %29 : vector<64x16xf32>
    %31 = arith.addf %24, %30 : vector<64x16xf32>
    %c0_16 = arith.constant 0 : index
    %c8 = arith.constant 8 : index
    %c0_17 = arith.constant 0 : index
    %32 = vector.load %arg1[%c0_16, %c8, %c0_17] : memref<1x82x1xf32, #tpu.memory_space<vmem>>, vector<1x64x1xf32>
    %33 = vector.shape_cast %32 : vector<1x64x1xf32> to vector<64x1xf32>
    %c4_18 = arith.constant 4 : index
    %c0_19 = arith.constant 0 : index
    %34 = vector.load %arg2[%c4_18, %c0_19] : memref<10x16xf32, #tpu.memory_space<vmem>>, vector<1x16xf32>
    %35 = vector.broadcast %33 : vector<64x1xf32> to vector<64x16xf32>
    %36 = vector.broadcast %34 : vector<1x16xf32> to vector<64x16xf32>
    %37 = arith.mulf %35, %36 : vector<64x16xf32>
    %38 = arith.addf %31, %37 : vector<64x16xf32>
    %c0_20 = arith.constant 0 : index
    %c10 = arith.constant 10 : index
    %c0_21 = arith.constant 0 : index
    %39 = vector.load %arg1[%c0_20, %c10, %c0_21] : memref<1x82x1xf32, #tpu.memory_space<vmem>>, vector<1x64x1xf32>
    %40 = vector.shape_cast %39 : vector<1x64x1xf32> to vector<64x1xf32>
    %c5 = arith.constant 5 : index
    %c0_22 = arith.constant 0 : index
    %41 = vector.load %arg2[%c5, %c0_22] : memref<10x16xf32, #tpu.memory_space<vmem>>, vector<1x16xf32>
    %42 = vector.broadcast %40 : vector<64x1xf32> to vector<64x16xf32>
    %43 = vector.broadcast %41 : vector<1x16xf32> to vector<64x16xf32>
    %44 = arith.mulf %42, %43 : vector<64x16xf32>
    %45 = arith.addf %38, %44 : vector<64x16xf32>
    %c0_23 = arith.constant 0 : index
    %c12 = arith.constant 12 : index
    %c0_24 = arith.constant 0 : index
    %46 = vector.load %arg1[%c0_23, %c12, %c0_24] : memref<1x82x1xf32, #tpu.memory_space<vmem>>, vector<1x64x1xf32>
    %47 = vector.shape_cast %46 : vector<1x64x1xf32> to vector<64x1xf32>
    %c6_25 = arith.constant 6 : index
    %c0_26 = arith.constant 0 : index
    %48 = vector.load %arg2[%c6_25, %c0_26] : memref<10x16xf32, #tpu.memory_space<vmem>>, vector<1x16xf32>
    %49 = vector.broadcast %47 : vector<64x1xf32> to vector<64x16xf32>
    %50 = vector.broadcast %48 : vector<1x16xf32> to vector<64x16xf32>
    %51 = arith.mulf %49, %50 : vector<64x16xf32>
    %52 = arith.addf %45, %51 : vector<64x16xf32>
    %c0_27 = arith.constant 0 : index
    %c14 = arith.constant 14 : index
    %c0_28 = arith.constant 0 : index
    %53 = vector.load %arg1[%c0_27, %c14, %c0_28] : memref<1x82x1xf32, #tpu.memory_space<vmem>>, vector<1x64x1xf32>
    %54 = vector.shape_cast %53 : vector<1x64x1xf32> to vector<64x1xf32>
    %c7 = arith.constant 7 : index
    %c0_29 = arith.constant 0 : index
    %55 = vector.load %arg2[%c7, %c0_29] : memref<10x16xf32, #tpu.memory_space<vmem>>, vector<1x16xf32>
    %56 = vector.broadcast %54 : vector<64x1xf32> to vector<64x16xf32>
    %57 = vector.broadcast %55 : vector<1x16xf32> to vector<64x16xf32>
    %58 = arith.mulf %56, %57 : vector<64x16xf32>
    %59 = arith.addf %52, %58 : vector<64x16xf32>
    %c0_30 = arith.constant 0 : index
    %c16 = arith.constant 16 : index
    %c0_31 = arith.constant 0 : index
    %60 = vector.load %arg1[%c0_30, %c16, %c0_31] : memref<1x82x1xf32, #tpu.memory_space<vmem>>, vector<1x64x1xf32>
    %61 = vector.shape_cast %60 : vector<1x64x1xf32> to vector<64x1xf32>
    %c8_32 = arith.constant 8 : index
    %c0_33 = arith.constant 0 : index
    %62 = vector.load %arg2[%c8_32, %c0_33] : memref<10x16xf32, #tpu.memory_space<vmem>>, vector<1x16xf32>
    %63 = vector.broadcast %61 : vector<64x1xf32> to vector<64x16xf32>
    %64 = vector.broadcast %62 : vector<1x16xf32> to vector<64x16xf32>
    %65 = arith.mulf %63, %64 : vector<64x16xf32>
    %66 = arith.addf %59, %65 : vector<64x16xf32>
    %c0_34 = arith.constant 0 : index
    %c18 = arith.constant 18 : index
    %c0_35 = arith.constant 0 : index
    %67 = vector.load %arg1[%c0_34, %c18, %c0_35] : memref<1x82x1xf32, #tpu.memory_space<vmem>>, vector<1x64x1xf32>
    %68 = vector.shape_cast %67 : vector<1x64x1xf32> to vector<64x1xf32>
    %c9 = arith.constant 9 : index
    %c0_36 = arith.constant 0 : index
    %69 = vector.load %arg2[%c9, %c0_36] : memref<10x16xf32, #tpu.memory_space<vmem>>, vector<1x16xf32>
    %70 = vector.broadcast %68 : vector<64x1xf32> to vector<64x16xf32>
    %71 = vector.broadcast %69 : vector<1x16xf32> to vector<64x16xf32>
    %72 = arith.mulf %70, %71 : vector<64x16xf32>
    %73 = arith.addf %66, %72 : vector<64x16xf32>
    %cst_37 = arith.constant 0.000000e+00 : f32
    %74 = vector.broadcast %cst_37 : f32 to vector<64x16xf32>
    %75 = arith.cmpf ogt, %73, %74 : vector<64x16xf32>
    %cst_38 = arith.constant 0.00999999977 : f32
    %76 = vector.broadcast %cst_38 : f32 to vector<64x16xf32>
    %77 = arith.mulf %76, %73 : vector<64x16xf32>
    %78 = arith.select %75, %73, %77 : vector<64x16xi1>, vector<64x16xf32>
    %c0_39 = arith.constant 0 : index
    %c0_40 = arith.constant 0 : index
    %c0_41 = arith.constant 0 : index
    %79 = vector.load %arg4[%c0_39, %c0_40, %c0_41] : memref<1x64x16xf32, #tpu.memory_space<vmem>>, vector<1x64x16xf32>
    %80 = vector.shape_cast %79 : vector<1x64x16xf32> to vector<64x16xf32>
    %81 = vector.shape_cast %78 : vector<64x16xf32> to vector<1x64x16xf32>
    tpu.vector_store %arg4[%c0_39, %c0_40, %c0_41], %81 {strides = array<i32>} : memref<1x64x16xf32, #tpu.memory_space<vmem>>, vector<1x64x16xf32>,
    return
  }
  func.func @transform_0(%arg0: i32) -> (i32, i32, i32) {
    %c0_i32 = arith.constant 0 : i32
    %c0_i32_0 = arith.constant 0 : i32
    %c0_i32_1 = arith.constant 0 : i32
    return %arg0, %c0_i32, %c0_i32_0 : i32, i32, i32
  }
  func.func @transform_1(%arg0: i32) -> (i32, i32) {
    %c0_i32 = arith.constant 0 : i32
    %c0_i32_0 = arith.constant 0 : i32
    %c0_i32_1 = arith.constant 0 : i32
    return %c0_i32, %c0_i32_0 : i32, i32
  }
  func.func @transform_2(%arg0: i32) -> (i32, i32) {
    %c0_i32 = arith.constant 0 : i32
    %c0_i32_0 = arith.constant 0 : i32
    %c0_i32_1 = arith.constant 0 : i32
    return %c0_i32, %c0_i32_0 : i32, i32
  }
  func.func @transform_3(%arg0: i32) -> (i32, i32, i32) {
    %c0_i32 = arith.constant 0 : i32
    %c0_i32_0 = arith.constant 0 : i32
    %c0_i32_1 = arith.constant 0 : i32
    return %arg0, %c0_i32, %c0_i32_0 : i32, i32, i32
  }
}

module attributes {stable_mosaic.version = 11 : i64} {
  func.func @_causal_conv_kernel(%arg0: i32, %arg1: memref<1x34x16xf32, #tpu.memory_space<vmem>>, %arg2: memref<160x16xf32, #tpu.memory_space<vmem>>, %arg3: memref<1x16xf32, #tpu.memory_space<vmem>>, %arg4: memref<1x16x16xf32, #tpu.memory_space<vmem>>) attributes {dimension_semantics = [#tpu.dimension_semantics<parallel>], iteration_bounds = array<i64: 2>, scalar_prefetch = 0 : i64, scratch_operands = 0 : i64, tpu.core_type = #tpu.core_type<tc>, window_params = [{transform_indices = @transform_0, window_bounds = array<i64: 1, 34, 16>}, {pipeline_mode = #tpu.pipeline_mode<synchronous>, transform_indices = @transform_1, window_bounds = array<i64: 160, 16>}, {pipeline_mode = #tpu.pipeline_mode<synchronous>, transform_indices = @transform_2, window_bounds = array<i64: 1, 16>}, {transform_indices = @transform_3, window_bounds = array<i64: 1, 16, 16>}]} {
    %cst = arith.constant 0.000000e+00 : f32
    %0 = vector.broadcast %cst : f32 to vector<16x16xf32>
    %c0 = arith.constant 0 : index
    %c0_0 = arith.constant 0 : index
    %1 = vector.load %arg3[%c0, %c0_0] : memref<1x16xf32, #tpu.memory_space<vmem>>, vector<1x16xf32>
    %2 = vector.broadcast %1 : vector<1x16xf32> to vector<16x16xf32>
    %3 = arith.addf %0, %2 : vector<16x16xf32>
    %c0_1 = arith.constant 0 : index
    %c0_2 = arith.constant 0 : index
    %c0_3 = arith.constant 0 : index
    %4 = vector.load %arg1[%c0_1, %c0_2, %c0_3] : memref<1x34x16xf32, #tpu.memory_space<vmem>>, vector<1x16x16xf32>
    %5 = vector.shape_cast %4 : vector<1x16x16xf32> to vector<16x16xf32>
    %c0_4 = arith.constant 0 : index
    %c0_5 = arith.constant 0 : index
    %6 = vector.load %arg2[%c0_4, %c0_5] : memref<160x16xf32, #tpu.memory_space<vmem>>, vector<16x16xf32>
    %cst_6 = arith.constant dense<0.000000e+00> : vector<16x16xf32>
    %7 = tpu.matmul %5, %6, %cst_6 {dimension_numbers = #tpu.dot_dimension_numbers<[1], [0], [0], [1], [0, 0, 1, 1], [], []>} : vector<16x16xf32>, vector<16x16xf32>, vector<16x16xf32> -> vector<16x16xf32>
    %8 = arith.addf %3, %7 : vector<16x16xf32>
    %c0_7 = arith.constant 0 : index
    %c2 = arith.constant 2 : index
    %c0_8 = arith.constant 0 : index
    %9 = vector.load %arg1[%c0_7, %c2, %c0_8] : memref<1x34x16xf32, #tpu.memory_space<vmem>>, vector<1x16x16xf32>
    %10 = vector.shape_cast %9 : vector<1x16x16xf32> to vector<16x16xf32>
    %c16 = arith.constant 16 : index
    %c0_9 = arith.constant 0 : index
    %11 = vector.load %arg2[%c16, %c0_9] : memref<160x16xf32, #tpu.memory_space<vmem>>, vector<16x16xf32>
    %cst_10 = arith.constant dense<0.000000e+00> : vector<16x16xf32>
    %12 = tpu.matmul %10, %11, %cst_10 {dimension_numbers = #tpu.dot_dimension_numbers<[1], [0], [0], [1], [0, 0, 1, 1], [], []>} : vector<16x16xf32>, vector<16x16xf32>, vector<16x16xf32> -> vector<16x16xf32>
    %13 = arith.addf %8, %12 : vector<16x16xf32>
    %c0_11 = arith.constant 0 : index
    %c4 = arith.constant 4 : index
    %c0_12 = arith.constant 0 : index
    %14 = vector.load %arg1[%c0_11, %c4, %c0_12] : memref<1x34x16xf32, #tpu.memory_space<vmem>>, vector<1x16x16xf32>
    %15 = vector.shape_cast %14 : vector<1x16x16xf32> to vector<16x16xf32>
    %c32 = arith.constant 32 : index
    %c0_13 = arith.constant 0 : index
    %16 = vector.load %arg2[%c32, %c0_13] : memref<160x16xf32, #tpu.memory_space<vmem>>, vector<16x16xf32>
    %cst_14 = arith.constant dense<0.000000e+00> : vector<16x16xf32>
    %17 = tpu.matmul %15, %16, %cst_14 {dimension_numbers = #tpu.dot_dimension_numbers<[1], [0], [0], [1], [0, 0, 1, 1], [], []>} : vector<16x16xf32>, vector<16x16xf32>, vector<16x16xf32> -> vector<16x16xf32>
    %18 = arith.addf %13, %17 : vector<16x16xf32>
    %c0_15 = arith.constant 0 : index
    %c6 = arith.constant 6 : index
    %c0_16 = arith.constant 0 : index
    %19 = vector.load %arg1[%c0_15, %c6, %c0_16] : memref<1x34x16xf32, #tpu.memory_space<vmem>>, vector<1x16x16xf32>
    %20 = vector.shape_cast %19 : vector<1x16x16xf32> to vector<16x16xf32>
    %c48 = arith.constant 48 : index
    %c0_17 = arith.constant 0 : index
    %21 = vector.load %arg2[%c48, %c0_17] : memref<160x16xf32, #tpu.memory_space<vmem>>, vector<16x16xf32>
    %cst_18 = arith.constant dense<0.000000e+00> : vector<16x16xf32>
    %22 = tpu.matmul %20, %21, %cst_18 {dimension_numbers = #tpu.dot_dimension_numbers<[1], [0], [0], [1], [0, 0, 1, 1], [], []>} : vector<16x16xf32>, vector<16x16xf32>, vector<16x16xf32> -> vector<16x16xf32>
    %23 = arith.addf %18, %22 : vector<16x16xf32>
    %c0_19 = arith.constant 0 : index
    %c8 = arith.constant 8 : index
    %c0_20 = arith.constant 0 : index
    %24 = vector.load %arg1[%c0_19, %c8, %c0_20] : memref<1x34x16xf32, #tpu.memory_space<vmem>>, vector<1x16x16xf32>
    %25 = vector.shape_cast %24 : vector<1x16x16xf32> to vector<16x16xf32>
    %c64 = arith.constant 64 : index
    %c0_21 = arith.constant 0 : index
    %26 = vector.load %arg2[%c64, %c0_21] : memref<160x16xf32, #tpu.memory_space<vmem>>, vector<16x16xf32>
    %cst_22 = arith.constant dense<0.000000e+00> : vector<16x16xf32>
    %27 = tpu.matmul %25, %26, %cst_22 {dimension_numbers = #tpu.dot_dimension_numbers<[1], [0], [0], [1], [0, 0, 1, 1], [], []>} : vector<16x16xf32>, vector<16x16xf32>, vector<16x16xf32> -> vector<16x16xf32>
    %28 = arith.addf %23, %27 : vector<16x16xf32>
    %c0_23 = arith.constant 0 : index
    %c10 = arith.constant 10 : index
    %c0_24 = arith.constant 0 : index
    %29 = vector.load %arg1[%c0_23, %c10, %c0_24] : memref<1x34x16xf32, #tpu.memory_space<vmem>>, vector<1x16x16xf32>
    %30 = vector.shape_cast %29 : vector<1x16x16xf32> to vector<16x16xf32>
    %c80 = arith.constant 80 : index
    %c0_25 = arith.constant 0 : index
    %31 = vector.load %arg2[%c80, %c0_25] : memref<160x16xf32, #tpu.memory_space<vmem>>, vector<16x16xf32>
    %cst_26 = arith.constant dense<0.000000e+00> : vector<16x16xf32>
    %32 = tpu.matmul %30, %31, %cst_26 {dimension_numbers = #tpu.dot_dimension_numbers<[1], [0], [0], [1], [0, 0, 1, 1], [], []>} : vector<16x16xf32>, vector<16x16xf32>, vector<16x16xf32> -> vector<16x16xf32>
    %33 = arith.addf %28, %32 : vector<16x16xf32>
    %c0_27 = arith.constant 0 : index
    %c12 = arith.constant 12 : index
    %c0_28 = arith.constant 0 : index
    %34 = vector.load %arg1[%c0_27, %c12, %c0_28] : memref<1x34x16xf32, #tpu.memory_space<vmem>>, vector<1x16x16xf32>
    %35 = vector.shape_cast %34 : vector<1x16x16xf32> to vector<16x16xf32>
    %c96 = arith.constant 96 : index
    %c0_29 = arith.constant 0 : index
    %36 = vector.load %arg2[%c96, %c0_29] : memref<160x16xf32, #tpu.memory_space<vmem>>, vector<16x16xf32>
    %cst_30 = arith.constant dense<0.000000e+00> : vector<16x16xf32>
    %37 = tpu.matmul %35, %36, %cst_30 {dimension_numbers = #tpu.dot_dimension_numbers<[1], [0], [0], [1], [0, 0, 1, 1], [], []>} : vector<16x16xf32>, vector<16x16xf32>, vector<16x16xf32> -> vector<16x16xf32>
    %38 = arith.addf %33, %37 : vector<16x16xf32>
    %c0_31 = arith.constant 0 : index
    %c14 = arith.constant 14 : index
    %c0_32 = arith.constant 0 : index
    %39 = vector.load %arg1[%c0_31, %c14, %c0_32] : memref<1x34x16xf32, #tpu.memory_space<vmem>>, vector<1x16x16xf32>
    %40 = vector.shape_cast %39 : vector<1x16x16xf32> to vector<16x16xf32>
    %c112 = arith.constant 112 : index
    %c0_33 = arith.constant 0 : index
    %41 = vector.load %arg2[%c112, %c0_33] : memref<160x16xf32, #tpu.memory_space<vmem>>, vector<16x16xf32>
    %cst_34 = arith.constant dense<0.000000e+00> : vector<16x16xf32>
    %42 = tpu.matmul %40, %41, %cst_34 {dimension_numbers = #tpu.dot_dimension_numbers<[1], [0], [0], [1], [0, 0, 1, 1], [], []>} : vector<16x16xf32>, vector<16x16xf32>, vector<16x16xf32> -> vector<16x16xf32>
    %43 = arith.addf %38, %42 : vector<16x16xf32>
    %c0_35 = arith.constant 0 : index
    %c16_36 = arith.constant 16 : index
    %c0_37 = arith.constant 0 : index
    %44 = vector.load %arg1[%c0_35, %c16_36, %c0_37] : memref<1x34x16xf32, #tpu.memory_space<vmem>>, vector<1x16x16xf32>
    %45 = vector.shape_cast %44 : vector<1x16x16xf32> to vector<16x16xf32>
    %c128 = arith.constant 128 : index
    %c0_38 = arith.constant 0 : index
    %46 = vector.load %arg2[%c128, %c0_38] : memref<160x16xf32, #tpu.memory_space<vmem>>, vector<16x16xf32>
    %cst_39 = arith.constant dense<0.000000e+00> : vector<16x16xf32>
    %47 = tpu.matmul %45, %46, %cst_39 {dimension_numbers = #tpu.dot_dimension_numbers<[1], [0], [0], [1], [0, 0, 1, 1], [], []>} : vector<16x16xf32>, vector<16x16xf32>, vector<16x16xf32> -> vector<16x16xf32>
    %48 = arith.addf %43, %47 : vector<16x16xf32>
    %c0_40 = arith.constant 0 : index
    %c18 = arith.constant 18 : index
    %c0_41 = arith.constant 0 : index
    %49 = vector.load %arg1[%c0_40, %c18, %c0_41] : memref<1x34x16xf32, #tpu.memory_space<vmem>>, vector<1x16x16xf32>
    %50 = vector.shape_cast %49 : vector<1x16x16xf32> to vector<16x16xf32>
    %c144 = arith.constant 144 : index
    %c0_42 = arith.constant 0 : index
    %51 = vector.load %arg2[%c144, %c0_42] : memref<160x16xf32, #tpu.memory_space<vmem>>, vector<16x16xf32>
    %cst_43 = arith.constant dense<0.000000e+00> : vector<16x16xf32>
    %52 = tpu.matmul %50, %51, %cst_43 {dimension_numbers = #tpu.dot_dimension_numbers<[1], [0], [0], [1], [0, 0, 1, 1], [], []>} : vector<16x16xf32>, vector<16x16xf32>, vector<16x16xf32> -> vector<16x16xf32>
    %53 = arith.addf %48, %52 : vector<16x16xf32>
    %cst_44 = arith.constant 0.000000e+00 : f32
    %54 = vector.broadcast %cst_44 : f32 to vector<16x16xf32>
    %55 = arith.cmpf ogt, %53, %54 : vector<16x16xf32>
    %cst_45 = arith.constant 0.00999999977 : f32
    %56 = vector.broadcast %cst_45 : f32 to vector<16x16xf32>
    %57 = arith.mulf %56, %53 : vector<16x16xf32>
    %58 = arith.select %55, %53, %57 : vector<16x16xi1>, vector<16x16xf32>
    %c0_46 = arith.constant 0 : index
    %c0_47 = arith.constant 0 : index
    %c0_48 = arith.constant 0 : index
    %59 = vector.load %arg4[%c0_46, %c0_47, %c0_48] : memref<1x16x16xf32, #tpu.memory_space<vmem>>, vector<1x16x16xf32>
    %60 = vector.shape_cast %59 : vector<1x16x16xf32> to vector<16x16xf32>
    %61 = vector.shape_cast %58 : vector<16x16xf32> to vector<1x16x16xf32>
    tpu.vector_store %arg4[%c0_46, %c0_47, %c0_48], %61 {strides = array<i32>} : memref<1x16x16xf32, #tpu.memory_space<vmem>>, vector<1x16x16xf32>,
    return
  }
  func.func @transform_0(%arg0: i32) -> (i32, i32, i32) {
    %c0_i32 = arith.constant 0 : i32
    %c0_i32_0 = arith.constant 0 : i32
    %c0_i32_1 = arith.constant 0 : i32
    return %arg0, %c0_i32, %c0_i32_0 : i32, i32, i32
  }
  func.func @transform_1(%arg0: i32) -> (i32, i32) {
    %c0_i32 = arith.constant 0 : i32
    %c0_i32_0 = arith.constant 0 : i32
    %c0_i32_1 = arith.constant 0 : i32
    return %c0_i32, %c0_i32_0 : i32, i32
  }
  func.func @transform_2(%arg0: i32) -> (i32, i32) {
    %c0_i32 = arith.constant 0 : i32
    %c0_i32_0 = arith.constant 0 : i32
    %c0_i32_1 = arith.constant 0 : i32
    return %c0_i32, %c0_i32_0 : i32, i32
  }
  func.func @transform_3(%arg0: i32) -> (i32, i32, i32) {
    %c0_i32 = arith.constant 0 : i32
    %c0_i32_0 = arith.constant 0 : i32
    %c0_i32_1 = arith.constant 0 : i32
    return %arg0, %c0_i32, %c0_i32_0 : i32, i32, i32
  }
}

module attributes {stable_mosaic.version = 11 : i64} {
  func.func @_time_fuse_kernel(%arg0: i32, %arg1: memref<4x2x16xf32, #tpu.memory_space<vmem>>, %arg2: memref<16x256xf32, #tpu.memory_space<vmem>>, %arg3: memref<64x256xf32, #tpu.memory_space<vmem>>, %arg4: memref<1x256xf32, #tpu.memory_space<vmem>>, %arg5: memref<64x256xf32, #tpu.memory_space<vmem>>, %arg6: memref<64x256xf32, #tpu.memory_space<vmem>>, %arg7: memref<1x256xf32, #tpu.memory_space<vmem>>, %arg8: memref<64x32xf32, #tpu.memory_space<vmem>>, %arg9: memref<1x32xf32, #tpu.memory_space<vmem>>, %arg10: memref<2x2x16xf32, #tpu.memory_space<vmem>>, %arg11: memref<32x16xf32, #tpu.memory_space<vmem>>, %arg12: memref<1x16xf32, #tpu.memory_space<vmem>>, %arg13: memref<32x16xf32, #tpu.memory_space<vmem>>, %arg14: memref<1x16xf32, #tpu.memory_space<vmem>>, %arg15: memref<2x2x16xf32, #tpu.memory_space<vmem>>) attributes {dimension_semantics = [#tpu.dimension_semantics<arbitrary>], iteration_bounds = array<i64: 1>, scalar_prefetch = 0 : i64, scratch_operands = 0 : i64, tpu.core_type = #tpu.core_type<tc>, window_params = [{pipeline_mode = #tpu.pipeline_mode<synchronous>, transform_indices = @transform_0, window_bounds = array<i64: 4, 2, 16>}, {pipeline_mode = #tpu.pipeline_mode<synchronous>, transform_indices = @transform_1, window_bounds = array<i64: 16, 256>}, {pipeline_mode = #tpu.pipeline_mode<synchronous>, transform_indices = @transform_2, window_bounds = array<i64: 64, 256>}, {pipeline_mode = #tpu.pipeline_mode<synchronous>, transform_indices = @transform_3, window_bounds = array<i64: 1, 256>}, {pipeline_mode = #tpu.pipeline_mode<synchronous>, transform_indices = @transform_4, window_bounds = array<i64: 64, 256>}, {pipeline_mode = #tpu.pipeline_mode<synchronous>, transform_indices = @transform_5, window_bounds = array<i64: 64, 256>}, {pipeline_mode = #tpu.pipeline_mode<synchronous>, transform_indices = @transform_6, window_bounds = array<i64: 1, 256>}, {pipeline_mode = #tpu.pipeline_mode<synchronous>, transform_indices = @transform_7, window_bounds = array<i64: 64, 32>}, {pipeline_mode = #tpu.pipeline_mode<synchronous>, transform_indices = @transform_8, window_bounds = array<i64: 1, 32>}, {pipeline_mode = #tpu.pipeline_mode<synchronous>, transform_indices = @transform_9, window_bounds = array<i64: 2, 2, 16>}, {pipeline_mode = #tpu.pipeline_mode<synchronous>, transform_indices = @transform_10, window_bounds = array<i64: 32, 16>}, {pipeline_mode = #tpu.pipeline_mode<synchronous>, transform_indices = @transform_11, window_bounds = array<i64: 1, 16>}, {pipeline_mode = #tpu.pipeline_mode<synchronous>, transform_indices = @transform_12, window_bounds = array<i64: 32, 16>}, {pipeline_mode = #tpu.pipeline_mode<synchronous>, transform_indices = @transform_13, window_bounds = array<i64: 1, 16>}, {pipeline_mode = #tpu.pipeline_mode<synchronous>, transform_indices = @transform_14, window_bounds = array<i64: 2, 2, 16>}]} {
    %c0 = arith.constant 0 : index
    %c0_0 = arith.constant 0 : index
    %0 = vector.load %arg2[%c0, %c0_0] : memref<16x256xf32, #tpu.memory_space<vmem>>, vector<16x256xf32>
    %c0_1 = arith.constant 0 : index
    %c0_2 = arith.constant 0 : index
    %1 = vector.load %arg3[%c0_1, %c0_2] : memref<64x256xf32, #tpu.memory_space<vmem>>, vector<64x256xf32>
    %c0_3 = arith.constant 0 : index
    %c0_4 = arith.constant 0 : index
    %2 = vector.load %arg4[%c0_3, %c0_4] : memref<1x256xf32, #tpu.memory_space<vmem>>, vector<1x256xf32>
    %c0_5 = arith.constant 0 : index
    %c0_6 = arith.constant 0 : index
    %3 = vector.load %arg5[%c0_5, %c0_6] : memref<64x256xf32, #tpu.memory_space<vmem>>, vector<64x256xf32>
    %c0_7 = arith.constant 0 : index
    %c0_8 = arith.constant 0 : index
    %4 = vector.load %arg6[%c0_7, %c0_8] : memref<64x256xf32, #tpu.memory_space<vmem>>, vector<64x256xf32>
    %c0_9 = arith.constant 0 : index
    %c0_10 = arith.constant 0 : index
    %5 = vector.load %arg7[%c0_9, %c0_10] : memref<1x256xf32, #tpu.memory_space<vmem>>, vector<1x256xf32>
    %cst = arith.constant 0.000000e+00 : f32
    %6 = vector.broadcast %cst : f32 to vector<2x64xf32>
    %cst_11 = arith.constant 0.000000e+00 : f32
    %7 = vector.broadcast %cst_11 : f32 to vector<2x64xf32>
    %cst_12 = arith.constant 0.000000e+00 : f32
    %8 = vector.broadcast %cst_12 : f32 to vector<2x64xf32>
    %cst_13 = arith.constant 0.000000e+00 : f32
    %9 = vector.broadcast %cst_13 : f32 to vector<2x64xf32>
    %c0_14 = arith.constant 0 : index
    %c0_15 = arith.constant 0 : index
    %c0_16 = arith.constant 0 : index
    %10 = vector.load %arg1[%c0_14, %c0_15, %c0_16] : memref<4x2x16xf32, #tpu.memory_space<vmem>>, vector<1x2x16xf32>
    %11 = vector.shape_cast %10 : vector<1x2x16xf32> to vector<2x16xf32>
    %cst_17 = arith.constant dense<0.000000e+00> : vector<2x256xf32>
    %12 = tpu.matmul %11, %0, %cst_17 {dimension_numbers = #tpu.dot_dimension_numbers<[1], [0], [0], [1], [0, 0, 1, 1], [], []>} : vector<2x16xf32>, vector<16x256xf32>, vector<2x256xf32> -> vector<2x256xf32>
    %cst_18 = arith.constant dense<0.000000e+00> : vector<2x256xf32>
    %13 = tpu.matmul %6, %1, %cst_18 {dimension_numbers = #tpu.dot_dimension_numbers<[1], [0], [0], [1], [0, 0, 1, 1], [], []>} : vector<2x64xf32>, vector<64x256xf32>, vector<2x256xf32> -> vector<2x256xf32>
    %14 = arith.addf %12, %13 : vector<2x256xf32>
    %15 = vector.broadcast %2 : vector<1x256xf32> to vector<2x256xf32>
    %16 = arith.addf %14, %15 : vector<2x256xf32>
    %17 = vector.extract_strided_slice %16 {offsets = [0, 0], sizes = [2, 64], strides = [1, 1]} : vector<2x256xf32> to vector<2x64xf32>
    %cst_19 = arith.constant 5.000000e-01 : f32
    %18 = vector.broadcast %cst_19 : f32 to vector<2x64xf32>
    %19 = arith.mulf %18, %17 : vector<2x64xf32>
    %20 = math.tanh %19 : vector<2x64xf32>
    %cst_20 = arith.constant 1.000000e+00 : f32
    %21 = vector.broadcast %cst_20 : f32 to vector<2x64xf32>
    %22 = arith.addf %20, %21 : vector<2x64xf32>
    %cst_21 = arith.constant 5.000000e-01 : f32
    %23 = vector.broadcast %cst_21 : f32 to vector<2x64xf32>
    %24 = arith.mulf %23, %22 : vector<2x64xf32>
    %25 = vector.extract_strided_slice %16 {offsets = [0, 64], sizes = [2, 64], strides = [1, 1]} : vector<2x256xf32> to vector<2x64xf32>
    %cst_22 = arith.constant 5.000000e-01 : f32
    %26 = vector.broadcast %cst_22 : f32 to vector<2x64xf32>
    %27 = arith.mulf %26, %25 : vector<2x64xf32>
    %28 = math.tanh %27 : vector<2x64xf32>
    %cst_23 = arith.constant 1.000000e+00 : f32
    %29 = vector.broadcast %cst_23 : f32 to vector<2x64xf32>
    %30 = arith.addf %28, %29 : vector<2x64xf32>
    %cst_24 = arith.constant 5.000000e-01 : f32
    %31 = vector.broadcast %cst_24 : f32 to vector<2x64xf32>
    %32 = arith.mulf %31, %30 : vector<2x64xf32>
    %33 = vector.extract_strided_slice %16 {offsets = [0, 128], sizes = [2, 64], strides = [1, 1]} : vector<2x256xf32> to vector<2x64xf32>
    %34 = math.tanh %33 : vector<2x64xf32>
    %35 = vector.extract_strided_slice %16 {offsets = [0, 192], sizes = [2, 64], strides = [1, 1]} : vector<2x256xf32> to vector<2x64xf32>
    %cst_25 = arith.constant 5.000000e-01 : f32
    %36 = vector.broadcast %cst_25 : f32 to vector<2x64xf32>
    %37 = arith.mulf %36, %35 : vector<2x64xf32>
    %38 = math.tanh %37 : vector<2x64xf32>
    %cst_26 = arith.constant 1.000000e+00 : f32
    %39 = vector.broadcast %cst_26 : f32 to vector<2x64xf32>
    %40 = arith.addf %38, %39 : vector<2x64xf32>
    %cst_27 = arith.constant 5.000000e-01 : f32
    %41 = vector.broadcast %cst_27 : f32 to vector<2x64xf32>
    %42 = arith.mulf %41, %40 : vector<2x64xf32>
    %43 = arith.mulf %32, %7 : vector<2x64xf32>
    %44 = arith.mulf %24, %34 : vector<2x64xf32>
    %45 = arith.addf %43, %44 : vector<2x64xf32>
    %46 = math.tanh %45 : vector<2x64xf32>
    %47 = arith.mulf %42, %46 : vector<2x64xf32>
    %cst_28 = arith.constant dense<0.000000e+00> : vector<2x256xf32>
    %48 = tpu.matmul %47, %3, %cst_28 {dimension_numbers = #tpu.dot_dimension_numbers<[1], [0], [0], [1], [0, 0, 1, 1], [], []>} : vector<2x64xf32>, vector<64x256xf32>, vector<2x256xf32> -> vector<2x256xf32>
    %cst_29 = arith.constant dense<0.000000e+00> : vector<2x256xf32>
    %49 = tpu.matmul %8, %4, %cst_29 {dimension_numbers = #tpu.dot_dimension_numbers<[1], [0], [0], [1], [0, 0, 1, 1], [], []>} : vector<2x64xf32>, vector<64x256xf32>, vector<2x256xf32> -> vector<2x256xf32>
    %50 = arith.addf %48, %49 : vector<2x256xf32>
    %51 = vector.broadcast %5 : vector<1x256xf32> to vector<2x256xf32>
    %52 = arith.addf %50, %51 : vector<2x256xf32>
    %53 = vector.extract_strided_slice %52 {offsets = [0, 0], sizes = [2, 64], strides = [1, 1]} : vector<2x256xf32> to vector<2x64xf32>
    %cst_30 = arith.constant 5.000000e-01 : f32
    %54 = vector.broadcast %cst_30 : f32 to vector<2x64xf32>
    %55 = arith.mulf %54, %53 : vector<2x64xf32>
    %56 = math.tanh %55 : vector<2x64xf32>
    %cst_31 = arith.constant 1.000000e+00 : f32
    %57 = vector.broadcast %cst_31 : f32 to vector<2x64xf32>
    %58 = arith.addf %56, %57 : vector<2x64xf32>
    %cst_32 = arith.constant 5.000000e-01 : f32
    %59 = vector.broadcast %cst_32 : f32 to vector<2x64xf32>
    %60 = arith.mulf %59, %58 : vector<2x64xf32>
    %61 = vector.extract_strided_slice %52 {offsets = [0, 64], sizes = [2, 64], strides = [1, 1]} : vector<2x256xf32> to vector<2x64xf32>
    %cst_33 = arith.constant 5.000000e-01 : f32
    %62 = vector.broadcast %cst_33 : f32 to vector<2x64xf32>
    %63 = arith.mulf %62, %61 : vector<2x64xf32>
    %64 = math.tanh %63 : vector<2x64xf32>
    %cst_34 = arith.constant 1.000000e+00 : f32
    %65 = vector.broadcast %cst_34 : f32 to vector<2x64xf32>
    %66 = arith.addf %64, %65 : vector<2x64xf32>
    %cst_35 = arith.constant 5.000000e-01 : f32
    %67 = vector.broadcast %cst_35 : f32 to vector<2x64xf32>
    %68 = arith.mulf %67, %66 : vector<2x64xf32>
    %69 = vector.extract_strided_slice %52 {offsets = [0, 128], sizes = [2, 64], strides = [1, 1]} : vector<2x256xf32> to vector<2x64xf32>
    %70 = math.tanh %69 : vector<2x64xf32>
    %71 = vector.extract_strided_slice %52 {offsets = [0, 192], sizes = [2, 64], strides = [1, 1]} : vector<2x256xf32> to vector<2x64xf32>
    %cst_36 = arith.constant 5.000000e-01 : f32
    %72 = vector.broadcast %cst_36 : f32 to vector<2x64xf32>
    %73 = arith.mulf %72, %71 : vector<2x64xf32>
    %74 = math.tanh %73 : vector<2x64xf32>
    %cst_37 = arith.constant 1.000000e+00 : f32
    %75 = vector.broadcast %cst_37 : f32 to vector<2x64xf32>
    %76 = arith.addf %74, %75 : vector<2x64xf32>
    %cst_38 = arith.constant 5.000000e-01 : f32
    %77 = vector.broadcast %cst_38 : f32 to vector<2x64xf32>
    %78 = arith.mulf %77, %76 : vector<2x64xf32>
    %79 = arith.mulf %68, %9 : vector<2x64xf32>
    %80 = arith.mulf %60, %70 : vector<2x64xf32>
    %81 = arith.addf %79, %80 : vector<2x64xf32>
    %82 = math.tanh %81 : vector<2x64xf32>
    %83 = arith.mulf %78, %82 : vector<2x64xf32>
    %c1 = arith.constant 1 : index
    %c0_39 = arith.constant 0 : index
    %c0_40 = arith.constant 0 : index
    %84 = vector.load %arg1[%c1, %c0_39, %c0_40] : memref<4x2x16xf32, #tpu.memory_space<vmem>>, vector<1x2x16xf32>
    %85 = vector.shape_cast %84 : vector<1x2x16xf32> to vector<2x16xf32>
    %cst_41 = arith.constant dense<0.000000e+00> : vector<2x256xf32>
    %86 = tpu.matmul %85, %0, %cst_41 {dimension_numbers = #tpu.dot_dimension_numbers<[1], [0], [0], [1], [0, 0, 1, 1], [], []>} : vector<2x16xf32>, vector<16x256xf32>, vector<2x256xf32> -> vector<2x256xf32>
    %cst_42 = arith.constant dense<0.000000e+00> : vector<2x256xf32>
    %87 = tpu.matmul %47, %1, %cst_42 {dimension_numbers = #tpu.dot_dimension_numbers<[1], [0], [0], [1], [0, 0, 1, 1], [], []>} : vector<2x64xf32>, vector<64x256xf32>, vector<2x256xf32> -> vector<2x256xf32>
    %88 = arith.addf %86, %87 : vector<2x256xf32>
    %89 = vector.broadcast %2 : vector<1x256xf32> to vector<2x256xf32>
    %90 = arith.addf %88, %89 : vector<2x256xf32>
    %91 = vector.extract_strided_slice %90 {offsets = [0, 0], sizes = [2, 64], strides = [1, 1]} : vector<2x256xf32> to vector<2x64xf32>
    %cst_43 = arith.constant 5.000000e-01 : f32
    %92 = vector.broadcast %cst_43 : f32 to vector<2x64xf32>
    %93 = arith.mulf %92, %91 : vector<2x64xf32>
    %94 = math.tanh %93 : vector<2x64xf32>
    %cst_44 = arith.constant 1.000000e+00 : f32
    %95 = vector.broadcast %cst_44 : f32 to vector<2x64xf32>
    %96 = arith.addf %94, %95 : vector<2x64xf32>
    %cst_45 = arith.constant 5.000000e-01 : f32
    %97 = vector.broadcast %cst_45 : f32 to vector<2x64xf32>
    %98 = arith.mulf %97, %96 : vector<2x64xf32>
    %99 = vector.extract_strided_slice %90 {offsets = [0, 64], sizes = [2, 64], strides = [1, 1]} : vector<2x256xf32> to vector<2x64xf32>
    %cst_46 = arith.constant 5.000000e-01 : f32
    %100 = vector.broadcast %cst_46 : f32 to vector<2x64xf32>
    %101 = arith.mulf %100, %99 : vector<2x64xf32>
    %102 = math.tanh %101 : vector<2x64xf32>
    %cst_47 = arith.constant 1.000000e+00 : f32
    %103 = vector.broadcast %cst_47 : f32 to vector<2x64xf32>
    %104 = arith.addf %102, %103 : vector<2x64xf32>
    %cst_48 = arith.constant 5.000000e-01 : f32
    %105 = vector.broadcast %cst_48 : f32 to vector<2x64xf32>
    %106 = arith.mulf %105, %104 : vector<2x64xf32>
    %107 = vector.extract_strided_slice %90 {offsets = [0, 128], sizes = [2, 64], strides = [1, 1]} : vector<2x256xf32> to vector<2x64xf32>
    %108 = math.tanh %107 : vector<2x64xf32>
    %109 = vector.extract_strided_slice %90 {offsets = [0, 192], sizes = [2, 64], strides = [1, 1]} : vector<2x256xf32> to vector<2x64xf32>
    %cst_49 = arith.constant 5.000000e-01 : f32
    %110 = vector.broadcast %cst_49 : f32 to vector<2x64xf32>
    %111 = arith.mulf %110, %109 : vector<2x64xf32>
    %112 = math.tanh %111 : vector<2x64xf32>
    %cst_50 = arith.constant 1.000000e+00 : f32
    %113 = vector.broadcast %cst_50 : f32 to vector<2x64xf32>
    %114 = arith.addf %112, %113 : vector<2x64xf32>
    %cst_51 = arith.constant 5.000000e-01 : f32
    %115 = vector.broadcast %cst_51 : f32 to vector<2x64xf32>
    %116 = arith.mulf %115, %114 : vector<2x64xf32>
    %117 = arith.mulf %106, %45 : vector<2x64xf32>
    %118 = arith.mulf %98, %108 : vector<2x64xf32>
    %119 = arith.addf %117, %118 : vector<2x64xf32>
    %120 = math.tanh %119 : vector<2x64xf32>
    %121 = arith.mulf %116, %120 : vector<2x64xf32>
    %cst_52 = arith.constant dense<0.000000e+00> : vector<2x256xf32>
    %122 = tpu.matmul %121, %3, %cst_52 {dimension_numbers = #tpu.dot_dimension_numbers<[1], [0], [0], [1], [0, 0, 1, 1], [], []>} : vector<2x64xf32>, vector<64x256xf32>, vector<2x256xf32> -> vector<2x256xf32>
    %cst_53 = arith.constant dense<0.000000e+00> : vector<2x256xf32>
    %123 = tpu.matmul %83, %4, %cst_53 {dimension_numbers = #tpu.dot_dimension_numbers<[1], [0], [0], [1], [0, 0, 1, 1], [], []>} : vector<2x64xf32>, vector<64x256xf32>, vector<2x256xf32> -> vector<2x256xf32>
    %124 = arith.addf %122, %123 : vector<2x256xf32>
    %125 = vector.broadcast %5 : vector<1x256xf32> to vector<2x256xf32>
    %126 = arith.addf %124, %125 : vector<2x256xf32>
    %127 = vector.extract_strided_slice %126 {offsets = [0, 0], sizes = [2, 64], strides = [1, 1]} : vector<2x256xf32> to vector<2x64xf32>
    %cst_54 = arith.constant 5.000000e-01 : f32
    %128 = vector.broadcast %cst_54 : f32 to vector<2x64xf32>
    %129 = arith.mulf %128, %127 : vector<2x64xf32>
    %130 = math.tanh %129 : vector<2x64xf32>
    %cst_55 = arith.constant 1.000000e+00 : f32
    %131 = vector.broadcast %cst_55 : f32 to vector<2x64xf32>
    %132 = arith.addf %130, %131 : vector<2x64xf32>
    %cst_56 = arith.constant 5.000000e-01 : f32
    %133 = vector.broadcast %cst_56 : f32 to vector<2x64xf32>
    %134 = arith.mulf %133, %132 : vector<2x64xf32>
    %135 = vector.extract_strided_slice %126 {offsets = [0, 64], sizes = [2, 64], strides = [1, 1]} : vector<2x256xf32> to vector<2x64xf32>
    %cst_57 = arith.constant 5.000000e-01 : f32
    %136 = vector.broadcast %cst_57 : f32 to vector<2x64xf32>
    %137 = arith.mulf %136, %135 : vector<2x64xf32>
    %138 = math.tanh %137 : vector<2x64xf32>
    %cst_58 = arith.constant 1.000000e+00 : f32
    %139 = vector.broadcast %cst_58 : f32 to vector<2x64xf32>
    %140 = arith.addf %138, %139 : vector<2x64xf32>
    %cst_59 = arith.constant 5.000000e-01 : f32
    %141 = vector.broadcast %cst_59 : f32 to vector<2x64xf32>
    %142 = arith.mulf %141, %140 : vector<2x64xf32>
    %143 = vector.extract_strided_slice %126 {offsets = [0, 128], sizes = [2, 64], strides = [1, 1]} : vector<2x256xf32> to vector<2x64xf32>
    %144 = math.tanh %143 : vector<2x64xf32>
    %145 = vector.extract_strided_slice %126 {offsets = [0, 192], sizes = [2, 64], strides = [1, 1]} : vector<2x256xf32> to vector<2x64xf32>
    %cst_60 = arith.constant 5.000000e-01 : f32
    %146 = vector.broadcast %cst_60 : f32 to vector<2x64xf32>
    %147 = arith.mulf %146, %145 : vector<2x64xf32>
    %148 = math.tanh %147 : vector<2x64xf32>
    %cst_61 = arith.constant 1.000000e+00 : f32
    %149 = vector.broadcast %cst_61 : f32 to vector<2x64xf32>
    %150 = arith.addf %148, %149 : vector<2x64xf32>
    %cst_62 = arith.constant 5.000000e-01 : f32
    %151 = vector.broadcast %cst_62 : f32 to vector<2x64xf32>
    %152 = arith.mulf %151, %150 : vector<2x64xf32>
    %153 = arith.mulf %142, %81 : vector<2x64xf32>
    %154 = arith.mulf %134, %144 : vector<2x64xf32>
    %155 = arith.addf %153, %154 : vector<2x64xf32>
    %156 = math.tanh %155 : vector<2x64xf32>
    %157 = arith.mulf %152, %156 : vector<2x64xf32>
    %c2 = arith.constant 2 : index
    %c0_63 = arith.constant 0 : index
    %c0_64 = arith.constant 0 : index
    %158 = vector.load %arg1[%c2, %c0_63, %c0_64] : memref<4x2x16xf32, #tpu.memory_space<vmem>>, vector<1x2x16xf32>
    %159 = vector.shape_cast %158 : vector<1x2x16xf32> to vector<2x16xf32>
    %cst_65 = arith.constant dense<0.000000e+00> : vector<2x256xf32>
    %160 = tpu.matmul %159, %0, %cst_65 {dimension_numbers = #tpu.dot_dimension_numbers<[1], [0], [0], [1], [0, 0, 1, 1], [], []>} : vector<2x16xf32>, vector<16x256xf32>, vector<2x256xf32> -> vector<2x256xf32>
    %cst_66 = arith.constant dense<0.000000e+00> : vector<2x256xf32>
    %161 = tpu.matmul %121, %1, %cst_66 {dimension_numbers = #tpu.dot_dimension_numbers<[1], [0], [0], [1], [0, 0, 1, 1], [], []>} : vector<2x64xf32>, vector<64x256xf32>, vector<2x256xf32> -> vector<2x256xf32>
    %162 = arith.addf %160, %161 : vector<2x256xf32>
    %163 = vector.broadcast %2 : vector<1x256xf32> to vector<2x256xf32>
    %164 = arith.addf %162, %163 : vector<2x256xf32>
    %165 = vector.extract_strided_slice %164 {offsets = [0, 0], sizes = [2, 64], strides = [1, 1]} : vector<2x256xf32> to vector<2x64xf32>
    %cst_67 = arith.constant 5.000000e-01 : f32
    %166 = vector.broadcast %cst_67 : f32 to vector<2x64xf32>
    %167 = arith.mulf %166, %165 : vector<2x64xf32>
    %168 = math.tanh %167 : vector<2x64xf32>
    %cst_68 = arith.constant 1.000000e+00 : f32
    %169 = vector.broadcast %cst_68 : f32 to vector<2x64xf32>
    %170 = arith.addf %168, %169 : vector<2x64xf32>
    %cst_69 = arith.constant 5.000000e-01 : f32
    %171 = vector.broadcast %cst_69 : f32 to vector<2x64xf32>
    %172 = arith.mulf %171, %170 : vector<2x64xf32>
    %173 = vector.extract_strided_slice %164 {offsets = [0, 64], sizes = [2, 64], strides = [1, 1]} : vector<2x256xf32> to vector<2x64xf32>
    %cst_70 = arith.constant 5.000000e-01 : f32
    %174 = vector.broadcast %cst_70 : f32 to vector<2x64xf32>
    %175 = arith.mulf %174, %173 : vector<2x64xf32>
    %176 = math.tanh %175 : vector<2x64xf32>
    %cst_71 = arith.constant 1.000000e+00 : f32
    %177 = vector.broadcast %cst_71 : f32 to vector<2x64xf32>
    %178 = arith.addf %176, %177 : vector<2x64xf32>
    %cst_72 = arith.constant 5.000000e-01 : f32
    %179 = vector.broadcast %cst_72 : f32 to vector<2x64xf32>
    %180 = arith.mulf %179, %178 : vector<2x64xf32>
    %181 = vector.extract_strided_slice %164 {offsets = [0, 128], sizes = [2, 64], strides = [1, 1]} : vector<2x256xf32> to vector<2x64xf32>
    %182 = math.tanh %181 : vector<2x64xf32>
    %183 = vector.extract_strided_slice %164 {offsets = [0, 192], sizes = [2, 64], strides = [1, 1]} : vector<2x256xf32> to vector<2x64xf32>
    %cst_73 = arith.constant 5.000000e-01 : f32
    %184 = vector.broadcast %cst_73 : f32 to vector<2x64xf32>
    %185 = arith.mulf %184, %183 : vector<2x64xf32>
    %186 = math.tanh %185 : vector<2x64xf32>
    %cst_74 = arith.constant 1.000000e+00 : f32
    %187 = vector.broadcast %cst_74 : f32 to vector<2x64xf32>
    %188 = arith.addf %186, %187 : vector<2x64xf32>
    %cst_75 = arith.constant 5.000000e-01 : f32
    %189 = vector.broadcast %cst_75 : f32 to vector<2x64xf32>
    %190 = arith.mulf %189, %188 : vector<2x64xf32>
    %191 = arith.mulf %180, %119 : vector<2x64xf32>
    %192 = arith.mulf %172, %182 : vector<2x64xf32>
    %193 = arith.addf %191, %192 : vector<2x64xf32>
    %194 = math.tanh %193 : vector<2x64xf32>
    %195 = arith.mulf %190, %194 : vector<2x64xf32>
    %cst_76 = arith.constant dense<0.000000e+00> : vector<2x256xf32>
    %196 = tpu.matmul %195, %3, %cst_76 {dimension_numbers = #tpu.dot_dimension_numbers<[1], [0], [0], [1], [0, 0, 1, 1], [], []>} : vector<2x64xf32>, vector<64x256xf32>, vector<2x256xf32> -> vector<2x256xf32>
    %cst_77 = arith.constant dense<0.000000e+00> : vector<2x256xf32>
    %197 = tpu.matmul %157, %4, %cst_77 {dimension_numbers = #tpu.dot_dimension_numbers<[1], [0], [0], [1], [0, 0, 1, 1], [], []>} : vector<2x64xf32>, vector<64x256xf32>, vector<2x256xf32> -> vector<2x256xf32>
    %198 = arith.addf %196, %197 : vector<2x256xf32>
    %199 = vector.broadcast %5 : vector<1x256xf32> to vector<2x256xf32>
    %200 = arith.addf %198, %199 : vector<2x256xf32>
    %201 = vector.extract_strided_slice %200 {offsets = [0, 0], sizes = [2, 64], strides = [1, 1]} : vector<2x256xf32> to vector<2x64xf32>
    %cst_78 = arith.constant 5.000000e-01 : f32
    %202 = vector.broadcast %cst_78 : f32 to vector<2x64xf32>
    %203 = arith.mulf %202, %201 : vector<2x64xf32>
    %204 = math.tanh %203 : vector<2x64xf32>
    %cst_79 = arith.constant 1.000000e+00 : f32
    %205 = vector.broadcast %cst_79 : f32 to vector<2x64xf32>
    %206 = arith.addf %204, %205 : vector<2x64xf32>
    %cst_80 = arith.constant 5.000000e-01 : f32
    %207 = vector.broadcast %cst_80 : f32 to vector<2x64xf32>
    %208 = arith.mulf %207, %206 : vector<2x64xf32>
    %209 = vector.extract_strided_slice %200 {offsets = [0, 64], sizes = [2, 64], strides = [1, 1]} : vector<2x256xf32> to vector<2x64xf32>
    %cst_81 = arith.constant 5.000000e-01 : f32
    %210 = vector.broadcast %cst_81 : f32 to vector<2x64xf32>
    %211 = arith.mulf %210, %209 : vector<2x64xf32>
    %212 = math.tanh %211 : vector<2x64xf32>
    %cst_82 = arith.constant 1.000000e+00 : f32
    %213 = vector.broadcast %cst_82 : f32 to vector<2x64xf32>
    %214 = arith.addf %212, %213 : vector<2x64xf32>
    %cst_83 = arith.constant 5.000000e-01 : f32
    %215 = vector.broadcast %cst_83 : f32 to vector<2x64xf32>
    %216 = arith.mulf %215, %214 : vector<2x64xf32>
    %217 = vector.extract_strided_slice %200 {offsets = [0, 128], sizes = [2, 64], strides = [1, 1]} : vector<2x256xf32> to vector<2x64xf32>
    %218 = math.tanh %217 : vector<2x64xf32>
    %219 = vector.extract_strided_slice %200 {offsets = [0, 192], sizes = [2, 64], strides = [1, 1]} : vector<2x256xf32> to vector<2x64xf32>
    %cst_84 = arith.constant 5.000000e-01 : f32
    %220 = vector.broadcast %cst_84 : f32 to vector<2x64xf32>
    %221 = arith.mulf %220, %219 : vector<2x64xf32>
    %222 = math.tanh %221 : vector<2x64xf32>
    %cst_85 = arith.constant 1.000000e+00 : f32
    %223 = vector.broadcast %cst_85 : f32 to vector<2x64xf32>
    %224 = arith.addf %222, %223 : vector<2x64xf32>
    %cst_86 = arith.constant 5.000000e-01 : f32
    %225 = vector.broadcast %cst_86 : f32 to vector<2x64xf32>
    %226 = arith.mulf %225, %224 : vector<2x64xf32>
    %227 = arith.mulf %216, %155 : vector<2x64xf32>
    %228 = arith.mulf %208, %218 : vector<2x64xf32>
    %229 = arith.addf %227, %228 : vector<2x64xf32>
    %230 = math.tanh %229 : vector<2x64xf32>
    %231 = arith.mulf %226, %230 : vector<2x64xf32>
    %c3 = arith.constant 3 : index
    %c0_87 = arith.constant 0 : index
    %c0_88 = arith.constant 0 : index
    %232 = vector.load %arg1[%c3, %c0_87, %c0_88] : memref<4x2x16xf32, #tpu.memory_space<vmem>>, vector<1x2x16xf32>
    %233 = vector.shape_cast %232 : vector<1x2x16xf32> to vector<2x16xf32>
    %cst_89 = arith.constant dense<0.000000e+00> : vector<2x256xf32>
    %234 = tpu.matmul %233, %0, %cst_89 {dimension_numbers = #tpu.dot_dimension_numbers<[1], [0], [0], [1], [0, 0, 1, 1], [], []>} : vector<2x16xf32>, vector<16x256xf32>, vector<2x256xf32> -> vector<2x256xf32>
    %cst_90 = arith.constant dense<0.000000e+00> : vector<2x256xf32>
    %235 = tpu.matmul %195, %1, %cst_90 {dimension_numbers = #tpu.dot_dimension_numbers<[1], [0], [0], [1], [0, 0, 1, 1], [], []>} : vector<2x64xf32>, vector<64x256xf32>, vector<2x256xf32> -> vector<2x256xf32>
    %236 = arith.addf %234, %235 : vector<2x256xf32>
    %237 = vector.broadcast %2 : vector<1x256xf32> to vector<2x256xf32>
    %238 = arith.addf %236, %237 : vector<2x256xf32>
    %239 = vector.extract_strided_slice %238 {offsets = [0, 0], sizes = [2, 64], strides = [1, 1]} : vector<2x256xf32> to vector<2x64xf32>
    %cst_91 = arith.constant 5.000000e-01 : f32
    %240 = vector.broadcast %cst_91 : f32 to vector<2x64xf32>
    %241 = arith.mulf %240, %239 : vector<2x64xf32>
    %242 = math.tanh %241 : vector<2x64xf32>
    %cst_92 = arith.constant 1.000000e+00 : f32
    %243 = vector.broadcast %cst_92 : f32 to vector<2x64xf32>
    %244 = arith.addf %242, %243 : vector<2x64xf32>
    %cst_93 = arith.constant 5.000000e-01 : f32
    %245 = vector.broadcast %cst_93 : f32 to vector<2x64xf32>
    %246 = arith.mulf %245, %244 : vector<2x64xf32>
    %247 = vector.extract_strided_slice %238 {offsets = [0, 64], sizes = [2, 64], strides = [1, 1]} : vector<2x256xf32> to vector<2x64xf32>
    %cst_94 = arith.constant 5.000000e-01 : f32
    %248 = vector.broadcast %cst_94 : f32 to vector<2x64xf32>
    %249 = arith.mulf %248, %247 : vector<2x64xf32>
    %250 = math.tanh %249 : vector<2x64xf32>
    %cst_95 = arith.constant 1.000000e+00 : f32
    %251 = vector.broadcast %cst_95 : f32 to vector<2x64xf32>
    %252 = arith.addf %250, %251 : vector<2x64xf32>
    %cst_96 = arith.constant 5.000000e-01 : f32
    %253 = vector.broadcast %cst_96 : f32 to vector<2x64xf32>
    %254 = arith.mulf %253, %252 : vector<2x64xf32>
    %255 = vector.extract_strided_slice %238 {offsets = [0, 128], sizes = [2, 64], strides = [1, 1]} : vector<2x256xf32> to vector<2x64xf32>
    %256 = math.tanh %255 : vector<2x64xf32>
    %257 = vector.extract_strided_slice %238 {offsets = [0, 192], sizes = [2, 64], strides = [1, 1]} : vector<2x256xf32> to vector<2x64xf32>
    %cst_97 = arith.constant 5.000000e-01 : f32
    %258 = vector.broadcast %cst_97 : f32 to vector<2x64xf32>
    %259 = arith.mulf %258, %257 : vector<2x64xf32>
    %260 = math.tanh %259 : vector<2x64xf32>
    %cst_98 = arith.constant 1.000000e+00 : f32
    %261 = vector.broadcast %cst_98 : f32 to vector<2x64xf32>
    %262 = arith.addf %260, %261 : vector<2x64xf32>
    %cst_99 = arith.constant 5.000000e-01 : f32
    %263 = vector.broadcast %cst_99 : f32 to vector<2x64xf32>
    %264 = arith.mulf %263, %262 : vector<2x64xf32>
    %265 = arith.mulf %254, %193 : vector<2x64xf32>
    %266 = arith.mulf %246, %256 : vector<2x64xf32>
    %267 = arith.addf %265, %266 : vector<2x64xf32>
    %268 = math.tanh %267 : vector<2x64xf32>
    %269 = arith.mulf %264, %268 : vector<2x64xf32>
    %cst_100 = arith.constant dense<0.000000e+00> : vector<2x256xf32>
    %270 = tpu.matmul %269, %3, %cst_100 {dimension_numbers = #tpu.dot_dimension_numbers<[1], [0], [0], [1], [0, 0, 1, 1], [], []>} : vector<2x64xf32>, vector<64x256xf32>, vector<2x256xf32> -> vector<2x256xf32>
    %cst_101 = arith.constant dense<0.000000e+00> : vector<2x256xf32>
    %271 = tpu.matmul %231, %4, %cst_101 {dimension_numbers = #tpu.dot_dimension_numbers<[1], [0], [0], [1], [0, 0, 1, 1], [], []>} : vector<2x64xf32>, vector<64x256xf32>, vector<2x256xf32> -> vector<2x256xf32>
    %272 = arith.addf %270, %271 : vector<2x256xf32>
    %273 = vector.broadcast %5 : vector<1x256xf32> to vector<2x256xf32>
    %274 = arith.addf %272, %273 : vector<2x256xf32>
    %275 = vector.extract_strided_slice %274 {offsets = [0, 0], sizes = [2, 64], strides = [1, 1]} : vector<2x256xf32> to vector<2x64xf32>
    %cst_102 = arith.constant 5.000000e-01 : f32
    %276 = vector.broadcast %cst_102 : f32 to vector<2x64xf32>
    %277 = arith.mulf %276, %275 : vector<2x64xf32>
    %278 = math.tanh %277 : vector<2x64xf32>
    %cst_103 = arith.constant 1.000000e+00 : f32
    %279 = vector.broadcast %cst_103 : f32 to vector<2x64xf32>
    %280 = arith.addf %278, %279 : vector<2x64xf32>
    %cst_104 = arith.constant 5.000000e-01 : f32
    %281 = vector.broadcast %cst_104 : f32 to vector<2x64xf32>
    %282 = arith.mulf %281, %280 : vector<2x64xf32>
    %283 = vector.extract_strided_slice %274 {offsets = [0, 64], sizes = [2, 64], strides = [1, 1]} : vector<2x256xf32> to vector<2x64xf32>
    %cst_105 = arith.constant 5.000000e-01 : f32
    %284 = vector.broadcast %cst_105 : f32 to vector<2x64xf32>
    %285 = arith.mulf %284, %283 : vector<2x64xf32>
    %286 = math.tanh %285 : vector<2x64xf32>
    %cst_106 = arith.constant 1.000000e+00 : f32
    %287 = vector.broadcast %cst_106 : f32 to vector<2x64xf32>
    %288 = arith.addf %286, %287 : vector<2x64xf32>
    %cst_107 = arith.constant 5.000000e-01 : f32
    %289 = vector.broadcast %cst_107 : f32 to vector<2x64xf32>
    %290 = arith.mulf %289, %288 : vector<2x64xf32>
    %291 = vector.extract_strided_slice %274 {offsets = [0, 128], sizes = [2, 64], strides = [1, 1]} : vector<2x256xf32> to vector<2x64xf32>
    %292 = math.tanh %291 : vector<2x64xf32>
    %293 = vector.extract_strided_slice %274 {offsets = [0, 192], sizes = [2, 64], strides = [1, 1]} : vector<2x256xf32> to vector<2x64xf32>
    %cst_108 = arith.constant 5.000000e-01 : f32
    %294 = vector.broadcast %cst_108 : f32 to vector<2x64xf32>
    %295 = arith.mulf %294, %293 : vector<2x64xf32>
    %296 = math.tanh %295 : vector<2x64xf32>
    %cst_109 = arith.constant 1.000000e+00 : f32
    %297 = vector.broadcast %cst_109 : f32 to vector<2x64xf32>
    %298 = arith.addf %296, %297 : vector<2x64xf32>
    %cst_110 = arith.constant 5.000000e-01 : f32
    %299 = vector.broadcast %cst_110 : f32 to vector<2x64xf32>
    %300 = arith.mulf %299, %298 : vector<2x64xf32>
    %301 = arith.mulf %290, %229 : vector<2x64xf32>
    %302 = arith.mulf %282, %292 : vector<2x64xf32>
    %303 = arith.addf %301, %302 : vector<2x64xf32>
    %304 = math.tanh %303 : vector<2x64xf32>
    %305 = arith.mulf %300, %304 : vector<2x64xf32>
    %c0_111 = arith.constant 0 : index
    %c0_112 = arith.constant 0 : index
    %306 = vector.load %arg8[%c0_111, %c0_112] : memref<64x32xf32, #tpu.memory_space<vmem>>, vector<64x32xf32>
    %cst_113 = arith.constant dense<0.000000e+00> : vector<2x32xf32>
    %307 = tpu.matmul %305, %306, %cst_113 {dimension_numbers = #tpu.dot_dimension_numbers<[1], [0], [0], [1], [0, 0, 1, 1], [], []>} : vector<2x64xf32>, vector<64x32xf32>, vector<2x32xf32> -> vector<2x32xf32>
    %c0_114 = arith.constant 0 : index
    %c0_115 = arith.constant 0 : index
    %308 = vector.load %arg9[%c0_114, %c0_115] : memref<1x32xf32, #tpu.memory_space<vmem>>, vector<1x32xf32>
    %309 = vector.broadcast %308 : vector<1x32xf32> to vector<2x32xf32>
    %310 = arith.addf %307, %309 : vector<2x32xf32>
    %cst_116 = arith.constant 0.000000e+00 : f32
    %311 = vector.broadcast %cst_116 : f32 to vector<2x32xf32>
    %312 = arith.cmpf ogt, %310, %311 : vector<2x32xf32>
    %cst_117 = arith.constant 0.00999999977 : f32
    %313 = vector.broadcast %cst_117 : f32 to vector<2x32xf32>
    %314 = arith.mulf %313, %310 : vector<2x32xf32>
    %315 = arith.select %312, %310, %314 : vector<2x32xi1>, vector<2x32xf32>
    %c0_118 = arith.constant 0 : index
    %c0_119 = arith.constant 0 : index
    %c0_120 = arith.constant 0 : index
    %316 = vector.load %arg10[%c0_118, %c0_119, %c0_120] : memref<2x2x16xf32, #tpu.memory_space<vmem>>, vector<1x2x16xf32>
    %317 = vector.shape_cast %316 : vector<1x2x16xf32> to vector<2x16xf32>
    %318 = vector.extract_strided_slice %315 {offsets = [0, 0], sizes = [1, 16], strides = [1, 1]} : vector<2x32xf32> to vector<1x16xf32>
    %319 = vector.extract_strided_slice %315 {offsets = [0, 16], sizes = [1, 16], strides = [1, 1]} : vector<2x32xf32> to vector<1x16xf32>
    %320 = vector.extract_strided_slice %317 {offsets = [0, 0], sizes = [1, 16], strides = [1, 1]} : vector<2x16xf32> to vector<1x16xf32>
    %321 = tpu.concatenate %318, %320 in 0 : vector<1x16xf32>, vector<1x16xf32> -> vector<2x16xf32>
    %322 = vector.extract_strided_slice %317 {offsets = [0, 0], sizes = [1, 16], strides = [1, 1]} : vector<2x16xf32> to vector<1x16xf32>
    %323 = tpu.concatenate %319, %322 in 0 : vector<1x16xf32>, vector<1x16xf32> -> vector<2x16xf32>
    %c0_121 = arith.constant 0 : index
    %c0_122 = arith.constant 0 : index
    %324 = vector.load %arg11[%c0_121, %c0_122] : memref<32x16xf32, #tpu.memory_space<vmem>>, vector<16x16xf32>
    %cst_123 = arith.constant dense<0.000000e+00> : vector<2x16xf32>
    %325 = tpu.matmul %321, %324, %cst_123 {dimension_numbers = #tpu.dot_dimension_numbers<[1], [0], [0], [1], [0, 0, 1, 1], [], []>} : vector<2x16xf32>, vector<16x16xf32>, vector<2x16xf32> -> vector<2x16xf32>
    %c16 = arith.constant 16 : index
    %c0_124 = arith.constant 0 : index
    %326 = vector.load %arg11[%c16, %c0_124] : memref<32x16xf32, #tpu.memory_space<vmem>>, vector<16x16xf32>
    %cst_125 = arith.constant dense<0.000000e+00> : vector<2x16xf32>
    %327 = tpu.matmul %317, %326, %cst_125 {dimension_numbers = #tpu.dot_dimension_numbers<[1], [0], [0], [1], [0, 0, 1, 1], [], []>} : vector<2x16xf32>, vector<16x16xf32>, vector<2x16xf32> -> vector<2x16xf32>
    %328 = arith.addf %325, %327 : vector<2x16xf32>
    %c0_126 = arith.constant 0 : index
    %c0_127 = arith.constant 0 : index
    %329 = vector.load %arg12[%c0_126, %c0_127] : memref<1x16xf32, #tpu.memory_space<vmem>>, vector<1x16xf32>
    %330 = vector.broadcast %329 : vector<1x16xf32> to vector<2x16xf32>
    %331 = arith.addf %328, %330 : vector<2x16xf32>
    %332 = math.tanh %331 : vector<2x16xf32>
    %c0_128 = arith.constant 0 : index
    %c0_129 = arith.constant 0 : index
    %333 = vector.load %arg13[%c0_128, %c0_129] : memref<32x16xf32, #tpu.memory_space<vmem>>, vector<16x16xf32>
    %cst_130 = arith.constant dense<0.000000e+00> : vector<2x16xf32>
    %334 = tpu.matmul %323, %333, %cst_130 {dimension_numbers = #tpu.dot_dimension_numbers<[1], [0], [0], [1], [0, 0, 1, 1], [], []>} : vector<2x16xf32>, vector<16x16xf32>, vector<2x16xf32> -> vector<2x16xf32>
    %c16_131 = arith.constant 16 : index
    %c0_132 = arith.constant 0 : index
    %335 = vector.load %arg13[%c16_131, %c0_132] : memref<32x16xf32, #tpu.memory_space<vmem>>, vector<16x16xf32>
    %cst_133 = arith.constant dense<0.000000e+00> : vector<2x16xf32>
    %336 = tpu.matmul %317, %335, %cst_133 {dimension_numbers = #tpu.dot_dimension_numbers<[1], [0], [0], [1], [0, 0, 1, 1], [], []>} : vector<2x16xf32>, vector<16x16xf32>, vector<2x16xf32> -> vector<2x16xf32>
    %337 = arith.addf %334, %336 : vector<2x16xf32>
    %c0_134 = arith.constant 0 : index
    %c0_135 = arith.constant 0 : index
    %338 = vector.load %arg14[%c0_134, %c0_135] : memref<1x16xf32, #tpu.memory_space<vmem>>, vector<1x16xf32>
    %339 = vector.broadcast %338 : vector<1x16xf32> to vector<2x16xf32>
    %340 = arith.addf %337, %339 : vector<2x16xf32>
    %cst_136 = arith.constant 0.000000e+00 : f32
    %341 = vector.broadcast %cst_136 : f32 to vector<2x16xf32>
    %342 = arith.maximumf %340, %341 : vector<2x16xf32>
    %343 = arith.mulf %332, %342 : vector<2x16xf32>
    %344 = arith.addf %317, %343 : vector<2x16xf32>
    %c0_137 = arith.constant 0 : index
    %c0_138 = arith.constant 0 : index
    %c0_139 = arith.constant 0 : index
    %345 = vector.load %arg15[%c0_137, %c0_138, %c0_139] : memref<2x2x16xf32, #tpu.memory_space<vmem>>, vector<1x2x16xf32>
    %346 = vector.shape_cast %345 : vector<1x2x16xf32> to vector<2x16xf32>
    %347 = vector.shape_cast %344 : vector<2x16xf32> to vector<1x2x16xf32>
    tpu.vector_store %arg15[%c0_137, %c0_138, %c0_139], %347 {strides = array<i32>} : memref<2x2x16xf32, #tpu.memory_space<vmem>>, vector<1x2x16xf32>,
    %c1_140 = arith.constant 1 : index
    %c0_141 = arith.constant 0 : index
    %c0_142 = arith.constant 0 : index
    %348 = vector.load %arg10[%c1_140, %c0_141, %c0_142] : memref<2x2x16xf32, #tpu.memory_space<vmem>>, vector<1x2x16xf32>
    %349 = vector.shape_cast %348 : vector<1x2x16xf32> to vector<2x16xf32>
    %350 = vector.extract_strided_slice %315 {offsets = [1, 0], sizes = [1, 16], strides = [1, 1]} : vector<2x32xf32> to vector<1x16xf32>
    %351 = vector.extract_strided_slice %315 {offsets = [1, 16], sizes = [1, 16], strides = [1, 1]} : vector<2x32xf32> to vector<1x16xf32>
    %352 = vector.extract_strided_slice %349 {offsets = [0, 0], sizes = [1, 16], strides = [1, 1]} : vector<2x16xf32> to vector<1x16xf32>
    %353 = tpu.concatenate %350, %352 in 0 : vector<1x16xf32>, vector<1x16xf32> -> vector<2x16xf32>
    %354 = vector.extract_strided_slice %349 {offsets = [0, 0], sizes = [1, 16], strides = [1, 1]} : vector<2x16xf32> to vector<1x16xf32>
    %355 = tpu.concatenate %351, %354 in 0 : vector<1x16xf32>, vector<1x16xf32> -> vector<2x16xf32>
    %c0_143 = arith.constant 0 : index
    %c0_144 = arith.constant 0 : index
    %356 = vector.load %arg11[%c0_143, %c0_144] : memref<32x16xf32, #tpu.memory_space<vmem>>, vector<16x16xf32>
    %cst_145 = arith.constant dense<0.000000e+00> : vector<2x16xf32>
    %357 = tpu.matmul %353, %356, %cst_145 {dimension_numbers = #tpu.dot_dimension_numbers<[1], [0], [0], [1], [0, 0, 1, 1], [], []>} : vector<2x16xf32>, vector<16x16xf32>, vector<2x16xf32> -> vector<2x16xf32>
    %c16_146 = arith.constant 16 : index
    %c0_147 = arith.constant 0 : index
    %358 = vector.load %arg11[%c16_146, %c0_147] : memref<32x16xf32, #tpu.memory_space<vmem>>, vector<16x16xf32>
    %cst_148 = arith.constant dense<0.000000e+00> : vector<2x16xf32>
    %359 = tpu.matmul %349, %358, %cst_148 {dimension_numbers = #tpu.dot_dimension_numbers<[1], [0], [0], [1], [0, 0, 1, 1], [], []>} : vector<2x16xf32>, vector<16x16xf32>, vector<2x16xf32> -> vector<2x16xf32>
    %360 = arith.addf %357, %359 : vector<2x16xf32>
    %c0_149 = arith.constant 0 : index
    %c0_150 = arith.constant 0 : index
    %361 = vector.load %arg12[%c0_149, %c0_150] : memref<1x16xf32, #tpu.memory_space<vmem>>, vector<1x16xf32>
    %362 = vector.broadcast %361 : vector<1x16xf32> to vector<2x16xf32>
    %363 = arith.addf %360, %362 : vector<2x16xf32>
    %364 = math.tanh %363 : vector<2x16xf32>
    %c0_151 = arith.constant 0 : index
    %c0_152 = arith.constant 0 : index
    %365 = vector.load %arg13[%c0_151, %c0_152] : memref<32x16xf32, #tpu.memory_space<vmem>>, vector<16x16xf32>
    %cst_153 = arith.constant dense<0.000000e+00> : vector<2x16xf32>
    %366 = tpu.matmul %355, %365, %cst_153 {dimension_numbers = #tpu.dot_dimension_numbers<[1], [0], [0], [1], [0, 0, 1, 1], [], []>} : vector<2x16xf32>, vector<16x16xf32>, vector<2x16xf32> -> vector<2x16xf32>
    %c16_154 = arith.constant 16 : index
    %c0_155 = arith.constant 0 : index
    %367 = vector.load %arg13[%c16_154, %c0_155] : memref<32x16xf32, #tpu.memory_space<vmem>>, vector<16x16xf32>
    %cst_156 = arith.constant dense<0.000000e+00> : vector<2x16xf32>
    %368 = tpu.matmul %349, %367, %cst_156 {dimension_numbers = #tpu.dot_dimension_numbers<[1], [0], [0], [1], [0, 0, 1, 1], [], []>} : vector<2x16xf32>, vector<16x16xf32>, vector<2x16xf32> -> vector<2x16xf32>
    %369 = arith.addf %366, %368 : vector<2x16xf32>
    %c0_157 = arith.constant 0 : index
    %c0_158 = arith.constant 0 : index
    %370 = vector.load %arg14[%c0_157, %c0_158] : memref<1x16xf32, #tpu.memory_space<vmem>>, vector<1x16xf32>
    %371 = vector.broadcast %370 : vector<1x16xf32> to vector<2x16xf32>
    %372 = arith.addf %369, %371 : vector<2x16xf32>
    %cst_159 = arith.constant 0.000000e+00 : f32
    %373 = vector.broadcast %cst_159 : f32 to vector<2x16xf32>
    %374 = arith.maximumf %372, %373 : vector<2x16xf32>
    %375 = arith.mulf %364, %374 : vector<2x16xf32>
    %376 = arith.addf %349, %375 : vector<2x16xf32>
    %c1_160 = arith.constant 1 : index
    %c0_161 = arith.constant 0 : index
    %c0_162 = arith.constant 0 : index
    %377 = vector.load %arg15[%c1_160, %c0_161, %c0_162] : memref<2x2x16xf32, #tpu.memory_space<vmem>>, vector<1x2x16xf32>
    %378 = vector.shape_cast %377 : vector<1x2x16xf32> to vector<2x16xf32>
    %379 = vector.shape_cast %376 : vector<2x16xf32> to vector<1x2x16xf32>
    tpu.vector_store %arg15[%c1_160, %c0_161, %c0_162], %379 {strides = array<i32>} : memref<2x2x16xf32, #tpu.memory_space<vmem>>, vector<1x2x16xf32>,
    return
  }
  func.func @transform_0(%arg0: i32) -> (i32, i32, i32) {
    %c0_i32 = arith.constant 0 : i32
    %c0_i32_0 = arith.constant 0 : i32
    %c0_i32_1 = arith.constant 0 : i32
    %c0_i32_2 = arith.constant 0 : i32
    return %c0_i32, %c0_i32_0, %c0_i32_1 : i32, i32, i32
  }
  func.func @transform_1(%arg0: i32) -> (i32, i32) {
    %c0_i32 = arith.constant 0 : i32
    %c0_i32_0 = arith.constant 0 : i32
    %c0_i32_1 = arith.constant 0 : i32
    return %c0_i32, %c0_i32_0 : i32, i32
  }
  func.func @transform_2(%arg0: i32) -> (i32, i32) {
    %c0_i32 = arith.constant 0 : i32
    %c0_i32_0 = arith.constant 0 : i32
    %c0_i32_1 = arith.constant 0 : i32
    return %c0_i32, %c0_i32_0 : i32, i32
  }
  func.func @transform_3(%arg0: i32) -> (i32, i32) {
    %c0_i32 = arith.constant 0 : i32
    %c0_i32_0 = arith.constant 0 : i32
    %c0_i32_1 = arith.constant 0 : i32
    return %c0_i32, %c0_i32_0 : i32, i32
  }
  func.func @transform_4(%arg0: i32) -> (i32, i32) {
    %c0_i32 = arith.constant 0 : i32
    %c0_i32_0 = arith.constant 0 : i32
    %c0_i32_1 = arith.constant 0 : i32
    return %c0_i32, %c0_i32_0 : i32, i32
  }
  func.func @transform_5(%arg0: i32) -> (i32, i32) {
    %c0_i32 = arith.constant 0 : i32
    %c0_i32_0 = arith.constant 0 : i32
    %c0_i32_1 = arith.constant 0 : i32
    return %c0_i32, %c0_i32_0 : i32, i32
  }
  func.func @transform_6(%arg0: i32) -> (i32, i32) {
    %c0_i32 = arith.constant 0 : i32
    %c0_i32_0 = arith.constant 0 : i32
    %c0_i32_1 = arith.constant 0 : i32
    return %c0_i32, %c0_i32_0 : i32, i32
  }
  func.func @transform_7(%arg0: i32) -> (i32, i32) {
    %c0_i32 = arith.constant 0 : i32
    %c0_i32_0 = arith.constant 0 : i32
    %c0_i32_1 = arith.constant 0 : i32
    return %c0_i32, %c0_i32_0 : i32, i32
  }
  func.func @transform_8(%arg0: i32) -> (i32, i32) {
    %c0_i32 = arith.constant 0 : i32
    %c0_i32_0 = arith.constant 0 : i32
    %c0_i32_1 = arith.constant 0 : i32
    return %c0_i32, %c0_i32_0 : i32, i32
  }
  func.func @transform_9(%arg0: i32) -> (i32, i32, i32) {
    %c0_i32 = arith.constant 0 : i32
    %c0_i32_0 = arith.constant 0 : i32
    %c0_i32_1 = arith.constant 0 : i32
    %c0_i32_2 = arith.constant 0 : i32
    return %c0_i32, %c0_i32_0, %c0_i32_1 : i32, i32, i32
  }
  func.func @transform_10(%arg0: i32) -> (i32, i32) {
    %c0_i32 = arith.constant 0 : i32
    %c0_i32_0 = arith.constant 0 : i32
    %c0_i32_1 = arith.constant 0 : i32
    return %c0_i32, %c0_i32_0 : i32, i32
  }
  func.func @transform_11(%arg0: i32) -> (i32, i32) {
    %c0_i32 = arith.constant 0 : i32
    %c0_i32_0 = arith.constant 0 : i32
    %c0_i32_1 = arith.constant 0 : i32
    return %c0_i32, %c0_i32_0 : i32, i32
  }
  func.func @transform_12(%arg0: i32) -> (i32, i32) {
    %c0_i32 = arith.constant 0 : i32
    %c0_i32_0 = arith.constant 0 : i32
    %c0_i32_1 = arith.constant 0 : i32
    return %c0_i32, %c0_i32_0 : i32, i32
  }
  func.func @transform_13(%arg0: i32) -> (i32, i32) {
    %c0_i32 = arith.constant 0 : i32
    %c0_i32_0 = arith.constant 0 : i32
    %c0_i32_1 = arith.constant 0 : i32
    return %c0_i32, %c0_i32_0 : i32, i32
  }
  func.func @transform_14(%arg0: i32) -> (i32, i32, i32) {
    %c0_i32 = arith.constant 0 : i32
    %c0_i32_0 = arith.constant 0 : i32
    %c0_i32_1 = arith.constant 0 : i32
    %c0_i32_2 = arith.constant 0 : i32
    return %c0_i32, %c0_i32_0, %c0_i32_1 : i32, i32, i32
  }
}

module attributes {stable_mosaic.version = 11 : i64} {
  func.func @_upfuse_kernel(%arg0: i32, %arg1: memref<1x4x16xf32, #tpu.memory_space<vmem>>, %arg2: memref<1x4x16xf32, #tpu.memory_space<vmem>>, %arg3: memref<16x4xf32, #tpu.memory_space<vmem>>, %arg4: memref<1x4xf32, #tpu.memory_space<vmem>>, %arg5: memref<16x4xf32, #tpu.memory_space<vmem>>, %arg6: memref<1x4xf32, #tpu.memory_space<vmem>>, %arg7: memref<1x4xf32, #tpu.memory_space<vmem>>, %arg8: memref<1x1xf32, #tpu.memory_space<vmem>>, %arg9: memref<96x16xf32, #tpu.memory_space<vmem>>, %arg10: memref<1x16xf32, #tpu.memory_space<vmem>>, %arg11: memref<48x16xf32, #tpu.memory_space<vmem>>, %arg12: memref<1x16xf32, #tpu.memory_space<vmem>>, %arg13: memref<1x4x16xf32, #tpu.memory_space<vmem>>, %arg14: memref<6x32xf32, #tpu.memory_space<vmem>>, %arg15: memref<6x16xf32, #tpu.memory_space<vmem>>) attributes {dimension_semantics = [#tpu.dimension_semantics<parallel>], iteration_bounds = array<i64: 2>, scalar_prefetch = 0 : i64, scratch_operands = 2 : i64, tpu.core_type = #tpu.core_type<tc>, window_params = [{transform_indices = @transform_0, window_bounds = array<i64: 1, 4, 16>}, {transform_indices = @transform_1, window_bounds = array<i64: 1, 4, 16>}, {pipeline_mode = #tpu.pipeline_mode<synchronous>, transform_indices = @transform_2, window_bounds = array<i64: 16, 4>}, {pipeline_mode = #tpu.pipeline_mode<synchronous>, transform_indices = @transform_3, window_bounds = array<i64: 1, 4>}, {pipeline_mode = #tpu.pipeline_mode<synchronous>, transform_indices = @transform_4, window_bounds = array<i64: 16, 4>}, {pipeline_mode = #tpu.pipeline_mode<synchronous>, transform_indices = @transform_5, window_bounds = array<i64: 1, 4>}, {pipeline_mode = #tpu.pipeline_mode<synchronous>, transform_indices = @transform_6, window_bounds = array<i64: 1, 4>}, {pipeline_mode = #tpu.pipeline_mode<synchronous>, transform_indices = @transform_7, window_bounds = array<i64: 1, 1>}, {pipeline_mode = #tpu.pipeline_mode<synchronous>, transform_indices = @transform_8, window_bounds = array<i64: 96, 16>}, {pipeline_mode = #tpu.pipeline_mode<synchronous>, transform_indices = @transform_9, window_bounds = array<i64: 1, 16>}, {pipeline_mode = #tpu.pipeline_mode<synchronous>, transform_indices = @transform_10, window_bounds = array<i64: 48, 16>}, {pipeline_mode = #tpu.pipeline_mode<synchronous>, transform_indices = @transform_11, window_bounds = array<i64: 1, 16>}, {transform_indices = @transform_12, window_bounds = array<i64: 1, 4, 16>}]} {
    %c0 = arith.constant 0 : index
    %c0_0 = arith.constant 0 : index
    %c0_1 = arith.constant 0 : index
    %0 = vector.load %arg1[%c0, %c0_0, %c0_1] : memref<1x4x16xf32, #tpu.memory_space<vmem>>, vector<1x4x16xf32>
    %1 = vector.shape_cast %0 : vector<1x4x16xf32> to vector<4x16xf32>
    %c0_2 = arith.constant 0 : index
    %c0_3 = arith.constant 0 : index
    %c0_4 = arith.constant 0 : index
    %2 = vector.load %arg2[%c0_2, %c0_3, %c0_4] : memref<1x4x16xf32, #tpu.memory_space<vmem>>, vector<1x4x16xf32>
    %3 = vector.shape_cast %2 : vector<1x4x16xf32> to vector<4x16xf32>
    %c0_5 = arith.constant 0 : index
    %c0_6 = arith.constant 0 : index
    %4 = vector.load %arg3[%c0_5, %c0_6] : memref<16x4xf32, #tpu.memory_space<vmem>>, vector<16x4xf32>
    %cst = arith.constant dense<0.000000e+00> : vector<4x4xf32>
    %5 = tpu.matmul %3, %4, %cst {dimension_numbers = #tpu.dot_dimension_numbers<[1], [0], [0], [1], [0, 0, 1, 1], [], []>} : vector<4x16xf32>, vector<16x4xf32>, vector<4x4xf32> -> vector<4x4xf32>
    %c0_7 = arith.constant 0 : index
    %c0_8 = arith.constant 0 : index
    %6 = vector.load %arg4[%c0_7, %c0_8] : memref<1x4xf32, #tpu.memory_space<vmem>>, vector<1x4xf32>
    %7 = vector.broadcast %6 : vector<1x4xf32> to vector<4x4xf32>
    %8 = arith.addf %5, %7 : vector<4x4xf32>
    %c0_9 = arith.constant 0 : index
    %c0_10 = arith.constant 0 : index
    %9 = vector.load %arg5[%c0_9, %c0_10] : memref<16x4xf32, #tpu.memory_space<vmem>>, vector<16x4xf32>
    %cst_11 = arith.constant dense<0.000000e+00> : vector<4x4xf32>
    %10 = tpu.matmul %1, %9, %cst_11 {dimension_numbers = #tpu.dot_dimension_numbers<[1], [0], [0], [1], [0, 0, 1, 1], [], []>} : vector<4x16xf32>, vector<16x4xf32>, vector<4x4xf32> -> vector<4x4xf32>
    %c0_12 = arith.constant 0 : index
    %c0_13 = arith.constant 0 : index
    %11 = vector.load %arg6[%c0_12, %c0_13] : memref<1x4xf32, #tpu.memory_space<vmem>>, vector<1x4xf32>
    %12 = vector.broadcast %11 : vector<1x4xf32> to vector<4x4xf32>
    %13 = arith.addf %10, %12 : vector<4x4xf32>
    %14 = arith.addf %8, %13 : vector<4x4xf32>
    %cst_14 = arith.constant 0.000000e+00 : f32
    %15 = vector.broadcast %cst_14 : f32 to vector<4x4xf32>
    %16 = arith.maximumf %14, %15 : vector<4x4xf32>
    %c0_15 = arith.constant 0 : index
    %c0_16 = arith.constant 0 : index
    %17 = vector.load %arg7[%c0_15, %c0_16] : memref<1x4xf32, #tpu.memory_space<vmem>>, vector<1x4xf32>
    %18 = vector.broadcast %17 : vector<1x4xf32> to vector<4x4xf32>
    %19 = arith.mulf %16, %18 : vector<4x4xf32>
    %cst_17 = arith.constant dense<0.000000e+00> : vector<4xf32>
    %20 = vector.multi_reduction <add>, %19, %cst_17 [1] : vector<4x4xf32> to vector<4xf32>
    %21 = vector.shape_cast %20 : vector<4xf32> to vector<4x1xf32>
    %c0_18 = arith.constant 0 : index
    %c0_19 = arith.constant 0 : index
    %22 = vector.load %arg8[%c0_18, %c0_19] : memref<1x1xf32, #tpu.memory_space<vmem>>, vector<1x1xf32>
    %23 = vector.broadcast %22 : vector<1x1xf32> to vector<4x1xf32>
    %24 = arith.addf %21, %23 : vector<4x1xf32>
    %cst_20 = arith.constant 5.000000e-01 : f32
    %25 = vector.broadcast %cst_20 : f32 to vector<4x1xf32>
    %26 = arith.mulf %25, %24 : vector<4x1xf32>
    %27 = math.tanh %26 : vector<4x1xf32>
    %cst_21 = arith.constant 1.000000e+00 : f32
    %28 = vector.broadcast %cst_21 : f32 to vector<4x1xf32>
    %29 = arith.addf %27, %28 : vector<4x1xf32>
    %cst_22 = arith.constant 5.000000e-01 : f32
    %30 = vector.broadcast %cst_22 : f32 to vector<4x1xf32>
    %31 = arith.mulf %30, %29 : vector<4x1xf32>
    %32 = vector.broadcast %31 : vector<4x1xf32> to vector<4x16xf32>
    %33 = arith.mulf %3, %32 : vector<4x16xf32>
    %cst_23 = arith.constant 0.000000e+00 : f32
    %34 = vector.broadcast %cst_23 : f32 to vector<6x32xf32>
    %c0_24 = arith.constant 0 : index
    %c0_25 = arith.constant 0 : index
    %35 = vector.load %arg14[%c0_24, %c0_25] : memref<6x32xf32, #tpu.memory_space<vmem>>, vector<6x32xf32>
    tpu.vector_store %arg14[%c0_24, %c0_25], %34 {strides = array<i32>} : memref<6x32xf32, #tpu.memory_space<vmem>>, vector<6x32xf32>,
    %c1 = arith.constant 1 : index
    %c0_26 = arith.constant 0 : index
    %36 = vector.load %arg14[%c1, %c0_26] : memref<6x32xf32, #tpu.memory_space<vmem>>, vector<4x16xf32>
    tpu.vector_store %arg14[%c1, %c0_26], %1 {strides = array<i32>} : memref<6x32xf32, #tpu.memory_space<vmem>>, vector<4x16xf32>,
    %c1_27 = arith.constant 1 : index
    %c16 = arith.constant 16 : index
    %37 = vector.load %arg14[%c1_27, %c16] : memref<6x32xf32, #tpu.memory_space<vmem>>, vector<4x16xf32>
    tpu.vector_store %arg14[%c1_27, %c16], %33 {strides = array<i32>} : memref<6x32xf32, #tpu.memory_space<vmem>>, vector<4x16xf32>,
    %cst_28 = arith.constant 0.000000e+00 : f32
    %38 = vector.broadcast %cst_28 : f32 to vector<4x16xf32>
    %c0_29 = arith.constant 0 : index
    %c0_30 = arith.constant 0 : index
    %39 = vector.load %arg10[%c0_29, %c0_30] : memref<1x16xf32, #tpu.memory_space<vmem>>, vector<1x16xf32>
    %40 = vector.broadcast %39 : vector<1x16xf32> to vector<4x16xf32>
    %41 = arith.addf %38, %40 : vector<4x16xf32>
    %c0_31 = arith.constant 0 : index
    %c0_32 = arith.constant 0 : index
    %42 = vector.load %arg14[%c0_31, %c0_32] : memref<6x32xf32, #tpu.memory_space<vmem>>, vector<4x32xf32>
    %c0_33 = arith.constant 0 : index
    %c0_34 = arith.constant 0 : index
    %43 = vector.load %arg9[%c0_33, %c0_34] : memref<96x16xf32, #tpu.memory_space<vmem>>, vector<32x16xf32>
    %cst_35 = arith.constant dense<0.000000e+00> : vector<4x16xf32>
    %44 = tpu.matmul %42, %43, %cst_35 {dimension_numbers = #tpu.dot_dimension_numbers<[1], [0], [0], [1], [0, 0, 1, 1], [], []>} : vector<4x32xf32>, vector<32x16xf32>, vector<4x16xf32> -> vector<4x16xf32>
    %45 = arith.addf %41, %44 : vector<4x16xf32>
    %c1_36 = arith.constant 1 : index
    %c0_37 = arith.constant 0 : index
    %46 = vector.load %arg14[%c1_36, %c0_37] : memref<6x32xf32, #tpu.memory_space<vmem>>, vector<4x32xf32>
    %c32 = arith.constant 32 : index
    %c0_38 = arith.constant 0 : index
    %47 = vector.load %arg9[%c32, %c0_38] : memref<96x16xf32, #tpu.memory_space<vmem>>, vector<32x16xf32>
    %cst_39 = arith.constant dense<0.000000e+00> : vector<4x16xf32>
    %48 = tpu.matmul %46, %47, %cst_39 {dimension_numbers = #tpu.dot_dimension_numbers<[1], [0], [0], [1], [0, 0, 1, 1], [], []>} : vector<4x32xf32>, vector<32x16xf32>, vector<4x16xf32> -> vector<4x16xf32>
    %49 = arith.addf %45, %48 : vector<4x16xf32>
    %c2 = arith.constant 2 : index
    %c0_40 = arith.constant 0 : index
    %50 = vector.load %arg14[%c2, %c0_40] : memref<6x32xf32, #tpu.memory_space<vmem>>, vector<4x32xf32>
    %c64 = arith.constant 64 : index
    %c0_41 = arith.constant 0 : index
    %51 = vector.load %arg9[%c64, %c0_41] : memref<96x16xf32, #tpu.memory_space<vmem>>, vector<32x16xf32>
    %cst_42 = arith.constant dense<0.000000e+00> : vector<4x16xf32>
    %52 = tpu.matmul %50, %51, %cst_42 {dimension_numbers = #tpu.dot_dimension_numbers<[1], [0], [0], [1], [0, 0, 1, 1], [], []>} : vector<4x32xf32>, vector<32x16xf32>, vector<4x16xf32> -> vector<4x16xf32>
    %53 = arith.addf %49, %52 : vector<4x16xf32>
    %cst_43 = arith.constant 0.000000e+00 : f32
    %54 = vector.broadcast %cst_43 : f32 to vector<6x16xf32>
    %c0_44 = arith.constant 0 : index
    %c0_45 = arith.constant 0 : index
    %55 = vector.load %arg15[%c0_44, %c0_45] : memref<6x16xf32, #tpu.memory_space<vmem>>, vector<6x16xf32>
    tpu.vector_store %arg15[%c0_44, %c0_45], %54 {strides = array<i32>} : memref<6x16xf32, #tpu.memory_space<vmem>>, vector<6x16xf32>,
    %cst_46 = arith.constant 0.000000e+00 : f32
    %56 = vector.broadcast %cst_46 : f32 to vector<4x16xf32>
    %57 = arith.maximumf %53, %56 : vector<4x16xf32>
    %c1_47 = arith.constant 1 : index
    %c0_48 = arith.constant 0 : index
    %58 = vector.load %arg15[%c1_47, %c0_48] : memref<6x16xf32, #tpu.memory_space<vmem>>, vector<4x16xf32>
    tpu.vector_store %arg15[%c1_47, %c0_48], %57 {strides = array<i32>} : memref<6x16xf32, #tpu.memory_space<vmem>>, vector<4x16xf32>,
    %cst_49 = arith.constant 0.000000e+00 : f32
    %59 = vector.broadcast %cst_49 : f32 to vector<4x16xf32>
    %c0_50 = arith.constant 0 : index
    %c0_51 = arith.constant 0 : index
    %60 = vector.load %arg12[%c0_50, %c0_51] : memref<1x16xf32, #tpu.memory_space<vmem>>, vector<1x16xf32>
    %61 = vector.broadcast %60 : vector<1x16xf32> to vector<4x16xf32>
    %62 = arith.addf %59, %61 : vector<4x16xf32>
    %c0_52 = arith.constant 0 : index
    %c0_53 = arith.constant 0 : index
    %63 = vector.load %arg15[%c0_52, %c0_53] : memref<6x16xf32, #tpu.memory_space<vmem>>, vector<4x16xf32>
    %c0_54 = arith.constant 0 : index
    %c0_55 = arith.constant 0 : index
    %64 = vector.load %arg11[%c0_54, %c0_55] : memref<48x16xf32, #tpu.memory_space<vmem>>, vector<16x16xf32>
    %cst_56 = arith.constant dense<0.000000e+00> : vector<4x16xf32>
    %65 = tpu.matmul %63, %64, %cst_56 {dimension_numbers = #tpu.dot_dimension_numbers<[1], [0], [0], [1], [0, 0, 1, 1], [], []>} : vector<4x16xf32>, vector<16x16xf32>, vector<4x16xf32> -> vector<4x16xf32>
    %66 = arith.addf %62, %65 : vector<4x16xf32>
    %c1_57 = arith.constant 1 : index
    %c0_58 = arith.constant 0 : index
    %67 = vector.load %arg15[%c1_57, %c0_58] : memref<6x16xf32, #tpu.memory_space<vmem>>, vector<4x16xf32>
    %c16_59 = arith.constant 16 : index
    %c0_60 = arith.constant 0 : index
    %68 = vector.load %arg11[%c16_59, %c0_60] : memref<48x16xf32, #tpu.memory_space<vmem>>, vector<16x16xf32>
    %cst_61 = arith.constant dense<0.000000e+00> : vector<4x16xf32>
    %69 = tpu.matmul %67, %68, %cst_61 {dimension_numbers = #tpu.dot_dimension_numbers<[1], [0], [0], [1], [0, 0, 1, 1], [], []>} : vector<4x16xf32>, vector<16x16xf32>, vector<4x16xf32> -> vector<4x16xf32>
    %70 = arith.addf %66, %69 : vector<4x16xf32>
    %c2_62 = arith.constant 2 : index
    %c0_63 = arith.constant 0 : index
    %71 = vector.load %arg15[%c2_62, %c0_63] : memref<6x16xf32, #tpu.memory_space<vmem>>, vector<4x16xf32>
    %c32_64 = arith.constant 32 : index
    %c0_65 = arith.constant 0 : index
    %72 = vector.load %arg11[%c32_64, %c0_65] : memref<48x16xf32, #tpu.memory_space<vmem>>, vector<16x16xf32>
    %cst_66 = arith.constant dense<0.000000e+00> : vector<4x16xf32>
    %73 = tpu.matmul %71, %72, %cst_66 {dimension_numbers = #tpu.dot_dimension_numbers<[1], [0], [0], [1], [0, 0, 1, 1], [], []>} : vector<4x16xf32>, vector<16x16xf32>, vector<4x16xf32> -> vector<4x16xf32>
    %74 = arith.addf %70, %73 : vector<4x16xf32>
    %cst_67 = arith.constant 0.000000e+00 : f32
    %75 = vector.broadcast %cst_67 : f32 to vector<4x16xf32>
    %76 = arith.maximumf %74, %75 : vector<4x16xf32>
    %c0_68 = arith.constant 0 : index
    %c0_69 = arith.constant 0 : index
    %c0_70 = arith.constant 0 : index
    %77 = vector.load %arg13[%c0_68, %c0_69, %c0_70] : memref<1x4x16xf32, #tpu.memory_space<vmem>>, vector<1x4x16xf32>
    %78 = vector.shape_cast %77 : vector<1x4x16xf32> to vector<4x16xf32>
    %79 = vector.shape_cast %76 : vector<4x16xf32> to vector<1x4x16xf32>
    tpu.vector_store %arg13[%c0_68, %c0_69, %c0_70], %79 {strides = array<i32>} : memref<1x4x16xf32, #tpu.memory_space<vmem>>, vector<1x4x16xf32>,
    return
  }
  func.func @transform_0(%arg0: i32) -> (i32, i32, i32) {
    %c0_i32 = arith.constant 0 : i32
    %c0_i32_0 = arith.constant 0 : i32
    %c0_i32_1 = arith.constant 0 : i32
    return %arg0, %c0_i32, %c0_i32_0 : i32, i32, i32
  }
  func.func @transform_1(%arg0: i32) -> (i32, i32, i32) {
    %c0_i32 = arith.constant 0 : i32
    %c0_i32_0 = arith.constant 0 : i32
    %c0_i32_1 = arith.constant 0 : i32
    return %arg0, %c0_i32, %c0_i32_0 : i32, i32, i32
  }
  func.func @transform_2(%arg0: i32) -> (i32, i32) {
    %c0_i32 = arith.constant 0 : i32
    %c0_i32_0 = arith.constant 0 : i32
    %c0_i32_1 = arith.constant 0 : i32
    return %c0_i32, %c0_i32_0 : i32, i32
  }
  func.func @transform_3(%arg0: i32) -> (i32, i32) {
    %c0_i32 = arith.constant 0 : i32
    %c0_i32_0 = arith.constant 0 : i32
    %c0_i32_1 = arith.constant 0 : i32
    return %c0_i32, %c0_i32_0 : i32, i32
  }
  func.func @transform_4(%arg0: i32) -> (i32, i32) {
    %c0_i32 = arith.constant 0 : i32
    %c0_i32_0 = arith.constant 0 : i32
    %c0_i32_1 = arith.constant 0 : i32
    return %c0_i32, %c0_i32_0 : i32, i32
  }
  func.func @transform_5(%arg0: i32) -> (i32, i32) {
    %c0_i32 = arith.constant 0 : i32
    %c0_i32_0 = arith.constant 0 : i32
    %c0_i32_1 = arith.constant 0 : i32
    return %c0_i32, %c0_i32_0 : i32, i32
  }
  func.func @transform_6(%arg0: i32) -> (i32, i32) {
    %c0_i32 = arith.constant 0 : i32
    %c0_i32_0 = arith.constant 0 : i32
    %c0_i32_1 = arith.constant 0 : i32
    return %c0_i32, %c0_i32_0 : i32, i32
  }
  func.func @transform_7(%arg0: i32) -> (i32, i32) {
    %c0_i32 = arith.constant 0 : i32
    %c0_i32_0 = arith.constant 0 : i32
    %c0_i32_1 = arith.constant 0 : i32
    return %c0_i32, %c0_i32_0 : i32, i32
  }
  func.func @transform_8(%arg0: i32) -> (i32, i32) {
    %c0_i32 = arith.constant 0 : i32
    %c0_i32_0 = arith.constant 0 : i32
    %c0_i32_1 = arith.constant 0 : i32
    return %c0_i32, %c0_i32_0 : i32, i32
  }
  func.func @transform_9(%arg0: i32) -> (i32, i32) {
    %c0_i32 = arith.constant 0 : i32
    %c0_i32_0 = arith.constant 0 : i32
    %c0_i32_1 = arith.constant 0 : i32
    return %c0_i32, %c0_i32_0 : i32, i32
  }
  func.func @transform_10(%arg0: i32) -> (i32, i32) {
    %c0_i32 = arith.constant 0 : i32
    %c0_i32_0 = arith.constant 0 : i32
    %c0_i32_1 = arith.constant 0 : i32
    return %c0_i32, %c0_i32_0 : i32, i32
  }
  func.func @transform_11(%arg0: i32) -> (i32, i32) {
    %c0_i32 = arith.constant 0 : i32
    %c0_i32_0 = arith.constant 0 : i32
    %c0_i32_1 = arith.constant 0 : i32
    return %c0_i32, %c0_i32_0 : i32, i32
  }
  func.func @transform_12(%arg0: i32) -> (i32, i32, i32) {
    %c0_i32 = arith.constant 0 : i32
    %c0_i32_0 = arith.constant 0 : i32
    %c0_i32_1 = arith.constant 0 : i32
    return %arg0, %c0_i32, %c0_i32_0 : i32, i32, i32
  }
}

module attributes {stable_mosaic.version = 11 : i64} {
  func.func @_upfuse_kernel(%arg0: i32, %arg1: memref<1x8x16xf32, #tpu.memory_space<vmem>>, %arg2: memref<1x8x8xf32, #tpu.memory_space<vmem>>, %arg3: memref<8x4xf32, #tpu.memory_space<vmem>>, %arg4: memref<1x4xf32, #tpu.memory_space<vmem>>, %arg5: memref<16x4xf32, #tpu.memory_space<vmem>>, %arg6: memref<1x4xf32, #tpu.memory_space<vmem>>, %arg7: memref<1x4xf32, #tpu.memory_space<vmem>>, %arg8: memref<1x1xf32, #tpu.memory_space<vmem>>, %arg9: memref<72x8xf32, #tpu.memory_space<vmem>>, %arg10: memref<1x8xf32, #tpu.memory_space<vmem>>, %arg11: memref<24x8xf32, #tpu.memory_space<vmem>>, %arg12: memref<1x8xf32, #tpu.memory_space<vmem>>, %arg13: memref<1x8x8xf32, #tpu.memory_space<vmem>>, %arg14: memref<10x24xf32, #tpu.memory_space<vmem>>, %arg15: memref<10x8xf32, #tpu.memory_space<vmem>>) attributes {dimension_semantics = [#tpu.dimension_semantics<parallel>], iteration_bounds = array<i64: 2>, scalar_prefetch = 0 : i64, scratch_operands = 2 : i64, tpu.core_type = #tpu.core_type<tc>, window_params = [{transform_indices = @transform_0, window_bounds = array<i64: 1, 8, 16>}, {transform_indices = @transform_1, window_bounds = array<i64: 1, 8, 8>}, {pipeline_mode = #tpu.pipeline_mode<synchronous>, transform_indices = @transform_2, window_bounds = array<i64: 8, 4>}, {pipeline_mode = #tpu.pipeline_mode<synchronous>, transform_indices = @transform_3, window_bounds = array<i64: 1, 4>}, {pipeline_mode = #tpu.pipeline_mode<synchronous>, transform_indices = @transform_4, window_bounds = array<i64: 16, 4>}, {pipeline_mode = #tpu.pipeline_mode<synchronous>, transform_indices = @transform_5, window_bounds = array<i64: 1, 4>}, {pipeline_mode = #tpu.pipeline_mode<synchronous>, transform_indices = @transform_6, window_bounds = array<i64: 1, 4>}, {pipeline_mode = #tpu.pipeline_mode<synchronous>, transform_indices = @transform_7, window_bounds = array<i64: 1, 1>}, {pipeline_mode = #tpu.pipeline_mode<synchronous>, transform_indices = @transform_8, window_bounds = array<i64: 72, 8>}, {pipeline_mode = #tpu.pipeline_mode<synchronous>, transform_indices = @transform_9, window_bounds = array<i64: 1, 8>}, {pipeline_mode = #tpu.pipeline_mode<synchronous>, transform_indices = @transform_10, window_bounds = array<i64: 24, 8>}, {pipeline_mode = #tpu.pipeline_mode<synchronous>, transform_indices = @transform_11, window_bounds = array<i64: 1, 8>}, {transform_indices = @transform_12, window_bounds = array<i64: 1, 8, 8>}]} {
    %c0 = arith.constant 0 : index
    %c0_0 = arith.constant 0 : index
    %c0_1 = arith.constant 0 : index
    %0 = vector.load %arg1[%c0, %c0_0, %c0_1] : memref<1x8x16xf32, #tpu.memory_space<vmem>>, vector<1x8x16xf32>
    %1 = vector.shape_cast %0 : vector<1x8x16xf32> to vector<8x16xf32>
    %c0_2 = arith.constant 0 : index
    %c0_3 = arith.constant 0 : index
    %c0_4 = arith.constant 0 : index
    %2 = vector.load %arg2[%c0_2, %c0_3, %c0_4] : memref<1x8x8xf32, #tpu.memory_space<vmem>>, vector<1x8x8xf32>
    %3 = vector.shape_cast %2 : vector<1x8x8xf32> to vector<8x8xf32>
    %c0_5 = arith.constant 0 : index
    %c0_6 = arith.constant 0 : index
    %4 = vector.load %arg3[%c0_5, %c0_6] : memref<8x4xf32, #tpu.memory_space<vmem>>, vector<8x4xf32>
    %cst = arith.constant dense<0.000000e+00> : vector<8x4xf32>
    %5 = tpu.matmul %3, %4, %cst {dimension_numbers = #tpu.dot_dimension_numbers<[1], [0], [0], [1], [0, 0, 1, 1], [], []>} : vector<8x8xf32>, vector<8x4xf32>, vector<8x4xf32> -> vector<8x4xf32>
    %c0_7 = arith.constant 0 : index
    %c0_8 = arith.constant 0 : index
    %6 = vector.load %arg4[%c0_7, %c0_8] : memref<1x4xf32, #tpu.memory_space<vmem>>, vector<1x4xf32>
    %7 = vector.broadcast %6 : vector<1x4xf32> to vector<8x4xf32>
    %8 = arith.addf %5, %7 : vector<8x4xf32>
    %c0_9 = arith.constant 0 : index
    %c0_10 = arith.constant 0 : index
    %9 = vector.load %arg5[%c0_9, %c0_10] : memref<16x4xf32, #tpu.memory_space<vmem>>, vector<16x4xf32>
    %cst_11 = arith.constant dense<0.000000e+00> : vector<8x4xf32>
    %10 = tpu.matmul %1, %9, %cst_11 {dimension_numbers = #tpu.dot_dimension_numbers<[1], [0], [0], [1], [0, 0, 1, 1], [], []>} : vector<8x16xf32>, vector<16x4xf32>, vector<8x4xf32> -> vector<8x4xf32>
    %c0_12 = arith.constant 0 : index
    %c0_13 = arith.constant 0 : index
    %11 = vector.load %arg6[%c0_12, %c0_13] : memref<1x4xf32, #tpu.memory_space<vmem>>, vector<1x4xf32>
    %12 = vector.broadcast %11 : vector<1x4xf32> to vector<8x4xf32>
    %13 = arith.addf %10, %12 : vector<8x4xf32>
    %14 = arith.addf %8, %13 : vector<8x4xf32>
    %cst_14 = arith.constant 0.000000e+00 : f32
    %15 = vector.broadcast %cst_14 : f32 to vector<8x4xf32>
    %16 = arith.maximumf %14, %15 : vector<8x4xf32>
    %c0_15 = arith.constant 0 : index
    %c0_16 = arith.constant 0 : index
    %17 = vector.load %arg7[%c0_15, %c0_16] : memref<1x4xf32, #tpu.memory_space<vmem>>, vector<1x4xf32>
    %18 = vector.broadcast %17 : vector<1x4xf32> to vector<8x4xf32>
    %19 = arith.mulf %16, %18 : vector<8x4xf32>
    %cst_17 = arith.constant dense<0.000000e+00> : vector<8xf32>
    %20 = vector.multi_reduction <add>, %19, %cst_17 [1] : vector<8x4xf32> to vector<8xf32>
    %21 = vector.shape_cast %20 : vector<8xf32> to vector<8x1xf32>
    %c0_18 = arith.constant 0 : index
    %c0_19 = arith.constant 0 : index
    %22 = vector.load %arg8[%c0_18, %c0_19] : memref<1x1xf32, #tpu.memory_space<vmem>>, vector<1x1xf32>
    %23 = vector.broadcast %22 : vector<1x1xf32> to vector<8x1xf32>
    %24 = arith.addf %21, %23 : vector<8x1xf32>
    %cst_20 = arith.constant 5.000000e-01 : f32
    %25 = vector.broadcast %cst_20 : f32 to vector<8x1xf32>
    %26 = arith.mulf %25, %24 : vector<8x1xf32>
    %27 = math.tanh %26 : vector<8x1xf32>
    %cst_21 = arith.constant 1.000000e+00 : f32
    %28 = vector.broadcast %cst_21 : f32 to vector<8x1xf32>
    %29 = arith.addf %27, %28 : vector<8x1xf32>
    %cst_22 = arith.constant 5.000000e-01 : f32
    %30 = vector.broadcast %cst_22 : f32 to vector<8x1xf32>
    %31 = arith.mulf %30, %29 : vector<8x1xf32>
    %32 = vector.broadcast %31 : vector<8x1xf32> to vector<8x8xf32>
    %33 = arith.mulf %3, %32 : vector<8x8xf32>
    %cst_23 = arith.constant 0.000000e+00 : f32
    %34 = vector.broadcast %cst_23 : f32 to vector<10x24xf32>
    %c0_24 = arith.constant 0 : index
    %c0_25 = arith.constant 0 : index
    %35 = vector.load %arg14[%c0_24, %c0_25] : memref<10x24xf32, #tpu.memory_space<vmem>>, vector<10x24xf32>
    tpu.vector_store %arg14[%c0_24, %c0_25], %34 {strides = array<i32>} : memref<10x24xf32, #tpu.memory_space<vmem>>, vector<10x24xf32>,
    %c1 = arith.constant 1 : index
    %c0_26 = arith.constant 0 : index
    %36 = vector.load %arg14[%c1, %c0_26] : memref<10x24xf32, #tpu.memory_space<vmem>>, vector<8x16xf32>
    tpu.vector_store %arg14[%c1, %c0_26], %1 {strides = array<i32>} : memref<10x24xf32, #tpu.memory_space<vmem>>, vector<8x16xf32>,
    %c1_27 = arith.constant 1 : index
    %c16 = arith.constant 16 : index
    %37 = vector.load %arg14[%c1_27, %c16] : memref<10x24xf32, #tpu.memory_space<vmem>>, vector<8x8xf32>
    tpu.vector_store %arg14[%c1_27, %c16], %33 {strides = array<i32>} : memref<10x24xf32, #tpu.memory_space<vmem>>, vector<8x8xf32>,
    %cst_28 = arith.constant 0.000000e+00 : f32
    %38 = vector.broadcast %cst_28 : f32 to vector<8x8xf32>
    %c0_29 = arith.constant 0 : index
    %c0_30 = arith.constant 0 : index
    %39 = vector.load %arg10[%c0_29, %c0_30] : memref<1x8xf32, #tpu.memory_space<vmem>>, vector<1x8xf32>
    %40 = vector.broadcast %39 : vector<1x8xf32> to vector<8x8xf32>
    %41 = arith.addf %38, %40 : vector<8x8xf32>
    %c0_31 = arith.constant 0 : index
    %c0_32 = arith.constant 0 : index
    %42 = vector.load %arg14[%c0_31, %c0_32] : memref<10x24xf32, #tpu.memory_space<vmem>>, vector<8x24xf32>
    %c0_33 = arith.constant 0 : index
    %c0_34 = arith.constant 0 : index
    %43 = vector.load %arg9[%c0_33, %c0_34] : memref<72x8xf32, #tpu.memory_space<vmem>>, vector<24x8xf32>
    %cst_35 = arith.constant dense<0.000000e+00> : vector<8x8xf32>
    %44 = tpu.matmul %42, %43, %cst_35 {dimension_numbers = #tpu.dot_dimension_numbers<[1], [0], [0], [1], [0, 0, 1, 1], [], []>} : vector<8x24xf32>, vector<24x8xf32>, vector<8x8xf32> -> vector<8x8xf32>
    %45 = arith.addf %41, %44 : vector<8x8xf32>
    %c1_36 = arith.constant 1 : index
    %c0_37 = arith.constant 0 : index
    %46 = vector.load %arg14[%c1_36, %c0_37] : memref<10x24xf32, #tpu.memory_space<vmem>>, vector<8x24xf32>
    %c24 = arith.constant 24 : index
    %c0_38 = arith.constant 0 : index
    %47 = vector.load %arg9[%c24, %c0_38] : memref<72x8xf32, #tpu.memory_space<vmem>>, vector<24x8xf32>
    %cst_39 = arith.constant dense<0.000000e+00> : vector<8x8xf32>
    %48 = tpu.matmul %46, %47, %cst_39 {dimension_numbers = #tpu.dot_dimension_numbers<[1], [0], [0], [1], [0, 0, 1, 1], [], []>} : vector<8x24xf32>, vector<24x8xf32>, vector<8x8xf32> -> vector<8x8xf32>
    %49 = arith.addf %45, %48 : vector<8x8xf32>
    %c2 = arith.constant 2 : index
    %c0_40 = arith.constant 0 : index
    %50 = vector.load %arg14[%c2, %c0_40] : memref<10x24xf32, #tpu.memory_space<vmem>>, vector<8x24xf32>
    %c48 = arith.constant 48 : index
    %c0_41 = arith.constant 0 : index
    %51 = vector.load %arg9[%c48, %c0_41] : memref<72x8xf32, #tpu.memory_space<vmem>>, vector<24x8xf32>
    %cst_42 = arith.constant dense<0.000000e+00> : vector<8x8xf32>
    %52 = tpu.matmul %50, %51, %cst_42 {dimension_numbers = #tpu.dot_dimension_numbers<[1], [0], [0], [1], [0, 0, 1, 1], [], []>} : vector<8x24xf32>, vector<24x8xf32>, vector<8x8xf32> -> vector<8x8xf32>
    %53 = arith.addf %49, %52 : vector<8x8xf32>
    %cst_43 = arith.constant 0.000000e+00 : f32
    %54 = vector.broadcast %cst_43 : f32 to vector<10x8xf32>
    %c0_44 = arith.constant 0 : index
    %c0_45 = arith.constant 0 : index
    %55 = vector.load %arg15[%c0_44, %c0_45] : memref<10x8xf32, #tpu.memory_space<vmem>>, vector<10x8xf32>
    tpu.vector_store %arg15[%c0_44, %c0_45], %54 {strides = array<i32>} : memref<10x8xf32, #tpu.memory_space<vmem>>, vector<10x8xf32>,
    %cst_46 = arith.constant 0.000000e+00 : f32
    %56 = vector.broadcast %cst_46 : f32 to vector<8x8xf32>
    %57 = arith.maximumf %53, %56 : vector<8x8xf32>
    %c1_47 = arith.constant 1 : index
    %c0_48 = arith.constant 0 : index
    %58 = vector.load %arg15[%c1_47, %c0_48] : memref<10x8xf32, #tpu.memory_space<vmem>>, vector<8x8xf32>
    tpu.vector_store %arg15[%c1_47, %c0_48], %57 {strides = array<i32>} : memref<10x8xf32, #tpu.memory_space<vmem>>, vector<8x8xf32>,
    %cst_49 = arith.constant 0.000000e+00 : f32
    %59 = vector.broadcast %cst_49 : f32 to vector<8x8xf32>
    %c0_50 = arith.constant 0 : index
    %c0_51 = arith.constant 0 : index
    %60 = vector.load %arg12[%c0_50, %c0_51] : memref<1x8xf32, #tpu.memory_space<vmem>>, vector<1x8xf32>
    %61 = vector.broadcast %60 : vector<1x8xf32> to vector<8x8xf32>
    %62 = arith.addf %59, %61 : vector<8x8xf32>
    %c0_52 = arith.constant 0 : index
    %c0_53 = arith.constant 0 : index
    %63 = vector.load %arg15[%c0_52, %c0_53] : memref<10x8xf32, #tpu.memory_space<vmem>>, vector<8x8xf32>
    %c0_54 = arith.constant 0 : index
    %c0_55 = arith.constant 0 : index
    %64 = vector.load %arg11[%c0_54, %c0_55] : memref<24x8xf32, #tpu.memory_space<vmem>>, vector<8x8xf32>
    %cst_56 = arith.constant dense<0.000000e+00> : vector<8x8xf32>
    %65 = tpu.matmul %63, %64, %cst_56 {dimension_numbers = #tpu.dot_dimension_numbers<[1], [0], [0], [1], [0, 0, 1, 1], [], []>} : vector<8x8xf32>, vector<8x8xf32>, vector<8x8xf32> -> vector<8x8xf32>
    %66 = arith.addf %62, %65 : vector<8x8xf32>
    %c1_57 = arith.constant 1 : index
    %c0_58 = arith.constant 0 : index
    %67 = vector.load %arg15[%c1_57, %c0_58] : memref<10x8xf32, #tpu.memory_space<vmem>>, vector<8x8xf32>
    %c8 = arith.constant 8 : index
    %c0_59 = arith.constant 0 : index
    %68 = vector.load %arg11[%c8, %c0_59] : memref<24x8xf32, #tpu.memory_space<vmem>>, vector<8x8xf32>
    %cst_60 = arith.constant dense<0.000000e+00> : vector<8x8xf32>
    %69 = tpu.matmul %67, %68, %cst_60 {dimension_numbers = #tpu.dot_dimension_numbers<[1], [0], [0], [1], [0, 0, 1, 1], [], []>} : vector<8x8xf32>, vector<8x8xf32>, vector<8x8xf32> -> vector<8x8xf32>
    %70 = arith.addf %66, %69 : vector<8x8xf32>
    %c2_61 = arith.constant 2 : index
    %c0_62 = arith.constant 0 : index
    %71 = vector.load %arg15[%c2_61, %c0_62] : memref<10x8xf32, #tpu.memory_space<vmem>>, vector<8x8xf32>
    %c16_63 = arith.constant 16 : index
    %c0_64 = arith.constant 0 : index
    %72 = vector.load %arg11[%c16_63, %c0_64] : memref<24x8xf32, #tpu.memory_space<vmem>>, vector<8x8xf32>
    %cst_65 = arith.constant dense<0.000000e+00> : vector<8x8xf32>
    %73 = tpu.matmul %71, %72, %cst_65 {dimension_numbers = #tpu.dot_dimension_numbers<[1], [0], [0], [1], [0, 0, 1, 1], [], []>} : vector<8x8xf32>, vector<8x8xf32>, vector<8x8xf32> -> vector<8x8xf32>
    %74 = arith.addf %70, %73 : vector<8x8xf32>
    %cst_66 = arith.constant 0.000000e+00 : f32
    %75 = vector.broadcast %cst_66 : f32 to vector<8x8xf32>
    %76 = arith.maximumf %74, %75 : vector<8x8xf32>
    %c0_67 = arith.constant 0 : index
    %c0_68 = arith.constant 0 : index
    %c0_69 = arith.constant 0 : index
    %77 = vector.load %arg13[%c0_67, %c0_68, %c0_69] : memref<1x8x8xf32, #tpu.memory_space<vmem>>, vector<1x8x8xf32>
    %78 = vector.shape_cast %77 : vector<1x8x8xf32> to vector<8x8xf32>
    %79 = vector.shape_cast %76 : vector<8x8xf32> to vector<1x8x8xf32>
    tpu.vector_store %arg13[%c0_67, %c0_68, %c0_69], %79 {strides = array<i32>} : memref<1x8x8xf32, #tpu.memory_space<vmem>>, vector<1x8x8xf32>,
    return
  }
  func.func @transform_0(%arg0: i32) -> (i32, i32, i32) {
    %c0_i32 = arith.constant 0 : i32
    %c0_i32_0 = arith.constant 0 : i32
    %c0_i32_1 = arith.constant 0 : i32
    return %arg0, %c0_i32, %c0_i32_0 : i32, i32, i32
  }
  func.func @transform_1(%arg0: i32) -> (i32, i32, i32) {
    %c0_i32 = arith.constant 0 : i32
    %c0_i32_0 = arith.constant 0 : i32
    %c0_i32_1 = arith.constant 0 : i32
    return %arg0, %c0_i32, %c0_i32_0 : i32, i32, i32
  }
  func.func @transform_2(%arg0: i32) -> (i32, i32) {
    %c0_i32 = arith.constant 0 : i32
    %c0_i32_0 = arith.constant 0 : i32
    %c0_i32_1 = arith.constant 0 : i32
    return %c0_i32, %c0_i32_0 : i32, i32
  }
  func.func @transform_3(%arg0: i32) -> (i32, i32) {
    %c0_i32 = arith.constant 0 : i32
    %c0_i32_0 = arith.constant 0 : i32
    %c0_i32_1 = arith.constant 0 : i32
    return %c0_i32, %c0_i32_0 : i32, i32
  }
  func.func @transform_4(%arg0: i32) -> (i32, i32) {
    %c0_i32 = arith.constant 0 : i32
    %c0_i32_0 = arith.constant 0 : i32
    %c0_i32_1 = arith.constant 0 : i32
    return %c0_i32, %c0_i32_0 : i32, i32
  }
  func.func @transform_5(%arg0: i32) -> (i32, i32) {
    %c0_i32 = arith.constant 0 : i32
    %c0_i32_0 = arith.constant 0 : i32
    %c0_i32_1 = arith.constant 0 : i32
    return %c0_i32, %c0_i32_0 : i32, i32
  }
  func.func @transform_6(%arg0: i32) -> (i32, i32) {
    %c0_i32 = arith.constant 0 : i32
    %c0_i32_0 = arith.constant 0 : i32
    %c0_i32_1 = arith.constant 0 : i32
    return %c0_i32, %c0_i32_0 : i32, i32
  }
  func.func @transform_7(%arg0: i32) -> (i32, i32) {
    %c0_i32 = arith.constant 0 : i32
    %c0_i32_0 = arith.constant 0 : i32
    %c0_i32_1 = arith.constant 0 : i32
    return %c0_i32, %c0_i32_0 : i32, i32
  }
  func.func @transform_8(%arg0: i32) -> (i32, i32) {
    %c0_i32 = arith.constant 0 : i32
    %c0_i32_0 = arith.constant 0 : i32
    %c0_i32_1 = arith.constant 0 : i32
    return %c0_i32, %c0_i32_0 : i32, i32
  }
  func.func @transform_9(%arg0: i32) -> (i32, i32) {
    %c0_i32 = arith.constant 0 : i32
    %c0_i32_0 = arith.constant 0 : i32
    %c0_i32_1 = arith.constant 0 : i32
    return %c0_i32, %c0_i32_0 : i32, i32
  }
  func.func @transform_10(%arg0: i32) -> (i32, i32) {
    %c0_i32 = arith.constant 0 : i32
    %c0_i32_0 = arith.constant 0 : i32
    %c0_i32_1 = arith.constant 0 : i32
    return %c0_i32, %c0_i32_0 : i32, i32
  }
  func.func @transform_11(%arg0: i32) -> (i32, i32) {
    %c0_i32 = arith.constant 0 : i32
    %c0_i32_0 = arith.constant 0 : i32
    %c0_i32_1 = arith.constant 0 : i32
    return %c0_i32, %c0_i32_0 : i32, i32
  }
  func.func @transform_12(%arg0: i32) -> (i32, i32, i32) {
    %c0_i32 = arith.constant 0 : i32
    %c0_i32_0 = arith.constant 0 : i32
    %c0_i32_1 = arith.constant 0 : i32
    return %arg0, %c0_i32, %c0_i32_0 : i32, i32, i32
  }
}

module attributes {stable_mosaic.version = 11 : i64} {
  func.func @_upfuse_kernel(%arg0: i32, %arg1: memref<1x16x8xf32, #tpu.memory_space<vmem>>, %arg2: memref<1x16x4xf32, #tpu.memory_space<vmem>>, %arg3: memref<4x2xf32, #tpu.memory_space<vmem>>, %arg4: memref<1x2xf32, #tpu.memory_space<vmem>>, %arg5: memref<8x2xf32, #tpu.memory_space<vmem>>, %arg6: memref<1x2xf32, #tpu.memory_space<vmem>>, %arg7: memref<1x2xf32, #tpu.memory_space<vmem>>, %arg8: memref<1x1xf32, #tpu.memory_space<vmem>>, %arg9: memref<36x4xf32, #tpu.memory_space<vmem>>, %arg10: memref<1x4xf32, #tpu.memory_space<vmem>>, %arg11: memref<12x4xf32, #tpu.memory_space<vmem>>, %arg12: memref<1x4xf32, #tpu.memory_space<vmem>>, %arg13: memref<1x16x4xf32, #tpu.memory_space<vmem>>, %arg14: memref<18x12xf32, #tpu.memory_space<vmem>>, %arg15: memref<18x4xf32, #tpu.memory_space<vmem>>) attributes {dimension_semantics = [#tpu.dimension_semantics<parallel>], iteration_bounds = array<i64: 2>, scalar_prefetch = 0 : i64, scratch_operands = 2 : i64, tpu.core_type = #tpu.core_type<tc>, window_params = [{transform_indices = @transform_0, window_bounds = array<i64: 1, 16, 8>}, {transform_indices = @transform_1, window_bounds = array<i64: 1, 16, 4>}, {pipeline_mode = #tpu.pipeline_mode<synchronous>, transform_indices = @transform_2, window_bounds = array<i64: 4, 2>}, {pipeline_mode = #tpu.pipeline_mode<synchronous>, transform_indices = @transform_3, window_bounds = array<i64: 1, 2>}, {pipeline_mode = #tpu.pipeline_mode<synchronous>, transform_indices = @transform_4, window_bounds = array<i64: 8, 2>}, {pipeline_mode = #tpu.pipeline_mode<synchronous>, transform_indices = @transform_5, window_bounds = array<i64: 1, 2>}, {pipeline_mode = #tpu.pipeline_mode<synchronous>, transform_indices = @transform_6, window_bounds = array<i64: 1, 2>}, {pipeline_mode = #tpu.pipeline_mode<synchronous>, transform_indices = @transform_7, window_bounds = array<i64: 1, 1>}, {pipeline_mode = #tpu.pipeline_mode<synchronous>, transform_indices = @transform_8, window_bounds = array<i64: 36, 4>}, {pipeline_mode = #tpu.pipeline_mode<synchronous>, transform_indices = @transform_9, window_bounds = array<i64: 1, 4>}, {pipeline_mode = #tpu.pipeline_mode<synchronous>, transform_indices = @transform_10, window_bounds = array<i64: 12, 4>}, {pipeline_mode = #tpu.pipeline_mode<synchronous>, transform_indices = @transform_11, window_bounds = array<i64: 1, 4>}, {transform_indices = @transform_12, window_bounds = array<i64: 1, 16, 4>}]} {
    %c0 = arith.constant 0 : index
    %c0_0 = arith.constant 0 : index
    %c0_1 = arith.constant 0 : index
    %0 = vector.load %arg1[%c0, %c0_0, %c0_1] : memref<1x16x8xf32, #tpu.memory_space<vmem>>, vector<1x16x8xf32>
    %1 = vector.shape_cast %0 : vector<1x16x8xf32> to vector<16x8xf32>
    %c0_2 = arith.constant 0 : index
    %c0_3 = arith.constant 0 : index
    %c0_4 = arith.constant 0 : index
    %2 = vector.load %arg2[%c0_2, %c0_3, %c0_4] : memref<1x16x4xf32, #tpu.memory_space<vmem>>, vector<1x16x4xf32>
    %3 = vector.shape_cast %2 : vector<1x16x4xf32> to vector<16x4xf32>
    %c0_5 = arith.constant 0 : index
    %c0_6 = arith.constant 0 : index
    %4 = vector.load %arg3[%c0_5, %c0_6] : memref<4x2xf32, #tpu.memory_space<vmem>>, vector<4x2xf32>
    %cst = arith.constant dense<0.000000e+00> : vector<16x2xf32>
    %5 = tpu.matmul %3, %4, %cst {dimension_numbers = #tpu.dot_dimension_numbers<[1], [0], [0], [1], [0, 0, 1, 1], [], []>} : vector<16x4xf32>, vector<4x2xf32>, vector<16x2xf32> -> vector<16x2xf32>
    %c0_7 = arith.constant 0 : index
    %c0_8 = arith.constant 0 : index
    %6 = vector.load %arg4[%c0_7, %c0_8] : memref<1x2xf32, #tpu.memory_space<vmem>>, vector<1x2xf32>
    %7 = vector.broadcast %6 : vector<1x2xf32> to vector<16x2xf32>
    %8 = arith.addf %5, %7 : vector<16x2xf32>
    %c0_9 = arith.constant 0 : index
    %c0_10 = arith.constant 0 : index
    %9 = vector.load %arg5[%c0_9, %c0_10] : memref<8x2xf32, #tpu.memory_space<vmem>>, vector<8x2xf32>
    %cst_11 = arith.constant dense<0.000000e+00> : vector<16x2xf32>
    %10 = tpu.matmul %1, %9, %cst_11 {dimension_numbers = #tpu.dot_dimension_numbers<[1], [0], [0], [1], [0, 0, 1, 1], [], []>} : vector<16x8xf32>, vector<8x2xf32>, vector<16x2xf32> -> vector<16x2xf32>
    %c0_12 = arith.constant 0 : index
    %c0_13 = arith.constant 0 : index
    %11 = vector.load %arg6[%c0_12, %c0_13] : memref<1x2xf32, #tpu.memory_space<vmem>>, vector<1x2xf32>
    %12 = vector.broadcast %11 : vector<1x2xf32> to vector<16x2xf32>
    %13 = arith.addf %10, %12 : vector<16x2xf32>
    %14 = arith.addf %8, %13 : vector<16x2xf32>
    %cst_14 = arith.constant 0.000000e+00 : f32
    %15 = vector.broadcast %cst_14 : f32 to vector<16x2xf32>
    %16 = arith.maximumf %14, %15 : vector<16x2xf32>
    %c0_15 = arith.constant 0 : index
    %c0_16 = arith.constant 0 : index
    %17 = vector.load %arg7[%c0_15, %c0_16] : memref<1x2xf32, #tpu.memory_space<vmem>>, vector<1x2xf32>
    %18 = vector.broadcast %17 : vector<1x2xf32> to vector<16x2xf32>
    %19 = arith.mulf %16, %18 : vector<16x2xf32>
    %cst_17 = arith.constant dense<0.000000e+00> : vector<16xf32>
    %20 = vector.multi_reduction <add>, %19, %cst_17 [1] : vector<16x2xf32> to vector<16xf32>
    %21 = vector.shape_cast %20 : vector<16xf32> to vector<16x1xf32>
    %c0_18 = arith.constant 0 : index
    %c0_19 = arith.constant 0 : index
    %22 = vector.load %arg8[%c0_18, %c0_19] : memref<1x1xf32, #tpu.memory_space<vmem>>, vector<1x1xf32>
    %23 = vector.broadcast %22 : vector<1x1xf32> to vector<16x1xf32>
    %24 = arith.addf %21, %23 : vector<16x1xf32>
    %cst_20 = arith.constant 5.000000e-01 : f32
    %25 = vector.broadcast %cst_20 : f32 to vector<16x1xf32>
    %26 = arith.mulf %25, %24 : vector<16x1xf32>
    %27 = math.tanh %26 : vector<16x1xf32>
    %cst_21 = arith.constant 1.000000e+00 : f32
    %28 = vector.broadcast %cst_21 : f32 to vector<16x1xf32>
    %29 = arith.addf %27, %28 : vector<16x1xf32>
    %cst_22 = arith.constant 5.000000e-01 : f32
    %30 = vector.broadcast %cst_22 : f32 to vector<16x1xf32>
    %31 = arith.mulf %30, %29 : vector<16x1xf32>
    %32 = vector.broadcast %31 : vector<16x1xf32> to vector<16x4xf32>
    %33 = arith.mulf %3, %32 : vector<16x4xf32>
    %cst_23 = arith.constant 0.000000e+00 : f32
    %34 = vector.broadcast %cst_23 : f32 to vector<18x12xf32>
    %c0_24 = arith.constant 0 : index
    %c0_25 = arith.constant 0 : index
    %35 = vector.load %arg14[%c0_24, %c0_25] : memref<18x12xf32, #tpu.memory_space<vmem>>, vector<18x12xf32>
    tpu.vector_store %arg14[%c0_24, %c0_25], %34 {strides = array<i32>} : memref<18x12xf32, #tpu.memory_space<vmem>>, vector<18x12xf32>,
    %c1 = arith.constant 1 : index
    %c0_26 = arith.constant 0 : index
    %36 = vector.load %arg14[%c1, %c0_26] : memref<18x12xf32, #tpu.memory_space<vmem>>, vector<16x8xf32>
    tpu.vector_store %arg14[%c1, %c0_26], %1 {strides = array<i32>} : memref<18x12xf32, #tpu.memory_space<vmem>>, vector<16x8xf32>,
    %c1_27 = arith.constant 1 : index
    %c8 = arith.constant 8 : index
    %37 = vector.load %arg14[%c1_27, %c8] : memref<18x12xf32, #tpu.memory_space<vmem>>, vector<16x4xf32>
    tpu.vector_store %arg14[%c1_27, %c8], %33 {strides = array<i32>} : memref<18x12xf32, #tpu.memory_space<vmem>>, vector<16x4xf32>,
    %cst_28 = arith.constant 0.000000e+00 : f32
    %38 = vector.broadcast %cst_28 : f32 to vector<16x4xf32>
    %c0_29 = arith.constant 0 : index
    %c0_30 = arith.constant 0 : index
    %39 = vector.load %arg10[%c0_29, %c0_30] : memref<1x4xf32, #tpu.memory_space<vmem>>, vector<1x4xf32>
    %40 = vector.broadcast %39 : vector<1x4xf32> to vector<16x4xf32>
    %41 = arith.addf %38, %40 : vector<16x4xf32>
    %c0_31 = arith.constant 0 : index
    %c0_32 = arith.constant 0 : index
    %42 = vector.load %arg14[%c0_31, %c0_32] : memref<18x12xf32, #tpu.memory_space<vmem>>, vector<16x12xf32>
    %c0_33 = arith.constant 0 : index
    %c0_34 = arith.constant 0 : index
    %43 = vector.load %arg9[%c0_33, %c0_34] : memref<36x4xf32, #tpu.memory_space<vmem>>, vector<12x4xf32>
    %cst_35 = arith.constant dense<0.000000e+00> : vector<16x4xf32>
    %44 = tpu.matmul %42, %43, %cst_35 {dimension_numbers = #tpu.dot_dimension_numbers<[1], [0], [0], [1], [0, 0, 1, 1], [], []>} : vector<16x12xf32>, vector<12x4xf32>, vector<16x4xf32> -> vector<16x4xf32>
    %45 = arith.addf %41, %44 : vector<16x4xf32>
    %c1_36 = arith.constant 1 : index
    %c0_37 = arith.constant 0 : index
    %46 = vector.load %arg14[%c1_36, %c0_37] : memref<18x12xf32, #tpu.memory_space<vmem>>, vector<16x12xf32>
    %c12 = arith.constant 12 : index
    %c0_38 = arith.constant 0 : index
    %47 = vector.load %arg9[%c12, %c0_38] : memref<36x4xf32, #tpu.memory_space<vmem>>, vector<12x4xf32>
    %cst_39 = arith.constant dense<0.000000e+00> : vector<16x4xf32>
    %48 = tpu.matmul %46, %47, %cst_39 {dimension_numbers = #tpu.dot_dimension_numbers<[1], [0], [0], [1], [0, 0, 1, 1], [], []>} : vector<16x12xf32>, vector<12x4xf32>, vector<16x4xf32> -> vector<16x4xf32>
    %49 = arith.addf %45, %48 : vector<16x4xf32>
    %c2 = arith.constant 2 : index
    %c0_40 = arith.constant 0 : index
    %50 = vector.load %arg14[%c2, %c0_40] : memref<18x12xf32, #tpu.memory_space<vmem>>, vector<16x12xf32>
    %c24 = arith.constant 24 : index
    %c0_41 = arith.constant 0 : index
    %51 = vector.load %arg9[%c24, %c0_41] : memref<36x4xf32, #tpu.memory_space<vmem>>, vector<12x4xf32>
    %cst_42 = arith.constant dense<0.000000e+00> : vector<16x4xf32>
    %52 = tpu.matmul %50, %51, %cst_42 {dimension_numbers = #tpu.dot_dimension_numbers<[1], [0], [0], [1], [0, 0, 1, 1], [], []>} : vector<16x12xf32>, vector<12x4xf32>, vector<16x4xf32> -> vector<16x4xf32>
    %53 = arith.addf %49, %52 : vector<16x4xf32>
    %cst_43 = arith.constant 0.000000e+00 : f32
    %54 = vector.broadcast %cst_43 : f32 to vector<18x4xf32>
    %c0_44 = arith.constant 0 : index
    %c0_45 = arith.constant 0 : index
    %55 = vector.load %arg15[%c0_44, %c0_45] : memref<18x4xf32, #tpu.memory_space<vmem>>, vector<18x4xf32>
    tpu.vector_store %arg15[%c0_44, %c0_45], %54 {strides = array<i32>} : memref<18x4xf32, #tpu.memory_space<vmem>>, vector<18x4xf32>,
    %cst_46 = arith.constant 0.000000e+00 : f32
    %56 = vector.broadcast %cst_46 : f32 to vector<16x4xf32>
    %57 = arith.maximumf %53, %56 : vector<16x4xf32>
    %c1_47 = arith.constant 1 : index
    %c0_48 = arith.constant 0 : index
    %58 = vector.load %arg15[%c1_47, %c0_48] : memref<18x4xf32, #tpu.memory_space<vmem>>, vector<16x4xf32>
    tpu.vector_store %arg15[%c1_47, %c0_48], %57 {strides = array<i32>} : memref<18x4xf32, #tpu.memory_space<vmem>>, vector<16x4xf32>,
    %cst_49 = arith.constant 0.000000e+00 : f32
    %59 = vector.broadcast %cst_49 : f32 to vector<16x4xf32>
    %c0_50 = arith.constant 0 : index
    %c0_51 = arith.constant 0 : index
    %60 = vector.load %arg12[%c0_50, %c0_51] : memref<1x4xf32, #tpu.memory_space<vmem>>, vector<1x4xf32>
    %61 = vector.broadcast %60 : vector<1x4xf32> to vector<16x4xf32>
    %62 = arith.addf %59, %61 : vector<16x4xf32>
    %c0_52 = arith.constant 0 : index
    %c0_53 = arith.constant 0 : index
    %63 = vector.load %arg15[%c0_52, %c0_53] : memref<18x4xf32, #tpu.memory_space<vmem>>, vector<16x4xf32>
    %c0_54 = arith.constant 0 : index
    %c0_55 = arith.constant 0 : index
    %64 = vector.load %arg11[%c0_54, %c0_55] : memref<12x4xf32, #tpu.memory_space<vmem>>, vector<4x4xf32>
    %cst_56 = arith.constant dense<0.000000e+00> : vector<16x4xf32>
    %65 = tpu.matmul %63, %64, %cst_56 {dimension_numbers = #tpu.dot_dimension_numbers<[1], [0], [0], [1], [0, 0, 1, 1], [], []>} : vector<16x4xf32>, vector<4x4xf32>, vector<16x4xf32> -> vector<16x4xf32>
    %66 = arith.addf %62, %65 : vector<16x4xf32>
    %c1_57 = arith.constant 1 : index
    %c0_58 = arith.constant 0 : index
    %67 = vector.load %arg15[%c1_57, %c0_58] : memref<18x4xf32, #tpu.memory_space<vmem>>, vector<16x4xf32>
    %c4 = arith.constant 4 : index
    %c0_59 = arith.constant 0 : index
    %68 = vector.load %arg11[%c4, %c0_59] : memref<12x4xf32, #tpu.memory_space<vmem>>, vector<4x4xf32>
    %cst_60 = arith.constant dense<0.000000e+00> : vector<16x4xf32>
    %69 = tpu.matmul %67, %68, %cst_60 {dimension_numbers = #tpu.dot_dimension_numbers<[1], [0], [0], [1], [0, 0, 1, 1], [], []>} : vector<16x4xf32>, vector<4x4xf32>, vector<16x4xf32> -> vector<16x4xf32>
    %70 = arith.addf %66, %69 : vector<16x4xf32>
    %c2_61 = arith.constant 2 : index
    %c0_62 = arith.constant 0 : index
    %71 = vector.load %arg15[%c2_61, %c0_62] : memref<18x4xf32, #tpu.memory_space<vmem>>, vector<16x4xf32>
    %c8_63 = arith.constant 8 : index
    %c0_64 = arith.constant 0 : index
    %72 = vector.load %arg11[%c8_63, %c0_64] : memref<12x4xf32, #tpu.memory_space<vmem>>, vector<4x4xf32>
    %cst_65 = arith.constant dense<0.000000e+00> : vector<16x4xf32>
    %73 = tpu.matmul %71, %72, %cst_65 {dimension_numbers = #tpu.dot_dimension_numbers<[1], [0], [0], [1], [0, 0, 1, 1], [], []>} : vector<16x4xf32>, vector<4x4xf32>, vector<16x4xf32> -> vector<16x4xf32>
    %74 = arith.addf %70, %73 : vector<16x4xf32>
    %cst_66 = arith.constant 0.000000e+00 : f32
    %75 = vector.broadcast %cst_66 : f32 to vector<16x4xf32>
    %76 = arith.maximumf %74, %75 : vector<16x4xf32>
    %c0_67 = arith.constant 0 : index
    %c0_68 = arith.constant 0 : index
    %c0_69 = arith.constant 0 : index
    %77 = vector.load %arg13[%c0_67, %c0_68, %c0_69] : memref<1x16x4xf32, #tpu.memory_space<vmem>>, vector<1x16x4xf32>
    %78 = vector.shape_cast %77 : vector<1x16x4xf32> to vector<16x4xf32>
    %79 = vector.shape_cast %76 : vector<16x4xf32> to vector<1x16x4xf32>
    tpu.vector_store %arg13[%c0_67, %c0_68, %c0_69], %79 {strides = array<i32>} : memref<1x16x4xf32, #tpu.memory_space<vmem>>, vector<1x16x4xf32>,
    return
  }
  func.func @transform_0(%arg0: i32) -> (i32, i32, i32) {
    %c0_i32 = arith.constant 0 : i32
    %c0_i32_0 = arith.constant 0 : i32
    %c0_i32_1 = arith.constant 0 : i32
    return %arg0, %c0_i32, %c0_i32_0 : i32, i32, i32
  }
  func.func @transform_1(%arg0: i32) -> (i32, i32, i32) {
    %c0_i32 = arith.constant 0 : i32
    %c0_i32_0 = arith.constant 0 : i32
    %c0_i32_1 = arith.constant 0 : i32
    return %arg0, %c0_i32, %c0_i32_0 : i32, i32, i32
  }
  func.func @transform_2(%arg0: i32) -> (i32, i32) {
    %c0_i32 = arith.constant 0 : i32
    %c0_i32_0 = arith.constant 0 : i32
    %c0_i32_1 = arith.constant 0 : i32
    return %c0_i32, %c0_i32_0 : i32, i32
  }
  func.func @transform_3(%arg0: i32) -> (i32, i32) {
    %c0_i32 = arith.constant 0 : i32
    %c0_i32_0 = arith.constant 0 : i32
    %c0_i32_1 = arith.constant 0 : i32
    return %c0_i32, %c0_i32_0 : i32, i32
  }
  func.func @transform_4(%arg0: i32) -> (i32, i32) {
    %c0_i32 = arith.constant 0 : i32
    %c0_i32_0 = arith.constant 0 : i32
    %c0_i32_1 = arith.constant 0 : i32
    return %c0_i32, %c0_i32_0 : i32, i32
  }
  func.func @transform_5(%arg0: i32) -> (i32, i32) {
    %c0_i32 = arith.constant 0 : i32
    %c0_i32_0 = arith.constant 0 : i32
    %c0_i32_1 = arith.constant 0 : i32
    return %c0_i32, %c0_i32_0 : i32, i32
  }
  func.func @transform_6(%arg0: i32) -> (i32, i32) {
    %c0_i32 = arith.constant 0 : i32
    %c0_i32_0 = arith.constant 0 : i32
    %c0_i32_1 = arith.constant 0 : i32
    return %c0_i32, %c0_i32_0 : i32, i32
  }
  func.func @transform_7(%arg0: i32) -> (i32, i32) {
    %c0_i32 = arith.constant 0 : i32
    %c0_i32_0 = arith.constant 0 : i32
    %c0_i32_1 = arith.constant 0 : i32
    return %c0_i32, %c0_i32_0 : i32, i32
  }
  func.func @transform_8(%arg0: i32) -> (i32, i32) {
    %c0_i32 = arith.constant 0 : i32
    %c0_i32_0 = arith.constant 0 : i32
    %c0_i32_1 = arith.constant 0 : i32
    return %c0_i32, %c0_i32_0 : i32, i32
  }
  func.func @transform_9(%arg0: i32) -> (i32, i32) {
    %c0_i32 = arith.constant 0 : i32
    %c0_i32_0 = arith.constant 0 : i32
    %c0_i32_1 = arith.constant 0 : i32
    return %c0_i32, %c0_i32_0 : i32, i32
  }
  func.func @transform_10(%arg0: i32) -> (i32, i32) {
    %c0_i32 = arith.constant 0 : i32
    %c0_i32_0 = arith.constant 0 : i32
    %c0_i32_1 = arith.constant 0 : i32
    return %c0_i32, %c0_i32_0 : i32, i32
  }
  func.func @transform_11(%arg0: i32) -> (i32, i32) {
    %c0_i32 = arith.constant 0 : i32
    %c0_i32_0 = arith.constant 0 : i32
    %c0_i32_1 = arith.constant 0 : i32
    return %c0_i32, %c0_i32_0 : i32, i32
  }
  func.func @transform_12(%arg0: i32) -> (i32, i32, i32) {
    %c0_i32 = arith.constant 0 : i32
    %c0_i32_0 = arith.constant 0 : i32
    %c0_i32_1 = arith.constant 0 : i32
    return %arg0, %c0_i32, %c0_i32_0 : i32, i32, i32
  }
}

module attributes {stable_mosaic.version = 11 : i64} {
  func.func @_final_softmax_kernel(%arg0: i32, %arg1: memref<4x2x16xf32, #tpu.memory_space<vmem>>, %arg2: memref<4x1x1xf32, #tpu.memory_space<vmem>>, %arg3: memref<1x1xf32, #tpu.memory_space<vmem>>, %arg4: memref<2x16xf32, #tpu.memory_space<vmem>>) attributes {dimension_semantics = [#tpu.dimension_semantics<arbitrary>], iteration_bounds = array<i64: 1>, scalar_prefetch = 0 : i64, scratch_operands = 0 : i64, tpu.core_type = #tpu.core_type<tc>, window_params = [{pipeline_mode = #tpu.pipeline_mode<synchronous>, transform_indices = @transform_0, window_bounds = array<i64: 4, 2, 16>}, {pipeline_mode = #tpu.pipeline_mode<synchronous>, transform_indices = @transform_1, window_bounds = array<i64: 4, 1, 1>}, {pipeline_mode = #tpu.pipeline_mode<synchronous>, transform_indices = @transform_2, window_bounds = array<i64: 1, 1>}, {pipeline_mode = #tpu.pipeline_mode<synchronous>, transform_indices = @transform_3, window_bounds = array<i64: 2, 16>}]} {
    %cst = arith.constant 0.000000e+00 : f32
    %0 = vector.broadcast %cst : f32 to vector<2x16xf32>
    %c0 = arith.constant 0 : index
    %c0_0 = arith.constant 0 : index
    %1 = vector.load %arg3[%c0, %c0_0] : memref<1x1xf32, #tpu.memory_space<vmem>>, vector<1x1xf32>
    %2 = vector.broadcast %1 : vector<1x1xf32> to vector<2x16xf32>
    %3 = arith.addf %0, %2 : vector<2x16xf32>
    %c0_1 = arith.constant 0 : index
    %c0_2 = arith.constant 0 : index
    %c0_3 = arith.constant 0 : index
    %4 = vector.load %arg1[%c0_1, %c0_2, %c0_3] : memref<4x2x16xf32, #tpu.memory_space<vmem>>, vector<1x2x16xf32>
    %5 = vector.shape_cast %4 : vector<1x2x16xf32> to vector<2x16xf32>
    %c0_4 = arith.constant 0 : index
    %c0_5 = arith.constant 0 : index
    %c0_6 = arith.constant 0 : index
    %6 = vector.load %arg2[%c0_4, %c0_5, %c0_6] : memref<4x1x1xf32, #tpu.memory_space<vmem>>, vector<1x1x1xf32>
    %7 = vector.shape_cast %6 : vector<1x1x1xf32> to vector<1x1xf32>
    %8 = vector.broadcast %7 : vector<1x1xf32> to vector<2x16xf32>
    %9 = arith.mulf %5, %8 : vector<2x16xf32>
    %10 = arith.addf %3, %9 : vector<2x16xf32>
    %c1 = arith.constant 1 : index
    %c0_7 = arith.constant 0 : index
    %c0_8 = arith.constant 0 : index
    %11 = vector.load %arg1[%c1, %c0_7, %c0_8] : memref<4x2x16xf32, #tpu.memory_space<vmem>>, vector<1x2x16xf32>
    %12 = vector.shape_cast %11 : vector<1x2x16xf32> to vector<2x16xf32>
    %c1_9 = arith.constant 1 : index
    %c0_10 = arith.constant 0 : index
    %c0_11 = arith.constant 0 : index
    %13 = vector.load %arg2[%c1_9, %c0_10, %c0_11] : memref<4x1x1xf32, #tpu.memory_space<vmem>>, vector<1x1x1xf32>
    %14 = vector.shape_cast %13 : vector<1x1x1xf32> to vector<1x1xf32>
    %15 = vector.broadcast %14 : vector<1x1xf32> to vector<2x16xf32>
    %16 = arith.mulf %12, %15 : vector<2x16xf32>
    %17 = arith.addf %10, %16 : vector<2x16xf32>
    %c2 = arith.constant 2 : index
    %c0_12 = arith.constant 0 : index
    %c0_13 = arith.constant 0 : index
    %18 = vector.load %arg1[%c2, %c0_12, %c0_13] : memref<4x2x16xf32, #tpu.memory_space<vmem>>, vector<1x2x16xf32>
    %19 = vector.shape_cast %18 : vector<1x2x16xf32> to vector<2x16xf32>
    %c2_14 = arith.constant 2 : index
    %c0_15 = arith.constant 0 : index
    %c0_16 = arith.constant 0 : index
    %20 = vector.load %arg2[%c2_14, %c0_15, %c0_16] : memref<4x1x1xf32, #tpu.memory_space<vmem>>, vector<1x1x1xf32>
    %21 = vector.shape_cast %20 : vector<1x1x1xf32> to vector<1x1xf32>
    %22 = vector.broadcast %21 : vector<1x1xf32> to vector<2x16xf32>
    %23 = arith.mulf %19, %22 : vector<2x16xf32>
    %24 = arith.addf %17, %23 : vector<2x16xf32>
    %c3 = arith.constant 3 : index
    %c0_17 = arith.constant 0 : index
    %c0_18 = arith.constant 0 : index
    %25 = vector.load %arg1[%c3, %c0_17, %c0_18] : memref<4x2x16xf32, #tpu.memory_space<vmem>>, vector<1x2x16xf32>
    %26 = vector.shape_cast %25 : vector<1x2x16xf32> to vector<2x16xf32>
    %c3_19 = arith.constant 3 : index
    %c0_20 = arith.constant 0 : index
    %c0_21 = arith.constant 0 : index
    %27 = vector.load %arg2[%c3_19, %c0_20, %c0_21] : memref<4x1x1xf32, #tpu.memory_space<vmem>>, vector<1x1x1xf32>
    %28 = vector.shape_cast %27 : vector<1x1x1xf32> to vector<1x1xf32>
    %29 = vector.broadcast %28 : vector<1x1xf32> to vector<2x16xf32>
    %30 = arith.mulf %26, %29 : vector<2x16xf32>
    %31 = arith.addf %24, %30 : vector<2x16xf32>
    %cst_22 = arith.constant dense<0xFF800000> : vector<2xf32>
    %32 = vector.multi_reduction <maximumf>, %31, %cst_22 [1] : vector<2x16xf32> to vector<2xf32>
    %33 = vector.shape_cast %32 : vector<2xf32> to vector<2x1xf32>
    %34 = vector.broadcast %33 : vector<2x1xf32> to vector<2x16xf32>
    %35 = arith.subf %31, %34 : vector<2x16xf32>
    %36 = math.exp %35 : vector<2x16xf32>
    %cst_23 = arith.constant dense<0.000000e+00> : vector<2xf32>
    %37 = vector.multi_reduction <add>, %36, %cst_23 [1] : vector<2x16xf32> to vector<2xf32>
    %38 = vector.shape_cast %37 : vector<2xf32> to vector<2x1xf32>
    %39 = vector.broadcast %38 : vector<2x1xf32> to vector<2x16xf32>
    %40 = arith.divf %36, %39 : vector<2x16xf32>
    %c0_24 = arith.constant 0 : index
    %c0_25 = arith.constant 0 : index
    %41 = vector.load %arg4[%c0_24, %c0_25] : memref<2x16xf32, #tpu.memory_space<vmem>>, vector<2x16xf32>
    tpu.vector_store %arg4[%c0_24, %c0_25], %40 {strides = array<i32>} : memref<2x16xf32, #tpu.memory_space<vmem>>, vector<2x16xf32>,
    return
  }
  func.func @transform_0(%arg0: i32) -> (i32, i32, i32) {
    %c0_i32 = arith.constant 0 : i32
    %c0_i32_0 = arith.constant 0 : i32
    %c0_i32_1 = arith.constant 0 : i32
    %c0_i32_2 = arith.constant 0 : i32
    return %c0_i32, %c0_i32_0, %c0_i32_1 : i32, i32, i32
  }
  func.func @transform_1(%arg0: i32) -> (i32, i32, i32) {
    %c0_i32 = arith.constant 0 : i32
    %c0_i32_0 = arith.constant 0 : i32
    %c0_i32_1 = arith.constant 0 : i32
    %c0_i32_2 = arith.constant 0 : i32
    return %c0_i32, %c0_i32_0, %c0_i32_1 : i32, i32, i32
  }
  func.func @transform_2(%arg0: i32) -> (i32, i32) {
    %c0_i32 = arith.constant 0 : i32
    %c0_i32_0 = arith.constant 0 : i32
    %c0_i32_1 = arith.constant 0 : i32
    return %c0_i32, %c0_i32_0 : i32, i32
  }
  func.func @transform_3(%arg0: i32) -> (i32, i32) {
    %c0_i32 = arith.constant 0 : i32
    %c0_i32_0 = arith.constant 0 : i32
    %c0_i32_1 = arith.constant 0 : i32
    return %c0_i32, %c0_i32_0 : i32, i32
  }
}

</mosaic_0001>

<bundles_post_ra>
// kernel: eq.22
= control target key start
LH: loop header
LB: loop body
LE: loop exit
PB: predicated region body
PF: predicated region fallthrough
CT: control target
= control target key end

     0   :  { %s259_s10 = smov 124   ;;  %s260_s11 = smov 116   ;;  %vm3_vm0 = vcmask 31744   ;;  %vm9_vm1 = vcmask 1048544   ;;  %vm15_vm2 = vcmask 1015744   ;;  %vm21_vm3 = vcmask 982944   ;;  %s399_s0 = inlined_call_operand.vmem [shape: s32[32,4], index: 0, kind: input, shape index: {}]   ;;  %s400_s1 = inlined_call_operand.vmem [shape: s32[128], index: 1, kind: output, shape index: {}]  }
   0x1   :  { %v197_v0 = vld [vmem:[%s399_s0 + $0x1f] sm:$0x1]   ;;  %v199_v1 = vld [vmem:[%s399_s0 + $0x1d] sm:$0x1]   ;;  %v198_v2 = vld [vmem:[%s399_s0 + $0x1e] sm:$0x1]  }
   0x2   :  { %7 = vrot.lane.b32.xlu0 %v197_v0, %s259_s10  ;;  %19 = vrot.lane.b32.xlu1 %v199_v1, %s260_s11  ;;  %v200_v3 = vld [vmem:[%s399_s0 + $0x1c] sm:$0x1]   ;;  %s261_s16 = smov 120   ;;  %s262_s17 = smov 112   ;;  %v201_v4 = vld [vmem:[%s399_s0 + $0x1b] sm:$0x1]  }
   0x3   :  { %v202_v5 = vld [vmem:[%s399_s0 + $0x1a] sm:$0x1]   ;;  %s263_s22 = smov 108   ;;  %s264_s23 = smov 104   ;;  %v203_v6 = vld [vmem:[%s399_s0 + $0x19] sm:$0x1]  }
   0x4   :  { %v204_v7 = vld [vmem:[%s399_s0 + $0x18] sm:$0x1]   ;;  %s265_s28 = smov 100   ;;  %s266_s29 = smov 96   ;;  %v205_v8 = vld [vmem:[%s399_s0 + $0x17] sm:$0x1]  }
   0x5   :  { %v206_v9 = vld [vmem:[%s399_s0 + $0x16] sm:$0x1]   ;;  %v2_v10 = vld [vmem:[%s399_s0] sm:$0x1]   ;;  %s267_s7 = smov 92   ;;  %s268_s8 = smov 88  }
   0x6   :  { %13 = vrot.lane.b32.xlu0 %v198_v2, %s261_s16  ;;  %25 = vrot.lane.b32.xlu1 %v200_v3, %s262_s17  ;;  %4 = vst.msk [vmem:[#allocation0] sm:$0x1] %vm3_vm0, %v2_v10   ;;  %v207_v11 = vld [vmem:[%s399_s0 + $0x15] sm:$0x1]   ;;  %v208_v12 = vld [vmem:[%s399_s0 + $0x14] sm:$0x1]  }
   0x7   :  { %s269_s13 = smov 84   ;;  %s270_s14 = smov 80   ;;  %v209_v13 = vld [vmem:[%s399_s0 + $0x13] sm:$0x1]   ;;  %v210_v14 = vld [vmem:[%s399_s0 + $0x12] sm:$0x1]  }
   0x8   :  { %s271_s19 = smov 76   ;;  %s272_s20 = smov 72   ;;  %v211_v15 = vld [vmem:[%s399_s0 + $0x11] sm:$0x1]   ;;  %v212_v16 = vld [vmem:[%s399_s0 + $0x10] sm:$0x1]  }
   0x9   :  { %s273_s25 = smov 68   ;;  %s274_s26 = smov 64   ;;  %v213_v17 = vld [vmem:[%s399_s0 + $0xf] sm:$0x1]   ;;  %v214_v18 = vld [vmem:[%s399_s0 + $0xe] sm:$0x1]  }
   0xa   :  { %31 = vrot.lane.b32.xlu0 %v201_v4, %s263_s22  ;;  %37 = vrot.lane.b32.xlu1 %v202_v5, %s264_s23  ;;  %s275_s2 = smov 60   ;;  %s276_s3 = smov 56   ;;  %v215_v19 = vld [vmem:[%s399_s0 + $0xd] sm:$0x1]   ;;  %v216_v20 = vld [vmem:[%s399_s0 + $0xc] sm:$0x1]  }
   0xb   :  { %s278_s9 = smov 48   ;;  %v217_v21 = vld [vmem:[%s399_s0 + $0xb] sm:$0x1]   ;;  %v218_v22 = vld [vmem:[%s399_s0 + $0xa] sm:$0x1]   ;;  %s280_s15 = smov 40  }
   0xc   :  { %v219_v23 = vld [vmem:[%s399_s0 + $0x9] sm:$0x1]   ;;  %v220_v24 = vld [vmem:[%s399_s0 + $0x8] sm:$0x1]   ;;  %s282_s21 = smov 32   ;;  %s284_s27 = smov 24  }
   0xd   :  { %v221_v25 = vld [vmem:[%s399_s0 + $0x7] sm:$0x1]   ;;  %v222_v26 = vld [vmem:[%s399_s0 + $0x6] sm:$0x1]   ;;  %v223_v27 = vld [vmem:[%s399_s0 + $0x5] sm:$0x1]  }
   0xe   :  { %43 = vrot.lane.b32.xlu0 %v203_v6, %s265_s28  ;;  %49 = vrot.lane.b32.xlu1 %v204_v7, %s266_s29  ;;  %v224_v28 = vld [vmem:[%s399_s0 + $0x4] sm:$0x1]   ;;  %s286_s4 = smov 16   ;;  %v225_v29 = vld [vmem:[%s399_s0 + $0x3] sm:$0x1]   ;;  %s288_s10 = smov 8  }
   0xf   :  { %v226_v30 = vld [vmem:[%s399_s0 + $0x2] sm:$0x1]   ;;  %v227_v31 = vld [vmem:[%s399_s0 + $0x1] sm:$0x1]   ;;  %s289_s0 = smov 4   ;;  %vm27_vm4 = vcmask 950144  }
  0x10   :  { %vm33_vm5 = vcmask 917344   ;;  %vm39_vm6 = vcmask 884544   ;;  %vm45_vm7 = vcmask 851744   ;;  %vm51_vm8 = vcmask 818944  }
  0x11   :  { %vm57_vm9 = vcmask 786144   ;;  %vm63_vm10 = vcmask 753344   ;;  %vm69_vm11 = vcmask 720544   ;;  %vm75_vm12 = vcmask 687744  }
  0x12   :  { %55 = vrot.lane.b32.xlu0 %v205_v8, %s267_s7  ;;  %61 = vrot.lane.b32.xlu1 %v206_v9, %s268_s8  ;;  %s277_s8 = smov 52   ;;  %vm81_vm13 = vcmask 654944   ;;  %vm87_vm14 = vcmask 622144   ;;  %vm93_vm15 = vcmask 589344   ;;  %vm99_vm0 = vcmask 556544  }
  0x16   :  { %67 = vrot.lane.b32.xlu0 %v207_v11, %s269_s13  ;;  %73 = vrot.lane.b32.xlu1 %v208_v12, %s270_s14  ;;  %s279_s14 = smov 44  }
  0x1a   :  { %79 = vrot.lane.b32.xlu0 %v209_v13, %s271_s19  ;;  %85 = vrot.lane.b32.xlu1 %v210_v14, %s272_s20  ;;  %s281_s20 = smov 36  }
  0x1e   :  { %91 = vrot.lane.b32.xlu0 %v211_v15, %s273_s25  ;;  %97 = vrot.lane.b32.xlu1 %v212_v16, %s274_s26  ;;  %s283_s26 = smov 28  }
  0x22   :  { %103 = vrot.lane.b32.xlu0 %v213_v17, %s275_s2  ;;  %109 = vrot.lane.b32.xlu1 %v214_v18, %s276_s3  ;;  %s285_s3 = smov 20  }
  0x26   :  { %115 = vrot.lane.b32.xlu0 %v215_v19, %s277_s8  ;;  %121 = vrot.lane.b32.xlu1 %v216_v20, %s278_s9  ;;  %s287_s9 = smov 12  }
  0x2a   :  { %127 = vrot.lane.b32.xlu0 %v217_v21, %s279_s14  ;;  %133 = vrot.lane.b32.xlu1 %v218_v22, %s280_s15 }
  0x2e   :  { %139 = vrot.lane.b32.xlu0 %v219_v23, %s281_s20  ;;  %145 = vrot.lane.b32.xlu1 %v220_v24, %s282_s21 }
  0x32   :  { %151 = vrot.lane.b32.xlu0 %v221_v25, %s283_s26  ;;  %157 = vrot.lane.b32.xlu1 %v222_v26, %s284_s27 }
  0x36   :  { %163 = vrot.lane.b32.xlu0 %v223_v27, %s285_s3  ;;  %169 = vrot.lane.b32.xlu1 %v224_v28, %s286_s4 }
  0x3a   :  { %175 = vrot.lane.b32.xlu0 %v225_v29, %s287_s9  ;;  %181 = vrot.lane.b32.xlu1 %v226_v30, %s288_s10 }
  0x3e   :  { %187 = vrot.lane.b32.xlu0 %v227_v31, %s289_s0 }
  0x74   :  { %v8_v32 = vpop.permute.xlu0 %7   ;;  %v20_v33 = vpop.permute.xlu1 %19  }
  0x75   :  { %10 = vst.msk [vmem:[#allocation0] sm:$0x1] %vm9_vm1, %v8_v32   ;;  %vm105_vm1 = vcmask 523744  }
  0x78   :  { %v14_v34 = vpop.permute.xlu0 %13   ;;  %v26_v35 = vpop.permute.xlu1 %25  }
  0x79   :  { %16 = vst.msk [vmem:[#allocation0] sm:$0x1] %vm15_vm2, %v14_v34   ;;  %vm111_vm2 = vcmask 490944  }
  0x7a   :  { %22 = vst.msk [vmem:[#allocation0] sm:$0x1] %vm21_vm3, %v20_v33   ;;  %vm117_vm3 = vcmask 458144  }
  0x7b   :  { %28 = vst.msk [vmem:[#allocation0] sm:$0x1] %vm27_vm4, %v26_v35   ;;  %vm123_vm4 = vcmask 425344  }
  0x7c   :  { %v32_v36 = vpop.permute.xlu0 %31   ;;  %v38_v37 = vpop.permute.xlu1 %37  }
  0x7d   :  { %34 = vst.msk [vmem:[#allocation0] sm:$0x1] %vm33_vm5, %v32_v36   ;;  %vm129_vm5 = vcmask 392544  }
  0x7e   :  { %40 = vst.msk [vmem:[#allocation0] sm:$0x1] %vm39_vm6, %v38_v37   ;;  %vm135_vm6 = vcmask 359744  }
  0x80   :  { %v44_v38 = vpop.permute.xlu0 %43   ;;  %v50_v39 = vpop.permute.xlu1 %49  }
  0x81   :  { %46 = vst.msk [vmem:[#allocation0] sm:$0x1] %vm45_vm7, %v44_v38   ;;  %vm141_vm7 = vcmask 326944  }
  0x82   :  { %52 = vst.msk [vmem:[#allocation0] sm:$0x1] %vm51_vm8, %v50_v39   ;;  %vm147_vm8 = vcmask 294144  }
  0x84   :  { %v56_v40 = vpop.permute.xlu0 %55   ;;  %v62_v41 = vpop.permute.xlu1 %61  }
  0x85   :  { %58 = vst.msk [vmem:[#allocation0] sm:$0x1] %vm57_vm9, %v56_v40   ;;  %vm153_vm9 = vcmask 261344  }
  0x86   :  { %64 = vst.msk [vmem:[#allocation0] sm:$0x1] %vm63_vm10, %v62_v41   ;;  %vm159_vm10 = vcmask 228544  }
  0x88   :  { %v68_v42 = vpop.permute.xlu0 %67   ;;  %v74_v43 = vpop.permute.xlu1 %73  }
  0x89   :  { %70 = vst.msk [vmem:[#allocation0] sm:$0x1] %vm69_vm11, %v68_v42   ;;  %vm165_vm11 = vcmask 195744  }
  0x8a   :  { %76 = vst.msk [vmem:[#allocation0] sm:$0x1] %vm75_vm12, %v74_v43   ;;  %vm171_vm12 = vcmask 162944  }
  0x8c   :  { %v80_v44 = vpop.permute.xlu0 %79   ;;  %v86_v45 = vpop.permute.xlu1 %85  }
  0x8d   :  { %82 = vst.msk [vmem:[#allocation0] sm:$0x1] %vm81_vm13, %v80_v44   ;;  %vm177_vm13 = vcmask 130144  }
  0x8e   :  { %88 = vst.msk [vmem:[#allocation0] sm:$0x1] %vm87_vm14, %v86_v45   ;;  %vm183_vm14 = vcmask 97344  }
  0x90   :  { %v92_v46 = vpop.permute.xlu0 %91   ;;  %v98_v47 = vpop.permute.xlu1 %97  }
  0x91   :  { %94 = vst.msk [vmem:[#allocation0] sm:$0x1] %vm93_vm15, %v92_v46   ;;  %vm189_vm15 = vcmask 64544  }
  0x92   :  { %100 = vst.msk [vmem:[#allocation0] sm:$0x1] %vm99_vm0, %v98_v47  }
  0x94   :  { %v104_v48 = vpop.permute.xlu0 %103   ;;  %v110_v49 = vpop.permute.xlu1 %109  }
  0x95   :  { %106 = vst.msk [vmem:[#allocation0] sm:$0x1] %vm105_vm1, %v104_v48  }
  0x96   :  { %112 = vst.msk [vmem:[#allocation0] sm:$0x1] %vm111_vm2, %v110_v49  }
  0x98   :  { %v116_v50 = vpop.permute.xlu0 %115   ;;  %v122_v51 = vpop.permute.xlu1 %121  }
  0x99   :  { %118 = vst.msk [vmem:[#allocation0] sm:$0x1] %vm117_vm3, %v116_v50  }
  0x9a   :  { %124 = vst.msk [vmem:[#allocation0] sm:$0x1] %vm123_vm4, %v122_v51  }
  0x9c   :  { %v128_v52 = vpop.permute.xlu0 %127   ;;  %v134_v53 = vpop.permute.xlu1 %133  }
  0x9d   :  { %130 = vst.msk [vmem:[#allocation0] sm:$0x1] %vm129_vm5, %v128_v52  }
  0x9e   :  { %136 = vst.msk [vmem:[#allocation0] sm:$0x1] %vm135_vm6, %v134_v53  }
  0xa0   :  { %v140_v54 = vpop.permute.xlu0 %139   ;;  %v146_v55 = vpop.permute.xlu1 %145  }
  0xa1   :  { %142 = vst.msk [vmem:[#allocation0] sm:$0x1] %vm141_vm7, %v140_v54  }
  0xa2   :  { %148 = vst.msk [vmem:[#allocation0] sm:$0x1] %vm147_vm8, %v146_v55  }
  0xa4   :  { %v152_v56 = vpop.permute.xlu0 %151   ;;  %v158_v57 = vpop.permute.xlu1 %157  }
  0xa5   :  { %154 = vst.msk [vmem:[#allocation0] sm:$0x1] %vm153_vm9, %v152_v56  }
  0xa6   :  { %160 = vst.msk [vmem:[#allocation0] sm:$0x1] %vm159_vm10, %v158_v57  }
  0xa8   :  { %v164_v58 = vpop.permute.xlu0 %163   ;;  %v170_v59 = vpop.permute.xlu1 %169  }
  0xa9   :  { %166 = vst.msk [vmem:[#allocation0] sm:$0x1] %vm165_vm11, %v164_v58  }
  0xaa   :  { %172 = vst.msk [vmem:[#allocation0] sm:$0x1] %vm171_vm12, %v170_v59  }
  0xac   :  { %v176_v60 = vpop.permute.xlu0 %175   ;;  %v182_v61 = vpop.permute.xlu1 %181  }
  0xad   :  { %178 = vst.msk [vmem:[#allocation0] sm:$0x1] %vm177_vm13, %v176_v60  }
  0xae   :  { %184 = vst.msk [vmem:[#allocation0] sm:$0x1] %vm183_vm14, %v182_v61  }
  0xb0   :  { %v188_v62 = vpop.permute.xlu0 %187  }
  0xb1   :  { %190 = vst.msk [vmem:[#allocation0] sm:$0x1] %vm189_vm15, %v188_v62  }
  0xb8   :  { %v194_v63 = vld [vmem:[#allocation0] sm:$0x1] }
  0xb9   :  { %196 = vst [vmem:[%s400_s1] sm:$0x1] %v194_v63 }

// kernel: eq.15
= control target key start
LH: loop header
LB: loop body
LE: loop exit
PB: predicated region body
PF: predicated region fallthrough
CT: control target
= control target key end

     0   :  { %s67_s10 = smov 112   ;;  %s68_s11 = smov 80   ;;  %vm3_vm0 = vcmask 130048   ;;  %vm9_vm1 = vcmask 1048448   ;;  %vm15_vm2 = vcmask 917248   ;;  %vm21_vm3 = vcmask 786048   ;;  %s111_s0 = inlined_call_operand.vmem [shape: s32[8,16], index: 0, kind: input, shape index: {}]   ;;  %s112_s1 = inlined_call_operand.vmem [shape: s32[128], index: 1, kind: output, shape index: {}]  }
   0x1   :  { %v53_v0 = vld [vmem:[%s111_s0 + $0x7] sm:$0x1]   ;;  %v55_v1 = vld [vmem:[%s111_s0 + $0x5] sm:$0x1]   ;;  %v54_v2 = vld [vmem:[%s111_s0 + $0x6] sm:$0x1]  }
   0x2   :  { %7 = vrot.lane.b32.xlu0 %v53_v0, %s67_s10  ;;  %19 = vrot.lane.b32.xlu1 %v55_v1, %s68_s11  ;;  %v56_v3 = vld [vmem:[%s111_s0 + $0x4] sm:$0x1]   ;;  %v2_v4 = vld [vmem:[%s111_s0] sm:$0x1]   ;;  %s69_s18 = smov 96   ;;  %s70_s19 = smov 64  }
   0x3   :  { %4 = vst.msk [vmem:[#allocation0] sm:$0x1] %vm3_vm0, %v2_v4   ;;  %v57_v5 = vld [vmem:[%s111_s0 + $0x3] sm:$0x1]   ;;  %v58_v6 = vld [vmem:[%s111_s0 + $0x2] sm:$0x1]  }
   0x4   :  { %s71_s24 = smov 48   ;;  %s72_s25 = smov 32   ;;  %v59_v7 = vld [vmem:[%s111_s0 + $0x1] sm:$0x1]   ;;  %vm27_vm4 = vcmask 654848   ;;  %vm33_vm5 = vcmask 523648  }
   0x5   :  { %s73_s0 = smov 16   ;;  %vm39_vm6 = vcmask 392448   ;;  %vm45_vm7 = vcmask 261248  }
   0x6   :  { %13 = vrot.lane.b32.xlu0 %v54_v2, %s69_s18  ;;  %25 = vrot.lane.b32.xlu1 %v56_v3, %s70_s19 }
   0xa   :  { %31 = vrot.lane.b32.xlu0 %v57_v5, %s71_s24  ;;  %37 = vrot.lane.b32.xlu1 %v58_v6, %s72_s25 }
   0xe   :  { %43 = vrot.lane.b32.xlu0 %v59_v7, %s73_s0 }
  0x74   :  { %v8_v8 = vpop.permute.xlu0 %7   ;;  %v20_v9 = vpop.permute.xlu1 %19  }
  0x75   :  { %10 = vst.msk [vmem:[#allocation0] sm:$0x1] %vm9_vm1, %v8_v8  }
  0x78   :  { %v14_v10 = vpop.permute.xlu0 %13   ;;  %v26_v11 = vpop.permute.xlu1 %25  }
  0x79   :  { %16 = vst.msk [vmem:[#allocation0] sm:$0x1] %vm15_vm2, %v14_v10  }
  0x7a   :  { %22 = vst.msk [vmem:[#allocation0] sm:$0x1] %vm21_vm3, %v20_v9  }
  0x7b   :  { %28 = vst.msk [vmem:[#allocation0] sm:$0x1] %vm27_vm4, %v26_v11  }
  0x7c   :  { %v32_v12 = vpop.permute.xlu0 %31   ;;  %v38_v13 = vpop.permute.xlu1 %37  }
  0x7d   :  { %34 = vst.msk [vmem:[#allocation0] sm:$0x1] %vm33_vm5, %v32_v12  }
  0x7e   :  { %40 = vst.msk [vmem:[#allocation0] sm:$0x1] %vm39_vm6, %v38_v13  }
  0x80   :  { %v44_v14 = vpop.permute.xlu0 %43  }
  0x81   :  { %46 = vst.msk [vmem:[#allocation0] sm:$0x1] %vm45_vm7, %v44_v14  }
  0x88   :  { %v50_v15 = vld [vmem:[#allocation0] sm:$0x1] }
  0x89   :  { %52 = vst [vmem:[%s112_s1] sm:$0x1] %v50_v15 }

// kernel: beliefppg_forward.17
= control target key start
LH: loop header
LB: loop body
LE: loop exit
PB: predicated region body
PF: predicated region fallthrough
CT: control target
= control target key end

     0   :  { %vm93_vm0 = vcmask 1041408   ;;  %vm44_vm1 = vcmask 15360   ;;  %vm314_vm2 = vcmask 64512   ;;  %s662_s3 = inlined_call_operand.vmem [shape: f32[2,8], index: 3, kind: input, shape index: {}]   ;;  %s663_s0 = inlined_call_operand.vmem [shape: f32[128,2], index: 0, kind: input, shape index: {}]   ;;  %s664_s4 = inlined_call_operand.vmem [shape: f32[1,8], index: 4, kind: input, shape index: {}]   ;;  %s665_s1 = inlined_call_operand.vmem [shape: f32[128,8], index: 1, kind: input, shape index: {}]   ;;  %s666_s2 = inlined_call_operand.vmem [shape: f32[128,8], index: 2, kind: input, shape index: {}]   ;;  %s667_s5 = inlined_call_operand.vmem [shape: f32[32,8], index: 5, kind: output, shape index: {}]  }
   0x1   :  { %v36_v0 = vld [vmem:[%s662_s3] sm:$0x3]  ;;  %v21_v3 = vld [vmem:[%s663_s0 + $0x8] sm:$0xff]  ;;  %v22_v5 = vld [vmem:[%s663_s0 + $0x10] sm:$0xff] }
   0x2   :  { %v20_v1 = vld [vmem:[%s663_s0] sm:$0xff]  ;;  %366 = vmatprep.subr.msk.mxu0 %vm93_vm0, %v36_v0  ;;  %392 = vmatprep.subr.msk.mxu1 %vm93_vm0, %v36_v0  ;;  %v29_v4 = vld [vmem:[%s663_s0 + $0x48] sm:$0xff]  ;;  %v30_v6 = vld [vmem:[%s663_s0 + $0x50] sm:$0xff] }
   0x3   :  { %v28_v2 = vld [vmem:[%s663_s0 + $0x40] sm:$0xff]  ;;  %367 = vmatpush3.msk.msra.mxu0 %vm93_vm0, %v36_v0  ;;  %393 = vmatpush3.msk.msra.mxu1 %vm93_vm0, %v36_v0  ;;  %v23_v7 = vld [vmem:[%s663_s0 + $0x18] sm:$0xff]  ;;  %v25_v11 = vld [vmem:[%s663_s0 + $0x28] sm:$0xff] }
   0x4   :  { %368 = vmatprep.mubr.msk.f32.mxu0 %vm44_vm1, %v20_v1  ;;  %380 = vmatprep.mubr.msk.f32.mxu1 %vm44_vm1, %v28_v2  ;;  %v31_v8 = vld [vmem:[%s663_s0 + $0x58] sm:$0xff]  ;;  %v24_v9 = vld [vmem:[%s663_s0 + $0x20] sm:$0xff]  ;;  %v33_v12 = vld [vmem:[%s663_s0 + $0x68] sm:$0xff] }
   0x5   :  { %369 = vmatmul.mubr.msk.f32.vlgmr.msra.gmra.mrb[0].mxu0 %vm44_vm1, %v21_v3  ;;  %381 = vmatmul.mubr.msk.f32.vlgmr.msra.gmra.mrb[0].mxu1 %vm44_vm1, %v29_v4  ;;  %v32_v10 = vld [vmem:[%s663_s0 + $0x60] sm:$0xff]  ;;  %v26_v13 = vld [vmem:[%s663_s0 + $0x30] sm:$0xff]  ;;  %v27_v15 = vld [vmem:[%s663_s0 + $0x38] sm:$0xff] }
   0x6   :  { %371 = vmatprep.mubr.msk.f32.mxu0 %vm44_vm1, %v22_v5  ;;  %383 = vmatprep.mubr.msk.f32.mxu1 %vm44_vm1, %v30_v6  ;;  %v34_v14 = vld [vmem:[%s663_s0 + $0x70] sm:$0xff]  ;;  %v35_v16 = vld [vmem:[%s663_s0 + $0x78] sm:$0xff]  ;;  %v331_v17 = vld [vmem:[%s664_s4] ss:$0 sm:$0xff] }
   0x7   :  { %v406_v18 = vadd.f32 %v331_v17, %v331_v17  ;;  %v243_v22 = vld [vmem:[%s665_s1 + $0x8] sm:$0xff]  ;;  %v242_v28 = vld [vmem:[%s665_s1] sm:$0xff]  ;;  %v245_v31 = vld [vmem:[%s665_s1 + $0x18] sm:$0xff] }
   0x8   :  { %v251_v24 = vld [vmem:[%s665_s1 + $0x48] sm:$0xff]  ;;  %v250_v30 = vld [vmem:[%s665_s1 + $0x40] sm:$0xff]  ;;  %v253_v32 = vld [vmem:[%s665_s1 + $0x58] sm:$0xff] }
   0x9   :  { %v407_v19 = vadd.f32 %v406_v18, %v331_v17  ;;  %v244_v37 = vld [vmem:[%s665_s1 + $0x10] sm:$0xff]  ;;  %v247_v39 = vld [vmem:[%s665_s1 + $0x28] sm:$0xff]  ;;  %v246_v45 = vld [vmem:[%s665_s1 + $0x20] sm:$0xff] }
   0xa   :  { %v252_v38 = vld [vmem:[%s665_s1 + $0x50] sm:$0xff]  ;;  %v255_v40 = vld [vmem:[%s665_s1 + $0x68] sm:$0xff]  ;;  %v254_v46 = vld [vmem:[%s665_s1 + $0x60] sm:$0xff] }
   0xb   :  { %v408_v20 = vadd.f32 %v407_v19, %v331_v17  ;;  %v249_v47 = vld [vmem:[%s665_s1 + $0x38] sm:$0xff]  ;;  %v248_v53 = vld [vmem:[%s665_s1 + $0x30] sm:$0xff]  ;;  %v275_v55 = vld [vmem:[%s666_s2 + $0x8] sm:$0xff] }
   0xc   :  { %v257_v48 = vld [vmem:[%s665_s1 + $0x78] sm:$0xff]  ;;  %v256_v54 = vld [vmem:[%s665_s1 + $0x70] sm:$0xff]  ;;  %v283_v56 = vld [vmem:[%s666_s2 + $0x48] sm:$0xff] }
   0xd   :  { %372 = vmatmul.mubr.msk.f32.gmra.mrb[0].mxu0 %vm44_vm1, %v23_v7  ;;  %384 = vmatmul.mubr.msk.f32.gmra.mrb[0].mxu1 %vm44_vm1, %v31_v8  ;;  %v274_v61 = vld [vmem:[%s666_s2] sm:$0xff]  ;;  %v277_v63 = vld [vmem:[%s666_s2 + $0x18] sm:$0xff]  ;;  %v276_v5 = vld [vmem:[%s666_s2 + $0x10] sm:$0xff] }
   0xe   :  { %374 = vmatprep.mubr.msk.f32.mxu0 %vm44_vm1, %v24_v9  ;;  %386 = vmatprep.mubr.msk.f32.mxu1 %vm44_vm1, %v32_v10  ;;  %v282_v62 = vld [vmem:[%s666_s2 + $0x40] sm:$0xff]  ;;  %v285_v0 = vld [vmem:[%s666_s2 + $0x58] sm:$0xff]  ;;  %v284_v6 = vld [vmem:[%s666_s2 + $0x50] sm:$0xff] }
   0xf   :  { %v279_v7 = vld [vmem:[%s666_s2 + $0x28] sm:$0xff] }
  0x10   :  { %v287_v8 = vld [vmem:[%s666_s2 + $0x68] sm:$0xff] }
  0x15   :  { %375 = vmatmul.mubr.msk.f32.gmra.mrb[0].mxu0 %vm44_vm1, %v25_v11  ;;  %387 = vmatmul.mubr.msk.f32.gmra.mrb[0].mxu1 %vm44_vm1, %v33_v12 }
  0x16   :  { %377 = vmatprep.mubr.msk.f32.mxu0 %vm44_vm1, %v26_v13  ;;  %389 = vmatprep.mubr.msk.f32.mxu1 %vm44_vm1, %v34_v14  ;;  %v278_v13 = vld [vmem:[%s666_s2 + $0x20] sm:$0xff] }
  0x17   :  { %v286_v14 = vld [vmem:[%s666_s2 + $0x60] sm:$0xff] }
  0x1d   :  { %378 = vmatmul.mubr.msk.f32.gmra.mrb[0].mxu0 %vm44_vm1, %v27_v15  ;;  %390 = vmatmul.mubr.msk.f32.gmra.mrb[0].mxu1 %vm44_vm1, %v35_v16  ;;  %v281_v15 = vld [vmem:[%s666_s2 + $0x38] sm:$0xff] }
  0x1e   :  { %v289_v16 = vld [vmem:[%s666_s2 + $0x78] sm:$0xff] }
  0xf0   :  { %v379_v21 = vpop.f32.mrb[0].mxu0  ;;  %v391_v23 = vpop.f32.mrb[0].mxu1 }
  0xf1   :  { %v397_v25 = vadd.f32 %v408_v20, %v379_v21  ;;  %v421_v26 = vadd.f32 %v408_v20, %v391_v23  ;;  %v193_v27 = vpop.f32.mrb[1].mxu0  ;;  %v233_v29 = vpop.f32.mrb[1].mxu1  ;;  %v280_v21 = vld [vmem:[%s666_s2 + $0x30] sm:$0xff] }
  0xf2   :  { %v409_v33 = vadd.f32 %v408_v20, %v193_v27  ;;  %v433_v34 = vadd.f32 %v408_v20, %v233_v29 }
  0xf3   :  { %v398_v35 = vadd.f32 %v397_v25, %v243_v22  ;;  %v422_v36 = vadd.f32 %v421_v26, %v251_v24  ;;  %v288_v22 = vld [vmem:[%s666_s2 + $0x70] sm:$0xff] }
  0xf4   :  { %v410_v41 = vadd.f32 %v409_v33, %v242_v28  ;;  %v434_v42 = vadd.f32 %v433_v34, %v250_v30 }
  0xf5   :  { %v399_v43 = vadd.f32 %v398_v35, %v245_v31  ;;  %v423_v44 = vadd.f32 %v422_v36, %v253_v32 }
  0xf6   :  { %v411_v49 = vadd.f32 %v410_v41, %v244_v37  ;;  %v435_v50 = vadd.f32 %v434_v42, %v252_v38 }
  0xf7   :  { %v400_v51 = vadd.f32 %v399_v43, %v247_v39  ;;  %v424_v52 = vadd.f32 %v423_v44, %v255_v40 }
  0xf8   :  { %v412_v57 = vadd.f32 %v411_v49, %v246_v45  ;;  %v436_v58 = vadd.f32 %v435_v50, %v254_v46 }
  0xf9   :  { %v401_v59 = vadd.f32 %v400_v51, %v249_v47  ;;  %v425_v60 = vadd.f32 %v424_v52, %v257_v48 }
  0xfa   :  { %v413_v1 = vadd.f32 %v412_v57, %v248_v53  ;;  %v437_v2 = vadd.f32 %v436_v58, %v256_v54 }
  0xfb   :  { %v402_v3 = vadd.f32 %v401_v59, %v275_v55  ;;  %v426_v4 = vadd.f32 %v425_v60, %v283_v56 }
  0xfc   :  { %v414_v9 = vadd.f32 %v413_v1, %v274_v61  ;;  %v438_v10 = vadd.f32 %v437_v2, %v282_v62 }
  0xfd   :  { %v403_v11 = vadd.f32 %v402_v3, %v277_v63  ;;  %v427_v12 = vadd.f32 %v426_v4, %v285_v0 }
  0xfe   :  { %v415_v17 = vadd.f32 %v414_v9, %v276_v5  ;;  %v439_v18 = vadd.f32 %v438_v10, %v284_v6 }
  0xff   :  { %v404_v19 = vadd.f32 %v403_v11, %v279_v7  ;;  %v428_v20 = vadd.f32 %v427_v12, %v287_v8 }
 0x100   :  { %v416_v23 = vadd.f32 %v415_v17, %v278_v13  ;;  %v440_v24 = vadd.f32 %v439_v18, %v286_v14 }
 0x101   :  { %v405_v25 = vadd.f32 %v404_v19, %v281_v15  ;;  %v429_v26 = vadd.f32 %v428_v20, %v289_v16 }
 0x102   :  { %v417_v27 = vadd.f32 %v416_v23, %v280_v21  ;;  %v441_v28 = vadd.f32 %v440_v24, %v288_v22 }
 0x103   :  { %v313_v29 = vmul.f32 0.25, %v405_v25  ;;  %v324_v30 = vmul.f32 0.25, %v429_v26 }
 0x104   :  { %v312_v31 = vmul.f32 0.25, %v417_v27  ;;  %v323_v32 = vmul.f32 0.25, %v441_v28 }
 0x105   :  { %316 = vst.msk [vmem:[%s667_s5 + $0x8] sm:$0xff] %vm314_vm2, %v313_v29  ;;  %326 = vst.msk [vmem:[%s667_s5 + $0x18] sm:$0xff] %vm314_vm2, %v324_v30 }
 0x106   :  { %315 = vst.msk [vmem:[%s667_s5] sm:$0xff] %vm314_vm2, %v312_v31  ;;  %325 = vst.msk [vmem:[%s667_s5 + $0x10] sm:$0xff] %vm314_vm2, %v323_v32 }

// kernel: beliefppg_forward.16
= control target key start
LH: loop header
LB: loop body
LE: loop exit
PB: predicated region body
PF: predicated region fallthrough
CT: control target
= control target key end

     0   :  { %vm47_vm0 = vcmask 64512   ;;  %s1658_s7 = smov 120   ;;  %s2169_s2 = inlined_call_operand.vmem [shape: f32[8,24], index: 2, kind: input, shape index: {}]   ;;  %s2170_s0 = inlined_call_operand.vmem [shape: f32[128,8], index: 0, kind: input, shape index: {}]   ;;  %s2171_s3 = inlined_call_operand.vmem [shape: f32[1,24], index: 3, kind: input, shape index: {}]   ;;  %s2172_s1 = inlined_call_operand.vmem [shape: f32[128,128], index: 1, kind: input, shape index: {}]   ;;  %s2173_s4 = inlined_call_operand.vmem [shape: f32[8,8], index: 4, kind: input, shape index: {}]   ;;  %s2174_s5 = inlined_call_operand.vmem [shape: f32[1,8], index: 5, kind: input, shape index: {}]   ;;  %s2175_s6 = inlined_call_operand.vmem [shape: f32[128,8], index: 6, kind: output, shape index: {}]  }
   0x1   :  { %v39_v0 = vld [vmem:[%s2169_s2] sm:$0xff]  ;;  %v24_v2 = vld [vmem:[%s2170_s0 + $0x8] sm:$0xff]  ;;  %v25_v3 = vld [vmem:[%s2170_s0 + $0x10] sm:$0xff] }
   0x2   :  { %v23_v1 = vld [vmem:[%s2170_s0] sm:$0xff]  ;;  %1268 = vmatprep.subr.mxu0 %v39_v0  ;;  %v26_v4 = vld [vmem:[%s2170_s0 + $0x18] sm:$0xff]  ;;  %v28_v6 = vld [vmem:[%s2170_s0 + $0x28] sm:$0xff] }
   0x3   :  { %1270 = vmatprep.mubr.msk.f32.mxu0 %vm47_vm0, %v23_v1  ;;  %1269 = vmatpush3.msra.mxu0 %v39_v0  ;;  %v27_v5 = vld [vmem:[%s2170_s0 + $0x20] sm:$0xff]  ;;  %v29_v7 = vld [vmem:[%s2170_s0 + $0x30] sm:$0xff]  ;;  %v30_v8 = vld [vmem:[%s2170_s0 + $0x38] sm:$0xff] }
   0x4   :  { %1271 = vmatmul.mubr.msk.f32.vlgmr.msra.gmra.mrb[0].mxu0 %vm47_vm0, %v24_v2  ;;  %v31_v9 = vld [vmem:[%s2170_s0 + $0x40] sm:$0xff]  ;;  %v32_v10 = vld [vmem:[%s2170_s0 + $0x48] sm:$0xff]  ;;  %v33_v11 = vld [vmem:[%s2170_s0 + $0x50] sm:$0xff] }
   0x5   :  { %1273 = vmatprep.mubr.msk.f32.mxu0 %vm47_vm0, %v25_v3  ;;  %v34_v12 = vld [vmem:[%s2170_s0 + $0x58] sm:$0xff]  ;;  %v35_v13 = vld [vmem:[%s2170_s0 + $0x60] sm:$0xff]  ;;  %v36_v14 = vld [vmem:[%s2170_s0 + $0x68] sm:$0xff] }
   0x6   :  { %v37_v15 = vld [vmem:[%s2170_s0 + $0x70] sm:$0xff]  ;;  %v38_v16 = vld [vmem:[%s2170_s0 + $0x78] sm:$0xff]  ;;  %v1104_v17 = vld [vmem:[%s2171_s3] ss:$0 sm:$0xff]  ;;  %s1659_s0 = smov 112  }
   0x7   :  { %vm1835_vm1 = vmpackc.low %vm47_vm0, %vm47_vm0 }
   0x8   :  { %1274 = vmatmul.mubr.msk.f32.gmra.mrb[2].mxu0 %vm47_vm0, %v26_v4 }
   0x9   :  { %1276 = vmatprep.mubr.msk.f32.mxu0 %vm47_vm0, %v27_v5 }
   0xc   :  { %1277 = vmatmul.mubr.msk.f32.gmra.mrb[4].mxu0 %vm47_vm0, %v28_v6 }
   0xd   :  { %1279 = vmatprep.mubr.msk.f32.mxu0 %vm47_vm0, %v29_v7 }
  0x10   :  { %1280 = vmatmul.mubr.msk.f32.gmra.mrb[6].mxu0 %vm47_vm0, %v30_v8 }
  0x11   :  { %1282 = vmatprep.mubr.msk.f32.mxu0 %vm47_vm0, %v31_v9 }
  0x14   :  { %1283 = vmatmul.mubr.msk.f32.gmra.mrb[8].mxu0 %vm47_vm0, %v32_v10 }
  0x15   :  { %1285 = vmatprep.mubr.msk.f32.mxu0 %vm47_vm0, %v33_v11 }
  0x18   :  { %1286 = vmatmul.mubr.msk.f32.gmra.mrb[10].mxu0 %vm47_vm0, %v34_v12 }
  0x19   :  { %1288 = vmatprep.mubr.msk.f32.mxu0 %vm47_vm0, %v35_v13 }
  0x1c   :  { %1289 = vmatmul.mubr.msk.f32.gmra.mrb[12].mxu0 %vm47_vm0, %v36_v14 }
  0x1d   :  { %1291 = vmatprep.mubr.msk.f32.mxu0 %vm47_vm0, %v37_v15 }
  0x20   :  { %1292 = vmatmul.mubr.msk.f32.gmra.mrb[14].mxu0 %vm47_vm0, %v38_v16 }
  0xd7   :  { %v1272_v18 = vpop.f32.mrb[0].mxu0 }
  0xd8   :  { %v1765_v19 = vadd.f32 %v1272_v18, %v1104_v17  ;;  %v162_v20 = vpop.f32.mrb[1].mxu0 }
  0xd9   :  { %v163_v21 = vadd.f32 %v1104_v17, %v162_v20 }
  0xdb   :  { %v1514_v22 = vpack.i.bf16 %v1765_v19, %v163_v21  ;;  %v241_v23 = vmul.f32 0.35355338, %v163_v21  ;;  %v1275_v24 = vpop.f32.mrb[2].mxu0 }
  0xdc   :  { %v1768_v25 = vadd.f32 %v1275_v24, %v1104_v17  ;;  %v172_v26 = vpop.f32.mrb[3].mxu0 }
  0xdd   :  { %1515 = vrot.lane.b32.xlu0 %v1514_v22, %s1658_s7  ;;  %1326 = vmatprep.mubr.msk.f32.mxu1 %vm47_vm0, %v241_v23  ;;  %v1772_v27 = vadd.f32 %v1104_v17, %v172_v26 }
  0xdf   :  { %v1519_v28 = vpack.i.bf16 %v1768_v25, %v1772_v27  ;;  %v1278_v29 = vpop.f32.mrb[4].mxu0 }
  0xe0   :  { %v1776_v30 = vadd.f32 %v1278_v29, %v1104_v17  ;;  %v182_v31 = vpop.f32.mrb[5].mxu0 }
  0xe1   :  { %1520 = vrot.lane.b32.xlu0 %v1519_v28, %s1658_s7  ;;  %v1779_v32 = vadd.f32 %v1104_v17, %v182_v31 }
  0xe3   :  { %v1281_v33 = vpop.f32.mrb[6].mxu0  ;;  %v1524_v34 = vpack.i.bf16 %v1776_v30, %v1779_v32 }
  0xe4   :  { %v1783_v35 = vadd.f32 %v1281_v33, %v1104_v17  ;;  %v192_v36 = vpop.f32.mrb[7].mxu0 }
  0xe5   :  { %v1785_v37 = vadd.f32 %v1104_v17, %v192_v36  ;;  %1525 = vrot.lane.b32.xlu1 %v1524_v34, %s1658_s7 }
  0xe7   :  { %v1284_v38 = vpop.f32.mrb[8].mxu0  ;;  %v1529_v39 = vpack.i.bf16 %v1783_v35, %v1785_v37  ;;  %v247_v62 = vmul.f32 0.35355338, %v1785_v37 }
  0xe8   :  { %v1790_v40 = vadd.f32 %v1284_v38, %v1104_v17  ;;  %v202_v41 = vpop.f32.mrb[9].mxu0 }
  0xe9   :  { %v1792_v42 = vadd.f32 %v1104_v17, %v202_v41  ;;  %1530 = vrot.lane.b32.xlu1 %v1529_v39, %s1658_s7 }
  0xeb   :  { %v1287_v43 = vpop.f32.mrb[10].mxu0  ;;  %v1534_v44 = vpack.i.bf16 %v1790_v40, %v1792_v42 }
  0xec   :  { %v1797_v45 = vadd.f32 %v1287_v43, %v1104_v17  ;;  %v212_v46 = vpop.f32.mrb[11].mxu0 }
  0xed   :  { %v1799_v47 = vadd.f32 %v1104_v17, %v212_v46  ;;  %1535 = vrot.lane.b32.xlu0 %v1534_v44, %s1658_s7 }
  0xef   :  { %v1290_v48 = vpop.f32.mrb[12].mxu0  ;;  %v1804_v49 = vpack.i.bf16 %v1797_v45, %v1799_v47 }
  0xf0   :  { %v1806_v50 = vadd.f32 %v1290_v48, %v1104_v17  ;;  %v222_v51 = vpop.f32.mrb[13].mxu0 }
  0xf1   :  { %v1808_v52 = vadd.f32 %v1104_v17, %v222_v51  ;;  %1540 = vrot.lane.b32.xlu1 %v1804_v49, %s1658_s7 }
  0xf3   :  { %v1293_v53 = vpop.f32.mrb[14].mxu0  ;;  %v1814_v54 = vpack.i.bf16 %v1806_v50, %v1808_v52  ;;  %v253_v37 = vmul.f32 0.35355338, %v1808_v52 }
  0xf4   :  { %v1816_v55 = vadd.f32 %v1293_v53, %v1104_v17  ;;  %v232_v56 = vpop.f32.mrb[15].mxu0 }
  0xf5   :  { %v1818_v57 = vadd.f32 %v1104_v17, %v232_v56  ;;  %1545 = vrot.lane.b32.xlu0 %v1814_v54, %s1658_s7 }
  0xf7   :  { %v1824_v58 = vpack.i.bf16 %v1816_v55, %v1818_v57 }
  0xf9   :  { %1550 = vrot.lane.b32.xlu1 %v1824_v58, %s1658_s7  ;;  %1560 = vrot.lane.b32.xlu0 %v1519_v28, %s1659_s0 }
  0xfd   :  { %1555 = vrot.lane.b32.xlu1 %v1514_v22, %s1659_s0  ;;  %1570 = vrot.lane.b32.xlu0 %v1529_v39, %s1659_s0 }
 0x101   :  { %1565 = vrot.lane.b32.xlu1 %v1524_v34, %s1659_s0 }
 0x105   :  { %1575 = vrot.lane.b32.xlu1 %v1534_v44, %s1659_s0 }
 0x14f   :  { %v1516_v59 = vpop.permute.xlu0 %1515 }
 0x150   :  { %v1518_v60 = vunpack.i.h.bf16 %v1516_v59  ;;  %v1517_v61 = vunpack.i.l.bf16 %v1516_v59 }
 0x152   :  { %v1432_v63 = vpack.c.bf16 %v1518_v60, %v1517_v61 }
 0x153   :  { %v1521_v0 = vpop.permute.xlu0 %1520 }
 0x154   :  { %1434 = vmatprep.subr.msk.bf16.mxu1 %vm1835_vm1, %v1432_v63  ;;  %v1523_v1 = vunpack.i.h.bf16 %v1521_v0  ;;  %v1522_v2 = vunpack.i.l.bf16 %v1521_v0 }
 0x155   :  { %1437 = vmatpush3.bf16.xpose.msk.msra.mxu1 %vm1835_vm1, %v1432_v63 }
 0x156   :  { %v1438_v3 = vpack.c.bf16 %v1523_v1, %v1522_v2 }
 0x157   :  { %v1526_v4 = vpop.permute.xlu1 %1525 }
 0x158   :  { %1440 = vmatprep.subr.msk.bf16.mxu1 %vm1835_vm1, %v1438_v3  ;;  %v1528_v5 = vunpack.i.h.bf16 %v1526_v4  ;;  %v1527_v6 = vunpack.i.l.bf16 %v1526_v4  ;;  %v243_v4 = vmul.f32 0.35355338, %v1772_v27  ;;  %v249_v27 = vmul.f32 0.35355338, %v1792_v42 }
 0x159   :  { %v255_v42 = vmul.f32 0.35355338, %v1818_v57 }
 0x15a   :  { %v1444_v7 = vpack.c.bf16 %v1528_v5, %v1527_v6  ;;  %v244_v5 = vmul.f32 0.35355338, %v1768_v25  ;;  %v245_v6 = vmul.f32 0.35355338, %v1779_v32  ;;  %v250_v25 = vmul.f32 0.35355338, %v1790_v40 }
 0x15b   :  { %v1531_v8 = vpop.permute.xlu1 %1530  ;;  %v251_v32 = vmul.f32 0.35355338, %v1799_v47  ;;  %v256_v40 = vmul.f32 0.35355338, %v1816_v55  ;;  %v257_v47 = vld [vmem:[%s2172_s1] sm:$0xff]  ;;  %v260_v55 = vld [vmem:[%s2172_s1 + $0x18] sm:$0xff] }
 0x15c   :  { %v1533_v9 = vunpack.i.h.bf16 %v1531_v8  ;;  %v1532_v10 = vunpack.i.l.bf16 %v1531_v8 }
 0x15d   :  { %1443 = vmatpush3.bf16.xpose.msk.msra.mxu1 %vm1835_vm1, %v1438_v3  ;;  %v242_v3 = vmul.f32 0.35355338, %v1765_v19  ;;  %v248_v19 = vmul.f32 0.35355338, %v1783_v35  ;;  %v254_v35 = vmul.f32 0.35355338, %v1806_v50 }
 0x15e   :  { %1446 = vmatprep.subr.msk.bf16.mxu1 %vm1835_vm1, %v1444_v7  ;;  %v1450_v12 = vpack.c.bf16 %v1533_v9, %v1532_v10 }
 0x15f   :  { %v1536_v11 = vpop.permute.xlu0 %1535 }
 0x160   :  { %v1538_v14 = vunpack.i.h.bf16 %v1536_v11  ;;  %v1537_v15 = vunpack.i.l.bf16 %v1536_v11 }
 0x162   :  { %v1456_v17 = vpack.c.bf16 %v1538_v14, %v1537_v15 }
 0x163   :  { %v1541_v13 = vpop.permute.xlu1 %1540 }
 0x164   :  { %v1543_v21 = vunpack.i.h.bf16 %v1541_v13  ;;  %v1542_v22 = vunpack.i.l.bf16 %v1541_v13  ;;  %v261_v13 = vld [vmem:[%s2172_s1 + $0x20] sm:$0xff] }
 0x165   :  { %1449 = vmatpush3.bf16.xpose.msk.msra.mxu1 %vm1835_vm1, %v1444_v7  ;;  %v246_v7 = vmul.f32 0.35355338, %v1776_v30  ;;  %v252_v30 = vmul.f32 0.35355338, %v1797_v45  ;;  %v258_v45 = vld [vmem:[%s2172_s1 + $0x8] sm:$0xff] }
 0x166   :  { %1452 = vmatprep.subr.msk.bf16.mxu1 %vm1835_vm1, %v1450_v12  ;;  %v1462_v31 = vpack.c.bf16 %v1543_v21, %v1542_v22 }
 0x167   :  { %v1546_v16 = vpop.permute.xlu0 %1545 }
 0x168   :  { %v1548_v43 = vunpack.i.h.bf16 %v1546_v16  ;;  %v1547_v44 = vunpack.i.l.bf16 %v1546_v16 }
 0x16a   :  { %v1468_v56 = vpack.c.bf16 %v1548_v43, %v1547_v44 }
 0x16b   :  { %v1551_v18 = vpop.permute.xlu1 %1550  ;;  %v1561_v20 = vpop.permute.xlu0 %1560 }
 0x16c   :  { %v1563_v24 = vunpack.i.h.bf16 %v1561_v20  ;;  %v1562_v26 = vunpack.i.l.bf16 %v1561_v20  ;;  %v1553_v63 = vunpack.i.h.bf16 %v1551_v18  ;;  %v1552_v0 = vunpack.i.l.bf16 %v1551_v18  ;;  %v262_v18 = vld [vmem:[%s2172_s1 + $0x28] sm:$0xff]  ;;  %v263_v20 = vld [vmem:[%s2172_s1 + $0x30] sm:$0xff] }
 0x16d   :  { %1455 = vmatpush3.bf16.xpose.msk.msra.mxu1 %vm1835_vm1, %v1450_v12  ;;  %v259_v12 = vld [vmem:[%s2172_s1 + $0x10] sm:$0xff] }
 0x16e   :  { %1458 = vmatprep.subr.msk.bf16.mxu1 %vm1835_vm1, %v1456_v17  ;;  %v1484_v36 = vpack.c.bf16 %v1563_v24, %v1562_v26  ;;  %v1474_v2 = vpack.c.bf16 %v1553_v63, %v1552_v0  ;;  %v264_v26 = vld [vmem:[%s2172_s1 + $0x38] sm:$0xff] }
 0x16f   :  { %v1556_v23 = vpop.permute.xlu1 %1555  ;;  %v1571_v41 = vpop.permute.xlu0 %1570 }
 0x170   :  { %v1558_v28 = vunpack.i.h.bf16 %v1556_v23  ;;  %v1557_v29 = vunpack.i.l.bf16 %v1556_v23  ;;  %v1573_v46 = vunpack.i.h.bf16 %v1571_v41  ;;  %v1572_v48 = vunpack.i.l.bf16 %v1571_v41 }
 0x172   :  { %v1480_v33 = vpack.c.bf16 %v1558_v28, %v1557_v29  ;;  %v1492_v59 = vpack.c.bf16 %v1573_v46, %v1572_v48  ;;  %v265_v28 = vld [vmem:[%s2172_s1 + $0x40] sm:$0xff]  ;;  %v268_v46 = vld [vmem:[%s2172_s1 + $0x58] sm:$0xff] }
 0x173   :  { %v1566_v34 = vpop.permute.xlu1 %1565  ;;  %v269_v48 = vld [vmem:[%s2172_s1 + $0x60] sm:$0xff] }
 0x174   :  { %v1568_v38 = vunpack.i.h.bf16 %v1566_v34  ;;  %v1567_v39 = vunpack.i.l.bf16 %v1566_v34  ;;  %1481 = vmatprep.subr.bf16.mxu0 %v1480_v33 }
 0x175   :  { %1461 = vmatpush3.bf16.xpose.msk.msra.mxu1 %vm1835_vm1, %v1456_v17  ;;  %1483 = vmatpush3.bf16.msra.mxu0 %v1480_v33 }
 0x176   :  { %1485 = vmatprep.subr.bf16.mxu0 %v1484_v36  ;;  %1464 = vmatprep.subr.msk.bf16.mxu1 %vm1835_vm1, %v1462_v31  ;;  %v1488_v51 = vpack.c.bf16 %v1568_v38, %v1567_v39  ;;  %v267_v38 = vld [vmem:[%s2172_s1 + $0x50] sm:$0xff] }
 0x177   :  { %v1576_v53 = vpop.permute.xlu1 %1575 }
 0x178   :  { %v1578_v60 = vunpack.i.h.bf16 %v1576_v53  ;;  %v1577_v61 = vunpack.i.l.bf16 %v1576_v53 }
 0x179   :  { %1487 = vmatpush3.bf16.msra.mxu0 %v1484_v36  ;;  %v266_v36 = vld [vmem:[%s2172_s1 + $0x48] sm:$0xff] }
 0x17a   :  { %1489 = vmatprep.subr.bf16.mxu0 %v1488_v51  ;;  %v1496_v1 = vpack.c.bf16 %v1578_v60, %v1577_v61  ;;  %v270_v60 = vld [vmem:[%s2172_s1 + $0x68] sm:$0xff]  ;;  %v271_v61 = vld [vmem:[%s2172_s1 + $0x70] sm:$0xff] }
 0x17d   :  { %1467 = vmatpush3.bf16.xpose.msk.msra.mxu1 %vm1835_vm1, %v1462_v31  ;;  %1491 = vmatpush3.bf16.msra.mxu0 %v1488_v51 }
 0x17e   :  { %1493 = vmatprep.subr.bf16.mxu0 %v1492_v59  ;;  %1470 = vmatprep.subr.msk.bf16.mxu1 %vm1835_vm1, %v1468_v56 }
 0x181   :  { %1495 = vmatpush3.bf16.msra.mxu0 %v1492_v59 }
 0x182   :  { %1497 = vmatprep.subr.bf16.mxu0 %v1496_v1 }
 0x185   :  { %1473 = vmatpush3.bf16.xpose.msk.msra.mxu1 %vm1835_vm1, %v1468_v56  ;;  %1499 = vmatpush3.bf16.msra.mxu0 %v1496_v1 }
 0x186   :  { %1476 = vmatprep.subr.msk.bf16.mxu1 %vm1835_vm1, %v1474_v2 }
 0x18d   :  { %1479 = vmatpush3.bf16.xpose.msk.msra.mxu1 %vm1835_vm1, %v1474_v2 }
 0x194   :  { %1327 = vmatmul.mubr.msk.f32.vlgmr.msra.gmra.mrb[0].mxu1 %vm47_vm0, %v242_v3  ;;  %v272_v3 = vld [vmem:[%s2172_s1 + $0x78] sm:$0xff] }
 0x195   :  { %1329 = vmatprep.mubr.msk.f32.mxu1 %vm47_vm0, %v243_v4 }
 0x198   :  { %1330 = vmatmul.mubr.msk.f32.gmra.mrb[2].mxu1 %vm47_vm0, %v244_v5 }
 0x199   :  { %1332 = vmatprep.mubr.msk.f32.mxu1 %vm47_vm0, %v245_v6 }
 0x19c   :  { %1333 = vmatmul.mubr.msk.f32.gmra.mrb[4].mxu1 %vm47_vm0, %v246_v7 }
 0x19d   :  { %1335 = vmatprep.mubr.msk.f32.mxu1 %vm47_vm0, %v247_v62 }
 0x1a0   :  { %1336 = vmatmul.mubr.msk.f32.gmra.mrb[6].mxu1 %vm47_vm0, %v248_v19 }
 0x1a1   :  { %1338 = vmatprep.mubr.msk.f32.mxu1 %vm47_vm0, %v249_v27 }
 0x1a4   :  { %1339 = vmatmul.mubr.msk.f32.gmra.mrb[8].mxu1 %vm47_vm0, %v250_v25 }
 0x1a5   :  { %1341 = vmatprep.mubr.msk.f32.mxu1 %vm47_vm0, %v251_v32 }
 0x1a8   :  { %1342 = vmatmul.mubr.msk.f32.gmra.mrb[10].mxu1 %vm47_vm0, %v252_v30 }
 0x1a9   :  { %1344 = vmatprep.mubr.msk.f32.mxu1 %vm47_vm0, %v253_v37 }
 0x1ac   :  { %1345 = vmatmul.mubr.msk.f32.gmra.mrb[12].mxu1 %vm47_vm0, %v254_v35 }
 0x1ad   :  { %1347 = vmatprep.mubr.msk.f32.mxu1 %vm47_vm0, %v255_v42 }
 0x1b0   :  { %1348 = vmatmul.mubr.msk.f32.gmra.mrb[14].mxu1 %vm47_vm0, %v256_v40 }
 0x267   :  { %v1328_v52 = vpop.f32.mrb[0].mxu1 }
 0x268   :  { %v1907_v50 = vadd.f32 %v1328_v52, %v258_v45  ;;  %v467_v57 = vpop.f32.mrb[1].mxu1 }
 0x269   :  { %v1909_v8 = vadd.f32 %v467_v57, %v257_v47 }
 0x26a   :  { %548 = vmax.xlane.f32.xlu1 %v1907_v50 }
 0x26b   :  { %v1331_v9 = vpop.f32.mrb[2].mxu1  ;;  %546 = vmax.xlane.f32.xlu0 %v1909_v8 }
 0x26c   :  { %v1916_v10 = vadd.f32 %v1331_v9, %v260_v55  ;;  %v477_v11 = vpop.f32.mrb[3].mxu1 }
 0x26d   :  { %v1925_v16 = vadd.f32 %v477_v11, %v259_v12 }
 0x26f   :  { %v1334_v14 = vpop.f32.mrb[4].mxu1  ;;  %552 = vmax.xlane.f32.xlu0 %v1916_v10 }
 0x270   :  { %v487_v15 = vpop.f32.mrb[5].mxu1  ;;  %v1937_v23 = vadd.f32 %v1334_v14, %v262_v18 }
 0x271   :  { %v1927_v17 = vadd.f32 %v487_v15, %v261_v13 }
 0x273   :  { %v1337_v21 = vpop.f32.mrb[6].mxu1  ;;  %554 = vmax.xlane.f32.xlu1 %v1927_v17  ;;  %550 = vmax.xlane.f32.xlu0 %v1925_v16 }
 0x274   :  { %v497_v22 = vpop.f32.mrb[7].mxu1  ;;  %v1949_v33 = vadd.f32 %v1337_v21, %v264_v26 }
 0x275   :  { %v1939_v24 = vadd.f32 %v497_v22, %v263_v20 }
 0x277   :  { %v1340_v29 = vpop.f32.mrb[8].mxu1  ;;  %558 = vmax.xlane.f32.xlu1 %v1939_v24  ;;  %556 = vmax.xlane.f32.xlu0 %v1937_v23 }
 0x278   :  { %v507_v31 = vpop.f32.mrb[9].mxu1  ;;  %v1961_v43 = vadd.f32 %v1340_v29, %v266_v36 }
 0x279   :  { %v1951_v34 = vadd.f32 %v507_v31, %v265_v28 }
 0x27b   :  { %v1343_v39 = vpop.f32.mrb[10].mxu1  ;;  %562 = vmax.xlane.f32.xlu1 %v1951_v34  ;;  %560 = vmax.xlane.f32.xlu0 %v1949_v33 }
 0x27c   :  { %v517_v41 = vpop.f32.mrb[11].mxu1  ;;  %v1973_v56 = vadd.f32 %v1343_v39, %v268_v46 }
 0x27d   :  { %v1963_v44 = vadd.f32 %v517_v41, %v267_v38 }
 0x27f   :  { %v1346_v51 = vpop.f32.mrb[12].mxu1  ;;  %566 = vmax.xlane.f32.xlu1 %v1963_v44  ;;  %564 = vmax.xlane.f32.xlu0 %v1961_v43 }
 0x280   :  { %v527_v53 = vpop.f32.mrb[13].mxu1  ;;  %v1985_v1 = vadd.f32 %v1346_v51, %v270_v60 }
 0x281   :  { %v1975_v59 = vadd.f32 %v527_v53, %v269_v48 }
 0x283   :  { %v1349_v63 = vpop.f32.mrb[14].mxu1  ;;  %570 = vmax.xlane.f32.xlu1 %v1975_v59  ;;  %568 = vmax.xlane.f32.xlu0 %v1973_v56 }
 0x284   :  { %v537_v0 = vpop.f32.mrb[15].mxu1  ;;  %v1994_v4 = vadd.f32 %v1349_v63, %v272_v3 }
 0x285   :  { %v1987_v2 = vadd.f32 %v537_v0, %v271_v61 }
 0x287   :  { %574 = vmax.xlane.f32.xlu1 %v1987_v2  ;;  %572 = vmax.xlane.f32.xlu0 %v1985_v1 }
 0x28b   :  { %576 = vmax.xlane.f32.xlu0 %v1994_v4 }
 0x298   :  { %1580 = vrot.lane.b32.xlu1 %v1804_v49, %s1659_s0 }
 0x2a1   :  { %1585 = vrot.lane.b32.xlu0 %v1814_v54, %s1659_s0 }
 0x2f7   :  { %v549_v5 = vpop.xlane.xlu1 %548 }
 0x2f8   :  { %v579_v6 = vsub.f32 %v1907_v50, %v549_v5  ;;  %v547_v7 = vpop.xlane.xlu0 %546 }
 0x2f9   :  { %v578_v62 = vsub.f32 %v1909_v8, %v547_v7 }
 0x2fa   :  { %v596_v19 = vmul.f32 1.442695, %v579_v6 }
 0x2fb   :  { %v594_v27 = vmul.f32 1.442695, %v578_v62 }
 0x2fc   :  { %1594 = vpow2.f32 %v596_v19  ;;  %v553_v25 = vpop.xlane.xlu0 %552 }
 0x2fd   :  { %1596 = vpow2.f32 %v594_v27  ;;  %v581_v32 = vsub.f32 %v1916_v10, %v553_v25 }
 0x2ff   :  { %v600_v30 = vmul.f32 1.442695, %v581_v32 }
 0x300   :  { %v555_v37 = vpop.xlane.xlu1 %554  ;;  %v551_v35 = vpop.xlane.xlu0 %550 }
 0x301   :  { %1598 = vpow2.f32 %v600_v30  ;;  %v582_v49 = vsub.f32 %v1927_v17, %v555_v37  ;;  %v580_v54 = vsub.f32 %v1925_v16, %v551_v35 }
 0x303   :  { %v602_v42 = vmul.f32 1.442695, %v582_v49  ;;  %v598_v40 = vmul.f32 1.442695, %v580_v54 }
 0x304   :  { %v559_v45 = vpop.xlane.xlu1 %558  ;;  %v557_v47 = vpop.xlane.xlu0 %556 }
 0x305   :  { %1600 = vpow2.f32 %v602_v42  ;;  %v583_v52 = vsub.f32 %v1937_v23, %v557_v47  ;;  %v584_v11 = vsub.f32 %v1939_v24, %v559_v45 }
 0x306   :  { %v2007_v50 = vpop.eup %1594  ;;  %1602 = vpow2.f32 %v598_v40 }
 0x307   :  { %v2009_v57 = vpop.eup %1596  ;;  %v604_v8 = vmul.f32 1.442695, %v583_v52  ;;  %628 = vadd.xlane.f32.xlu0 %v2007_v50  ;;  %v606_v16 = vmul.f32 1.442695, %v584_v11 }
 0x308   :  { %v563_v55 = vpop.xlane.xlu1 %562  ;;  %626 = vadd.xlane.f32.xlu1 %v2009_v57  ;;  %v561_v9 = vpop.xlane.xlu0 %560 }
 0x309   :  { %v585_v10 = vsub.f32 %v1949_v33, %v561_v9  ;;  %1604 = vpow2.f32 %v604_v8  ;;  %v586_v17 = vsub.f32 %v1951_v34, %v563_v55 }
 0x30b   :  { %v2015_v12 = vpop.eup %1598  ;;  %v608_v13 = vmul.f32 1.442695, %v585_v10  ;;  %v610_v23 = vmul.f32 1.442695, %v586_v17 }
 0x30c   :  { %v567_v14 = vpop.xlane.xlu1 %566  ;;  %632 = vadd.xlane.f32.xlu0 %v2015_v12  ;;  %v565_v15 = vpop.xlane.xlu0 %564 }
 0x30d   :  { %1606 = vpow2.f32 %v608_v13  ;;  %v588_v24 = vsub.f32 %v1963_v44, %v567_v14 }
 0x30e   :  { %1608 = vpow2.f32 %v606_v16 }
 0x30f   :  { %v2019_v18 = vpop.eup %1600  ;;  %1610 = vpow2.f32 %v610_v23  ;;  %v614_v31 = vmul.f32 1.442695, %v588_v24 }
 0x310   :  { %v2021_v20 = vpop.eup %1602  ;;  %v571_v21 = vpop.xlane.xlu1 %570  ;;  %634 = vadd.xlane.f32.xlu1 %v2019_v18 }
 0x311   :  { %v569_v22 = vpop.xlane.xlu0 %568  ;;  %630 = vadd.xlane.f32.xlu0 %v2021_v20  ;;  %v590_v33 = vsub.f32 %v1975_v59, %v571_v21  ;;  %1612 = vpow2.f32 %v614_v31 }
 0x312   :  { %v589_v19 = vsub.f32 %v1973_v56, %v569_v22 }
 0x313   :  { %v2026_v26 = vpop.eup %1604  ;;  %v618_v44 = vmul.f32 1.442695, %v590_v33 }
 0x314   :  { %v575_v28 = vpop.xlane.xlu1 %574  ;;  %v616_v27 = vmul.f32 1.442695, %v589_v19 }
 0x315   :  { %v573_v29 = vpop.xlane.xlu0 %572  ;;  %636 = vadd.xlane.f32.xlu0 %v2026_v26  ;;  %v592_v46 = vsub.f32 %v1987_v2, %v575_v28  ;;  %1614 = vpow2.f32 %v618_v44 }
 0x316   :  { %v591_v25 = vsub.f32 %v1985_v1, %v573_v29 }
 0x317   :  { %v2030_v34 = vpop.eup %1606  ;;  %v622_v61 = vmul.f32 1.442695, %v592_v46 }
 0x318   :  { %v1581_v36 = vpop.permute.xlu1 %1580  ;;  %v2034_v51 = vpop.eup %1608  ;;  %v620_v32 = vmul.f32 1.442695, %v591_v25 }
 0x319   :  { %v577_v38 = vpop.xlane.xlu0 %576  ;;  %v1583_v39 = vunpack.i.h.bf16 %v1581_v36  ;;  %v1582_v41 = vunpack.i.l.bf16 %v1581_v36  ;;  %640 = vadd.xlane.f32.xlu0 %v2030_v34  ;;  %v2038_v3 = vpop.eup %1610  ;;  %1616 = vpow2.f32 %v622_v61 }
 0x31a   :  { %v593_v63 = vsub.f32 %v1994_v4, %v577_v38 }
 0x31b   :  { %v1500_v48 = vpack.c.bf16 %v1583_v39, %v1582_v41  ;;  %v2043_v5 = vpop.eup %1612 }
 0x31c   :  { %v624_v2 = vmul.f32 1.442695, %v593_v63 }
 0x31d   :  { %v1586_v53 = vpop.permute.xlu0 %1585  ;;  %638 = vadd.xlane.f32.xlu0 %v2034_v51  ;;  %1501 = vmatprep.subr.bf16.mxu0 %v1500_v48 }
 0x31e   :  { %v1588_v60 = vunpack.i.h.bf16 %v1586_v53  ;;  %v1587_v59 = vunpack.i.l.bf16 %v1586_v53  ;;  %1503 = vmatpush3.bf16.msra.mxu0 %v1500_v48  ;;  %1618 = vpow2.f32 %v624_v2 }
 0x31f   :  { %v2046_v6 = vpop.eup %1614 }
 0x320   :  { %v1504_v0 = vpack.c.bf16 %v1588_v60, %v1587_v59 }
 0x321   :  { %642 = vadd.xlane.f32.xlu0 %v2038_v3  ;;  %1590 = vrot.lane.b32.xlu1 %v1824_v58, %s1659_s0  ;;  %v587_v58 = vsub.f32 %v1961_v43, %v565_v15 }
 0x322   :  { %1505 = vmatprep.subr.bf16.mxu0 %v1504_v0 }
 0x323   :  { %1507 = vmatpush3.bf16.msra.mxu0 %v1504_v0  ;;  %v2049_v4 = vpop.eup %1616  ;;  %v612_v62 = vmul.f32 1.442695, %v587_v58  ;;  %v883_v58 = vld [vmem:[%s2173_s4] sm:$0xff] }
 0x325   :  { %646 = vadd.xlane.f32.xlu0 %v2043_v5  ;;  %1620 = vpow2.f32 %v612_v62 }
 0x326   :  { %1622 = vpow2.f32 %v616_v27 }
 0x327   :  { %1624 = vpow2.f32 %v620_v32 }
 0x328   :  { %v2052_v7 = vpop.eup %1618 }
 0x329   :  { %650 = vadd.xlane.f32.xlu0 %v2046_v6 }
 0x32d   :  { %654 = vadd.xlane.f32.xlu0 %v2049_v4 }
 0x32f   :  { %v2058_v30 = vpop.eup %1620 }
 0x330   :  { %v2061_v37 = vpop.eup %1622 }
 0x331   :  { %656 = vadd.xlane.f32.xlu0 %v2052_v7  ;;  %v2064_v35 = vpop.eup %1624 }
 0x345   :  { %644 = vadd.xlane.f32.xlu1 %v2058_v30 }
 0x349   :  { %648 = vadd.xlane.f32.xlu1 %v2061_v37 }
 0x34d   :  { %652 = vadd.xlane.f32.xlu1 %v2064_v35 }
 0x394   :  { %v629_v43 = vpop.xlane.xlu0 %628 }
 0x395   :  { %v627_v56 = vpop.xlane.xlu1 %626 }
 0x396   :  { %1626 = vrcp.f32 %v627_v56 }
 0x397   :  { %1628 = vrcp.f32 %v629_v43 }
 0x399   :  { %v633_v49 = vpop.xlane.xlu0 %632 }
 0x39a   :  { %1630 = vrcp.f32 %v633_v49 }
 0x39d   :  { %v635_v1 = vpop.xlane.xlu1 %634 }
 0x39e   :  { %v631_v54 = vpop.xlane.xlu0 %630 }
 0x39f   :  { %1632 = vrcp.f32 %v631_v54 }
 0x3a0   :  { %v1627_v42 = vpop.eup %1626  ;;  %1634 = vrcp.f32 %v635_v1 }
 0x3a1   :  { %v1591_v40 = vpop.permute.xlu1 %1590  ;;  %v674_v45 = vmul.f32 %v1627_v42, %v2009_v57  ;;  %v1629_v9 = vpop.eup %1628  ;;  %v1153_v42 = vld [vmem:[%s2174_s5] ss:$0 sm:$0xff] }
 0x3a2   :  { %v1593_v47 = vunpack.i.h.bf16 %v1591_v40  ;;  %v1592_v52 = vunpack.i.l.bf16 %v1591_v40  ;;  %v637_v8 = vpop.xlane.xlu0 %636  ;;  %v675_v13 = vmul.f32 %v1629_v9, %v2007_v50 }
 0x3a3   :  { %1636 = vrcp.f32 %v637_v8  ;;  %1382 = vmatprep.mubr.f32.mxu0 %v674_v45 }
 0x3a4   :  { %v1508_v55 = vpack.c.bf16 %v1593_v47, %v1592_v52  ;;  %v1631_v11 = vpop.eup %1630 }
 0x3a5   :  { %v677_v17 = vmul.f32 %v1631_v11, %v2015_v12 }
 0x3a6   :  { %v641_v10 = vpop.xlane.xlu0 %640  ;;  %1509 = vmatprep.subr.bf16.mxu0 %v1508_v55 }
 0x3a7   :  { %1511 = vmatpush3.bf16.msra.mxu0 %v1508_v55  ;;  %1638 = vrcp.f32 %v641_v10 }
 0x3a8   :  { %1406 = vmatprep.subr.mxu0 %v883_v58 }
 0x3a9   :  { %v1633_v14 = vpop.eup %1632 }
 0x3aa   :  { %v1635_v15 = vpop.eup %1634  ;;  %v639_v16 = vpop.xlane.xlu0 %638  ;;  %1383 = vmatmul.mubr.f32.vlgmr.msra.gmra.mrb[16].mxu0 %v675_v13  ;;  %v676_v57 = vmul.f32 %v1633_v14, %v2021_v20 }
 0x3ab   :  { %1640 = vrcp.f32 %v639_v16  ;;  %v678_v22 = vmul.f32 %v1635_v15, %v2019_v18  ;;  %1407 = vmatpush3.msra.mxu0 %v883_v58 }
 0x3ac   :  { %1385 = vmatprep.mubr.f32.mxu0 %v676_v57 }
 0x3ad   :  { %v1637_v21 = vpop.eup %1636 }
 0x3ae   :  { %v643_v23 = vpop.xlane.xlu0 %642  ;;  %1386 = vmatmul.mubr.f32.gmra.mrb[18].mxu0 %v677_v17  ;;  %v679_v50 = vmul.f32 %v1637_v21, %v2026_v26 }
 0x3af   :  { %1642 = vrcp.f32 %v643_v23  ;;  %1388 = vmatprep.mubr.f32.mxu0 %v678_v22 }
 0x3b1   :  { %v1639_v24 = vpop.eup %1638 }
 0x3b2   :  { %1389 = vmatmul.mubr.f32.gmra.mrb[20].mxu0 %v679_v50  ;;  %v681_v20 = vmul.f32 %v1639_v24, %v2030_v34  ;;  %v647_v18 = vpop.xlane.xlu0 %646 }
 0x3b3   :  { %1644 = vrcp.f32 %v647_v18 }
 0x3b5   :  { %v1641_v28 = vpop.eup %1640 }
 0x3b6   :  { %v680_v29 = vmul.f32 %v1641_v28, %v2034_v51  ;;  %v651_v33 = vpop.xlane.xlu0 %650 }
 0x3b8   :  { %1391 = vmatprep.mubr.f32.mxu0 %v680_v29 }
 0x3b9   :  { %v1643_v31 = vpop.eup %1642  ;;  %1392 = vmatmul.mubr.f32.gmra.mrb[22].mxu0 %v681_v20 }
 0x3ba   :  { %v682_v12 = vmul.f32 %v1643_v31, %v2038_v3  ;;  %v655_v38 = vpop.xlane.xlu0 %654 }
 0x3bc   :  { %1394 = vmatprep.mubr.f32.mxu0 %v682_v12 }
 0x3bd   :  { %v1645_v34 = vpop.eup %1644 }
 0x3be   :  { %v657_v39 = vpop.xlane.xlu0 %656  ;;  %v684_v48 = vmul.f32 %v1645_v34, %v2043_v5 }
 0x3d2   :  { %v645_v36 = vpop.xlane.xlu1 %644 }
 0x3d3   :  { %1646 = vrcp.f32 %v645_v36 }
 0x3d4   :  { %1648 = vrcp.f32 %v651_v33 }
 0x3d6   :  { %v649_v26 = vpop.xlane.xlu1 %648 }
 0x3d7   :  { %1650 = vrcp.f32 %v649_v26 }
 0x3d8   :  { %1652 = vrcp.f32 %v655_v38 }
 0x3da   :  { %v653_v41 = vpop.xlane.xlu1 %652 }
 0x3db   :  { %1654 = vrcp.f32 %v653_v41 }
 0x3dc   :  { %1656 = vrcp.f32 %v657_v39 }
 0x3dd   :  { %v1647_v44 = vpop.eup %1646 }
 0x3de   :  { %v683_v46 = vmul.f32 %v1647_v44, %v2058_v30  ;;  %v1649_v51 = vpop.eup %1648 }
 0x3df   :  { %v686_v59 = vmul.f32 %v1649_v51, %v2046_v6 }
 0x3e0   :  { %1395 = vmatmul.mubr.f32.gmra.mrb[24].mxu0 %v683_v46 }
 0x3e1   :  { %v1651_v53 = vpop.eup %1650  ;;  %1397 = vmatprep.mubr.f32.mxu0 %v684_v48 }
 0x3e2   :  { %v685_v60 = vmul.f32 %v1651_v53, %v2061_v37  ;;  %v1653_v61 = vpop.eup %1652 }
 0x3e3   :  { %v688_v2 = vmul.f32 %v1653_v61, %v2049_v4 }
 0x3e4   :  { %1398 = vmatmul.mubr.f32.gmra.mrb[26].mxu0 %v685_v60 }
 0x3e5   :  { %v1655_v63 = vpop.eup %1654  ;;  %1400 = vmatprep.mubr.f32.mxu0 %v686_v59 }
 0x3e6   :  { %v687_v0 = vmul.f32 %v1655_v63, %v2064_v35  ;;  %v1657_v3 = vpop.eup %1656 }
 0x3e7   :  { %v689_v5 = vmul.f32 %v1657_v3, %v2052_v7 }
 0x3e8   :  { %1401 = vmatmul.mubr.f32.gmra.mrb[28].mxu0 %v687_v0 }
 0x3e9   :  { %1403 = vmatprep.mubr.f32.mxu0 %v688_v2 }
 0x3ec   :  { %1404 = vmatmul.mubr.f32.gmra.mrb[30].mxu0 %v689_v5 }
 0x47d   :  { %v1384_v6 = vpop.f32.mrb[16].mxu0 }
 0x47e   :  { %v804_v62 = vpop.f32.mrb[17].mxu0 }
 0x47f   :  { %1408 = vmatprep.mubr.msk.f32.mxu0 %vm47_vm0, %v804_v62 }
 0x480   :  { %1409 = vmatmul.mubr.msk.f32.vlgmr.msra.gmra.mrb[32].mxu0 %vm47_vm0, %v1384_v6 }
 0x481   :  { %v1387_v19 = vpop.f32.mrb[18].mxu0 }
 0x482   :  { %v814_v27 = vpop.f32.mrb[19].mxu0 }
 0x483   :  { %1411 = vmatprep.mubr.msk.f32.mxu0 %vm47_vm0, %v814_v27 }
 0x484   :  { %1412 = vmatmul.mubr.msk.f32.gmra.mrb[34].mxu0 %vm47_vm0, %v1387_v19 }
 0x485   :  { %v1390_v4 = vpop.f32.mrb[20].mxu0 }
 0x486   :  { %v824_v7 = vpop.f32.mrb[21].mxu0 }
 0x487   :  { %1414 = vmatprep.mubr.msk.f32.mxu0 %vm47_vm0, %v824_v7 }
 0x488   :  { %1415 = vmatmul.mubr.msk.f32.gmra.mrb[36].mxu0 %vm47_vm0, %v1390_v4 }
 0x48c   :  { %v1393_v25 = vpop.f32.mrb[22].mxu0 }
 0x48d   :  { %v834_v32 = vpop.f32.mrb[23].mxu0 }
 0x48e   :  { %1417 = vmatprep.mubr.msk.f32.mxu0 %vm47_vm0, %v834_v32 }
 0x48f   :  { %1418 = vmatmul.mubr.msk.f32.gmra.mrb[38].mxu0 %vm47_vm0, %v1393_v25 }
 0x4b3   :  { %v1396_v30 = vpop.f32.mrb[24].mxu0 }
 0x4b4   :  { %v844_v37 = vpop.f32.mrb[25].mxu0 }
 0x4b5   :  { %1420 = vmatprep.mubr.msk.f32.mxu0 %vm47_vm0, %v844_v37 }
 0x4b6   :  { %1421 = vmatmul.mubr.msk.f32.gmra.mrb[40].mxu0 %vm47_vm0, %v1396_v30 }
 0x4b7   :  { %v1399_v35 = vpop.f32.mrb[26].mxu0 }
 0x4b8   :  { %v854_v43 = vpop.f32.mrb[27].mxu0 }
 0x4b9   :  { %1423 = vmatprep.mubr.msk.f32.mxu0 %vm47_vm0, %v854_v43 }
 0x4ba   :  { %1424 = vmatmul.mubr.msk.f32.gmra.mrb[42].mxu0 %vm47_vm0, %v1399_v35 }
 0x4bb   :  { %v1402_v56 = vpop.f32.mrb[28].mxu0 }
 0x4bc   :  { %v864_v49 = vpop.f32.mrb[29].mxu0 }
 0x4bd   :  { %1426 = vmatprep.mubr.msk.f32.mxu0 %vm47_vm0, %v864_v49 }
 0x4be   :  { %1427 = vmatmul.mubr.msk.f32.gmra.mrb[44].mxu0 %vm47_vm0, %v1402_v56 }
 0x4bf   :  { %v1405_v1 = vpop.f32.mrb[30].mxu0 }
 0x4c0   :  { %v874_v54 = vpop.f32.mrb[31].mxu0 }
 0x4c1   :  { %1429 = vmatprep.mubr.msk.f32.mxu0 %vm47_vm0, %v874_v54 }
 0x4c2   :  { %1430 = vmatmul.mubr.msk.f32.gmra.mrb[46].mxu0 %vm47_vm0, %v1405_v1 }
 0x553   :  { %v1410_v40 = vpop.f32.mrb[32].mxu0 }
 0x554   :  { %v1011_v45 = vadd.f32 %v1410_v40, %v1153_v42  ;;  %v1005_v47 = vpop.f32.mrb[33].mxu0 }
 0x555   :  { %v1006_v52 = vadd.f32 %v1153_v42, %v1005_v47 }
 0x556   :  { %1085 = vst.msk [vmem:[%s2175_s6 + $0x8] sm:$0xff] %vm47_vm0, %v1011_v45 }
 0x557   :  { %1084 = vst.msk [vmem:[%s2175_s6] sm:$0xff] %vm47_vm0, %v1006_v52  ;;  %v1413_v8 = vpop.f32.mrb[34].mxu0 }
 0x558   :  { %v1021_v55 = vadd.f32 %v1413_v8, %v1153_v42  ;;  %v1015_v9 = vpop.f32.mrb[35].mxu0 }
 0x559   :  { %v1016_v10 = vadd.f32 %v1153_v42, %v1015_v9 }
 0x55a   :  { %1087 = vst.msk [vmem:[%s2175_s6 + $0x18] sm:$0xff] %vm47_vm0, %v1021_v55 }
 0x55b   :  { %1086 = vst.msk [vmem:[%s2175_s6 + $0x10] sm:$0xff] %vm47_vm0, %v1016_v10  ;;  %v1416_v11 = vpop.f32.mrb[36].mxu0 }
 0x55c   :  { %v1031_v13 = vadd.f32 %v1416_v11, %v1153_v42  ;;  %v1025_v14 = vpop.f32.mrb[37].mxu0 }
 0x55d   :  { %v1026_v15 = vadd.f32 %v1153_v42, %v1025_v14 }
 0x55e   :  { %1089 = vst.msk [vmem:[%s2175_s6 + $0x28] sm:$0xff] %vm47_vm0, %v1031_v13 }
 0x55f   :  { %1088 = vst.msk [vmem:[%s2175_s6 + $0x20] sm:$0xff] %vm47_vm0, %v1026_v15 }
 0x562   :  { %v1419_v16 = vpop.f32.mrb[38].mxu0 }
 0x563   :  { %v1041_v57 = vadd.f32 %v1419_v16, %v1153_v42  ;;  %v1035_v17 = vpop.f32.mrb[39].mxu0 }
 0x564   :  { %v1036_v21 = vadd.f32 %v1153_v42, %v1035_v17 }
 0x565   :  { %1091 = vst.msk [vmem:[%s2175_s6 + $0x38] sm:$0xff] %vm47_vm0, %v1041_v57 }
 0x566   :  { %1090 = vst.msk [vmem:[%s2175_s6 + $0x30] sm:$0xff] %vm47_vm0, %v1036_v21 }
 0x589   :  { %v1422_v22 = vpop.f32.mrb[40].mxu0 }
 0x58a   :  { %v1051_v23 = vadd.f32 %v1422_v22, %v1153_v42  ;;  %v1045_v50 = vpop.f32.mrb[41].mxu0 }
 0x58b   :  { %v1046_v24 = vadd.f32 %v1153_v42, %v1045_v50 }
 0x58c   :  { %1093 = vst.msk [vmem:[%s2175_s6 + $0x48] sm:$0xff] %vm47_vm0, %v1051_v23 }
 0x58d   :  { %1092 = vst.msk [vmem:[%s2175_s6 + $0x40] sm:$0xff] %vm47_vm0, %v1046_v24  ;;  %v1425_v28 = vpop.f32.mrb[42].mxu0 }
 0x58e   :  { %v1061_v29 = vadd.f32 %v1425_v28, %v1153_v42  ;;  %v1055_v20 = vpop.f32.mrb[43].mxu0 }
 0x58f   :  { %v1056_v31 = vadd.f32 %v1153_v42, %v1055_v20 }
 0x590   :  { %1095 = vst.msk [vmem:[%s2175_s6 + $0x58] sm:$0xff] %vm47_vm0, %v1061_v29 }
 0x591   :  { %1094 = vst.msk [vmem:[%s2175_s6 + $0x50] sm:$0xff] %vm47_vm0, %v1056_v31  ;;  %v1428_v12 = vpop.f32.mrb[44].mxu0 }
 0x592   :  { %v1071_v18 = vadd.f32 %v1428_v12, %v1153_v42  ;;  %v1065_v33 = vpop.f32.mrb[45].mxu0 }
 0x593   :  { %v1066_v36 = vadd.f32 %v1153_v42, %v1065_v33 }
 0x594   :  { %1097 = vst.msk [vmem:[%s2175_s6 + $0x68] sm:$0xff] %vm47_vm0, %v1071_v18 }
 0x595   :  { %1096 = vst.msk [vmem:[%s2175_s6 + $0x60] sm:$0xff] %vm47_vm0, %v1066_v36  ;;  %v1431_v38 = vpop.f32.mrb[46].mxu0 }
 0x596   :  { %v1081_v26 = vadd.f32 %v1431_v38, %v1153_v42  ;;  %v1075_v39 = vpop.f32.mrb[47].mxu0 }
 0x597   :  { %v1076_v41 = vadd.f32 %v1153_v42, %v1075_v39 }
 0x598   :  { %1099 = vst.msk [vmem:[%s2175_s6 + $0x78] sm:$0xff] %vm47_vm0, %v1081_v26 }
 0x599   :  { %1098 = vst.msk [vmem:[%s2175_s6 + $0x70] sm:$0xff] %vm47_vm0, %v1076_v41 }

// kernel: beliefppg_forward.18
= control target key start
LH: loop header
LB: loop body
LE: loop exit
PB: predicated region body
PF: predicated region fallthrough
CT: control target
= control target key end

     0   :  { %s973_s18 = smov 0   ;;  %s1042_s0 = inlined_call_operand.vmem [shape: f32[2,18,8], index: 0, kind: input, shape index: {}]   ;;  %s1043_s1 = inlined_call_operand.vmem [shape: f32[24,4], index: 1, kind: input, shape index: {}]   ;;  %s1044_s2 = inlined_call_operand.vmem [shape: f32[1,4], index: 2, kind: input, shape index: {}]   ;;  %s1045_s3 = inlined_call_operand.vmem [shape: f32[12,4], index: 3, kind: input, shape index: {}]   ;;  %s1046_s4 = inlined_call_operand.vmem [shape: f32[1,4], index: 4, kind: input, shape index: {}]   ;;  %s1047_s5 = inlined_call_operand.vmem [shape: f32[2,16,4], index: 5, kind: output, shape index: {}]  }
   0x1 LB: > { %s836_s19 = sadd.s32 4294967295, %s940_s18   ;;  %p840_p0 = scmp.ge.s32.totalorder %s940_s18, 1  ;;  %s940_s18 = sphi %s973_s18, %s15_s18  }
   0x2   : > { %p187_p1 = scmp.lt.s32.totalorder %s940_s18, 3 }
   0x4   : > { %p188_p2 = pnand %p840_p0, %p187_p1 }
   0x5   : > { %v235_v0 = vld [vmem:[%s1043_s1] sm:$0xff] (!%p188_p2)  ;;  %p215_p3 = scmp.lt.s32.totalorder (!%p188_p2), %s836_s19, 1  ;;  %v322_v1 = vld [vmem:[%s1043_s1 + $0x8] sm:$0xff] (!%p188_p2)  ;;  %vm236_vm0 = vcmask (!%p188_p2), 64512   ;;  %v408_v5 = vld [vmem:[%s1043_s1 + $0x10] sm:$0xff] (!%p188_p2)  ;;  %vm492_vm1 = vcmask (!%p188_p2), 31744  }
   0x6   : > { %191 = sbr.rel (%p188_p2) target bundleno = 495 (0x1ef), region = 40  ;;  %882 = vmatprep.subr.mxu0 (!%p188_p2), %v235_v0  ;;  %vm495_vm2 = vcmask (!%p188_p2), 25600   ;;  %v942_v9 = vmov (!%p188_p2), 0.0   ;;  %v511_v10 = vld [vmem:[%s1045_s3] sm:$0xf] (!%p188_p2)  ;;  %vm518_vm3 = vcmask (!%p188_p2), 1043456  }
   0x7   : > { %883 = vmatpush3.msra.mxu0 (!%p188_p2), %v235_v0  ;;  %494 = vst.msk [vmem:[#allocation2 + $0x8] sm:$0xff] (!%p188_p2), %vm492_vm1, %v942_v9  ;;  %493 = vst.msk [vmem:[#allocation2] sm:$0xff] (!%p188_p2), %vm492_vm1, %v942_v9  ;;  %897 = vmatprep.subr.msk.mxu1 (!%p188_p2), %vm518_vm3, %v511_v10  ;;  %v601_v11 = vld [vmem:[%s1045_s3 + $0x4] sm:$0xf] (!%p188_p2)  ;;  %v844_v12 = vld [vmem:[%s1044_s2] ss:$0 sm:$0xff] (!%p188_p2) }
   0x8   : > { %887 = vmatprep.subr.mxu0 (!%p188_p2), %v322_v1  ;;  %496 = vst.msk [vmem:[#allocation2 + $0x10] sm:$0x3] (!%p188_p2), %vm495_vm2, %v942_v9  ;;  %898 = vmatpush3.msk.msra.mxu1 (!%p188_p2), %vm518_vm3, %v511_v10  ;;  %v690_v21 = vld [vmem:[%s1045_s3 + $0x8] sm:$0xf] (!%p188_p2)  ;;  %v851_v26 = vld [vmem:[%s1046_s4] ss:$0 sm:$0xff] (!%p188_p2) }
   0x9   : > { %902 = vmatprep.subr.msk.mxu1 (!%p188_p2), %vm518_vm3, %v601_v11 }
   0xd   : > { %s1049_s19 = smov (!%p215_p3, %s836_s19), 1 }
   0xe   : > { %s924_s24 = smul.u32 24, %s1049_s19  ;;  %s863_s15 = sshll.u32 %s1049_s19, 4 }
   0xf   : > { %s224_s20 = scalar_lea.vmem %s1047_s5, %s863_s15 }
  0x10   : > { %s219_s27 = scalar_lea.vmem %s1042_s0, %s924_s24 }
  0x11   : > { %v233_v2 = vld [vmem:[%s219_s27] sm:$0xff]  ;;  %v234_v3 = vld [vmem:[%s219_s27 + $0x8] sm:$0xff] }
  0x12   : > { %v320_v4 = vld [vmem:[%s219_s27 + $0x1] sm:$0xff]  ;;  %884 = vmatprep.mubr.msk.f32.mxu0 %vm236_vm0, %v233_v2  ;;  %v321_v6 = vld [vmem:[%s219_s27 + $0x9] sm:$0xff] }
  0x13   : > { %885 = vmatmul.mubr.msk.f32.vlgmr.msra.gmra.mrb[0].mxu0 %vm236_vm0, %v234_v3  ;;  %v406_v7 = vld [vmem:[%s219_s27 + $0x2] sm:$0xff]  ;;  %v407_v8 = vld [vmem:[%s219_s27 + $0xa] sm:$0xff] }
  0x14   : > { %888 = vmatpush3.msra.mxu0 %v322_v1  ;;  %889 = vmatprep.mubr.msk.f32.mxu0 %vm236_vm0, %v320_v4 }
  0x15   : > { %892 = vmatprep.subr.mxu0 %v408_v5 }
  0x1b   : > { %890 = vmatmul.mubr.msk.f32.vlgmr.msra.gmra.mrb[0].mxu0 %vm236_vm0, %v321_v6 }
  0x1c   : > { %893 = vmatpush3.msra.mxu0 %v408_v5  ;;  %894 = vmatprep.mubr.msk.f32.mxu0 %vm236_vm0, %v406_v7 }
  0x23   : > { %895 = vmatmul.mubr.msk.f32.vlgmr.msra.gmra.mrb[0].mxu0 %vm236_vm0, %v407_v8 }
  0xf6   : > { %v896_v13 = vpop.f32.mrb[0].mxu0 }
  0xf7   : > { %v912_v14 = vadd.f32 %v896_v13, %v844_v12  ;;  %v481_v15 = vpop.f32.mrb[1].mxu0 }
  0xf8   : > { %v913_v16 = vadd.f32 %v844_v12, %v481_v15 }
  0xf9   : > { %v498_v17 = vmax.f32 %v912_v14, 0.0 }
  0xfa   : > { %v497_v18 = vmax.f32 %v913_v16, 0.0 }
  0xfb   : > { %500 = vst.msk [vmem:[#allocation2 + $0x9] sm:$0xff] %vm492_vm1, %v498_v17 }
  0xfc   : > { %499 = vst.msk [vmem:[#allocation2 + $0x1] sm:$0xff] %vm492_vm1, %v497_v18 }
 0x102   : > { %v600_v23 = vld [vmem:[#allocation2 + $0x9] sm:$0xff] }
 0x103   : > { %v509_v19 = vld [vmem:[#allocation2] sm:$0xff]  ;;  %v510_v20 = vld [vmem:[#allocation2 + $0x8] sm:$0xff] }
 0x104   : > { %899 = vmatprep.mubr.msk.f32.mxu1 %vm492_vm1, %v509_v19  ;;  %v599_v22 = vld [vmem:[#allocation2 + $0x1] sm:$0xff]  ;;  %v689_v25 = vld [vmem:[#allocation2 + $0xa] sm:$0xff] }
 0x105   : > { %900 = vmatmul.mubr.msk.f32.vlgmr.msra.gmra.mrb[0].mxu1 %vm492_vm1, %v510_v20  ;;  %v688_v24 = vld [vmem:[#allocation2 + $0x2] sm:$0xff] }
 0x106   : > { %903 = vmatpush3.msk.msra.mxu1 %vm518_vm3, %v601_v11  ;;  %904 = vmatprep.mubr.msk.f32.mxu1 %vm492_vm1, %v599_v22 }
 0x107   : > { %907 = vmatprep.subr.msk.mxu1 %vm518_vm3, %v690_v21 }
 0x10d   : > { %905 = vmatmul.mubr.msk.f32.vlgmr.msra.gmra.mrb[0].mxu1 %vm492_vm1, %v600_v23 }
 0x10e   : > { %908 = vmatpush3.msk.msra.mxu1 %vm518_vm3, %v690_v21  ;;  %909 = vmatprep.mubr.msk.f32.mxu1 %vm492_vm1, %v688_v24 }
 0x115   : > { %910 = vmatmul.mubr.msk.f32.vlgmr.msra.gmra.mrb[0].mxu1 %vm492_vm1, %v689_v25 }
 0x1e8   : > { %v911_v27 = vpop.f32.mrb[0].mxu1 }
 0x1e9   : > { %v914_v28 = vadd.f32 %v911_v27, %v851_v26  ;;  %v766_v29 = vpop.f32.mrb[1].mxu1 }
 0x1ea   : > { %v915_v30 = vadd.f32 %v851_v26, %v766_v29 }
 0x1eb   : > { %v778_v31 = vmax.f32 %v914_v28, 0.0 }
 0x1ec   : > { %v777_v32 = vmax.f32 %v915_v30, 0.0 }
 0x1ed   : > { %780 = vst.msk [vmem:[%s224_s20 + $0x8] sm:$0xff] %vm492_vm1, %v778_v31 }
 0x1ee   : > { %779 = vst.msk [vmem:[%s224_s20] sm:$0xff] %vm492_vm1, %v777_v32 }
 0x1ef PF: > { %s15_s18 = sadd.s32 1, %s940_s18  }
 0x1f0   : > { %p12_p4 = scmp.ge.s32.totalorder %s15_s18, 4  }
 0x1f2   :  { %14 = sbr.rel (!%p12_p4) target bundleno = 1 (0x1), region = 70 }

// kernel: beliefppg_forward.14
= control target key start
LH: loop header
LB: loop body
LE: loop exit
PB: predicated region body
PF: predicated region fallthrough
CT: control target
= control target key end

     0   :  { %s4505_s18 = smov 0   ;;  %s5261_s0 = inlined_call_operand.vmem [shape: f32[2,110,2], index: 0, kind: input, shape index: {}]   ;;  %s5262_s1 = inlined_call_operand.vmem [shape: f32[18,8], index: 1, kind: input, shape index: {}]   ;;  %s5263_s2 = inlined_call_operand.vmem [shape: f32[1,8], index: 2, kind: input, shape index: {}]   ;;  %s5264_s3 = inlined_call_operand.vmem [shape: f32[72,8], index: 3, kind: input, shape index: {}]   ;;  %s5265_s4 = inlined_call_operand.vmem [shape: f32[1,8], index: 4, kind: input, shape index: {}]   ;;  %s5266_s5 = inlined_call_operand.vmem [shape: f32[2,4,16,8], index: 5, kind: output, shape index: {}]  }
   0x1 LB: > { %s3256_s19 = sadd.s32 4294967295, %s4471_s18   ;;  %p3260_p0 = scmp.ge.s32.totalorder %s4471_s18, 1  ;;  %s4471_s18 = sphi %s4505_s18, %s15_s18  }
   0x2   : > { %p187_p1 = scmp.lt.s32.totalorder %s4471_s18, 3 }
   0x4   : > { %p188_p2 = pnand %p3260_p0, %p187_p1 }
   0x5   : > { %v233_v0 = vld [vmem:[%s5262_s1] sm:$0x3] (!%p188_p2)  ;;  %vm271_vm0 = vcmask (!%p188_p2), 1041408   ;;  %p215_p3 = scmp.lt.s32.totalorder (!%p188_p2), %s3256_s19, 1  ;;  %v4473_v1 = vmov (!%p188_p2), 0.0   ;;  %vm4474_vm1 = vmmov (!%p188_p2), 0  }
   0x6   : > { %191 = sbr.rel (%p188_p2) target bundleno = 1081 (0x439), region = 40  ;;  %3626 = vmatprep.subr.mxu0 (!%p188_p2), %v4473_v1  ;;  %3628 = vmatprep.mubr.msk.f32.mxu0 (!%p188_p2), %vm4474_vm1, %v4473_v1  ;;  %vm243_vm2 = vcmask (!%p188_p2), 15360   ;;  %v394_v2 = vld [vmem:[%s5262_s1 + $0x2] sm:$0x3] (!%p188_p2)  ;;  %v553_v13 = vld [vmem:[%s5262_s1 + $0x4] sm:$0x3] (!%p188_p2) }
   0x7   : > { %3627 = vmatpush3.msk.msra.mxu0 (!%p188_p2), %vm271_vm0, %v233_v0  ;;  %3887 = vmatprep.subr.mxu1 (!%p188_p2), %v4473_v1  ;;  %v712_v23 = vld [vmem:[%s5262_s1 + $0x6] sm:$0x3] (!%p188_p2)  ;;  %v871_v32 = vld [vmem:[%s5262_s1 + $0x8] sm:$0x3] (!%p188_p2)  ;;  %v1030_v36 = vld [vmem:[%s5262_s1 + $0xa] sm:$0x3] (!%p188_p2) }
   0x8   : > { %3655 = vmatprep.subr.mxu0 (!%p188_p2), %v4473_v1  ;;  %3889 = vmatprep.mubr.msk.f32.mxu1 (!%p188_p2), %vm4474_vm1, %v4473_v1  ;;  %v1189_v46 = vld [vmem:[%s5262_s1 + $0xc] sm:$0x3] (!%p188_p2)  ;;  %v1348_v55 = vld [vmem:[%s5262_s1 + $0xe] sm:$0x3] (!%p188_p2)  ;;  %v1507_v59 = vld [vmem:[%s5262_s1 + $0x10] sm:$0x3] (!%p188_p2) }
   0x9   : > { %vm1693_vm3 = vcmask (!%p188_p2), 64512   ;;  %vm1716_vm13 = vcmask (!%p188_p2), 62464  }
   0xa   : > { %1703 = vst.msk [vmem:[#allocation2] sm:$0xff] (!%p188_p2), %vm1693_vm3, %v4473_v1  ;;  %1704 = vst.msk [vmem:[#allocation2 + $0x8] sm:$0xff] (!%p188_p2), %vm1693_vm3, %v4473_v1 }
   0xb   : > { %1705 = vst.msk [vmem:[#allocation2 + $0x10] sm:$0xff] (!%p188_p2), %vm1693_vm3, %v4473_v1  ;;  %1706 = vst.msk [vmem:[#allocation2 + $0x18] sm:$0xff] (!%p188_p2), %vm1693_vm3, %v4473_v1 }
   0xc   : > { %1707 = vst.msk [vmem:[#allocation2 + $0x20] sm:$0xff] (!%p188_p2), %vm1693_vm3, %v4473_v1  ;;  %1708 = vst.msk [vmem:[#allocation2 + $0x28] sm:$0xff] (!%p188_p2), %vm1693_vm3, %v4473_v1 }
   0xd   : > { %s5268_s19 = smov (!%p215_p3, %s3256_s19), 1  ;;  %1709 = vst.msk [vmem:[#allocation2 + $0x30] sm:$0xff] %vm1693_vm3, %v4473_v1  ;;  %1710 = vst.msk [vmem:[#allocation2 + $0x38] sm:$0xff] %vm1693_vm3, %v4473_v1 }
   0xe   : > { %s4454_s22 = smul.u32 112, %s5268_s19  ;;  %1711 = vst.msk [vmem:[#allocation2 + $0x40] sm:$0xff] %vm1693_vm3, %v4473_v1  ;;  %1712 = vst.msk [vmem:[#allocation2 + $0x48] sm:$0xff] %vm1693_vm3, %v4473_v1  ;;  %s3445_s16 = sshll.u32 %s5268_s19, 6 }
   0xf   : > { %1713 = vst.msk [vmem:[#allocation2 + $0x50] sm:$0xff] %vm1693_vm3, %v4473_v1  ;;  %1714 = vst.msk [vmem:[#allocation2 + $0x58] sm:$0xff] %vm1693_vm3, %v4473_v1  ;;  %s5227_s21 = scalar_lea.vmem %s5266_s5, %s3445_s16 }
  0x10   : > { %s4530_s25 = scalar_lea.vmem %s5261_s0, %s4454_s22  ;;  %1715 = vst.msk [vmem:[#allocation2 + $0x60] sm:$0xff] %vm1693_vm3, %v4473_v1 }
  0x11   : > { %v234_v3 = vld [vmem:[%s4530_s25] sm:$0xff]  ;;  %v235_v4 = vld [vmem:[%s4530_s25 + $0x8] sm:$0xff]  ;;  %v236_v5 = vld [vmem:[%s4530_s25 + $0x10] sm:$0xff]  ;;  %1717 = vst.msk [vmem:[#allocation2 + $0x68] sm:$0x3f] %vm1716_vm13, %v4473_v1 }
  0x12   : > { %3629 = vmatmul.mubr.msk.f32.vlgmr.msra.gmra.mrb[0].mxu0 %vm243_vm2, %v234_v3  ;;  %v237_v6 = vld [vmem:[%s4530_s25 + $0x18] sm:$0xff]  ;;  %v238_v7 = vld [vmem:[%s4530_s25 + $0x20] sm:$0xff]  ;;  %v239_v8 = vld [vmem:[%s4530_s25 + $0x28] sm:$0xff] }
  0x13   : > { %3656 = vmatpush3.msk.msra.mxu0 %vm271_vm0, %v394_v2  ;;  %3631 = vmatprep.mubr.msk.f32.mxu0 %vm4474_vm1, %v4473_v1  ;;  %v240_v9 = vld [vmem:[%s4530_s25 + $0x30] sm:$0xff]  ;;  %v241_v10 = vld [vmem:[%s4530_s25 + $0x38] sm:$0xff]  ;;  %v242_v11 = vld [vmem:[%s4530_s25 + $0x40] sm:$0xff] }
  0x14   : > { %3684 = vmatprep.subr.mxu0 %v4473_v1  ;;  %v395_v12 = vld [vmem:[%s4530_s25 + $0x1] sm:$0xff]  ;;  %v396_v14 = vld [vmem:[%s4530_s25 + $0x9] sm:$0xff]  ;;  %v397_v15 = vld [vmem:[%s4530_s25 + $0x11] sm:$0xff] }
  0x15   : > { %v398_v16 = vld [vmem:[%s4530_s25 + $0x19] sm:$0xff]  ;;  %v399_v17 = vld [vmem:[%s4530_s25 + $0x21] sm:$0xff]  ;;  %v400_v18 = vld [vmem:[%s4530_s25 + $0x29] sm:$0xff] }
  0x16   : > { %3632 = vmatmul.mubr.msk.f32.gmra.mrb[2].mxu0 %vm243_vm2, %v235_v4  ;;  %v401_v19 = vld [vmem:[%s4530_s25 + $0x31] sm:$0xff]  ;;  %v402_v20 = vld [vmem:[%s4530_s25 + $0x39] sm:$0xff]  ;;  %v403_v21 = vld [vmem:[%s4530_s25 + $0x41] sm:$0xff] }
  0x17   : > { %3634 = vmatprep.mubr.msk.f32.mxu0 %vm4474_vm1, %v4473_v1  ;;  %v554_v22 = vld [vmem:[%s4530_s25 + $0x2] sm:$0xff]  ;;  %v555_v24 = vld [vmem:[%s4530_s25 + $0xa] sm:$0xff]  ;;  %v556_v25 = vld [vmem:[%s4530_s25 + $0x12] sm:$0xff] }
  0x18   : > { %v557_v26 = vld [vmem:[%s4530_s25 + $0x1a] sm:$0xff]  ;;  %v558_v27 = vld [vmem:[%s4530_s25 + $0x22] sm:$0xff]  ;;  %v559_v28 = vld [vmem:[%s4530_s25 + $0x2a] sm:$0xff] }
  0x19   : > { %v560_v29 = vld [vmem:[%s4530_s25 + $0x32] sm:$0xff]  ;;  %v561_v30 = vld [vmem:[%s4530_s25 + $0x3a] sm:$0xff]  ;;  %v562_v31 = vld [vmem:[%s4530_s25 + $0x42] sm:$0xff] }
  0x1a   : > { %3635 = vmatmul.mubr.msk.f32.gmra.mrb[4].mxu0 %vm243_vm2, %v236_v5  ;;  %v720_v33 = vld [vmem:[%s4530_s25 + $0x4a] sm:$0xff]  ;;  %v721_v34 = vld [vmem:[%s4530_s25 + $0x52] sm:$0xff]  ;;  %v873_v37 = vld [vmem:[%s4530_s25 + $0x1b] sm:$0xff] }
  0x1b   : > { %3637 = vmatprep.mubr.msk.f32.mxu0 %vm4474_vm1, %v4473_v1  ;;  %v872_v35 = vld [vmem:[%s4530_s25 + $0x13] sm:$0xff]  ;;  %v874_v38 = vld [vmem:[%s4530_s25 + $0x23] sm:$0xff]  ;;  %v875_v39 = vld [vmem:[%s4530_s25 + $0x2b] sm:$0xff] }
  0x1c   : > { %v876_v40 = vld [vmem:[%s4530_s25 + $0x33] sm:$0xff]  ;;  %v877_v41 = vld [vmem:[%s4530_s25 + $0x3b] sm:$0xff]  ;;  %v878_v42 = vld [vmem:[%s4530_s25 + $0x43] sm:$0xff] }
  0x1d   : > { %v879_v43 = vld [vmem:[%s4530_s25 + $0x4b] sm:$0xff]  ;;  %v880_v44 = vld [vmem:[%s4530_s25 + $0x53] sm:$0xff]  ;;  %v1032_v47 = vld [vmem:[%s4530_s25 + $0x1c] sm:$0xff] }
  0x1e   : > { %3638 = vmatmul.mubr.msk.f32.gmra.mrb[6].mxu0 %vm243_vm2, %v237_v6  ;;  %v1031_v45 = vld [vmem:[%s4530_s25 + $0x14] sm:$0xff]  ;;  %v1033_v48 = vld [vmem:[%s4530_s25 + $0x24] sm:$0xff]  ;;  %v1034_v49 = vld [vmem:[%s4530_s25 + $0x2c] sm:$0xff] }
  0x1f   : > { %3640 = vmatprep.mubr.msk.f32.mxu0 %vm4474_vm1, %v4473_v1  ;;  %v1035_v50 = vld [vmem:[%s4530_s25 + $0x34] sm:$0xff]  ;;  %v1036_v51 = vld [vmem:[%s4530_s25 + $0x3c] sm:$0xff]  ;;  %v1037_v52 = vld [vmem:[%s4530_s25 + $0x44] sm:$0xff] }
  0x20   : > { %v1038_v53 = vld [vmem:[%s4530_s25 + $0x4c] sm:$0xff]  ;;  %v1039_v54 = vld [vmem:[%s4530_s25 + $0x54] sm:$0xff]  ;;  %v1197_v56 = vld [vmem:[%s4530_s25 + $0x5c] sm:$0xff] }
  0x21   : > { %v1198_v57 = vld [vmem:[%s4530_s25 + $0x64] sm:$0xff]  ;;  %v1350_v60 = vld [vmem:[%s4530_s25 + $0x2d] sm:$0xff]  ;;  %v1351_v61 = vld [vmem:[%s4530_s25 + $0x35] sm:$0xff] }
  0x22   : > { %3641 = vmatmul.mubr.msk.f32.gmra.mrb[8].mxu0 %vm243_vm2, %v238_v7  ;;  %v1349_v58 = vld [vmem:[%s4530_s25 + $0x25] sm:$0xff]  ;;  %v1352_v62 = vld [vmem:[%s4530_s25 + $0x3d] sm:$0xff]  ;;  %v1354_v0 = vld [vmem:[%s4530_s25 + $0x4d] sm:$0xff] }
  0x23   : > { %3643 = vmatprep.mubr.msk.f32.mxu0 %vm4474_vm1, %v4473_v1  ;;  %v1353_v63 = vld [vmem:[%s4530_s25 + $0x45] sm:$0xff]  ;;  %v1355_v2 = vld [vmem:[%s4530_s25 + $0x55] sm:$0xff]  ;;  %v1356_v3 = vld [vmem:[%s4530_s25 + $0x5d] sm:$0xff] }
  0x24   : > { %v1357_v4 = vld [vmem:[%s4530_s25 + $0x65] sm:$0xff]  ;;  %v1509_v6 = vld [vmem:[%s4530_s25 + $0x2e] sm:$0xff]  ;;  %v1510_v7 = vld [vmem:[%s4530_s25 + $0x36] sm:$0xff] }
  0x25   : > { %v1508_v5 = vld [vmem:[%s4530_s25 + $0x26] sm:$0xff] }
  0x26   : > { %3644 = vmatmul.mubr.msk.f32.gmra.mrb[10].mxu0 %vm243_vm2, %v239_v8  ;;  %v1511_v8 = vld [vmem:[%s4530_s25 + $0x3e] sm:$0xff] }
  0x27   : > { %3646 = vmatprep.mubr.msk.f32.mxu0 %vm4474_vm1, %v4473_v1 }
  0x2a   : > { %3647 = vmatmul.mubr.msk.f32.gmra.mrb[12].mxu0 %vm243_vm2, %v240_v9  ;;  %v1512_v9 = vld [vmem:[%s4530_s25 + $0x46] sm:$0xff] }
  0x2b   : > { %3649 = vmatprep.mubr.msk.f32.mxu0 %vm4474_vm1, %v4473_v1 }
  0x2e   : > { %3650 = vmatmul.mubr.msk.f32.gmra.mrb[14].mxu0 %vm243_vm2, %v241_v10  ;;  %v1513_v10 = vld [vmem:[%s4530_s25 + $0x4e] sm:$0xff] }
  0x2f   : > { %3652 = vmatprep.mubr.msk.f32.mxu0 %vm4474_vm1, %v4473_v1 }
  0x32   : > { %3653 = vmatmul.mubr.msk.f32.gmra.mrb[16].mxu0 %vm243_vm2, %v242_v11  ;;  %v1514_v11 = vld [vmem:[%s4530_s25 + $0x56] sm:$0xff] }
  0x33   : > { %3657 = vmatprep.mubr.msk.f32.mxu0 %vm4474_vm1, %v4473_v1 }
  0x36   : > { %3658 = vmatmul.mubr.msk.f32.vlgmr.msra.gmra.mrb[0].mxu0 %vm243_vm2, %v395_v12  ;;  %v1515_v12 = vld [vmem:[%s4530_s25 + $0x5e] sm:$0xff] }
  0x37   : > { %3685 = vmatpush3.msk.msra.mxu0 %vm271_vm0, %v553_v13  ;;  %3660 = vmatprep.mubr.msk.f32.mxu0 %vm4474_vm1, %v4473_v1  ;;  %v1516_v13 = vld [vmem:[%s4530_s25 + $0x66] sm:$0xff] }
  0x38   : > { %3713 = vmatprep.subr.mxu0 %v4473_v1 }
  0x3a   : > { %3661 = vmatmul.mubr.msk.f32.gmra.mrb[2].mxu0 %vm243_vm2, %v396_v14  ;;  %v1742_v14 = vld [vmem:[%s5264_s3] sm:$0xff] }
  0x3b   : > { %3663 = vmatprep.mubr.msk.f32.mxu0 %vm4474_vm1, %v4473_v1  ;;  %3888 = vmatpush3.msra.mxu1 %v1742_v14 }
  0x3c   : > { %3916 = vmatprep.subr.mxu1 %v4473_v1 }
  0x3e   : > { %3664 = vmatmul.mubr.msk.f32.gmra.mrb[4].mxu0 %vm243_vm2, %v397_v15  ;;  %v1743_v15 = vld [vmem:[#allocation2] sm:$0xff] }
  0x3f   : > { %3666 = vmatprep.mubr.msk.f32.mxu0 %vm4474_vm1, %v4473_v1  ;;  %3890 = vmatmul.mubr.msk.f32.vlgmr.msra.gmra.mrb[0].mxu1 %vm1693_vm3, %v1743_v15 }
  0x40   : > { %3892 = vmatprep.mubr.msk.f32.mxu1 %vm4474_vm1, %v4473_v1 }
  0x42   : > { %3667 = vmatmul.mubr.msk.f32.gmra.mrb[6].mxu0 %vm243_vm2, %v398_v16  ;;  %v1744_v16 = vld [vmem:[#allocation2 + $0x8] sm:$0xff] }
  0x43   : > { %3669 = vmatprep.mubr.msk.f32.mxu0 %vm4474_vm1, %v4473_v1  ;;  %3893 = vmatmul.mubr.msk.f32.gmra.mrb[2].mxu1 %vm1693_vm3, %v1744_v16  ;;  %v1899_v16 = vld [vmem:[#allocation2 + $0x1] sm:$0xff] }
  0x44   : > { %3895 = vmatprep.mubr.msk.f32.mxu1 %vm4474_vm1, %v4473_v1 }
  0x46   : > { %3670 = vmatmul.mubr.msk.f32.gmra.mrb[8].mxu0 %vm243_vm2, %v399_v17  ;;  %v1898_v17 = vld [vmem:[%s5264_s3 + $0x8] sm:$0xff] }
  0x47   : > { %3672 = vmatprep.mubr.msk.f32.mxu0 %vm4474_vm1, %v4473_v1  ;;  %3917 = vmatpush3.msra.mxu1 %v1898_v17  ;;  %v2054_v17 = vld [vmem:[%s5264_s3 + $0x10] sm:$0xff] }
  0x48   : > { %3945 = vmatprep.subr.mxu1 %v4473_v1 }
  0x4a   : > { %3673 = vmatmul.mubr.msk.f32.gmra.mrb[10].mxu0 %vm243_vm2, %v400_v18  ;;  %v4922_v18 = vld [vmem:[%s5263_s2] ss:$0 sm:$0xff] }
  0x4b   : > { %3675 = vmatprep.mubr.msk.f32.mxu0 %vm4474_vm1, %v4473_v1 }
  0x4e   : > { %3676 = vmatmul.mubr.msk.f32.gmra.mrb[12].mxu0 %vm243_vm2, %v401_v19 }
  0x4f   : > { %3678 = vmatprep.mubr.msk.f32.mxu0 %vm4474_vm1, %v4473_v1 }
  0x52   : > { %3679 = vmatmul.mubr.msk.f32.gmra.mrb[14].mxu0 %vm243_vm2, %v402_v20 }
  0x53   : > { %3681 = vmatprep.mubr.msk.f32.mxu0 %vm4474_vm1, %v4473_v1 }
  0x56   : > { %3682 = vmatmul.mubr.msk.f32.gmra.mrb[16].mxu0 %vm243_vm2, %v403_v21 }
  0x57   : > { %3686 = vmatprep.mubr.msk.f32.mxu0 %vm4474_vm1, %v4473_v1 }
  0x5a   : > { %3687 = vmatmul.mubr.msk.f32.vlgmr.msra.gmra.mrb[0].mxu0 %vm243_vm2, %v554_v22 }
  0x5b   : > { %3714 = vmatpush3.msk.msra.mxu0 %vm271_vm0, %v712_v23  ;;  %3689 = vmatprep.mubr.msk.f32.mxu0 %vm4474_vm1, %v4473_v1 }
  0x5c   : > { %3742 = vmatprep.subr.mxu0 %v4473_v1 }
  0x5e   : > { %3690 = vmatmul.mubr.msk.f32.gmra.mrb[2].mxu0 %vm243_vm2, %v555_v24 }
  0x5f   : > { %3692 = vmatprep.mubr.msk.f32.mxu0 %vm4474_vm1, %v4473_v1 }
  0x62   : > { %3693 = vmatmul.mubr.msk.f32.gmra.mrb[4].mxu0 %vm243_vm2, %v556_v25 }
  0x63   : > { %3695 = vmatprep.mubr.msk.f32.mxu0 %vm4474_vm1, %v4473_v1 }
  0x66   : > { %3696 = vmatmul.mubr.msk.f32.gmra.mrb[6].mxu0 %vm243_vm2, %v557_v26 }
  0x67   : > { %3698 = vmatprep.mubr.msk.f32.mxu0 %vm4474_vm1, %v4473_v1 }
  0x6a   : > { %3699 = vmatmul.mubr.msk.f32.gmra.mrb[8].mxu0 %vm243_vm2, %v558_v27 }
  0x6b   : > { %3701 = vmatprep.mubr.msk.f32.mxu0 %vm4474_vm1, %v4473_v1 }
  0x6e   : > { %3702 = vmatmul.mubr.msk.f32.gmra.mrb[10].mxu0 %vm243_vm2, %v559_v28 }
  0x6f   : > { %3704 = vmatprep.mubr.msk.f32.mxu0 %vm4474_vm1, %v4473_v1 }
  0x72   : > { %3705 = vmatmul.mubr.msk.f32.gmra.mrb[12].mxu0 %vm243_vm2, %v560_v29 }
  0x73   : > { %3707 = vmatprep.mubr.msk.f32.mxu0 %vm4474_vm1, %v4473_v1 }
  0x76   : > { %3708 = vmatmul.mubr.msk.f32.gmra.mrb[14].mxu0 %vm243_vm2, %v561_v30 }
  0x77   : > { %3710 = vmatprep.mubr.msk.f32.mxu0 %vm4474_vm1, %v4473_v1 }
  0x7a   : > { %3711 = vmatmul.mubr.msk.f32.gmra.mrb[16].mxu0 %vm243_vm2, %v562_v31 }
  0x7b   : > { %3715 = vmatprep.mubr.msk.f32.mxu0 %vm4474_vm1, %v4473_v1 }
  0x7e   : > { %3716 = vmatmul.mubr.msk.f32.vlgmr.msra.gmra.mrb[0].mxu0 %vm243_vm2, %v556_v25 }
  0x7f   : > { %3743 = vmatpush3.msk.msra.mxu0 %vm271_vm0, %v871_v32  ;;  %3718 = vmatprep.mubr.msk.f32.mxu0 %vm4474_vm1, %v4473_v1 }
  0x80   : > { %3771 = vmatprep.subr.mxu0 %v4473_v1 }
  0x82   : > { %3719 = vmatmul.mubr.msk.f32.gmra.mrb[2].mxu0 %vm243_vm2, %v557_v26 }
  0x83   : > { %3721 = vmatprep.mubr.msk.f32.mxu0 %vm4474_vm1, %v4473_v1 }
  0x86   : > { %3722 = vmatmul.mubr.msk.f32.gmra.mrb[4].mxu0 %vm243_vm2, %v558_v27 }
  0x87   : > { %3724 = vmatprep.mubr.msk.f32.mxu0 %vm4474_vm1, %v4473_v1 }
  0x8a   : > { %3725 = vmatmul.mubr.msk.f32.gmra.mrb[6].mxu0 %vm243_vm2, %v559_v28 }
  0x8b   : > { %3727 = vmatprep.mubr.msk.f32.mxu0 %vm4474_vm1, %v4473_v1 }
  0x8e   : > { %3728 = vmatmul.mubr.msk.f32.gmra.mrb[8].mxu0 %vm243_vm2, %v560_v29 }
  0x8f   : > { %3730 = vmatprep.mubr.msk.f32.mxu0 %vm4474_vm1, %v4473_v1 }
  0x92   : > { %3731 = vmatmul.mubr.msk.f32.gmra.mrb[10].mxu0 %vm243_vm2, %v561_v30 }
  0x93   : > { %3733 = vmatprep.mubr.msk.f32.mxu0 %vm4474_vm1, %v4473_v1 }
  0x96   : > { %3734 = vmatmul.mubr.msk.f32.gmra.mrb[12].mxu0 %vm243_vm2, %v562_v31 }
  0x97   : > { %3736 = vmatprep.mubr.msk.f32.mxu0 %vm4474_vm1, %v4473_v1 }
  0x9a   : > { %3737 = vmatmul.mubr.msk.f32.gmra.mrb[14].mxu0 %vm243_vm2, %v720_v33 }
  0x9b   : > { %3739 = vmatprep.mubr.msk.f32.mxu0 %vm4474_vm1, %v4473_v1 }
  0x9e   : > { %3740 = vmatmul.mubr.msk.f32.gmra.mrb[16].mxu0 %vm243_vm2, %v721_v34 }
  0x9f   : > { %3744 = vmatprep.mubr.msk.f32.mxu0 %vm4474_vm1, %v4473_v1 }
  0xa2   : > { %3745 = vmatmul.mubr.msk.f32.vlgmr.msra.gmra.mrb[0].mxu0 %vm243_vm2, %v872_v35 }
  0xa3   : > { %3772 = vmatpush3.msk.msra.mxu0 %vm271_vm0, %v1030_v36  ;;  %3747 = vmatprep.mubr.msk.f32.mxu0 %vm4474_vm1, %v4473_v1 }
  0xa4   : > { %3800 = vmatprep.subr.mxu0 %v4473_v1 }
  0xa6   : > { %3748 = vmatmul.mubr.msk.f32.gmra.mrb[2].mxu0 %vm243_vm2, %v873_v37 }
  0xa7   : > { %3750 = vmatprep.mubr.msk.f32.mxu0 %vm4474_vm1, %v4473_v1 }
  0xaa   : > { %3751 = vmatmul.mubr.msk.f32.gmra.mrb[4].mxu0 %vm243_vm2, %v874_v38 }
  0xab   : > { %3753 = vmatprep.mubr.msk.f32.mxu0 %vm4474_vm1, %v4473_v1 }
  0xae   : > { %3754 = vmatmul.mubr.msk.f32.gmra.mrb[6].mxu0 %vm243_vm2, %v875_v39 }
  0xaf   : > { %3756 = vmatprep.mubr.msk.f32.mxu0 %vm4474_vm1, %v4473_v1 }
  0xb2   : > { %3757 = vmatmul.mubr.msk.f32.gmra.mrb[8].mxu0 %vm243_vm2, %v876_v40 }
  0xb3   : > { %3759 = vmatprep.mubr.msk.f32.mxu0 %vm4474_vm1, %v4473_v1 }
  0xb6   : > { %3760 = vmatmul.mubr.msk.f32.gmra.mrb[10].mxu0 %vm243_vm2, %v877_v41 }
  0xb7   : > { %3762 = vmatprep.mubr.msk.f32.mxu0 %vm4474_vm1, %v4473_v1 }
  0xba   : > { %3763 = vmatmul.mubr.msk.f32.gmra.mrb[12].mxu0 %vm243_vm2, %v878_v42 }
  0xbb   : > { %3765 = vmatprep.mubr.msk.f32.mxu0 %vm4474_vm1, %v4473_v1 }
  0xbe   : > { %3766 = vmatmul.mubr.msk.f32.gmra.mrb[14].mxu0 %vm243_vm2, %v879_v43 }
  0xbf   : > { %3768 = vmatprep.mubr.msk.f32.mxu0 %vm4474_vm1, %v4473_v1 }
  0xc2   : > { %3769 = vmatmul.mubr.msk.f32.gmra.mrb[16].mxu0 %vm243_vm2, %v880_v44 }
  0xc3   : > { %3773 = vmatprep.mubr.msk.f32.mxu0 %vm4474_vm1, %v4473_v1 }
  0xc6   : > { %3774 = vmatmul.mubr.msk.f32.vlgmr.msra.gmra.mrb[0].mxu0 %vm243_vm2, %v1031_v45 }
  0xc7   : > { %3801 = vmatpush3.msk.msra.mxu0 %vm271_vm0, %v1189_v46  ;;  %3776 = vmatprep.mubr.msk.f32.mxu0 %vm4474_vm1, %v4473_v1 }
  0xc8   : > { %3829 = vmatprep.subr.mxu0 %v4473_v1 }
  0xca   : > { %3777 = vmatmul.mubr.msk.f32.gmra.mrb[2].mxu0 %vm243_vm2, %v1032_v47 }
  0xcb   : > { %3779 = vmatprep.mubr.msk.f32.mxu0 %vm4474_vm1, %v4473_v1 }
  0xce   : > { %3780 = vmatmul.mubr.msk.f32.gmra.mrb[4].mxu0 %vm243_vm2, %v1033_v48 }
  0xcf   : > { %3782 = vmatprep.mubr.msk.f32.mxu0 %vm4474_vm1, %v4473_v1 }
  0xd2   : > { %3783 = vmatmul.mubr.msk.f32.gmra.mrb[6].mxu0 %vm243_vm2, %v1034_v49 }
  0xd3   : > { %3785 = vmatprep.mubr.msk.f32.mxu0 %vm4474_vm1, %v4473_v1 }
  0xd6   : > { %3786 = vmatmul.mubr.msk.f32.gmra.mrb[8].mxu0 %vm243_vm2, %v1035_v50 }
  0xd7   : > { %3788 = vmatprep.mubr.msk.f32.mxu0 %vm4474_vm1, %v4473_v1 }
  0xda   : > { %3789 = vmatmul.mubr.msk.f32.gmra.mrb[10].mxu0 %vm243_vm2, %v1036_v51 }
  0xdb   : > { %3791 = vmatprep.mubr.msk.f32.mxu0 %vm4474_vm1, %v4473_v1 }
  0xde   : > { %3792 = vmatmul.mubr.msk.f32.gmra.mrb[12].mxu0 %vm243_vm2, %v1037_v52 }
  0xdf   : > { %3794 = vmatprep.mubr.msk.f32.mxu0 %vm4474_vm1, %v4473_v1 }
  0xe2   : > { %3795 = vmatmul.mubr.msk.f32.gmra.mrb[14].mxu0 %vm243_vm2, %v1038_v53 }
  0xe3   : > { %3797 = vmatprep.mubr.msk.f32.mxu0 %vm4474_vm1, %v4473_v1 }
  0xe6   : > { %3798 = vmatmul.mubr.msk.f32.gmra.mrb[16].mxu0 %vm243_vm2, %v1039_v54 }
  0xe7   : > { %3802 = vmatprep.mubr.msk.f32.mxu0 %vm4474_vm1, %v4473_v1 }
  0xea   : > { %3803 = vmatmul.mubr.msk.f32.vlgmr.msra.gmra.mrb[0].mxu0 %vm243_vm2, %v1033_v48 }
  0xeb   : > { %3830 = vmatpush3.msk.msra.mxu0 %vm271_vm0, %v1348_v55  ;;  %3805 = vmatprep.mubr.msk.f32.mxu0 %vm4474_vm1, %v4473_v1 }
  0xec   : > { %3858 = vmatprep.subr.mxu0 %v4473_v1 }
  0xee   : > { %3806 = vmatmul.mubr.msk.f32.gmra.mrb[2].mxu0 %vm243_vm2, %v1034_v49 }
  0xef   : > { %3808 = vmatprep.mubr.msk.f32.mxu0 %vm4474_vm1, %v4473_v1 }
  0xf2   : > { %3809 = vmatmul.mubr.msk.f32.gmra.mrb[4].mxu0 %vm243_vm2, %v1035_v50 }
  0xf3   : > { %3811 = vmatprep.mubr.msk.f32.mxu0 %vm4474_vm1, %v4473_v1 }
  0xf6   : > { %3812 = vmatmul.mubr.msk.f32.gmra.mrb[6].mxu0 %vm243_vm2, %v1036_v51 }
  0xf7   : > { %3814 = vmatprep.mubr.msk.f32.mxu0 %vm4474_vm1, %v4473_v1 }
  0xfa   : > { %3815 = vmatmul.mubr.msk.f32.gmra.mrb[8].mxu0 %vm243_vm2, %v1037_v52 }
  0xfb   : > { %3817 = vmatprep.mubr.msk.f32.mxu0 %vm4474_vm1, %v4473_v1 }
  0xfe   : > { %3818 = vmatmul.mubr.msk.f32.gmra.mrb[10].mxu0 %vm243_vm2, %v1038_v53 }
  0xff   : > { %3820 = vmatprep.mubr.msk.f32.mxu0 %vm4474_vm1, %v4473_v1 }
 0x102   : > { %3821 = vmatmul.mubr.msk.f32.gmra.mrb[12].mxu0 %vm243_vm2, %v1039_v54 }
 0x103   : > { %3823 = vmatprep.mubr.msk.f32.mxu0 %vm4474_vm1, %v4473_v1 }
 0x106   : > { %3824 = vmatmul.mubr.msk.f32.gmra.mrb[14].mxu0 %vm243_vm2, %v1197_v56 }
 0x107   : > { %3826 = vmatprep.mubr.msk.f32.mxu0 %vm4474_vm1, %v4473_v1 }
 0x10a   : > { %3827 = vmatmul.mubr.msk.f32.gmra.mrb[16].mxu0 %vm243_vm2, %v1198_v57 }
 0x10b   : > { %3831 = vmatprep.mubr.msk.f32.mxu0 %vm4474_vm1, %v4473_v1 }
 0x10e   : > { %3832 = vmatmul.mubr.msk.f32.vlgmr.msra.gmra.mrb[0].mxu0 %vm243_vm2, %v1349_v58 }
 0x10f   : > { %3859 = vmatpush3.msk.msra.mxu0 %vm271_vm0, %v1507_v59  ;;  %3834 = vmatprep.mubr.msk.f32.mxu0 %vm4474_vm1, %v4473_v1 }
 0x112   : > { %3835 = vmatmul.mubr.msk.f32.gmra.mrb[2].mxu0 %vm243_vm2, %v1350_v60 }
 0x113   : > { %3837 = vmatprep.mubr.msk.f32.mxu0 %vm4474_vm1, %v4473_v1 }
 0x116   : > { %3838 = vmatmul.mubr.msk.f32.gmra.mrb[4].mxu0 %vm243_vm2, %v1351_v61 }
 0x117   : > { %3840 = vmatprep.mubr.msk.f32.mxu0 %vm4474_vm1, %v4473_v1 }
 0x11a   : > { %3841 = vmatmul.mubr.msk.f32.gmra.mrb[6].mxu0 %vm243_vm2, %v1352_v62 }
 0x11b   : > { %3843 = vmatprep.mubr.msk.f32.mxu0 %vm4474_vm1, %v4473_v1 }
 0x11e   : > { %3844 = vmatmul.mubr.msk.f32.gmra.mrb[8].mxu0 %vm243_vm2, %v1353_v63 }
 0x11f   : > { %3846 = vmatprep.mubr.msk.f32.mxu0 %vm4474_vm1, %v4473_v1 }
 0x122   : > { %3847 = vmatmul.mubr.msk.f32.gmra.mrb[10].mxu0 %vm243_vm2, %v1354_v0 }
 0x123   : > { %3849 = vmatprep.mubr.msk.f32.mxu0 %vm4474_vm1, %v4473_v1 }
 0x126   : > { %3850 = vmatmul.mubr.msk.f32.gmra.mrb[12].mxu0 %vm243_vm2, %v1355_v2 }
 0x127   : > { %3852 = vmatprep.mubr.msk.f32.mxu0 %vm4474_vm1, %v4473_v1 }
 0x12a   : > { %3853 = vmatmul.mubr.msk.f32.gmra.mrb[14].mxu0 %vm243_vm2, %v1356_v3 }
 0x12b   : > { %3855 = vmatprep.mubr.msk.f32.mxu0 %vm4474_vm1, %v4473_v1 }
 0x12e   : > { %3856 = vmatmul.mubr.msk.f32.gmra.mrb[16].mxu0 %vm243_vm2, %v1357_v4 }
 0x12f   : > { %3860 = vmatprep.mubr.msk.f32.mxu0 %vm4474_vm1, %v4473_v1 }
 0x132   : > { %3861 = vmatmul.mubr.msk.f32.vlgmr.msra.gmra.mrb[0].mxu0 %vm243_vm2, %v1508_v5 }
 0x133   : > { %3863 = vmatprep.mubr.msk.f32.mxu0 %vm4474_vm1, %v4473_v1 }
 0x136   : > { %3864 = vmatmul.mubr.msk.f32.gmra.mrb[2].mxu0 %vm243_vm2, %v1509_v6 }
 0x137   : > { %3866 = vmatprep.mubr.msk.f32.mxu0 %vm4474_vm1, %v4473_v1 }
 0x13a   : > { %3867 = vmatmul.mubr.msk.f32.gmra.mrb[4].mxu0 %vm243_vm2, %v1510_v7 }
 0x13b   : > { %3869 = vmatprep.mubr.msk.f32.mxu0 %vm4474_vm1, %v4473_v1 }
 0x13e   : > { %3870 = vmatmul.mubr.msk.f32.gmra.mrb[6].mxu0 %vm243_vm2, %v1511_v8 }
 0x13f   : > { %3872 = vmatprep.mubr.msk.f32.mxu0 %vm4474_vm1, %v4473_v1 }
 0x142   : > { %3873 = vmatmul.mubr.msk.f32.gmra.mrb[8].mxu0 %vm243_vm2, %v1512_v9 }
 0x143   : > { %3875 = vmatprep.mubr.msk.f32.mxu0 %vm4474_vm1, %v4473_v1 }
 0x146   : > { %3876 = vmatmul.mubr.msk.f32.gmra.mrb[10].mxu0 %vm243_vm2, %v1513_v10 }
 0x147   : > { %3878 = vmatprep.mubr.msk.f32.mxu0 %vm4474_vm1, %v4473_v1 }
 0x14a   : > { %3879 = vmatmul.mubr.msk.f32.gmra.mrb[12].mxu0 %vm243_vm2, %v1514_v11 }
 0x14b   : > { %3881 = vmatprep.mubr.msk.f32.mxu0 %vm4474_vm1, %v4473_v1 }
 0x14e   : > { %3882 = vmatmul.mubr.msk.f32.gmra.mrb[14].mxu0 %vm243_vm2, %v1515_v12 }
 0x14f   : > { %3884 = vmatprep.mubr.msk.f32.mxu0 %vm4474_vm1, %v4473_v1 }
 0x152   : > { %3885 = vmatmul.mubr.msk.f32.gmra.mrb[16].mxu0 %vm243_vm2, %v1516_v13 }
 0x205   : > { %v1613_v19 = vpop.f32.mrb[0].mxu0 }
 0x206   : > { %v4148_v20 = vadd.f32 %v4922_v18, %v1613_v19  ;;  %v3862_v21 = vpop.f32.mrb[1].mxu0 }
 0x208   : > { %vm1666_vm4 = vcmp.gt.f32.partialorder %v4148_v20, 0.0  ;;  %v1675_v22 = vmul.f32 0.01, %v4148_v20 }
 0x209   : > { %v1618_v23 = vpop.f32.mrb[2].mxu0 }
 0x20a   : > { %v1684_v24 = vsel %vm1666_vm4, %v4148_v20, %v1675_v22  ;;  %v4149_v25 = vadd.f32 %v4922_v18, %v1618_v23  ;;  %v3865_v26 = vpop.f32.mrb[3].mxu0 }
 0x20b   : > { %1694 = vst.msk [vmem:[#allocation3] sm:$0xff] %vm1693_vm3, %v1684_v24  ;;  %v2055_v26 = vld [vmem:[#allocation2 + $0x2] sm:$0xff] }
 0x20c   : > { %vm1667_vm5 = vcmp.gt.f32.partialorder %v4149_v25, 0.0  ;;  %v1676_v27 = vmul.f32 0.01, %v4149_v25 }
 0x20d   : > { %v1623_v28 = vpop.f32.mrb[4].mxu0 }
 0x20e   : > { %v1685_v29 = vsel %vm1667_vm5, %v4149_v25, %v1676_v27  ;;  %v4150_v30 = vadd.f32 %v4922_v18, %v1623_v28  ;;  %v3868_v31 = vpop.f32.mrb[5].mxu0  ;;  %v2210_v27 = vld [vmem:[%s5264_s3 + $0x18] sm:$0xff]  ;;  %v2056_v28 = vld [vmem:[#allocation2 + $0xa] sm:$0xff] }
 0x20f   : > { %1695 = vst.msk [vmem:[#allocation3 + $0x8] sm:$0xff] %vm1693_vm3, %v1685_v29 }
 0x210   : > { %vm1668_vm6 = vcmp.gt.f32.partialorder %v4150_v30, 0.0  ;;  %v1677_v32 = vmul.f32 0.01, %v4150_v30 }
 0x211   : > { %v1628_v33 = vpop.f32.mrb[6].mxu0 }
 0x212   : > { %v1718_v34 = vld [vmem:[#allocation3] sm:$0xff]  ;;  %v1686_v35 = vsel %vm1668_vm6, %v4150_v30, %v1677_v32  ;;  %v4151_v36 = vadd.f32 %v4922_v18, %v1628_v33  ;;  %v3871_v37 = vpop.f32.mrb[7].mxu0 }
 0x213   : > { %1720 = vst.msk [vmem:[#allocation2 + $0x13] sm:$0xff] %vm1693_vm3, %v1718_v34  ;;  %1696 = vst.msk [vmem:[#allocation3 + $0x10] sm:$0xff] %vm1693_vm3, %v1686_v35 }
 0x214   : > { %vm1669_vm7 = vcmp.gt.f32.partialorder %v4151_v36, 0.0  ;;  %v1678_v38 = vmul.f32 0.01, %v4151_v36 }
 0x215   : > { %v1633_v39 = vpop.f32.mrb[8].mxu0 }
 0x216   : > { %v1719_v40 = vld [vmem:[#allocation3 + $0x8] sm:$0xff]  ;;  %v1687_v41 = vsel %vm1669_vm7, %v4151_v36, %v1678_v38  ;;  %v4152_v42 = vadd.f32 %v4922_v18, %v1633_v39  ;;  %v3874_v43 = vpop.f32.mrb[9].mxu0  ;;  %v2366_v36 = vld [vmem:[%s5264_s3 + $0x20] sm:$0xff]  ;;  %v2522_v39 = vld [vmem:[%s5264_s3 + $0x28] sm:$0xff] }
 0x217   : > { %1721 = vst.msk [vmem:[#allocation2 + $0x1b] sm:$0xff] %vm1693_vm3, %v1719_v40  ;;  %1697 = vst.msk [vmem:[#allocation3 + $0x18] sm:$0xff] %vm1693_vm3, %v1687_v41 }
 0x218   : > { %vm1670_vm8 = vcmp.gt.f32.partialorder %v4152_v42, 0.0  ;;  %v1679_v44 = vmul.f32 0.01, %v4152_v42 }
 0x219   : > { %v1638_v45 = vpop.f32.mrb[10].mxu0 }
 0x21a   : > { %v1688_v46 = vsel %vm1670_vm8, %v4152_v42, %v1679_v44  ;;  %v4153_v47 = vadd.f32 %v4922_v18, %v1638_v45  ;;  %v3877_v48 = vpop.f32.mrb[11].mxu0  ;;  %v1745_v49 = vld [vmem:[#allocation2 + $0x10] sm:$0xff] }
 0x21b   : > { %1698 = vst.msk [vmem:[#allocation3 + $0x20] sm:$0xff] %vm1693_vm3, %v1688_v46  ;;  %3896 = vmatmul.mubr.msk.f32.gmra.mrb[4].mxu1 %vm1693_vm3, %v1745_v49  ;;  %v1901_v19 = vld [vmem:[#allocation2 + $0x11] sm:$0xff] }
 0x21c   : > { %vm1671_vm9 = vcmp.gt.f32.partialorder %v4153_v47, 0.0  ;;  %v1680_v50 = vmul.f32 0.01, %v4153_v47  ;;  %3898 = vmatprep.mubr.msk.f32.mxu1 %vm4474_vm1, %v4473_v1  ;;  %v2057_v29 = vld [vmem:[#allocation2 + $0x12] sm:$0xff] }
 0x21d   : > { %v1643_v51 = vpop.f32.mrb[12].mxu0  ;;  %v2367_v40 = vld [vmem:[#allocation2 + $0x13] sm:$0xff] }
 0x21e   : > { %v1722_v52 = vld [vmem:[#allocation3 + $0x12] sm:$0xff]  ;;  %v1689_v53 = vsel %vm1671_vm9, %v4153_v47, %v1680_v50  ;;  %v4154_v54 = vadd.f32 %v4922_v18, %v1643_v51  ;;  %v3880_v55 = vpop.f32.mrb[13].mxu0  ;;  %v1746_v56 = vld [vmem:[#allocation2 + $0x18] sm:$0xff]  ;;  %v2678_v49 = vld [vmem:[%s5264_s3 + $0x30] sm:$0xff] }
 0x21f   : > { %1724 = vst.msk [vmem:[#allocation2 + $0x25] sm:$0xff] %vm1693_vm3, %v1722_v52  ;;  %1699 = vst.msk [vmem:[#allocation3 + $0x28] sm:$0xff] %vm1693_vm3, %v1689_v53  ;;  %3899 = vmatmul.mubr.msk.f32.gmra.mrb[6].mxu1 %vm1693_vm3, %v1746_v56  ;;  %v1902_v20 = vld [vmem:[#allocation2 + $0x19] sm:$0xff] }
 0x220   : > { %vm1672_vm10 = vcmp.gt.f32.partialorder %v4154_v54, 0.0  ;;  %v1681_v57 = vmul.f32 0.01, %v4154_v54  ;;  %3901 = vmatprep.mubr.msk.f32.mxu1 %vm4474_vm1, %v4473_v1  ;;  %v2058_v30 = vld [vmem:[#allocation2 + $0x1a] sm:$0xff] }
 0x221   : > { %v1648_v58 = vpop.f32.mrb[14].mxu0  ;;  %v2368_v41 = vld [vmem:[#allocation2 + $0x1b] sm:$0xff] }
 0x222   : > { %v1723_v59 = vld [vmem:[#allocation3 + $0x1a] sm:$0xff]  ;;  %v1690_v60 = vsel %vm1672_vm10, %v4154_v54, %v1681_v57  ;;  %v4155_v61 = vadd.f32 %v4922_v18, %v1648_v58  ;;  %v3883_v62 = vpop.f32.mrb[15].mxu0  ;;  %v2523_v50 = vld [vmem:[#allocation2 + $0x14] sm:$0xff]  ;;  %v2524_v51 = vld [vmem:[#allocation2 + $0x1c] sm:$0xff] }
 0x223   : > { %1725 = vst.msk [vmem:[#allocation2 + $0x2d] sm:$0xff] %vm1693_vm3, %v1723_v59  ;;  %1700 = vst.msk [vmem:[#allocation3 + $0x30] sm:$0xff] %vm1693_vm3, %v1690_v60  ;;  %v2834_v59 = vld [vmem:[%s5264_s3 + $0x38] sm:$0xff]  ;;  %v2990_v62 = vld [vmem:[%s5264_s3 + $0x40] sm:$0xff] }
 0x224   : > { %vm1673_vm11 = vcmp.gt.f32.partialorder %v4155_v61, 0.0  ;;  %v1682_v63 = vmul.f32 0.01, %v4155_v61  ;;  %v2686_v60 = vld [vmem:[#allocation2 + $0x5c] sm:$0xff] }
 0x225   : > { %v1653_v0 = vpop.f32.mrb[16].mxu0 }
 0x226   : > { %v1726_v2 = vld [vmem:[#allocation3 + $0x24] sm:$0xff]  ;;  %v1691_v3 = vsel %vm1673_vm11, %v4155_v61, %v1682_v63  ;;  %v4156_v4 = vadd.f32 %v4922_v18, %v1653_v0  ;;  %v3886_v5 = vpop.f32.mrb[17].mxu0  ;;  %v1747_v6 = vld [vmem:[#allocation2 + $0x20] sm:$0xff]  ;;  %v1900_v18 = vld [vmem:[#allocation2 + $0x9] sm:$0xff] }
 0x227   : > { %1728 = vst.msk [vmem:[#allocation2 + $0x37] sm:$0xff] %vm1693_vm3, %v1726_v2  ;;  %1701 = vst.msk [vmem:[#allocation3 + $0x38] sm:$0xff] %vm1693_vm3, %v1691_v3  ;;  %3902 = vmatmul.mubr.msk.f32.gmra.mrb[8].mxu1 %vm1693_vm3, %v1747_v6  ;;  %v1903_v21 = vld [vmem:[#allocation2 + $0x21] sm:$0xff] }
 0x228   : > { %vm1674_vm12 = vcmp.gt.f32.partialorder %v4156_v4, 0.0  ;;  %v1683_v7 = vmul.f32 0.01, %v4156_v4  ;;  %3904 = vmatprep.mubr.msk.f32.mxu1 %vm4474_vm1, %v4473_v1  ;;  %v2059_v31 = vld [vmem:[#allocation2 + $0x22] sm:$0xff] }
 0x229   : > { %v2369_v42 = vld [vmem:[#allocation2 + $0x23] sm:$0xff] }
 0x22a   : > { %v1727_v8 = vld [vmem:[#allocation3 + $0x2c] sm:$0xff]  ;;  %v1692_v9 = vsel %vm1674_vm12, %v4156_v4, %v1683_v7  ;;  %v1748_v10 = vld [vmem:[#allocation2 + $0x28] sm:$0xff] }
 0x22b   : > { %1729 = vst.msk [vmem:[#allocation2 + $0x3f] sm:$0xff] %vm1693_vm3, %v1727_v8  ;;  %1702 = vst.msk [vmem:[#allocation3 + $0x40] sm:$0xff] %vm1693_vm3, %v1692_v9  ;;  %3905 = vmatmul.mubr.msk.f32.gmra.mrb[10].mxu1 %vm1693_vm3, %v1748_v10  ;;  %v1904_v22 = vld [vmem:[#allocation2 + $0x29] sm:$0xff]  ;;  %v2842_v7 = vld [vmem:[#allocation2 + $0x5d] sm:$0xff] }
 0x22c   : > { %3907 = vmatprep.mubr.msk.f32.mxu1 %vm4474_vm1, %v4473_v1  ;;  %v2060_v32 = vld [vmem:[#allocation2 + $0x2a] sm:$0xff] }
 0x22d   : > { %v2370_v43 = vld [vmem:[#allocation2 + $0x2b] sm:$0xff] }
 0x22e   : > { %v1730_v11 = vld [vmem:[#allocation3 + $0x36] sm:$0xff]  ;;  %v1749_v12 = vld [vmem:[#allocation2 + $0x30] sm:$0xff] }
 0x22f   : > { %1732 = vst.msk [vmem:[#allocation2 + $0x49] sm:$0xff] %vm1693_vm3, %v1730_v11  ;;  %3908 = vmatmul.mubr.msk.f32.gmra.mrb[12].mxu1 %vm1693_vm3, %v1749_v12  ;;  %v1905_v23 = vld [vmem:[#allocation2 + $0x31] sm:$0xff]  ;;  %v2525_v52 = vld [vmem:[#allocation2 + $0x24] sm:$0xff] }
 0x230   : > { %3910 = vmatprep.mubr.msk.f32.mxu1 %vm4474_vm1, %v4473_v1  ;;  %v2061_v33 = vld [vmem:[#allocation2 + $0x32] sm:$0xff]  ;;  %v2687_v61 = vld [vmem:[#allocation2 + $0x64] sm:$0xff] }
 0x231   : > { %v2371_v44 = vld [vmem:[#allocation2 + $0x33] sm:$0xff]  ;;  %v2835_v63 = vld [vmem:[#allocation2 + $0x25] sm:$0xff] }
 0x232   : > { %v1731_v13 = vld [vmem:[#allocation3 + $0x3e] sm:$0xff]  ;;  %v1750_v14 = vld [vmem:[#allocation2 + $0x38] sm:$0xff]  ;;  %v1751_v15 = vld [vmem:[#allocation2 + $0x40] sm:$0xff] }
 0x233   : > { %1733 = vst.msk [vmem:[#allocation2 + $0x51] sm:$0xff] %vm1693_vm3, %v1731_v13  ;;  %3911 = vmatmul.mubr.msk.f32.gmra.mrb[14].mxu1 %vm1693_vm3, %v1750_v14  ;;  %v1906_v24 = vld [vmem:[#allocation2 + $0x39] sm:$0xff]  ;;  %v1907_v25 = vld [vmem:[#allocation2 + $0x41] sm:$0xff]  ;;  %v2526_v53 = vld [vmem:[#allocation2 + $0x2c] sm:$0xff] }
 0x234   : > { %3913 = vmatprep.mubr.msk.f32.mxu1 %vm4474_vm1, %v4473_v1  ;;  %v2062_v34 = vld [vmem:[#allocation2 + $0x3a] sm:$0xff]  ;;  %v2836_v0 = vld [vmem:[#allocation2 + $0x2d] sm:$0xff]  ;;  %v2843_v8 = vld [vmem:[#allocation2 + $0x65] sm:$0xff] }
 0x235   : > { %v2372_v45 = vld [vmem:[#allocation2 + $0x3b] sm:$0xff]  ;;  %v2991_v9 = vld [vmem:[#allocation2 + $0x26] sm:$0xff]  ;;  %v2992_v10 = vld [vmem:[#allocation2 + $0x2e] sm:$0xff] }
 0x236   : > { %v2063_v35 = vld [vmem:[#allocation2 + $0x42] sm:$0xff]  ;;  %v2527_v54 = vld [vmem:[#allocation2 + $0x34] sm:$0xff] }
 0x237   : > { %3914 = vmatmul.mubr.msk.f32.gmra.mrb[16].mxu1 %vm1693_vm3, %v1751_v15  ;;  %v2373_v46 = vld [vmem:[#allocation2 + $0x43] sm:$0xff]  ;;  %v2837_v2 = vld [vmem:[#allocation2 + $0x35] sm:$0xff] }
 0x238   : > { %3918 = vmatprep.mubr.msk.f32.mxu1 %vm4474_vm1, %v4473_v1  ;;  %v2528_v55 = vld [vmem:[#allocation2 + $0x3c] sm:$0xff]  ;;  %v2529_v56 = vld [vmem:[#allocation2 + $0x44] sm:$0xff] }
 0x239   : > { %v2838_v3 = vld [vmem:[#allocation2 + $0x3d] sm:$0xff]  ;;  %v2839_v4 = vld [vmem:[#allocation2 + $0x45] sm:$0xff] }
 0x23a   : > { %v2218_v37 = vld [vmem:[#allocation2 + $0x4a] sm:$0xff]  ;;  %v2219_v38 = vld [vmem:[#allocation2 + $0x52] sm:$0xff]  ;;  %v2994_v12 = vld [vmem:[#allocation2 + $0x3e] sm:$0xff] }
 0x23b   : > { %3919 = vmatmul.mubr.msk.f32.vlgmr.msra.gmra.mrb[0].mxu1 %vm1693_vm3, %v1899_v16  ;;  %v2374_v47 = vld [vmem:[#allocation2 + $0x4b] sm:$0xff]  ;;  %v2375_v48 = vld [vmem:[#allocation2 + $0x53] sm:$0xff]  ;;  %v2998_v16 = vld [vmem:[#allocation2 + $0x5e] sm:$0xff] }
 0x23c   : > { %3946 = vmatpush3.msra.mxu1 %v2054_v17  ;;  %3921 = vmatprep.mubr.msk.f32.mxu1 %vm4474_vm1, %v4473_v1  ;;  %v2530_v57 = vld [vmem:[#allocation2 + $0x4c] sm:$0xff]  ;;  %v2531_v58 = vld [vmem:[#allocation2 + $0x54] sm:$0xff] }
 0x23d   : > { %3974 = vmatprep.subr.mxu1 %v4473_v1  ;;  %v2840_v5 = vld [vmem:[#allocation2 + $0x4d] sm:$0xff]  ;;  %v2841_v6 = vld [vmem:[#allocation2 + $0x55] sm:$0xff] }
 0x23e   : > { %v2993_v11 = vld [vmem:[#allocation2 + $0x36] sm:$0xff]  ;;  %v2995_v13 = vld [vmem:[#allocation2 + $0x46] sm:$0xff]  ;;  %v2996_v14 = vld [vmem:[#allocation2 + $0x4e] sm:$0xff] }
 0x23f   : > { %3922 = vmatmul.mubr.msk.f32.gmra.mrb[2].mxu1 %vm1693_vm3, %v1900_v18  ;;  %v2997_v15 = vld [vmem:[#allocation2 + $0x56] sm:$0xff]  ;;  %v2999_v17 = vld [vmem:[#allocation2 + $0x66] sm:$0xff]  ;;  %v5216_v18 = vld [vmem:[%s5265_s4] ss:$0 sm:$0xff] }
 0x240   : > { %3924 = vmatprep.mubr.msk.f32.mxu1 %vm4474_vm1, %v4473_v1 }
 0x243   : > { %3925 = vmatmul.mubr.msk.f32.gmra.mrb[4].mxu1 %vm1693_vm3, %v1901_v19 }
 0x244   : > { %3927 = vmatprep.mubr.msk.f32.mxu1 %vm4474_vm1, %v4473_v1 }
 0x247   : > { %3928 = vmatmul.mubr.msk.f32.gmra.mrb[6].mxu1 %vm1693_vm3, %v1902_v20 }
 0x248   : > { %3930 = vmatprep.mubr.msk.f32.mxu1 %vm4474_vm1, %v4473_v1 }
 0x24b   : > { %3931 = vmatmul.mubr.msk.f32.gmra.mrb[8].mxu1 %vm1693_vm3, %v1903_v21 }
 0x24c   : > { %3933 = vmatprep.mubr.msk.f32.mxu1 %vm4474_vm1, %v4473_v1 }
 0x24f   : > { %3934 = vmatmul.mubr.msk.f32.gmra.mrb[10].mxu1 %vm1693_vm3, %v1904_v22 }
 0x250   : > { %3936 = vmatprep.mubr.msk.f32.mxu1 %vm4474_vm1, %v4473_v1 }
 0x253   : > { %3937 = vmatmul.mubr.msk.f32.gmra.mrb[12].mxu1 %vm1693_vm3, %v1905_v23 }
 0x254   : > { %3939 = vmatprep.mubr.msk.f32.mxu1 %vm4474_vm1, %v4473_v1 }
 0x257   : > { %3940 = vmatmul.mubr.msk.f32.gmra.mrb[14].mxu1 %vm1693_vm3, %v1906_v24 }
 0x258   : > { %3942 = vmatprep.mubr.msk.f32.mxu1 %vm4474_vm1, %v4473_v1 }
 0x25b   : > { %3943 = vmatmul.mubr.msk.f32.gmra.mrb[16].mxu1 %vm1693_vm3, %v1907_v25 }
 0x25c   : > { %3947 = vmatprep.mubr.msk.f32.mxu1 %vm4474_vm1, %v4473_v1 }
 0x25f   : > { %3948 = vmatmul.mubr.msk.f32.vlgmr.msra.gmra.mrb[0].mxu1 %vm1693_vm3, %v2055_v26 }
 0x260   : > { %3975 = vmatpush3.msra.mxu1 %v2210_v27  ;;  %3950 = vmatprep.mubr.msk.f32.mxu1 %vm4474_vm1, %v4473_v1 }
 0x261   : > { %4003 = vmatprep.subr.mxu1 %v4473_v1 }
 0x263   : > { %3951 = vmatmul.mubr.msk.f32.gmra.mrb[2].mxu1 %vm1693_vm3, %v2056_v28 }
 0x264   : > { %3953 = vmatprep.mubr.msk.f32.mxu1 %vm4474_vm1, %v4473_v1 }
 0x267   : > { %3954 = vmatmul.mubr.msk.f32.gmra.mrb[4].mxu1 %vm1693_vm3, %v2057_v29 }
 0x268   : > { %3956 = vmatprep.mubr.msk.f32.mxu1 %vm4474_vm1, %v4473_v1 }
 0x26b   : > { %3957 = vmatmul.mubr.msk.f32.gmra.mrb[6].mxu1 %vm1693_vm3, %v2058_v30 }
 0x26c   : > { %3959 = vmatprep.mubr.msk.f32.mxu1 %vm4474_vm1, %v4473_v1 }
 0x26f   : > { %3960 = vmatmul.mubr.msk.f32.gmra.mrb[8].mxu1 %vm1693_vm3, %v2059_v31 }
 0x270   : > { %3962 = vmatprep.mubr.msk.f32.mxu1 %vm4474_vm1, %v4473_v1 }
 0x273   : > { %3963 = vmatmul.mubr.msk.f32.gmra.mrb[10].mxu1 %vm1693_vm3, %v2060_v32 }
 0x274   : > { %3965 = vmatprep.mubr.msk.f32.mxu1 %vm4474_vm1, %v4473_v1 }
 0x277   : > { %3966 = vmatmul.mubr.msk.f32.gmra.mrb[12].mxu1 %vm1693_vm3, %v2061_v33 }
 0x278   : > { %3968 = vmatprep.mubr.msk.f32.mxu1 %vm4474_vm1, %v4473_v1 }
 0x27b   : > { %3969 = vmatmul.mubr.msk.f32.gmra.mrb[14].mxu1 %vm1693_vm3, %v2062_v34 }
 0x27c   : > { %3971 = vmatprep.mubr.msk.f32.mxu1 %vm4474_vm1, %v4473_v1 }
 0x27f   : > { %3972 = vmatmul.mubr.msk.f32.gmra.mrb[16].mxu1 %vm1693_vm3, %v2063_v35 }
 0x280   : > { %3976 = vmatprep.mubr.msk.f32.mxu1 %vm4474_vm1, %v4473_v1 }
 0x283   : > { %3977 = vmatmul.mubr.msk.f32.vlgmr.msra.gmra.mrb[0].mxu1 %vm1693_vm3, %v2057_v29 }
 0x284   : > { %4004 = vmatpush3.msra.mxu1 %v2366_v36  ;;  %3979 = vmatprep.mubr.msk.f32.mxu1 %vm4474_vm1, %v4473_v1 }
 0x285   : > { %4032 = vmatprep.subr.mxu1 %v4473_v1 }
 0x287   : > { %3980 = vmatmul.mubr.msk.f32.gmra.mrb[2].mxu1 %vm1693_vm3, %v2058_v30 }
 0x288   : > { %3982 = vmatprep.mubr.msk.f32.mxu1 %vm4474_vm1, %v4473_v1 }
 0x28b   : > { %3983 = vmatmul.mubr.msk.f32.gmra.mrb[4].mxu1 %vm1693_vm3, %v2059_v31 }
 0x28c   : > { %3985 = vmatprep.mubr.msk.f32.mxu1 %vm4474_vm1, %v4473_v1 }
 0x28f   : > { %3986 = vmatmul.mubr.msk.f32.gmra.mrb[6].mxu1 %vm1693_vm3, %v2060_v32 }
 0x290   : > { %3988 = vmatprep.mubr.msk.f32.mxu1 %vm4474_vm1, %v4473_v1 }
 0x293   : > { %3989 = vmatmul.mubr.msk.f32.gmra.mrb[8].mxu1 %vm1693_vm3, %v2061_v33 }
 0x294   : > { %3991 = vmatprep.mubr.msk.f32.mxu1 %vm4474_vm1, %v4473_v1 }
 0x297   : > { %3992 = vmatmul.mubr.msk.f32.gmra.mrb[10].mxu1 %vm1693_vm3, %v2062_v34 }
 0x298   : > { %3994 = vmatprep.mubr.msk.f32.mxu1 %vm4474_vm1, %v4473_v1 }
 0x29b   : > { %3995 = vmatmul.mubr.msk.f32.gmra.mrb[12].mxu1 %vm1693_vm3, %v2063_v35 }
 0x29c   : > { %3997 = vmatprep.mubr.msk.f32.mxu1 %vm4474_vm1, %v4473_v1 }
 0x29f   : > { %3998 = vmatmul.mubr.msk.f32.gmra.mrb[14].mxu1 %vm1693_vm3, %v2218_v37 }
 0x2a0   : > { %4000 = vmatprep.mubr.msk.f32.mxu1 %vm4474_vm1, %v4473_v1 }
 0x2a3   : > { %4001 = vmatmul.mubr.msk.f32.gmra.mrb[16].mxu1 %vm1693_vm3, %v2219_v38 }
 0x2a4   : > { %4005 = vmatprep.mubr.msk.f32.mxu1 %vm4474_vm1, %v4473_v1 }
 0x2a7   : > { %4006 = vmatmul.mubr.msk.f32.vlgmr.msra.gmra.mrb[0].mxu1 %vm1693_vm3, %v2367_v40 }
 0x2a8   : > { %4033 = vmatpush3.msra.mxu1 %v2522_v39  ;;  %4008 = vmatprep.mubr.msk.f32.mxu1 %vm4474_vm1, %v4473_v1 }
 0x2a9   : > { %4061 = vmatprep.subr.mxu1 %v4473_v1 }
 0x2ab   : > { %4009 = vmatmul.mubr.msk.f32.gmra.mrb[2].mxu1 %vm1693_vm3, %v2368_v41 }
 0x2ac   : > { %4011 = vmatprep.mubr.msk.f32.mxu1 %vm4474_vm1, %v4473_v1 }
 0x2af   : > { %4012 = vmatmul.mubr.msk.f32.gmra.mrb[4].mxu1 %vm1693_vm3, %v2369_v42 }
 0x2b0   : > { %4014 = vmatprep.mubr.msk.f32.mxu1 %vm4474_vm1, %v4473_v1 }
 0x2b3   : > { %4015 = vmatmul.mubr.msk.f32.gmra.mrb[6].mxu1 %vm1693_vm3, %v2370_v43 }
 0x2b4   : > { %4017 = vmatprep.mubr.msk.f32.mxu1 %vm4474_vm1, %v4473_v1 }
 0x2b7   : > { %4018 = vmatmul.mubr.msk.f32.gmra.mrb[8].mxu1 %vm1693_vm3, %v2371_v44 }
 0x2b8   : > { %4020 = vmatprep.mubr.msk.f32.mxu1 %vm4474_vm1, %v4473_v1 }
 0x2bb   : > { %4021 = vmatmul.mubr.msk.f32.gmra.mrb[10].mxu1 %vm1693_vm3, %v2372_v45 }
 0x2bc   : > { %4023 = vmatprep.mubr.msk.f32.mxu1 %vm4474_vm1, %v4473_v1 }
 0x2bf   : > { %4024 = vmatmul.mubr.msk.f32.gmra.mrb[12].mxu1 %vm1693_vm3, %v2373_v46 }
 0x2c0   : > { %4026 = vmatprep.mubr.msk.f32.mxu1 %vm4474_vm1, %v4473_v1 }
 0x2c3   : > { %4027 = vmatmul.mubr.msk.f32.gmra.mrb[14].mxu1 %vm1693_vm3, %v2374_v47 }
 0x2c4   : > { %4029 = vmatprep.mubr.msk.f32.mxu1 %vm4474_vm1, %v4473_v1 }
 0x2c7   : > { %4030 = vmatmul.mubr.msk.f32.gmra.mrb[16].mxu1 %vm1693_vm3, %v2375_v48 }
 0x2c8   : > { %4034 = vmatprep.mubr.msk.f32.mxu1 %vm4474_vm1, %v4473_v1 }
 0x2cb   : > { %4035 = vmatmul.mubr.msk.f32.vlgmr.msra.gmra.mrb[0].mxu1 %vm1693_vm3, %v2523_v50 }
 0x2cc   : > { %4062 = vmatpush3.msra.mxu1 %v2678_v49  ;;  %4037 = vmatprep.mubr.msk.f32.mxu1 %vm4474_vm1, %v4473_v1 }
 0x2cd   : > { %4090 = vmatprep.subr.mxu1 %v4473_v1 }
 0x2cf   : > { %4038 = vmatmul.mubr.msk.f32.gmra.mrb[2].mxu1 %vm1693_vm3, %v2524_v51 }
 0x2d0   : > { %4040 = vmatprep.mubr.msk.f32.mxu1 %vm4474_vm1, %v4473_v1 }
 0x2d3   : > { %4041 = vmatmul.mubr.msk.f32.gmra.mrb[4].mxu1 %vm1693_vm3, %v2525_v52 }
 0x2d4   : > { %4043 = vmatprep.mubr.msk.f32.mxu1 %vm4474_vm1, %v4473_v1 }
 0x2d7   : > { %4044 = vmatmul.mubr.msk.f32.gmra.mrb[6].mxu1 %vm1693_vm3, %v2526_v53 }
 0x2d8   : > { %4046 = vmatprep.mubr.msk.f32.mxu1 %vm4474_vm1, %v4473_v1 }
 0x2db   : > { %4047 = vmatmul.mubr.msk.f32.gmra.mrb[8].mxu1 %vm1693_vm3, %v2527_v54 }
 0x2dc   : > { %4049 = vmatprep.mubr.msk.f32.mxu1 %vm4474_vm1, %v4473_v1 }
 0x2df   : > { %4050 = vmatmul.mubr.msk.f32.gmra.mrb[10].mxu1 %vm1693_vm3, %v2528_v55 }
 0x2e0   : > { %4052 = vmatprep.mubr.msk.f32.mxu1 %vm4474_vm1, %v4473_v1 }
 0x2e3   : > { %4053 = vmatmul.mubr.msk.f32.gmra.mrb[12].mxu1 %vm1693_vm3, %v2529_v56 }
 0x2e4   : > { %4055 = vmatprep.mubr.msk.f32.mxu1 %vm4474_vm1, %v4473_v1 }
 0x2e7   : > { %4056 = vmatmul.mubr.msk.f32.gmra.mrb[14].mxu1 %vm1693_vm3, %v2530_v57 }
 0x2e8   : > { %4058 = vmatprep.mubr.msk.f32.mxu1 %vm4474_vm1, %v4473_v1 }
 0x2eb   : > { %4059 = vmatmul.mubr.msk.f32.gmra.mrb[16].mxu1 %vm1693_vm3, %v2531_v58 }
 0x2ec   : > { %4063 = vmatprep.mubr.msk.f32.mxu1 %vm4474_vm1, %v4473_v1 }
 0x2ef   : > { %4064 = vmatmul.mubr.msk.f32.vlgmr.msra.gmra.mrb[0].mxu1 %vm1693_vm3, %v2525_v52 }
 0x2f0   : > { %4091 = vmatpush3.msra.mxu1 %v2834_v59  ;;  %4066 = vmatprep.mubr.msk.f32.mxu1 %vm4474_vm1, %v4473_v1 }
 0x2f1   : > { %4119 = vmatprep.subr.mxu1 %v4473_v1 }
 0x2f3   : > { %4067 = vmatmul.mubr.msk.f32.gmra.mrb[2].mxu1 %vm1693_vm3, %v2526_v53 }
 0x2f4   : > { %4069 = vmatprep.mubr.msk.f32.mxu1 %vm4474_vm1, %v4473_v1 }
 0x2f7   : > { %4070 = vmatmul.mubr.msk.f32.gmra.mrb[4].mxu1 %vm1693_vm3, %v2527_v54 }
 0x2f8   : > { %4072 = vmatprep.mubr.msk.f32.mxu1 %vm4474_vm1, %v4473_v1 }
 0x2fb   : > { %4073 = vmatmul.mubr.msk.f32.gmra.mrb[6].mxu1 %vm1693_vm3, %v2528_v55 }
 0x2fc   : > { %4075 = vmatprep.mubr.msk.f32.mxu1 %vm4474_vm1, %v4473_v1 }
 0x2ff   : > { %4076 = vmatmul.mubr.msk.f32.gmra.mrb[8].mxu1 %vm1693_vm3, %v2529_v56 }
 0x300   : > { %4078 = vmatprep.mubr.msk.f32.mxu1 %vm4474_vm1, %v4473_v1 }
 0x303   : > { %4079 = vmatmul.mubr.msk.f32.gmra.mrb[10].mxu1 %vm1693_vm3, %v2530_v57 }
 0x304   : > { %4081 = vmatprep.mubr.msk.f32.mxu1 %vm4474_vm1, %v4473_v1 }
 0x307   : > { %4082 = vmatmul.mubr.msk.f32.gmra.mrb[12].mxu1 %vm1693_vm3, %v2531_v58 }
 0x308   : > { %4084 = vmatprep.mubr.msk.f32.mxu1 %vm4474_vm1, %v4473_v1 }
 0x30b   : > { %4085 = vmatmul.mubr.msk.f32.gmra.mrb[14].mxu1 %vm1693_vm3, %v2686_v60 }
 0x30c   : > { %4087 = vmatprep.mubr.msk.f32.mxu1 %vm4474_vm1, %v4473_v1 }
 0x30f   : > { %4088 = vmatmul.mubr.msk.f32.gmra.mrb[16].mxu1 %vm1693_vm3, %v2687_v61 }
 0x310   : > { %4092 = vmatprep.mubr.msk.f32.mxu1 %vm4474_vm1, %v4473_v1 }
 0x313   : > { %4093 = vmatmul.mubr.msk.f32.vlgmr.msra.gmra.mrb[0].mxu1 %vm1693_vm3, %v2835_v63 }
 0x314   : > { %4120 = vmatpush3.msra.mxu1 %v2990_v62  ;;  %4095 = vmatprep.mubr.msk.f32.mxu1 %vm4474_vm1, %v4473_v1 }
 0x317   : > { %4096 = vmatmul.mubr.msk.f32.gmra.mrb[2].mxu1 %vm1693_vm3, %v2836_v0 }
 0x318   : > { %4098 = vmatprep.mubr.msk.f32.mxu1 %vm4474_vm1, %v4473_v1 }
 0x31b   : > { %4099 = vmatmul.mubr.msk.f32.gmra.mrb[4].mxu1 %vm1693_vm3, %v2837_v2 }
 0x31c   : > { %4101 = vmatprep.mubr.msk.f32.mxu1 %vm4474_vm1, %v4473_v1 }
 0x31f   : > { %4102 = vmatmul.mubr.msk.f32.gmra.mrb[6].mxu1 %vm1693_vm3, %v2838_v3 }
 0x320   : > { %4104 = vmatprep.mubr.msk.f32.mxu1 %vm4474_vm1, %v4473_v1 }
 0x323   : > { %4105 = vmatmul.mubr.msk.f32.gmra.mrb[8].mxu1 %vm1693_vm3, %v2839_v4 }
 0x324   : > { %4107 = vmatprep.mubr.msk.f32.mxu1 %vm4474_vm1, %v4473_v1 }
 0x327   : > { %4108 = vmatmul.mubr.msk.f32.gmra.mrb[10].mxu1 %vm1693_vm3, %v2840_v5 }
 0x328   : > { %4110 = vmatprep.mubr.msk.f32.mxu1 %vm4474_vm1, %v4473_v1 }
 0x32b   : > { %4111 = vmatmul.mubr.msk.f32.gmra.mrb[12].mxu1 %vm1693_vm3, %v2841_v6 }
 0x32c   : > { %4113 = vmatprep.mubr.msk.f32.mxu1 %vm4474_vm1, %v4473_v1 }
 0x32f   : > { %4114 = vmatmul.mubr.msk.f32.gmra.mrb[14].mxu1 %vm1693_vm3, %v2842_v7 }
 0x330   : > { %4116 = vmatprep.mubr.msk.f32.mxu1 %vm4474_vm1, %v4473_v1 }
 0x333   : > { %4117 = vmatmul.mubr.msk.f32.gmra.mrb[16].mxu1 %vm1693_vm3, %v2843_v8 }
 0x334   : > { %4121 = vmatprep.mubr.msk.f32.mxu1 %vm4474_vm1, %v4473_v1 }
 0x337   : > { %4122 = vmatmul.mubr.msk.f32.vlgmr.msra.gmra.mrb[0].mxu1 %vm1693_vm3, %v2991_v9 }
 0x338   : > { %4124 = vmatprep.mubr.msk.f32.mxu1 %vm4474_vm1, %v4473_v1 }
 0x33b   : > { %4125 = vmatmul.mubr.msk.f32.gmra.mrb[2].mxu1 %vm1693_vm3, %v2992_v10 }
 0x33c   : > { %4127 = vmatprep.mubr.msk.f32.mxu1 %vm4474_vm1, %v4473_v1 }
 0x33f   : > { %4128 = vmatmul.mubr.msk.f32.gmra.mrb[4].mxu1 %vm1693_vm3, %v2993_v11 }
 0x340   : > { %4130 = vmatprep.mubr.msk.f32.mxu1 %vm4474_vm1, %v4473_v1 }
 0x343   : > { %4131 = vmatmul.mubr.msk.f32.gmra.mrb[6].mxu1 %vm1693_vm3, %v2994_v12 }
 0x344   : > { %4133 = vmatprep.mubr.msk.f32.mxu1 %vm4474_vm1, %v4473_v1 }
 0x347   : > { %4134 = vmatmul.mubr.msk.f32.gmra.mrb[8].mxu1 %vm1693_vm3, %v2995_v13 }
 0x348   : > { %4136 = vmatprep.mubr.msk.f32.mxu1 %vm4474_vm1, %v4473_v1 }
 0x34b   : > { %4137 = vmatmul.mubr.msk.f32.gmra.mrb[10].mxu1 %vm1693_vm3, %v2996_v14 }
 0x34c   : > { %4139 = vmatprep.mubr.msk.f32.mxu1 %vm4474_vm1, %v4473_v1 }
 0x34f   : > { %4140 = vmatmul.mubr.msk.f32.gmra.mrb[12].mxu1 %vm1693_vm3, %v2997_v15 }
 0x350   : > { %4142 = vmatprep.mubr.msk.f32.mxu1 %vm4474_vm1, %v4473_v1 }
 0x353   : > { %4143 = vmatmul.mubr.msk.f32.gmra.mrb[14].mxu1 %vm1693_vm3, %v2998_v16 }
 0x354   : > { %4145 = vmatprep.mubr.msk.f32.mxu1 %vm4474_vm1, %v4473_v1 }
 0x357   : > { %4146 = vmatmul.mubr.msk.f32.gmra.mrb[16].mxu1 %vm1693_vm3, %v2999_v17 }
 0x40a   : > { %v3093_v19 = vpop.f32.mrb[0].mxu1 }
 0x40b   : > { %v4157_v20 = vadd.f32 %v5216_v18, %v3093_v19  ;;  %v4123_v21 = vpop.f32.mrb[1].mxu1 }
 0x40d   : > { %vm3146_vm14 = vcmp.gt.f32.partialorder %v4157_v20, 0.0  ;;  %v3155_v22 = vmul.f32 0.01, %v4157_v20 }
 0x40e   : > { %v3098_v23 = vpop.f32.mrb[2].mxu1 }
 0x40f   : > { %v3164_v24 = vsel %vm3146_vm14, %v4157_v20, %v3155_v22  ;;  %v4158_v25 = vadd.f32 %v5216_v18, %v3098_v23  ;;  %v4126_v1 = vpop.f32.mrb[3].mxu1 }
 0x410   : > { %3173 = vst.msk [vmem:[#allocation3] sm:$0xff] %vm1693_vm3, %v3164_v24 }
 0x411   : > { %vm3147_vm15 = vcmp.gt.f32.partialorder %v4158_v25, 0.0  ;;  %v3156_v26 = vmul.f32 0.01, %v4158_v25 }
 0x412   : > { %v3103_v27 = vpop.f32.mrb[4].mxu1 }
 0x413   : > { %v3165_v28 = vsel %vm3147_vm15, %v4158_v25, %v3156_v26  ;;  %v4159_v29 = vadd.f32 %v5216_v18, %v3103_v27  ;;  %v4129_v30 = vpop.f32.mrb[5].mxu1 }
 0x414   : > { %3174 = vst.msk [vmem:[#allocation3 + $0x8] sm:$0xff] %vm1693_vm3, %v3165_v28 }
 0x415   : > { %vm3148_vm0 = vcmp.gt.f32.partialorder %v4159_v29, 0.0  ;;  %v3157_v31 = vmul.f32 0.01, %v4159_v29 }
 0x416   : > { %v3108_v32 = vpop.f32.mrb[6].mxu1 }
 0x417   : > { %v3182_v33 = vld [vmem:[#allocation3] sm:$0xff]  ;;  %v3166_v34 = vsel %vm3148_vm0, %v4159_v29, %v3157_v31  ;;  %v4160_v35 = vadd.f32 %v5216_v18, %v3108_v32  ;;  %v4132_v36 = vpop.f32.mrb[7].mxu1 }
 0x418   : > { %3184 = vst.msk [vmem:[%s5227_s21] sm:$0xff] %vm1693_vm3, %v3182_v33  ;;  %3175 = vst.msk [vmem:[#allocation3 + $0x10] sm:$0xff] %vm1693_vm3, %v3166_v34 }
 0x419   : > { %vm3149_vm1 = vcmp.gt.f32.partialorder %v4160_v35, 0.0  ;;  %v3158_v37 = vmul.f32 0.01, %v4160_v35 }
 0x41a   : > { %v3113_v38 = vpop.f32.mrb[8].mxu1 }
 0x41b   : > { %v3183_v39 = vld [vmem:[#allocation3 + $0x8] sm:$0xff]  ;;  %v3167_v40 = vsel %vm3149_vm1, %v4160_v35, %v3158_v37  ;;  %v4161_v41 = vadd.f32 %v5216_v18, %v3113_v38  ;;  %v4135_v42 = vpop.f32.mrb[9].mxu1 }
 0x41c   : > { %3185 = vst.msk [vmem:[%s5227_s21 + $0x8] sm:$0xff] %vm1693_vm3, %v3183_v39  ;;  %3176 = vst.msk [vmem:[#allocation3 + $0x18] sm:$0xff] %vm1693_vm3, %v3167_v40 }
 0x41d   : > { %vm3150_vm2 = vcmp.gt.f32.partialorder %v4161_v41, 0.0  ;;  %v3159_v43 = vmul.f32 0.01, %v4161_v41 }
 0x41e   : > { %v3118_v44 = vpop.f32.mrb[10].mxu1 }
 0x41f   : > { %v3168_v45 = vsel %vm3150_vm2, %v4161_v41, %v3159_v43  ;;  %v4162_v46 = vadd.f32 %v5216_v18, %v3118_v44  ;;  %v4138_v47 = vpop.f32.mrb[11].mxu1 }
 0x420   : > { %3177 = vst.msk [vmem:[#allocation3 + $0x20] sm:$0xff] %vm1693_vm3, %v3168_v45 }
 0x421   : > { %vm3151_vm4 = vcmp.gt.f32.partialorder %v4162_v46, 0.0  ;;  %v3160_v48 = vmul.f32 0.01, %v4162_v46 }
 0x422   : > { %v3123_v49 = vpop.f32.mrb[12].mxu1 }
 0x423   : > { %v3186_v50 = vld [vmem:[#allocation3 + $0x12] sm:$0xff]  ;;  %v3169_v51 = vsel %vm3151_vm4, %v4162_v46, %v3160_v48  ;;  %v4163_v52 = vadd.f32 %v5216_v18, %v3123_v49  ;;  %v4141_v53 = vpop.f32.mrb[13].mxu1 }
 0x424   : > { %3437 = vst.msk [vmem:[%s5227_s21 + $0x10] sm:$0xff] %vm1693_vm3, %v3186_v50  ;;  %3178 = vst.msk [vmem:[#allocation3 + $0x28] sm:$0xff] %vm1693_vm3, %v3169_v51 }
 0x425   : > { %vm3152_vm5 = vcmp.gt.f32.partialorder %v4163_v52, 0.0  ;;  %v3161_v54 = vmul.f32 0.01, %v4163_v52 }
 0x426   : > { %v3128_v55 = vpop.f32.mrb[14].mxu1 }
 0x427   : > { %v3187_v56 = vld [vmem:[#allocation3 + $0x1a] sm:$0xff]  ;;  %v3170_v57 = vsel %vm3152_vm5, %v4163_v52, %v3161_v54  ;;  %v4164_v58 = vadd.f32 %v5216_v18, %v3128_v55  ;;  %v4144_v59 = vpop.f32.mrb[15].mxu1 }
 0x428   : > { %3438 = vst.msk [vmem:[%s5227_s21 + $0x18] sm:$0xff] %vm1693_vm3, %v3187_v56  ;;  %3179 = vst.msk [vmem:[#allocation3 + $0x30] sm:$0xff] %vm1693_vm3, %v3170_v57 }
 0x429   : > { %vm3153_vm6 = vcmp.gt.f32.partialorder %v4164_v58, 0.0  ;;  %v3162_v60 = vmul.f32 0.01, %v4164_v58 }
 0x42a   : > { %v3133_v61 = vpop.f32.mrb[16].mxu1 }
 0x42b   : > { %v3191_v62 = vld [vmem:[#allocation3 + $0x24] sm:$0xff]  ;;  %v3171_v63 = vsel %vm3153_vm6, %v4164_v58, %v3162_v60  ;;  %v4165_v0 = vadd.f32 %v5216_v18, %v3133_v61  ;;  %v4147_v2 = vpop.f32.mrb[17].mxu1 }
 0x42c   : > { %3439 = vst.msk [vmem:[%s5227_s21 + $0x20] sm:$0xff] %vm1693_vm3, %v3191_v62  ;;  %3180 = vst.msk [vmem:[#allocation3 + $0x38] sm:$0xff] %vm1693_vm3, %v3171_v63 }
 0x42d   : > { %vm3154_vm7 = vcmp.gt.f32.partialorder %v4165_v0, 0.0  ;;  %v3163_v3 = vmul.f32 0.01, %v4165_v0 }
 0x42f   : > { %v3192_v4 = vld [vmem:[#allocation3 + $0x2c] sm:$0xff]  ;;  %v3172_v5 = vsel %vm3154_vm7, %v4165_v0, %v3163_v3 }
 0x430   : > { %3440 = vst.msk [vmem:[%s5227_s21 + $0x28] sm:$0xff] %vm1693_vm3, %v3192_v4  ;;  %3181 = vst.msk [vmem:[#allocation3 + $0x40] sm:$0xff] %vm1693_vm3, %v3172_v5 }
 0x433   : > { %v3196_v6 = vld [vmem:[#allocation3 + $0x36] sm:$0xff] }
 0x434   : > { %3441 = vst.msk [vmem:[%s5227_s21 + $0x30] sm:$0xff] %vm1693_vm3, %v3196_v6 }
 0x437   : > { %v3197_v7 = vld [vmem:[#allocation3 + $0x3e] sm:$0xff] }
 0x438   : > { %3442 = vst.msk [vmem:[%s5227_s21 + $0x38] sm:$0xff] %vm1693_vm3, %v3197_v7 }
 0x439 PF: > { %s15_s18 = sadd.s32 1, %s4471_s18  }
 0x43a   : > { %p12_p4 = scmp.ge.s32.totalorder %s15_s18, 4  }
 0x43c   :  { %14 = sbr.rel (!%p12_p4) target bundleno = 1 (0x1), region = 73 }

// kernel: beliefppg_forward.19
= control target key start
LH: loop header
LB: loop body
LE: loop exit
PB: predicated region body
PF: predicated region fallthrough
CT: control target
= control target key end

     0   :  { %s891_s18 = smov 0   ;;  %s951_s0 = inlined_call_operand.vmem [shape: f32[2,10,4], index: 0, kind: input, shape index: {}]   ;;  %s952_s1 = inlined_call_operand.vmem [shape: f32[12,8], index: 1, kind: input, shape index: {}]   ;;  %s953_s2 = inlined_call_operand.vmem [shape: f32[1,8], index: 2, kind: input, shape index: {}]   ;;  %s954_s3 = inlined_call_operand.vmem [shape: f32[24,8], index: 3, kind: input, shape index: {}]   ;;  %s955_s4 = inlined_call_operand.vmem [shape: f32[1,8], index: 4, kind: input, shape index: {}]   ;;  %s956_s5 = inlined_call_operand.vmem [shape: f32[2,8,8], index: 5, kind: output, shape index: {}]  }
   0x1 LB: > { %s767_s19 = sadd.s32 4294967295, %s857_s18   ;;  %p771_p0 = scmp.ge.s32.totalorder %s857_s18, 1  ;;  %s857_s18 = sphi %s891_s18, %s15_s18  }
   0x2   : > { %p187_p1 = scmp.lt.s32.totalorder %s857_s18, 3 }
   0x4   : > { %p188_p2 = pnand %p771_p0, %p187_p1 }
   0x5   : > { %v232_v0 = vld [vmem:[%s952_s1] sm:$0xf] (!%p188_p2)  ;;  %vm237_vm0 = vcmask (!%p188_p2), 1043456   ;;  %p214_p3 = scmp.lt.s32.totalorder (!%p188_p2), %s767_s19, 1  ;;  %v859_v1 = vmov (!%p188_p2), 0.0   ;;  %vm860_vm1 = vmmov (!%p188_p2), 0  }
   0x6   : > { %191 = sbr.rel (%p188_p2) target bundleno = 490 (0x1ea), region = 40  ;;  %801 = vmatprep.subr.mxu0 (!%p188_p2), %v859_v1  ;;  %803 = vmatprep.mubr.msk.f32.mxu0 (!%p188_p2), %vm860_vm1, %v859_v1  ;;  %vm233_vm2 = vcmask (!%p188_p2), 31744   ;;  %v313_v2 = vld [vmem:[%s952_s1 + $0x4] sm:$0xf] (!%p188_p2)  ;;  %v392_v5 = vld [vmem:[%s952_s1 + $0x8] sm:$0xf] (!%p188_p2) }
   0x7   : > { %802 = vmatpush3.msk.msra.mxu0 (!%p188_p2), %vm237_vm0, %v232_v0  ;;  %816 = vmatprep.subr.mxu1 (!%p188_p2), %v859_v1  ;;  %v485_v7 = vld [vmem:[%s954_s3] sm:$0xff] (!%p188_p2)  ;;  %vm470_vm3 = vcmask (!%p188_p2), 64512   ;;  %vm472_vm4 = vcmask (!%p188_p2), 58368   ;;  %v561_v13 = vld [vmem:[%s954_s3 + $0x8] sm:$0xff] (!%p188_p2)  ;;  %v637_v15 = vld [vmem:[%s954_s3 + $0x10] sm:$0xff] (!%p188_p2) }
   0x8   : > { %806 = vmatprep.subr.mxu0 (!%p188_p2), %v859_v1  ;;  %818 = vmatprep.mubr.msk.f32.mxu1 (!%p188_p2), %vm860_vm1, %v859_v1  ;;  %471 = vst.msk [vmem:[#allocation2] sm:$0xff] (!%p188_p2), %vm470_vm3, %v859_v1  ;;  %v775_v8 = vld [vmem:[%s953_s2] ss:$0 sm:$0xff] (!%p188_p2) }
   0x9   : > { %817 = vmatpush3.msra.mxu1 (!%p188_p2), %v485_v7  ;;  %473 = vst.msk [vmem:[#allocation2 + $0x8] sm:$0x3] (!%p188_p2), %vm472_vm4, %v859_v1  ;;  %v782_v18 = vld [vmem:[%s955_s4] ss:$0 sm:$0xff] (!%p188_p2) }
   0xa   : > { %821 = vmatprep.subr.mxu1 (!%p188_p2), %v859_v1 }
   0xd   : > { %s958_s19 = smov (!%p214_p3, %s767_s19), 1 }
   0xe   : > { %s788_s22 = sshll.u32 %s958_s19, 4  ;;  %s774_s15 = sshll.u32 %s958_s19, 3 }
   0xf   : > { %s218_s25 = scalar_lea.vmem %s951_s0, %s788_s22  ;;  %s222_s20 = scalar_lea.vmem %s956_s5, %s774_s15 }
  0x10   : > { %v231_v3 = vld [vmem:[%s218_s25] sm:$0xff] }
  0x11   : > { %804 = vmatmul.mubr.msk.f32.vlgmr.msra.gmra.mrb[0].mxu0 %vm233_vm2, %v231_v3  ;;  %v312_v4 = vld [vmem:[%s218_s25 + $0x1] sm:$0xff] }
  0x12   : > { %807 = vmatpush3.msk.msra.mxu0 %vm237_vm0, %v313_v2  ;;  %808 = vmatprep.mubr.msk.f32.mxu0 %vm860_vm1, %v859_v1  ;;  %v391_v6 = vld [vmem:[%s218_s25 + $0x2] sm:$0xff] }
  0x13   : > { %811 = vmatprep.subr.mxu0 %v859_v1 }
  0x19   : > { %809 = vmatmul.mubr.msk.f32.vlgmr.msra.gmra.mrb[0].mxu0 %vm233_vm2, %v312_v4 }
  0x1a   : > { %812 = vmatpush3.msk.msra.mxu0 %vm237_vm0, %v392_v5  ;;  %813 = vmatprep.mubr.msk.f32.mxu0 %vm860_vm1, %v859_v1 }
  0x21   : > { %814 = vmatmul.mubr.msk.f32.vlgmr.msra.gmra.mrb[0].mxu0 %vm233_vm2, %v391_v6 }
  0xf4   : > { %v465_v9 = vpop.f32.mrb[0].mxu0 }
  0xf5   : > { %v831_v10 = vadd.f32 %v775_v8, %v465_v9  ;;  %v815_v11 = vpop.f32.mrb[1].mxu0 }
  0xf7   : > { %v474_v12 = vmax.f32 %v831_v10, 0.0 }
  0xf9   : > { %475 = vst.msk [vmem:[#allocation2 + $0x1] sm:$0xff] %vm470_vm3, %v474_v12 }
 0x100   : > { %v484_v14 = vld [vmem:[#allocation2] sm:$0xff] }
 0x101   : > { %819 = vmatmul.mubr.msk.f32.vlgmr.msra.gmra.mrb[0].mxu1 %vm470_vm3, %v484_v14  ;;  %v560_v16 = vld [vmem:[#allocation2 + $0x1] sm:$0xff] }
 0x102   : > { %822 = vmatpush3.msra.mxu1 %v561_v13  ;;  %823 = vmatprep.mubr.msk.f32.mxu1 %vm860_vm1, %v859_v1  ;;  %v636_v17 = vld [vmem:[#allocation2 + $0x2] sm:$0xff] }
 0x103   : > { %826 = vmatprep.subr.mxu1 %v859_v1 }
 0x109   : > { %824 = vmatmul.mubr.msk.f32.vlgmr.msra.gmra.mrb[0].mxu1 %vm470_vm3, %v560_v16 }
 0x10a   : > { %827 = vmatpush3.msra.mxu1 %v637_v15  ;;  %828 = vmatprep.mubr.msk.f32.mxu1 %vm860_vm1, %v859_v1 }
 0x111   : > { %829 = vmatmul.mubr.msk.f32.vlgmr.msra.gmra.mrb[0].mxu1 %vm470_vm3, %v636_v17 }
 0x1e4   : > { %v707_v19 = vpop.f32.mrb[0].mxu1 }
 0x1e5   : > { %v832_v20 = vadd.f32 %v782_v18, %v707_v19  ;;  %v830_v21 = vpop.f32.mrb[1].mxu1 }
 0x1e7   : > { %v712_v22 = vmax.f32 %v832_v20, 0.0 }
 0x1e9   : > { %713 = vst.msk [vmem:[%s222_s20] sm:$0xff] %vm470_vm3, %v712_v22 }
 0x1ea PF: > { %s15_s18 = sadd.s32 1, %s857_s18  }
 0x1eb   : > { %p12_p4 = scmp.ge.s32.totalorder %s15_s18, 4  }
 0x1ed   :  { %14 = sbr.rel (!%p12_p4) target bundleno = 1 (0x1), region = 70 }

// kernel: beliefppg_forward.20
= control target key start
LH: loop header
LB: loop body
LE: loop exit
PB: predicated region body
PF: predicated region fallthrough
CT: control target
= control target key end

     0   :  { %s896_s18 = smov 0   ;;  %s958_s0 = inlined_call_operand.vmem [shape: f32[2,6,8], index: 0, kind: input, shape index: {}]   ;;  %s959_s1 = inlined_call_operand.vmem [shape: f32[24,16], index: 1, kind: input, shape index: {}]   ;;  %s960_s2 = inlined_call_operand.vmem [shape: f32[1,16], index: 2, kind: input, shape index: {}]   ;;  %s961_s3 = inlined_call_operand.vmem [shape: f32[48,16], index: 3, kind: input, shape index: {}]   ;;  %s962_s4 = inlined_call_operand.vmem [shape: f32[1,16], index: 4, kind: input, shape index: {}]   ;;  %s963_s5 = inlined_call_operand.vmem [shape: f32[2,4,16], index: 5, kind: output, shape index: {}]  }
   0x1 LB: > { %s757_s19 = sadd.s32 4294967295, %s861_s18   ;;  %p761_p0 = scmp.ge.s32.totalorder %s861_s18, 1  ;;  %s861_s18 = sphi %s896_s18, %s15_s18  }
   0x2   : > { %p186_p1 = scmp.lt.s32.totalorder %s861_s18, 3 }
   0x4   : > { %p187_p2 = pnand %p761_p0, %p186_p1 }
   0x5   : > { %v229_v0 = vld [vmem:[%s959_s1] sm:$0xff] (!%p187_p2)  ;;  %p212_p3 = scmp.lt.s32.totalorder (!%p187_p2), %s757_s19, 1  ;;  %v863_v1 = vmov (!%p187_p2), 0.0   ;;  %vm864_vm0 = vmmov (!%p187_p2), 0   ;;  %vm230_vm1 = vcmask (!%p187_p2), 64512   ;;  %v306_v2 = vld [vmem:[%s959_s1 + $0x8] sm:$0xff] (!%p187_p2) }
   0x6   : > { %190 = sbr.rel (%p187_p2) target bundleno = 490 (0x1ea), region = 40  ;;  %789 = vmatprep.subr.mxu0 (!%p187_p2), %v863_v1  ;;  %791 = vmatprep.mubr.msk.f32.mxu0 (!%p187_p2), %vm864_vm0, %v863_v1  ;;  %v382_v5 = vld [vmem:[%s959_s1 + $0x10] sm:$0xff] (!%p187_p2)  ;;  %vm457_vm2 = vcmask (!%p187_p2), 128000   ;;  %v471_v7 = vld [vmem:[%s961_s3] sm:$0xff] (!%p187_p2)  ;;  %v472_v8 = vld [vmem:[%s961_s3 + $0x8] sm:$0xff] (!%p187_p2)  ;;  %v865_v9 = vmov (!%p187_p2), 0.0|0.0  }
   0x7   : > { %790 = vmatpush3.msra.mxu0 (!%p187_p2), %v229_v0  ;;  %808 = vmatprep.mubr.msk.f32.mxu1 (!%p187_p2), %vm864_vm0, %v863_v1  ;;  %458 = vst.msk [vmem:[#allocation2] sm:$0x3f] (!%p187_p2), %vm457_vm2, %v863_v1  ;;  %v826_v10 = vpack.c.bf16 (!%p187_p2), %v472_v8, %v471_v7  ;;  %v764_v11 = vld [vmem:[%s960_s2] ss:$0 sm:$0xff] (!%p187_p2)  ;;  %vm460_vm3 = vcmask (!%p187_p2), 125952   ;;  %v549_v16 = vld [vmem:[%s961_s3 + $0x10] sm:$0xff] (!%p187_p2) }
   0x8   : > { %794 = vmatprep.subr.mxu0 (!%p187_p2), %v863_v1  ;;  %825 = vmatprep.subr.bf16.mxu1 (!%p187_p2), %v865_v9  ;;  %v550_v17 = vld [vmem:[%s961_s3 + $0x18] sm:$0xff] (!%p187_p2)  ;;  %vm473_vm4 = vcmask (!%p187_p2), 130048   ;;  %v626_v20 = vld [vmem:[%s961_s3 + $0x20] sm:$0xff] (!%p187_p2)  ;;  %v627_v21 = vld [vmem:[%s961_s3 + $0x28] sm:$0xff] (!%p187_p2) }
   0x9   : > { %827 = vmatpush3.bf16.msra.mxu1 (!%p187_p2), %v826_v10  ;;  %v829_v18 = vpack.c.bf16 (!%p187_p2), %v550_v17, %v549_v16  ;;  %v832_v22 = vpack.c.bf16 (!%p187_p2), %v627_v21, %v626_v20  ;;  %v768_v25 = vld [vmem:[%s962_s4] ss:$0 sm:$0xff] (!%p187_p2) }
   0xa   : > { %828 = vmatprep.subr.bf16.mxu1 (!%p187_p2), %v865_v9 }
   0xd   : > { %s965_s19 = smov (!%p212_p3, %s757_s19), 1 }
   0xe   : > { %s762_s22 = sshll.u32 %s965_s19, 3  ;;  %s763_s23 = sshll.u32 %s965_s19, 2 }
   0xf   : > { %s215_s25 = scalar_lea.vmem %s958_s0, %s762_s22  ;;  %s219_s26 = scalar_lea.vmem %s963_s5, %s763_s23 }
  0x10   : > { %v228_v3 = vld [vmem:[%s215_s25] sm:$0xf] }
  0x11   : > { %792 = vmatmul.mubr.msk.f32.vlgmr.msra.gmra.mrb[0].mxu0 %vm230_vm1, %v228_v3  ;;  %v305_v4 = vld [vmem:[%s215_s25 + $0x1] sm:$0xf] }
  0x12   : > { %795 = vmatpush3.msra.mxu0 %v306_v2  ;;  %796 = vmatprep.mubr.msk.f32.mxu0 %vm864_vm0, %v863_v1  ;;  %v381_v6 = vld [vmem:[%s215_s25 + $0x2] sm:$0xf] }
  0x13   : > { %799 = vmatprep.subr.mxu0 %v863_v1 }
  0x19   : > { %797 = vmatmul.mubr.msk.f32.vlgmr.msra.gmra.mrb[0].mxu0 %vm230_vm1, %v305_v4 }
  0x1a   : > { %800 = vmatpush3.msra.mxu0 %v382_v5  ;;  %801 = vmatprep.mubr.msk.f32.mxu0 %vm864_vm0, %v863_v1 }
  0x21   : > { %802 = vmatmul.mubr.msk.f32.vlgmr.msra.gmra.mrb[0].mxu0 %vm230_vm1, %v381_v6 }
  0xf4   : > { %v452_v12 = vpop.f32.mrb[0].mxu0 }
  0xf5   : > { %v834_v13 = vadd.f32 %v764_v11, %v452_v12  ;;  %v803_v14 = vpop.f32.mrb[1].mxu0 }
  0xf7   : > { %v459_v15 = vmax.f32 %v834_v13, 0.0 }
  0xf9   : > { %461 = vst.msk [vmem:[#allocation2 + $0x1] sm:$0xf] %vm460_vm3, %v459_v15 }
 0x100   : > { %v470_v19 = vld [vmem:[#allocation2] sm:$0xf] }
 0x101   : > { %809 = vmatmul.mubr.msk.f32.vlgmr.msra.gmra.mrb[0].mxu1 %vm473_vm4, %v470_v19  ;;  %v548_v23 = vld [vmem:[#allocation2 + $0x1] sm:$0xf] }
 0x102   : > { %830 = vmatpush3.bf16.msra.mxu1 %v829_v18  ;;  %815 = vmatprep.mubr.msk.f32.mxu1 %vm864_vm0, %v863_v1  ;;  %v625_v24 = vld [vmem:[#allocation2 + $0x2] sm:$0xf] }
 0x103   : > { %831 = vmatprep.subr.bf16.mxu1 %v865_v9 }
 0x109   : > { %816 = vmatmul.mubr.msk.f32.vlgmr.msra.gmra.mrb[0].mxu1 %vm473_vm4, %v548_v23 }
 0x10a   : > { %833 = vmatpush3.bf16.msra.mxu1 %v832_v22  ;;  %822 = vmatprep.mubr.msk.f32.mxu1 %vm864_vm0, %v863_v1 }
 0x111   : > { %823 = vmatmul.mubr.msk.f32.vlgmr.msra.gmra.mrb[0].mxu1 %vm473_vm4, %v625_v24 }
 0x1e4   : > { %v697_v26 = vpop.f32.mrb[0].mxu1 }
 0x1e5   : > { %v835_v27 = vadd.f32 %v768_v25, %v697_v26  ;;  %v824_v28 = vpop.f32.mrb[1].mxu1 }
 0x1e7   : > { %v702_v29 = vmax.f32 %v835_v27, 0.0 }
 0x1e9   : > { %703 = vst.msk [vmem:[%s219_s26] sm:$0xf] %vm460_vm3, %v702_v29 }
 0x1ea PF: > { %s15_s18 = sadd.s32 1, %s861_s18  }
 0x1eb   : > { %p12_p4 = scmp.ge.s32.totalorder %s15_s18, 4  }
 0x1ed   :  { %14 = sbr.rel (!%p12_p4) target bundleno = 1 (0x1), region = 70 }

// kernel: beliefppg_forward.21
= control target key start
LH: loop header
LB: loop body
LE: loop exit
PB: predicated region body
PF: predicated region fallthrough
CT: control target
= control target key end

     0   :  { %s1020_s12 = smov 0   ;;  %s1232_s0 = inlined_call_operand.vmem [shape: f32[2,82,1], index: 0, kind: input, shape index: {}]   ;;  %s1233_s1 = inlined_call_operand.vmem [shape: f32[10,16], index: 1, kind: input, shape index: {}]   ;;  %s1234_s2 = inlined_call_operand.vmem [shape: f32[1,16], index: 2, kind: input, shape index: {}]   ;;  %s1235_s3 = inlined_call_operand.vmem [shape: f32[2,64,16], index: 3, kind: output, shape index: {}]  }
   0x1 LB: > { %s957_s13 = sadd.s32 4294967295, %s997_s12   ;;  %p961_p0 = scmp.ge.s32.totalorder %s997_s12, 1  ;;  %s997_s12 = sphi %s1020_s12, %s13_s12  }
   0x2   : > { %p137_p1 = scmp.lt.s32.totalorder %s997_s12, 3 }
   0x4   : > { %p138_p2 = pnand %p961_p0, %p137_p1 }
   0x5   : > { %p161_p3 = scmp.lt.s32.totalorder (!%p138_p2), %s957_s13, 1  ;;  %v999_v0 = vmov (!%p138_p2), 0   ;;  %v966_v43 = vld [vmem:[%s1233_s1] ss:$0 sm:$0xff] (!%p138_p2)  ;;  %v967_v50 = vld [vmem:[%s1233_s1 + $0x1] ss:$0 sm:$0xff] (!%p138_p2) }
   0x6   : > { %141 = sbr.rel (%p138_p2) target bundleno = 311 (0x137), region = 32  ;;  %990 = vset.pattern.permute.xlu1 (!%p138_p2), %v999_v0  ;;  %989 = vset.pattern.permute.xlu0 (!%p138_p2), %v999_v0  ;;  %v965_v48 = vld [vmem:[%s1234_s2] ss:$0 sm:$0xff] (!%p138_p2)  ;;  %vm893_vm0 = vcmask (!%p138_p2), 130048  }
   0xd   : > { %s1237_s13 = smov (!%p161_p3, %s957_s13), 1 }
   0xe   : > { %s979_s14 = smul.u32 88, %s1237_s13  ;;  %s978_s15 = sshll.u32 %s1237_s13, 6 }
   0xf   : > { %s1199_s18 = scalar_lea.vmem %s1235_s3, %s978_s15 }
  0x10   : > { %s1034_s17 = scalar_lea.vmem %s1232_s0, %s979_s14 }
  0x11   : > { %v1037_v1 = vld [vmem:[%s1034_s17 + $0x10] sm:$0xff]  ;;  %v179_v2 = vld [vmem:[%s1034_s17] sm:$0xff]  ;;  %v1042_v3 = vld [vmem:[%s1034_s17 + $0x18] sm:$0xff] }
  0x12   : > { %200 = vperm.xlu1 %990, %v1037_v1   ;;  %190 = vperm.xlu0 %989, %v179_v2   ;;  %v180_v4 = vld [vmem:[%s1034_s17 + $0x8] sm:$0xff]  ;;  %v1050_v6 = vld [vmem:[%s1034_s17 + $0x20] sm:$0xff]  ;;  %v1055_v7 = vld [vmem:[%s1034_s17 + $0x38] sm:$0xff] }
  0x13   : > { %v1047_v5 = vld [vmem:[%s1034_s17 + $0x28] sm:$0xff]  ;;  %v1058_v8 = vld [vmem:[%s1034_s17 + $0x30] sm:$0xff]  ;;  %v1065_v11 = vld [vmem:[%s1034_s17 + $0x1a] sm:$0xff] }
  0x14   : > { %v249_v9 = vld [vmem:[%s1034_s17 + $0xa] sm:$0xff]  ;;  %v248_v10 = vld [vmem:[%s1034_s17 + $0x2] sm:$0xff]  ;;  %v1068_v12 = vld [vmem:[%s1034_s17 + $0x12] sm:$0xff] }
  0x15   : > { %v1073_v13 = vld [vmem:[%s1034_s17 + $0x2a] sm:$0xff]  ;;  %v1076_v14 = vld [vmem:[%s1034_s17 + $0x22] sm:$0xff]  ;;  %v1081_v15 = vld [vmem:[%s1034_s17 + $0x3a] sm:$0xff] }
  0x16   : > { %205 = vperm.xlu1 %990, %v1042_v3   ;;  %195 = vperm.xlu0 %989, %v180_v4   ;;  %v1084_v16 = vld [vmem:[%s1034_s17 + $0x32] sm:$0xff]  ;;  %v317_v18 = vld [vmem:[%s1034_s17 + $0x4] sm:$0xff]  ;;  %v320_v19 = vld [vmem:[%s1034_s17 + $0x1c] sm:$0xff] }
  0x17   : > { %v318_v17 = vld [vmem:[%s1034_s17 + $0xc] sm:$0xff]  ;;  %v319_v20 = vld [vmem:[%s1034_s17 + $0x14] sm:$0xff]  ;;  %v321_v22 = vld [vmem:[%s1034_s17 + $0x24] sm:$0xff] }
  0x18   : > { %v322_v21 = vld [vmem:[%s1034_s17 + $0x2c] sm:$0xff]  ;;  %v324_v23 = vld [vmem:[%s1034_s17 + $0x3c] sm:$0xff]  ;;  %v323_v24 = vld [vmem:[%s1034_s17 + $0x34] sm:$0xff] }
  0x19   : > { %v387_v25 = vld [vmem:[%s1034_s17 + $0xe] sm:$0xff]  ;;  %v386_v26 = vld [vmem:[%s1034_s17 + $0x6] sm:$0xff]  ;;  %v389_v27 = vld [vmem:[%s1034_s17 + $0x1e] sm:$0xff] }
  0x1a   : > { %215 = vperm.xlu1 %990, %v1047_v5   ;;  %210 = vperm.xlu0 %989, %v1050_v6   ;;  %v388_v28 = vld [vmem:[%s1034_s17 + $0x16] sm:$0xff]  ;;  %v391_v29 = vld [vmem:[%s1034_s17 + $0x2e] sm:$0xff]  ;;  %v390_v30 = vld [vmem:[%s1034_s17 + $0x26] sm:$0xff] }
  0x1b   : > { %v393_v31 = vld [vmem:[%s1034_s17 + $0x3e] sm:$0xff]  ;;  %v392_v32 = vld [vmem:[%s1034_s17 + $0x36] sm:$0xff]  ;;  %v669_v36 = vld [vmem:[%s1034_s17 + $0x46] sm:$0xff] }
  0x1c   : > { %v462_v33 = vld [vmem:[%s1034_s17 + $0x40] sm:$0xff]  ;;  %v738_v44 = vld [vmem:[%s1034_s17 + $0x48] sm:$0xff] }
  0x1d   : > { %v1117_v34 = vld [vmem:[%s1034_s17 + $0x42] sm:$0xff] }
  0x1e   : > { %225 = vperm.xlu1 %990, %v1055_v7   ;;  %220 = vperm.xlu0 %989, %v1058_v8   ;;  %v600_v35 = vld [vmem:[%s1034_s17 + $0x44] sm:$0xff] }
  0x22   : > { %264 = vperm.xlu1 %990, %v249_v9   ;;  %259 = vperm.xlu0 %989, %v248_v10  }
  0x26   : > { %274 = vperm.xlu1 %990, %v1065_v11   ;;  %269 = vperm.xlu0 %989, %v1068_v12  }
  0x2a   : > { %284 = vperm.xlu1 %990, %v1073_v13   ;;  %279 = vperm.xlu0 %989, %v1076_v14  }
  0x2e   : > { %294 = vperm.xlu1 %990, %v1081_v15   ;;  %289 = vperm.xlu0 %989, %v1084_v16  }
  0x32   : > { %333 = vperm.xlu1 %990, %v318_v17   ;;  %328 = vperm.xlu0 %989, %v317_v18  }
  0x36   : > { %343 = vperm.xlu1 %990, %v320_v19   ;;  %338 = vperm.xlu0 %989, %v319_v20  }
  0x3a   : > { %353 = vperm.xlu1 %990, %v322_v21   ;;  %348 = vperm.xlu0 %989, %v321_v22  }
  0x3e   : > { %363 = vperm.xlu1 %990, %v324_v23   ;;  %358 = vperm.xlu0 %989, %v323_v24  }
  0x42   : > { %402 = vperm.xlu1 %990, %v387_v25   ;;  %397 = vperm.xlu0 %989, %v386_v26   ;;  %v968_v26 = vld [vmem:[%s1233_s1 + $0x2] ss:$0 sm:$0xff] }
  0x46   : > { %412 = vperm.xlu1 %990, %v389_v27   ;;  %407 = vperm.xlu0 %989, %v388_v28  }
  0x4a   : > { %422 = vperm.xlu1 %990, %v391_v29   ;;  %417 = vperm.xlu0 %989, %v390_v30  }
  0x4e   : > { %432 = vperm.xlu1 %990, %v393_v31   ;;  %427 = vperm.xlu0 %989, %v392_v32  }
  0x52   : > { %471 = vperm.xlu1 %990, %v1037_v1   ;;  %466 = vperm.xlu0 %989, %v180_v4  }
  0x56   : > { %481 = vperm.xlu1 %990, %v1050_v6   ;;  %476 = vperm.xlu0 %989, %v1042_v3  }
  0x5a   : > { %491 = vperm.xlu1 %990, %v1058_v8   ;;  %486 = vperm.xlu0 %989, %v1047_v5  }
  0x5e   : > { %501 = vperm.xlu1 %990, %v462_v33   ;;  %496 = vperm.xlu0 %989, %v1055_v7  }
  0x62   : > { %540 = vperm.xlu1 %990, %v1068_v12   ;;  %535 = vperm.xlu0 %989, %v249_v9  }
  0x66   : > { %550 = vperm.xlu1 %990, %v1076_v14   ;;  %545 = vperm.xlu0 %989, %v1065_v11  }
  0x6a   : > { %560 = vperm.xlu1 %990, %v1084_v16   ;;  %555 = vperm.xlu0 %989, %v1073_v13  }
  0x6e   : > { %570 = vperm.xlu1 %990, %v1117_v34   ;;  %565 = vperm.xlu0 %989, %v1081_v15  }
  0x72   : > { %609 = vperm.xlu1 %990, %v319_v20   ;;  %604 = vperm.xlu0 %989, %v318_v17  }
  0x76   : > { %619 = vperm.xlu1 %990, %v321_v22   ;;  %614 = vperm.xlu0 %989, %v320_v19   ;;  %v807_v19 = vld [vmem:[%s1034_s17 + $0x4a] sm:$0xff] }
  0x7a   : > { %629 = vperm.xlu1 %990, %v323_v24   ;;  %624 = vperm.xlu0 %989, %v322_v21  }
  0x7e   : > { %639 = vperm.xlu1 %990, %v600_v35   ;;  %634 = vperm.xlu0 %989, %v324_v23  }
  0x82   : > { %678 = vperm.xlu1 %990, %v388_v28   ;;  %673 = vperm.xlu0 %989, %v387_v25  }
  0x86   : > { %688 = vperm.xlu1 %990, %v390_v30   ;;  %683 = vperm.xlu0 %989, %v389_v27  }
  0x8a   : > { %698 = vperm.xlu1 %990, %v392_v32   ;;  %693 = vperm.xlu0 %989, %v391_v29  }
  0x8e   : > { %708 = vperm.xlu1 %990, %v669_v36   ;;  %703 = vperm.xlu0 %989, %v393_v31  }
  0x91   : > { %v201_v37 = vpop.permute.xlu1 %200  ;;  %v191_v38 = vpop.permute.xlu0 %190 }
  0x92   : > { %747 = vperm.xlu1 %990, %v1042_v3   ;;  %742 = vperm.xlu0 %989, %v1037_v1   ;;  %v232_v45 = vmul.f32 %v966_v43, %v191_v38  ;;  %v234_v51 = vmul.f32 %v966_v43, %v201_v37 }
  0x94   : > { %v240_v52 = vadd.f32 %v965_v48, %v232_v45  ;;  %v242_v61 = vadd.f32 %v965_v48, %v234_v51 }
  0x95   : > { %v206_v39 = vpop.permute.xlu1 %205  ;;  %v196_v40 = vpop.permute.xlu0 %195 }
  0x96   : > { %757 = vperm.xlu1 %990, %v1047_v5   ;;  %752 = vperm.xlu0 %989, %v1050_v6   ;;  %v233_v49 = vmul.f32 %v966_v43, %v196_v40  ;;  %v235_v53 = vmul.f32 %v966_v43, %v206_v39 }
  0x98   : > { %v241_v56 = vadd.f32 %v965_v48, %v233_v49  ;;  %v243_v2 = vadd.f32 %v965_v48, %v235_v53  ;;  %v969_v49 = vld [vmem:[%s1233_s1 + $0x3] ss:$0 sm:$0xff] }
  0x99   : > { %v216_v41 = vpop.permute.xlu1 %215  ;;  %v211_v42 = vpop.permute.xlu0 %210 }
  0x9a   : > { %767 = vperm.xlu1 %990, %v1055_v7   ;;  %762 = vperm.xlu0 %989, %v1058_v8   ;;  %v237_v62 = vmul.f32 %v966_v43, %v216_v41  ;;  %v236_v63 = vmul.f32 %v966_v43, %v211_v42 }
  0x9c   : > { %v245_v7 = vadd.f32 %v965_v48, %v237_v62  ;;  %v244_v8 = vadd.f32 %v965_v48, %v236_v63 }
  0x9d   : > { %v226_v46 = vpop.permute.xlu1 %225  ;;  %v221_v47 = vpop.permute.xlu0 %220 }
  0x9e   : > { %777 = vperm.xlu1 %990, %v738_v44   ;;  %772 = vperm.xlu0 %989, %v462_v33   ;;  %v239_v9 = vmul.f32 %v966_v43, %v226_v46 }
  0xa1   : > { %v265_v54 = vpop.permute.xlu1 %264  ;;  %v260_v55 = vpop.permute.xlu0 %259 }
  0xa2   : > { %v302_v57 = vmul.f32 %v967_v50, %v265_v54  ;;  %v301_v58 = vmul.f32 %v967_v50, %v260_v55  ;;  %816 = vperm.xlu1 %990, %v1065_v11   ;;  %811 = vperm.xlu0 %989, %v1068_v12   ;;  %v238_v12 = vmul.f32 %v966_v43, %v221_v47 }
  0xa4   : > { %v310_v59 = vadd.f32 %v302_v57, %v241_v56  ;;  %v309_v60 = vadd.f32 %v301_v58, %v240_v52  ;;  %v246_v23 = vadd.f32 %v965_v48, %v238_v12 }
  0xa5   : > { %v275_v0 = vpop.permute.xlu1 %274  ;;  %v270_v1 = vpop.permute.xlu0 %269 }
  0xa6   : > { %v304_v3 = vmul.f32 %v967_v50, %v275_v0  ;;  %v303_v4 = vmul.f32 %v967_v50, %v270_v1  ;;  %826 = vperm.xlu1 %990, %v1073_v13   ;;  %821 = vperm.xlu0 %989, %v1076_v14   ;;  %v247_v13 = vadd.f32 %v965_v48, %v239_v9 }
  0xa8   : > { %v312_v5 = vadd.f32 %v304_v3, %v243_v2  ;;  %v311_v6 = vadd.f32 %v303_v4, %v242_v61 }
  0xa9   : > { %v285_v10 = vpop.permute.xlu1 %284  ;;  %v280_v11 = vpop.permute.xlu0 %279 }
  0xaa   : > { %v306_v17 = vmul.f32 %v967_v50, %v285_v10  ;;  %v305_v18 = vmul.f32 %v967_v50, %v280_v11  ;;  %836 = vperm.xlu1 %990, %v1081_v15   ;;  %831 = vperm.xlu0 %989, %v1084_v16   ;;  %v970_v10 = vld [vmem:[%s1233_s1 + $0x4] ss:$0 sm:$0xff] }
  0xac   : > { %v314_v20 = vadd.f32 %v306_v17, %v245_v7  ;;  %v313_v21 = vadd.f32 %v305_v18, %v244_v8 }
  0xad   : > { %v295_v22 = vpop.permute.xlu1 %294  ;;  %v290_v14 = vpop.permute.xlu0 %289 }
  0xae   : > { %v308_v24 = vmul.f32 %v967_v50, %v295_v22  ;;  %v307_v25 = vmul.f32 %v967_v50, %v290_v14  ;;  %846 = vperm.xlu1 %990, %v807_v19   ;;  %841 = vperm.xlu0 %989, %v1117_v34  }
  0xb0   : > { %v316_v27 = vadd.f32 %v308_v24, %v247_v13  ;;  %v315_v15 = vadd.f32 %v307_v25, %v246_v23 }
  0xb1   : > { %v334_v28 = vpop.permute.xlu1 %333  ;;  %v329_v16 = vpop.permute.xlu0 %328 }
  0xb2   : > { %v371_v29 = vmul.f32 %v968_v26, %v334_v28  ;;  %v370_v30 = vmul.f32 %v968_v26, %v329_v16 }
  0xb4   : > { %v379_v31 = vadd.f32 %v371_v29, %v310_v59  ;;  %v378_v32 = vadd.f32 %v370_v30, %v309_v60 }
  0xb5   : > { %v344_v33 = vpop.permute.xlu1 %343  ;;  %v339_v35 = vpop.permute.xlu0 %338 }
  0xb6   : > { %v373_v36 = vmul.f32 %v968_v26, %v344_v33  ;;  %v372_v37 = vmul.f32 %v968_v26, %v339_v35 }
  0xb8   : > { %v381_v38 = vadd.f32 %v373_v36, %v312_v5  ;;  %v380_v39 = vadd.f32 %v372_v37, %v311_v6 }
  0xb9   : > { %v354_v40 = vpop.permute.xlu1 %353  ;;  %v349_v34 = vpop.permute.xlu0 %348 }
  0xba   : > { %v375_v41 = vmul.f32 %v968_v26, %v354_v40  ;;  %v374_v42 = vmul.f32 %v968_v26, %v349_v34 }
  0xbc   : > { %v383_v43 = vadd.f32 %v375_v41, %v314_v20  ;;  %v382_v44 = vadd.f32 %v374_v42, %v313_v21 }
  0xbd   : > { %v364_v45 = vpop.permute.xlu1 %363  ;;  %v359_v46 = vpop.permute.xlu0 %358 }
  0xbe   : > { %v377_v47 = vmul.f32 %v968_v26, %v364_v45  ;;  %v376_v48 = vmul.f32 %v968_v26, %v359_v46 }
  0xc0   : > { %v385_v50 = vadd.f32 %v377_v47, %v316_v27  ;;  %v384_v51 = vadd.f32 %v376_v48, %v315_v15 }
  0xc1   : > { %v403_v52 = vpop.permute.xlu1 %402  ;;  %v398_v53 = vpop.permute.xlu0 %397 }
  0xc2   : > { %v440_v54 = vmul.f32 %v969_v49, %v403_v52  ;;  %v439_v55 = vmul.f32 %v969_v49, %v398_v53 }
  0xc4   : > { %v448_v56 = vadd.f32 %v440_v54, %v379_v31  ;;  %v447_v57 = vadd.f32 %v439_v55, %v378_v32 }
  0xc5   : > { %v413_v58 = vpop.permute.xlu1 %412  ;;  %v408_v59 = vpop.permute.xlu0 %407 }
  0xc6   : > { %v442_v60 = vmul.f32 %v969_v49, %v413_v58  ;;  %v441_v61 = vmul.f32 %v969_v49, %v408_v59 }
  0xc8   : > { %v450_v62 = vadd.f32 %v442_v60, %v381_v38  ;;  %v449_v63 = vadd.f32 %v441_v61, %v380_v39 }
  0xc9   : > { %v423_v0 = vpop.permute.xlu1 %422  ;;  %v418_v1 = vpop.permute.xlu0 %417 }
  0xca   : > { %v444_v2 = vmul.f32 %v969_v49, %v423_v0  ;;  %v443_v3 = vmul.f32 %v969_v49, %v418_v1 }
  0xcc   : > { %v452_v4 = vadd.f32 %v444_v2, %v383_v43  ;;  %v451_v5 = vadd.f32 %v443_v3, %v382_v44 }
  0xcd   : > { %v433_v6 = vpop.permute.xlu1 %432  ;;  %v428_v7 = vpop.permute.xlu0 %427 }
  0xce   : > { %v446_v8 = vmul.f32 %v969_v49, %v433_v6  ;;  %v445_v9 = vmul.f32 %v969_v49, %v428_v7  ;;  %v972_v6 = vld [vmem:[%s1233_s1 + $0x6] ss:$0 sm:$0xff] }
  0xd0   : > { %v454_v11 = vadd.f32 %v446_v8, %v385_v50  ;;  %v453_v12 = vadd.f32 %v445_v9, %v384_v51 }
  0xd1   : > { %v472_v17 = vpop.permute.xlu1 %471  ;;  %v467_v18 = vpop.permute.xlu0 %466 }
  0xd2   : > { %v509_v19 = vmul.f32 %v970_v10, %v472_v17  ;;  %v508_v20 = vmul.f32 %v970_v10, %v467_v18 }
  0xd4   : > { %v517_v21 = vadd.f32 %v509_v19, %v448_v56  ;;  %v516_v13 = vadd.f32 %v508_v20, %v447_v57 }
  0xd5   : > { %v482_v22 = vpop.permute.xlu1 %481  ;;  %v477_v14 = vpop.permute.xlu0 %476 }
  0xd6   : > { %v511_v23 = vmul.f32 %v970_v10, %v482_v22  ;;  %v510_v24 = vmul.f32 %v970_v10, %v477_v14 }
  0xd8   : > { %v519_v25 = vadd.f32 %v511_v23, %v450_v62  ;;  %v518_v26 = vadd.f32 %v510_v24, %v449_v63  ;;  %v971_v63 = vld [vmem:[%s1233_s1 + $0x5] ss:$0 sm:$0xff] }
  0xd9   : > { %v492_v27 = vpop.permute.xlu1 %491  ;;  %v487_v15 = vpop.permute.xlu0 %486 }
  0xda   : > { %v513_v28 = vmul.f32 %v970_v10, %v492_v27  ;;  %v512_v16 = vmul.f32 %v970_v10, %v487_v15  ;;  %v1174_v15 = vld [vmem:[%s1233_s1 + $0x8] ss:$0 sm:$0xff] }
  0xdc   : > { %v521_v29 = vadd.f32 %v513_v28, %v452_v4  ;;  %v520_v30 = vadd.f32 %v512_v16, %v451_v5 }
  0xdd   : > { %v502_v31 = vpop.permute.xlu1 %501  ;;  %v497_v32 = vpop.permute.xlu0 %496 }
  0xde   : > { %v515_v33 = vmul.f32 %v970_v10, %v502_v31  ;;  %v514_v35 = vmul.f32 %v970_v10, %v497_v32 }
  0xe0   : > { %v523_v36 = vadd.f32 %v515_v33, %v454_v11  ;;  %v522_v37 = vadd.f32 %v514_v35, %v453_v12  ;;  %v1169_v11 = vld [vmem:[%s1233_s1 + $0x7] ss:$0 sm:$0xff] }
  0xe1   : > { %v541_v38 = vpop.permute.xlu1 %540  ;;  %v536_v39 = vpop.permute.xlu0 %535 }
  0xe2   : > { %v578_v2 = vmul.f32 %v971_v63, %v541_v38  ;;  %v577_v3 = vmul.f32 %v971_v63, %v536_v39 }
  0xe4   : > { %v586_v18 = vadd.f32 %v578_v2, %v517_v21  ;;  %v585_v19 = vadd.f32 %v577_v3, %v516_v13 }
  0xe5   : > { %v551_v40 = vpop.permute.xlu1 %550  ;;  %v546_v34 = vpop.permute.xlu0 %545 }
  0xe6   : > { %v580_v4 = vmul.f32 %v971_v63, %v551_v40  ;;  %v579_v5 = vmul.f32 %v971_v63, %v546_v34 }
  0xe8   : > { %v588_v14 = vadd.f32 %v580_v4, %v519_v25  ;;  %v587_v23 = vadd.f32 %v579_v5, %v518_v26 }
  0xe9   : > { %v561_v41 = vpop.permute.xlu1 %560  ;;  %v556_v42 = vpop.permute.xlu0 %555 }
  0xea   : > { %v582_v7 = vmul.f32 %v971_v63, %v561_v41  ;;  %v581_v8 = vmul.f32 %v971_v63, %v556_v42 }
  0xec   : > { %v590_v28 = vadd.f32 %v582_v7, %v521_v29  ;;  %v589_v16 = vadd.f32 %v581_v8, %v520_v30 }
  0xed   : > { %v571_v43 = vpop.permute.xlu1 %570  ;;  %v566_v44 = vpop.permute.xlu0 %565 }
  0xee   : > { %v584_v9 = vmul.f32 %v971_v63, %v571_v43  ;;  %v583_v10 = vmul.f32 %v971_v63, %v566_v44 }
  0xf0   : > { %v592_v33 = vadd.f32 %v584_v9, %v523_v36  ;;  %v591_v21 = vadd.f32 %v583_v10, %v522_v37  ;;  %v1183_v36 = vld [vmem:[%s1233_s1 + $0x9] ss:$0 sm:$0xff] }
  0xf1   : > { %v610_v45 = vpop.permute.xlu1 %609  ;;  %v605_v46 = vpop.permute.xlu0 %604 }
  0xf2   : > { %v647_v20 = vmul.f32 %v972_v6, %v610_v45  ;;  %v646_v22 = vmul.f32 %v972_v6, %v605_v46 }
  0xf4   : > { %v655_v26 = vadd.f32 %v647_v20, %v586_v18  ;;  %v654_v39 = vadd.f32 %v646_v22, %v585_v19 }
  0xf5   : > { %v620_v47 = vpop.permute.xlu1 %619  ;;  %v615_v48 = vpop.permute.xlu0 %614 }
  0xf6   : > { %v649_v24 = vmul.f32 %v972_v6, %v620_v47  ;;  %v648_v27 = vmul.f32 %v972_v6, %v615_v48 }
  0xf8   : > { %v657_v41 = vadd.f32 %v649_v24, %v588_v14  ;;  %v656_v29 = vadd.f32 %v648_v27, %v587_v23 }
  0xf9   : > { %v630_v49 = vpop.permute.xlu1 %629  ;;  %v625_v50 = vpop.permute.xlu0 %624 }
  0xfa   : > { %v651_v13 = vmul.f32 %v972_v6, %v630_v49  ;;  %v650_v35 = vmul.f32 %v972_v6, %v625_v50 }
  0xfc   : > { %v659_v46 = vadd.f32 %v651_v13, %v590_v28  ;;  %v658_v47 = vadd.f32 %v650_v35, %v589_v16 }
  0xfd   : > { %v640_v51 = vpop.permute.xlu1 %639  ;;  %v635_v52 = vpop.permute.xlu0 %634 }
  0xfe   : > { %v653_v30 = vmul.f32 %v972_v6, %v640_v51  ;;  %v652_v42 = vmul.f32 %v972_v6, %v635_v52 }
 0x100   : > { %v660_v63 = vadd.f32 %v652_v42, %v591_v21 }
 0x101   : > { %v679_v53 = vpop.permute.xlu1 %678  ;;  %v674_v54 = vpop.permute.xlu0 %673 }
 0x102   : > { %v716_v31 = vmul.f32 %v1169_v11, %v679_v53  ;;  %v715_v32 = vmul.f32 %v1169_v11, %v674_v54 }
 0x104   : > { %v724_v37 = vadd.f32 %v716_v31, %v655_v26  ;;  %v723_v43 = vadd.f32 %v715_v32, %v654_v39 }
 0x105   : > { %v689_v55 = vpop.permute.xlu1 %688  ;;  %v684_v56 = vpop.permute.xlu0 %683 }
 0x106   : > { %v718_v44 = vmul.f32 %v1169_v11, %v689_v55  ;;  %v717_v45 = vmul.f32 %v1169_v11, %v684_v56 }
 0x108   : > { %v726_v2 = vadd.f32 %v718_v44, %v657_v41  ;;  %v725_v3 = vadd.f32 %v717_v45, %v656_v29 }
 0x109   : > { %v699_v57 = vpop.permute.xlu1 %698  ;;  %v694_v58 = vpop.permute.xlu0 %693 }
 0x10a   : > { %v720_v48 = vmul.f32 %v1169_v11, %v699_v57  ;;  %v719_v49 = vmul.f32 %v1169_v11, %v694_v58 }
 0x10c   : > { %v728_v58 = vadd.f32 %v720_v48, %v659_v46  ;;  %v727_v5 = vadd.f32 %v719_v49, %v658_v47 }
 0x10d   : > { %v1156_v59 = vpop.permute.xlu1 %708  ;;  %v1158_v60 = vpop.permute.xlu0 %703 }
 0x10e   : > { %v721_v20 = vmul.f32 %v1169_v11, %v1158_v60 }
 0x110   : > { %v729_v39 = vadd.f32 %v721_v20, %v660_v63 }
 0x111   : > { %v748_v61 = vpop.permute.xlu1 %747  ;;  %v743_v62 = vpop.permute.xlu0 %742 }
 0x112   : > { %v785_v40 = vmul.f32 %v1174_v15, %v748_v61  ;;  %v784_v34 = vmul.f32 %v1174_v15, %v743_v62  ;;  %v661_v62 = vadd.f32 %v653_v30, %v592_v33 }
 0x114   : > { %v793_v52 = vadd.f32 %v785_v40, %v724_v37  ;;  %v792_v53 = vadd.f32 %v784_v34, %v723_v43 }
 0x115   : > { %v758_v0 = vpop.permute.xlu1 %757  ;;  %v753_v1 = vpop.permute.xlu0 %752 }
 0x116   : > { %v787_v55 = vmul.f32 %v1174_v15, %v758_v0  ;;  %v786_v56 = vmul.f32 %v1174_v15, %v753_v1 }
 0x118   : > { %v795_v10 = vadd.f32 %v787_v55, %v726_v2  ;;  %v794_v18 = vadd.f32 %v786_v56, %v725_v3 }
 0x119   : > { %v768_v12 = vpop.permute.xlu1 %767  ;;  %v763_v17 = vpop.permute.xlu0 %762 }
 0x11a   : > { %v789_v6 = vmul.f32 %v1174_v15, %v768_v12  ;;  %v788_v7 = vmul.f32 %v1174_v15, %v763_v17  ;;  %v722_v17 = vmul.f32 %v1169_v11, %v1156_v59 }
 0x11c   : > { %v797_v23 = vadd.f32 %v789_v6, %v728_v58  ;;  %v796_v24 = vadd.f32 %v788_v7, %v727_v5  ;;  %v730_v26 = vadd.f32 %v722_v17, %v661_v62 }
 0x11d   : > { %v778_v38 = vpop.permute.xlu1 %777  ;;  %v773_v25 = vpop.permute.xlu0 %772 }
 0x11e   : > { %v791_v32 = vmul.f32 %v1174_v15, %v778_v38  ;;  %v790_v59 = vmul.f32 %v1174_v15, %v773_v25 }
 0x120   : > { %v799_v29 = vadd.f32 %v791_v32, %v730_v26  ;;  %v798_v30 = vadd.f32 %v790_v59, %v729_v39 }
 0x121   : > { %v817_v50 = vpop.permute.xlu1 %816  ;;  %v812_v51 = vpop.permute.xlu0 %811 }
 0x122   : > { %v854_v54 = vmul.f32 %v1183_v36, %v817_v50  ;;  %v853_v61 = vmul.f32 %v1183_v36, %v812_v51 }
 0x124   : > { %v862_v57 = vadd.f32 %v854_v54, %v793_v52  ;;  %v861_v4 = vadd.f32 %v853_v61, %v792_v53 }
 0x125   : > { %v827_v8 = vpop.permute.xlu1 %826  ;;  %v822_v9 = vpop.permute.xlu0 %821 }
 0x126   : > { %vm870_vm1 = vcmp.gt.f32.partialorder %v862_v57, 0.0  ;;  %v878_v0 = vmul.f32 0.01, %v862_v57  ;;  %vm869_vm2 = vcmp.gt.f32.partialorder %v861_v4, 0.0  ;;  %v877_v1 = vmul.f32 0.01, %v861_v4 }
 0x127   : > { %v856_v19 = vmul.f32 %v1183_v36, %v827_v8  ;;  %v855_v12 = vmul.f32 %v1183_v36, %v822_v9 }
 0x128   : > { %v886_v22 = vsel %vm870_vm1, %v862_v57, %v878_v0  ;;  %v885_v14 = vsel %vm869_vm2, %v861_v4, %v877_v1 }
 0x129   : > { %895 = vst.msk [vmem:[%s1199_s18 + $0x8] sm:$0xff] %vm893_vm0, %v886_v22  ;;  %894 = vst.msk [vmem:[%s1199_s18] sm:$0xff] %vm893_vm0, %v885_v14  ;;  %v864_v27 = vadd.f32 %v856_v19, %v795_v10  ;;  %v863_v28 = vadd.f32 %v855_v12, %v794_v18  ;;  %v837_v16 = vpop.permute.xlu1 %836  ;;  %v832_v31 = vpop.permute.xlu0 %831 }
 0x12a   : > { %v858_v60 = vmul.f32 %v1183_v36, %v837_v16  ;;  %v857_v11 = vmul.f32 %v1183_v36, %v832_v31 }
 0x12b   : > { %vm872_vm3 = vcmp.gt.f32.partialorder %v864_v27, 0.0  ;;  %v880_v33 = vmul.f32 0.01, %v864_v27  ;;  %vm871_vm4 = vcmp.gt.f32.partialorder %v863_v28, 0.0  ;;  %v879_v21 = vmul.f32 0.01, %v863_v28 }
 0x12c   : > { %v866_v13 = vadd.f32 %v858_v60, %v797_v23  ;;  %v865_v35 = vadd.f32 %v857_v11, %v796_v24 }
 0x12d   : > { %v888_v40 = vsel %vm872_vm3, %v864_v27, %v880_v33  ;;  %v887_v34 = vsel %vm871_vm4, %v863_v28, %v879_v21  ;;  %v847_v38 = vpop.permute.xlu1 %846  ;;  %v842_v41 = vpop.permute.xlu0 %841 }
 0x12e   : > { %897 = vst.msk [vmem:[%s1199_s18 + $0x18] sm:$0xff] %vm893_vm0, %v888_v40  ;;  %896 = vst.msk [vmem:[%s1199_s18 + $0x10] sm:$0xff] %vm893_vm0, %v887_v34  ;;  %vm874_vm5 = vcmp.gt.f32.partialorder %v866_v13, 0.0  ;;  %v882_v15 = vmul.f32 0.01, %v866_v13  ;;  %vm873_vm6 = vcmp.gt.f32.partialorder %v865_v35, 0.0  ;;  %v860_v42 = vmul.f32 %v1183_v36, %v847_v38 }
 0x12f   : > { %v881_v25 = vmul.f32 0.01, %v865_v35  ;;  %v859_v37 = vmul.f32 %v1183_v36, %v842_v41 }
 0x130   : > { %v890_v43 = vsel %vm874_vm5, %v866_v13, %v882_v15  ;;  %v868_v45 = vadd.f32 %v860_v42, %v799_v29 }
 0x131   : > { %v889_v44 = vsel %vm873_vm6, %v865_v35, %v881_v25  ;;  %899 = vst.msk [vmem:[%s1199_s18 + $0x28] sm:$0xff] %vm893_vm0, %v890_v43  ;;  %v867_v46 = vadd.f32 %v859_v37, %v798_v30 }
 0x132   : > { %898 = vst.msk [vmem:[%s1199_s18 + $0x20] sm:$0xff] %vm893_vm0, %v889_v44  ;;  %vm876_vm7 = vcmp.gt.f32.partialorder %v868_v45, 0.0  ;;  %v884_v47 = vmul.f32 0.01, %v868_v45 }
 0x133   : > { %vm875_vm8 = vcmp.gt.f32.partialorder %v867_v46, 0.0  ;;  %v883_v48 = vmul.f32 0.01, %v867_v46 }
 0x134   : > { %v892_v49 = vsel %vm876_vm7, %v868_v45, %v884_v47 }
 0x135   : > { %v891_v50 = vsel %vm875_vm8, %v867_v46, %v883_v48  ;;  %901 = vst.msk [vmem:[%s1199_s18 + $0x38] sm:$0xff] %vm893_vm0, %v892_v49 }
 0x136   : > { %900 = vst.msk [vmem:[%s1199_s18 + $0x30] sm:$0xff] %vm893_vm0, %v891_v50 }
 0x137 PF: > { %s13_s12 = sadd.s32 1, %s997_s12  }
 0x138   : > { %p10_p4 = scmp.ge.s32.totalorder %s13_s12, 4  }
 0x13a   :  { %12 = sbr.rel (!%p10_p4) target bundleno = 1 (0x1), region = 62 }

// kernel: beliefppg_forward.22
= control target key start
LH: loop header
LB: loop body
LE: loop exit
PB: predicated region body
PF: predicated region fallthrough
CT: control target
= control target key end

     0   :  { %s1352_s12 = smov 0   ;;  %s1474_s0 = inlined_call_operand.vmem [shape: f32[2,34,16], index: 0, kind: input, shape index: {}]   ;;  %s1475_s1 = inlined_call_operand.vmem [shape: f32[160,16], index: 1, kind: input, shape index: {}]   ;;  %s1476_s2 = inlined_call_operand.vmem [shape: f32[1,16], index: 2, kind: input, shape index: {}]   ;;  %s1477_s3 = inlined_call_operand.vmem [shape: f32[2,16,16], index: 3, kind: output, shape index: {}]  }
   0x1 LB: > { %s1113_s13 = sadd.s32 4294967295, %s1330_s12   ;;  %p1117_p0 = scmp.ge.s32.totalorder %s1330_s12, 1  ;;  %s1330_s12 = sphi %s1352_s12, %s13_s12  }
   0x2   : > { %p137_p1 = scmp.lt.s32.totalorder %s1330_s12, 3 }
   0x4   : > { %p138_p2 = pnand %p1117_p0, %p137_p1 }
   0x5   : > { %v181_v0 = vld [vmem:[%s1475_s1] sm:$0xff] (!%p138_p2)  ;;  %v182_v1 = vld [vmem:[%s1475_s1 + $0x8] sm:$0xff] (!%p138_p2)  ;;  %v617_v2 = vld [vmem:[%s1475_s1 + $0x50] sm:$0xff] (!%p138_p2)  ;;  %p161_p3 = scmp.lt.s32.totalorder (!%p138_p2), %s1113_s13, 1  ;;  %vm183_vm0 = vcmask (!%p138_p2), 130048  }
   0x6   : > { %141 = sbr.rel (%p138_p2) target bundleno = 272 (0x110), region = 32  ;;  %v1255_v3 = vpack.c.bf16 (!%p138_p2), %v182_v1, %v181_v0  ;;  %v618_v4 = vld [vmem:[%s1475_s1 + $0x58] sm:$0xff] (!%p138_p2)  ;;  %v269_v5 = vld [vmem:[%s1475_s1 + $0x10] sm:$0xff] (!%p138_p2)  ;;  %v704_v9 = vld [vmem:[%s1475_s1 + $0x60] sm:$0xff] (!%p138_p2) }
   0x7   : > { %v270_v6 = vld [vmem:[%s1475_s1 + $0x18] sm:$0xff] (!%p138_p2)  ;;  %v1275_v7 = vpack.c.bf16 (!%p138_p2), %v618_v4, %v617_v2  ;;  %v705_v10 = vld [vmem:[%s1475_s1 + $0x68] sm:$0xff] (!%p138_p2)  ;;  %v356_v12 = vld [vmem:[%s1475_s1 + $0x20] sm:$0xff] (!%p138_p2) }
   0x8   : > { %v1259_v8 = vpack.c.bf16 (!%p138_p2), %v270_v6, %v269_v5  ;;  %1256 = vmatprep.subr.bf16.mxu1 (!%p138_p2), %v1255_v3  ;;  %v1279_v11 = vpack.c.bf16 (!%p138_p2), %v705_v10, %v704_v9  ;;  %v357_v13 = vld [vmem:[%s1475_s1 + $0x28] sm:$0xff] (!%p138_p2)  ;;  %v791_v14 = vld [vmem:[%s1475_s1 + $0x70] sm:$0xff] (!%p138_p2)  ;;  %v792_v15 = vld [vmem:[%s1475_s1 + $0x78] sm:$0xff] (!%p138_p2) }
   0x9   : > { %1258 = vmatpush3.bf16.msra.mxu1 (!%p138_p2), %v1255_v3  ;;  %1276 = vmatprep.subr.bf16.mxu0 (!%p138_p2), %v1275_v7  ;;  %v1263_v19 = vpack.c.bf16 (!%p138_p2), %v357_v13, %v356_v12  ;;  %v1283_v22 = vpack.c.bf16 (!%p138_p2), %v792_v15, %v791_v14  ;;  %v443_v24 = vld [vmem:[%s1475_s1 + $0x30] sm:$0xff] (!%p138_p2)  ;;  %v444_v25 = vld [vmem:[%s1475_s1 + $0x38] sm:$0xff] (!%p138_p2)  ;;  %v878_v26 = vld [vmem:[%s1475_s1 + $0x80] sm:$0xff] (!%p138_p2) }
   0xa   : > { %1278 = vmatpush3.bf16.msra.mxu0 (!%p138_p2), %v1275_v7  ;;  %1260 = vmatprep.subr.bf16.mxu1 (!%p138_p2), %v1259_v8  ;;  %v879_v27 = vld [vmem:[%s1475_s1 + $0x88] sm:$0xff] (!%p138_p2)  ;;  %v1267_v29 = vpack.c.bf16 (!%p138_p2), %v444_v25, %v443_v24  ;;  %v530_v33 = vld [vmem:[%s1475_s1 + $0x40] sm:$0xff] (!%p138_p2)  ;;  %v965_v35 = vld [vmem:[%s1475_s1 + $0x90] sm:$0xff] (!%p138_p2) }
   0xb   : > { %1280 = vmatprep.subr.bf16.mxu0 (!%p138_p2), %v1279_v11  ;;  %v1287_v31 = vpack.c.bf16 (!%p138_p2), %v879_v27, %v878_v26  ;;  %v531_v34 = vld [vmem:[%s1475_s1 + $0x48] sm:$0xff] (!%p138_p2)  ;;  %v966_v36 = vld [vmem:[%s1475_s1 + $0x98] sm:$0xff] (!%p138_p2)  ;;  %v1121_v44 = vld [vmem:[%s1476_s2] ss:$0 sm:$0xff] (!%p138_p2) }
   0xc   : > { %v1271_v38 = vpack.c.bf16 (!%p138_p2), %v531_v34, %v530_v33  ;;  %v1291_v40 = vpack.c.bf16 (!%p138_p2), %v966_v36, %v965_v35 }
   0xd   : > { %s1479_s13 = smov (!%p161_p3, %s1113_s13), 1 }
   0xe   : > { %s1315_s30 = smul.u32 40, %s1479_s13  ;;  %s1144_s8 = sshll.u32 %s1479_s13, 4 }
   0xf   : > { %s170_s11 = scalar_lea.vmem %s1477_s3, %s1144_s8 }
  0x10   : > { %s1402_s16 = scalar_lea.vmem %s1474_s0, %s1315_s30 }
  0x11   : > { %v179_v16 = vld [vmem:[%s1402_s16] sm:$0xff]  ;;  %v615_v17 = vld [vmem:[%s1402_s16 + $0xa] sm:$0xff]  ;;  %v616_v20 = vld [vmem:[%s1402_s16 + $0x12] sm:$0xff] }
  0x12   : > { %v180_v18 = vld [vmem:[%s1402_s16 + $0x8] sm:$0xff]  ;;  %1189 = vmatprep.mubr.msk.f32.mxu1 %vm183_vm0, %v179_v16  ;;  %1224 = vmatprep.mubr.msk.f32.mxu0 %vm183_vm0, %v615_v17  ;;  %v703_v28 = vld [vmem:[%s1402_s16 + $0x14] sm:$0xff] }
  0x13   : > { %v267_v21 = vld [vmem:[%s1402_s16 + $0x2] sm:$0xff]  ;;  %1190 = vmatmul.mubr.msk.f32.vlgmr.msra.gmra.mrb[0].mxu1 %vm183_vm0, %v180_v18  ;;  %1225 = vmatmul.mubr.msk.f32.vlgmr.msra.gmra.mrb[0].mxu0 %vm183_vm0, %v616_v20  ;;  %v702_v23 = vld [vmem:[%s1402_s16 + $0xc] sm:$0xff]  ;;  %v790_v37 = vld [vmem:[%s1402_s16 + $0x16] sm:$0xff] }
  0x14   : > { %1262 = vmatpush3.bf16.msra.mxu1 %v1259_v8  ;;  %1282 = vmatpush3.bf16.msra.mxu0 %v1279_v11  ;;  %v354_v30 = vld [vmem:[%s1402_s16 + $0x4] sm:$0xff]  ;;  %v789_v32 = vld [vmem:[%s1402_s16 + $0xe] sm:$0xff]  ;;  %v877_v42 = vld [vmem:[%s1402_s16 + $0x18] sm:$0xff] }
  0x15   : > { %1196 = vmatprep.mubr.msk.f32.mxu1 %vm183_vm0, %v267_v21  ;;  %1264 = vmatprep.subr.bf16.mxu1 %v1263_v19  ;;  %v441_v39 = vld [vmem:[%s1402_s16 + $0x6] sm:$0xff]  ;;  %v876_v41 = vld [vmem:[%s1402_s16 + $0x10] sm:$0xff]  ;;  %v964_v43 = vld [vmem:[%s1402_s16 + $0x1a] sm:$0xff] }
  0x16   : > { %1231 = vmatprep.mubr.msk.f32.mxu0 %vm183_vm0, %v702_v23  ;;  %1284 = vmatprep.subr.bf16.mxu0 %v1283_v22 }
  0x1b   : > { %1197 = vmatmul.mubr.msk.f32.vlgmr.msra.gmra.mrb[0].mxu1 %vm183_vm0, %v615_v17  ;;  %1232 = vmatmul.mubr.msk.f32.vlgmr.msra.gmra.mrb[0].mxu0 %vm183_vm0, %v703_v28 }
  0x1c   : > { %1266 = vmatpush3.bf16.msra.mxu1 %v1263_v19  ;;  %1286 = vmatpush3.bf16.msra.mxu0 %v1283_v22 }
  0x1d   : > { %1203 = vmatprep.mubr.msk.f32.mxu1 %vm183_vm0, %v354_v30  ;;  %1268 = vmatprep.subr.bf16.mxu1 %v1267_v29 }
  0x1e   : > { %1238 = vmatprep.mubr.msk.f32.mxu0 %vm183_vm0, %v789_v32  ;;  %1288 = vmatprep.subr.bf16.mxu0 %v1287_v31 }
  0x23   : > { %1204 = vmatmul.mubr.msk.f32.vlgmr.msra.gmra.mrb[0].mxu1 %vm183_vm0, %v702_v23  ;;  %1239 = vmatmul.mubr.msk.f32.vlgmr.msra.gmra.mrb[0].mxu0 %vm183_vm0, %v790_v37 }
  0x24   : > { %1270 = vmatpush3.bf16.msra.mxu1 %v1267_v29  ;;  %1290 = vmatpush3.bf16.msra.mxu0 %v1287_v31 }
  0x25   : > { %1210 = vmatprep.mubr.msk.f32.mxu1 %vm183_vm0, %v441_v39  ;;  %1272 = vmatprep.subr.bf16.mxu1 %v1271_v38 }
  0x26   : > { %1245 = vmatprep.mubr.msk.f32.mxu0 %vm183_vm0, %v876_v41  ;;  %1292 = vmatprep.subr.bf16.mxu0 %v1291_v40 }
  0x2b   : > { %1211 = vmatmul.mubr.msk.f32.vlgmr.msra.gmra.mrb[0].mxu1 %vm183_vm0, %v789_v32  ;;  %1246 = vmatmul.mubr.msk.f32.vlgmr.msra.gmra.mrb[0].mxu0 %vm183_vm0, %v877_v42 }
  0x2c   : > { %1274 = vmatpush3.bf16.msra.mxu1 %v1271_v38  ;;  %1294 = vmatpush3.bf16.msra.mxu0 %v1291_v40 }
  0x2d   : > { %1217 = vmatprep.mubr.msk.f32.mxu1 %vm183_vm0, %v180_v18  ;;  %1252 = vmatprep.mubr.msk.f32.mxu0 %vm183_vm0, %v616_v20 }
  0x33   : > { %1218 = vmatmul.mubr.msk.f32.vlgmr.msra.gmra.mrb[0].mxu1 %vm183_vm0, %v876_v41  ;;  %1253 = vmatmul.mubr.msk.f32.vlgmr.msra.gmra.mrb[0].mxu0 %vm183_vm0, %v964_v43 }
 0x106   : > { %v1219_v45 = vpop.f32.mrb[0].mxu1  ;;  %v1254_v46 = vpop.f32.mrb[0].mxu0 }
 0x107   : > { %v1295_v47 = vadd.f32 %v1219_v45, %v1121_v44  ;;  %v604_v48 = vpop.f32.mrb[1].mxu1  ;;  %v1039_v49 = vpop.f32.mrb[1].mxu0 }
 0x108   : > { %v1297_v50 = vadd.f32 %v1121_v44, %v604_v48 }
 0x109   : > { %v1296_v51 = vadd.f32 %v1295_v47, %v1254_v46 }
 0x10a   : > { %v1298_v52 = vadd.f32 %v1297_v50, %v1039_v49 }
 0x10b   : > { %vm1051_vm1 = vcmp.gt.f32.partialorder %v1296_v51, 0.0  ;;  %v1053_v53 = vmul.f32 0.01, %v1296_v51 }
 0x10c   : > { %vm1050_vm2 = vcmp.gt.f32.partialorder %v1298_v52, 0.0  ;;  %v1052_v54 = vmul.f32 0.01, %v1298_v52 }
 0x10d   : > { %v1055_v55 = vsel %vm1051_vm1, %v1296_v51, %v1053_v53 }
 0x10e   : > { %1057 = vst.msk [vmem:[%s170_s11 + $0x8] sm:$0xff] %vm183_vm0, %v1055_v55  ;;  %v1054_v56 = vsel %vm1050_vm2, %v1298_v52, %v1052_v54 }
 0x10f   : > { %1056 = vst.msk [vmem:[%s170_s11] sm:$0xff] %vm183_vm0, %v1054_v56 }
 0x110 PF: > { %s13_s12 = sadd.s32 1, %s1330_s12  }
 0x111   : > { %p10_p4 = scmp.ge.s32.totalorder %s13_s12, 4  }
 0x113   :  { %12 = sbr.rel (!%p10_p4) target bundleno = 1 (0x1), region = 62 }

// kernel: beliefppg_forward.24
= control target key start
LH: loop header
LB: loop body
LE: loop exit
PB: predicated region body
PF: predicated region fallthrough
CT: control target
= control target key end

     0   :  { %s1459_s23 = smov 0   ;;  %s1605_s0 = inlined_call_operand.vmem [shape: f32[2,4,16], index: 0, kind: input, shape index: {}]   ;;  %s1606_s1 = inlined_call_operand.vmem [shape: f32[2,4,16], index: 1, kind: input, shape index: {}]   ;;  %s1607_s2 = inlined_call_operand.vmem [shape: f32[16,4], index: 2, kind: input, shape index: {}]   ;;  %s1608_s3 = inlined_call_operand.vmem [shape: f32[1,4], index: 3, kind: input, shape index: {}]   ;;  %s1609_s4 = inlined_call_operand.vmem [shape: f32[16,4], index: 4, kind: input, shape index: {}]   ;;  %s1610_s5 = inlined_call_operand.vmem [shape: f32[1,4], index: 5, kind: input, shape index: {}]   ;;  %s1611_s6 = inlined_call_operand.vmem [shape: f32[1,4], index: 6, kind: input, shape index: {}]   ;;  %s1612_s7 = inlined_call_operand.<no memory space> [shape: f32[1,1], index: 7, kind: input, shape index: {}]   ;;  %s1613_s8 = inlined_call_operand.vmem [shape: f32[96,16], index: 8, kind: input, shape index: {}]   ;;  %s1614_s9 = inlined_call_operand.vmem [shape: f32[1,16], index: 9, kind: input, shape index: {}]   ;;  %s1615_s10 = inlined_call_operand.vmem [shape: f32[48,16], index: 10, kind: input, shape index: {}]   ;;  %s1616_s11 = inlined_call_operand.vmem [shape: f32[1,16], index: 11, kind: input, shape index: {}]   ;;  %s1617_s12 = inlined_call_operand.vmem [shape: f32[2,4,16], index: 12, kind: output, shape index: {}]  }
   0x1   :  { %v17_v0 = vstv %s1612_s7 }
   0x2   :  { %18 = vst [vmem:[#allocation4] sm:$0x1] %v17_v0 }
   0x3 LB: > { %s1193_s24 = sadd.s32 4294967295, %s1384_s23   ;;  %p1197_p0 = scmp.ge.s32.totalorder %s1384_s23, 1  ;;  %s1384_s23 = sphi %s1459_s23, %s24_s23  }
   0x4   : > { %p372_p1 = scmp.lt.s32.totalorder %s1384_s23, 3 }
   0x6   : > { %p373_p2 = pnand %p1197_p0, %p372_p1 }
   0x7   : > { %v430_v1 = vld [vmem:[%s1607_s2] sm:$0xff] (!%p373_p2)  ;;  %v431_v2 = vld [vmem:[%s1607_s2 + $0x8] sm:$0xff] (!%p373_p2)  ;;  %p416_p3 = scmp.lt.s32.totalorder (!%p373_p2), %s1193_s24, 1  ;;  %v1386_v3 = vmov (!%p373_p2), 0.0|0.0   ;;  %vm1387_vm0 = vmmov (!%p373_p2), 0   ;;  %v1388_v5 = vmov (!%p373_p2), 0.0  }
   0x8   : > { %376 = sbr.rel (%p373_p2) target bundleno = 1133 (0x46d), region = 68  ;;  %1315 = vmatprep.subr.bf16.mxu0 (!%p373_p2), %v1386_v3  ;;  %v1316_v4 = vpack.c.bf16 (!%p373_p2), %v431_v2, %v430_v1  ;;  %1251 = vmatprep.mubr.msk.f32.mxu0 (!%p373_p2), %vm1387_vm0, %v1388_v5  ;;  %v513_v6 = vld [vmem:[%s1609_s4] sm:$0xff] (!%p373_p2)  ;;  %v514_v7 = vld [vmem:[%s1609_s4 + $0x8] sm:$0xff] (!%p373_p2)  ;;  %vm439_vm1 = vcmask (!%p373_p2), 130048   ;;  %vm605_vm2 = vcmask (!%p373_p2), 27648   ;;  %v1389_v21 = vmov (!%p373_p2), 0  }
   0x9   : > { %1321 = vmatprep.subr.bf16.mxu1 (!%p373_p2), %v1386_v3  ;;  %1269 = vmatprep.mubr.msk.f32.mxu1 (!%p373_p2), %vm1387_vm0, %v1388_v5  ;;  %v1319_v8 = vpack.c.bf16 (!%p373_p2), %v514_v7, %v513_v6  ;;  %v1201_v11 = vld [vmem:[%s1608_s3] ss:$0 sm:$0xff] (!%p373_p2)  ;;  %v1206_v22 = vld [vmem:[#allocation4] ss:$0 sm:$0xff] (!%p373_p2)  ;;  %vm627_vm3 = vcmask (!%p373_p2), 259072   ;;  %vm629_vm4 = vcmask (!%p373_p2), 125952  }
   0xa   : > { %1317 = vmatpush3.bf16.msra.mxu0 (!%p373_p2), %v1316_v4  ;;  %v1203_v12 = vld [vmem:[%s1610_s5] ss:$0 sm:$0xff] (!%p373_p2)  ;;  %1375 = vset.pattern.permute.xlu0 (!%p373_p2), %v1389_v21  ;;  %628 = vst.msk [vmem:[#allocation2] sm:$0x3f] (!%p373_p2), %vm627_vm3, %v1388_v5  ;;  %v647_v30 = vld [vmem:[%s1613_s8 + $0x8] sm:$0xff] (!%p373_p2)  ;;  %v648_v32 = vld [vmem:[%s1613_s8 + $0x10] sm:$0xff] (!%p373_p2) }
   0xb   : > { %1318 = vmatprep.subr.bf16.mxu0 (!%p373_p2), %v1386_v3  ;;  %v1348_v13 = vadd.f32 (!%p373_p2), %v1203_v12, %v1201_v11  ;;  %v1205_v17 = vld [vmem:[%s1611_s6] ss:$0 sm:$0xff] (!%p373_p2)  ;;  %v649_v33 = vld [vmem:[%s1613_s8 + $0x18] sm:$0xff] (!%p373_p2)  ;;  %s1390_s18 = smov (!%p373_p2), 16   ;;  %vm635_vm5 = vcmask (!%p373_p2), 257152   ;;  %v727_v39 = vld [vmem:[%s1613_s8 + $0x28] sm:$0xff] (!%p373_p2) }
   0xc   : > { %v646_v29 = vld [vmem:[%s1613_s8] sm:$0xff] (!%p373_p2)  ;;  %v1325_v34 = vpack.c.bf16 (!%p373_p2), %v649_v33, %v648_v32  ;;  %vm650_vm6 = vcmask (!%p373_p2), 261120   ;;  %v728_v41 = vld [vmem:[%s1613_s8 + $0x30] sm:$0xff] (!%p373_p2)  ;;  %v729_v42 = vld [vmem:[%s1613_s8 + $0x38] sm:$0xff] (!%p373_p2)  ;;  %vm883_vm7 = vcmask (!%p373_p2), 128000  }
   0xd   : > { %v1322_v31 = vpack.c.bf16 (!%p373_p2), %v647_v30, %v646_v29  ;;  %v726_v38 = vld [vmem:[%s1613_s8 + $0x20] sm:$0xff] (!%p373_p2)  ;;  %v1331_v44 = vpack.c.bf16 (!%p373_p2), %v729_v42, %v728_v41  ;;  %v806_v46 = vld [vmem:[%s1613_s8 + $0x48] sm:$0xff] (!%p373_p2)  ;;  %v807_v48 = vld [vmem:[%s1613_s8 + $0x50] sm:$0xff] (!%p373_p2)  ;;  %884 = vst.msk [vmem:[#allocation3] sm:$0x3f] (!%p373_p2), %vm883_vm7, %v1388_v5 }
   0xe   : > { %v1328_v40 = vpack.c.bf16 (!%p373_p2), %v727_v39, %v726_v38  ;;  %v805_v45 = vld [vmem:[%s1613_s8 + $0x40] sm:$0xff] (!%p373_p2)  ;;  %v808_v49 = vld [vmem:[%s1613_s8 + $0x58] sm:$0xff] (!%p373_p2)  ;;  %v897_v54 = vld [vmem:[%s1615_s10 + $0x8] sm:$0xff] (!%p373_p2) }
   0xf   : > { %s1619_s24 = smov (!%p416_p3, %s1193_s24), 1  ;;  %1323 = vmatpush3.bf16.msra.mxu1 %v1322_v31  ;;  %v1334_v47 = vpack.c.bf16 %v806_v46, %v805_v45  ;;  %v1337_v51 = vpack.c.bf16 %v808_v49, %v807_v48  ;;  %v896_v53 = vld [vmem:[%s1615_s10] sm:$0xff]  ;;  %v973_v61 = vld [vmem:[%s1615_s10 + $0x10] sm:$0xff]  ;;  %v974_v62 = vld [vmem:[%s1615_s10 + $0x18] sm:$0xff] }
  0x10   : > { %s1486_s14 = sshll.u32 %s1619_s24, 2  ;;  %1324 = vmatprep.subr.bf16.mxu1 %v1386_v3  ;;  %v1340_v55 = vpack.c.bf16 %v897_v54, %v896_v53  ;;  %v1207_v56 = vld [vmem:[%s1614_s9] ss:$0 sm:$0xff]  ;;  %v1343_v63 = vpack.c.bf16 %v974_v62, %v973_v61  ;;  %v1051_v2 = vld [vmem:[%s1615_s10 + $0x28] sm:$0xff] }
  0x11   : > { %s423_s17 = scalar_lea.vmem %s1606_s1, %s1486_s14  ;;  %s419_s20 = scalar_lea.vmem %s1605_s0, %s1486_s14  ;;  %v1050_v1 = vld [vmem:[%s1615_s10 + $0x20] sm:$0xff] }
  0x12   : > { %v429_v9 = vld [vmem:[%s423_s17] sm:$0xf]  ;;  %v1346_v4 = vpack.c.bf16 %v1051_v2, %v1050_v1  ;;  %s427_s19 = scalar_lea.vmem %s1617_s12, %s1486_s14 }
  0x13   : > { %1252 = vmatmul.mubr.msk.f32.vlgmr.msra.gmra.mrb[0].mxu0 %vm439_vm1, %v429_v9  ;;  %v428_v10 = vld [vmem:[%s419_s20] sm:$0xf]  ;;  %1326 = vmatpush3.bf16.msra.mxu1 %v1325_v34 }
  0x14   : > { %1320 = vmatpush3.bf16.msra.mxu0 %v1319_v8  ;;  %1258 = vmatprep.mubr.msk.f32.mxu0 %vm1387_vm0, %v1388_v5  ;;  %630 = vst.msk [vmem:[#allocation2 + $0x1] sm:$0xf] %vm629_vm4, %v428_v10 }
  0x15   : > { %1339 = vmatprep.subr.bf16.mxu0 %v1386_v3  ;;  %1327 = vmatprep.subr.bf16.mxu1 %v1386_v3 }
  0x1b   : > { %1259 = vmatmul.mubr.msk.f32.vlgmr.msra.gmra.mrb[0].mxu0 %vm439_vm1, %v428_v10 }
  0x1c   : > { %1298 = vmatprep.mubr.msk.f32.mxu0 %vm1387_vm0, %v1388_v5  ;;  %1341 = vmatpush3.bf16.msra.mxu0 %v1340_v55 }
  0x1d   : > { %1342 = vmatprep.subr.bf16.mxu0 %v1386_v3 }
  0xee   : > { %v591_v14 = vpop.f32.mrb[0].mxu0 }
  0xef   : > { %v1349_v15 = vadd.f32 %v1348_v13, %v591_v14  ;;  %v1260_v16 = vpop.f32.mrb[1].mxu0 }
  0xf1   : > { %v596_v18 = vmax.f32 %v1349_v15, 0.0 }
  0xf3   : > { %v604_v19 = vmul.f32 %v1205_v17, %v596_v18 }
  0xf5   : > { %v606_v20 = vsel %vm605_vm2, %v604_v19, 0.0 }
  0xf6   : > { %607 = vadd.xlane.f32.xlu0 %v606_v20 }
 0x183   : > { %v608_v23 = vpop.xlane.xlu0 %607 }
 0x184   : > { %v616_v24 = vadd.f32 %v1206_v22, %v608_v23 }
 0x186   : > { %v617_v25 = vmul.f32 0.5, %v616_v24 }
 0x188   : > { %1376 = vtanh.f32 %v617_v25 }
 0x192   : > { %v1377_v26 = vpop.eup %1376 }
 0x193   : > { %v619_v27 = vadd.f32 1.0, %v1377_v26 }
 0x195   : > { %v620_v28 = vmul.f32 0.5, %v619_v27 }
 0x197   : > { %623 = vperm.xlu0 %1375, %v620_v28  }
 0x216   : > { %v624_v35 = vpop.permute.xlu0 %623 }
 0x217   : > { %v626_v36 = vmul.f32 %v624_v35, %v429_v9 }
 0x219   : > { %632 = vrot.lane.b32.xlu1 %v626_v36, %s1390_s18 }
 0x28b   : > { %v633_v37 = vpop.permute.xlu1 %632 }
 0x28c   : > { %636 = vst.msk [vmem:[#allocation2 + $0x1] sm:$0xf] %vm635_vm5, %v633_v37 }
 0x293   : > { %v645_v43 = vld [vmem:[#allocation2] sm:$0xf] }
 0x294   : > { %1270 = vmatmul.mubr.msk.f32.vlgmr.msra.gmra.mrb[0].mxu1 %vm650_vm6, %v645_v43  ;;  %v725_v50 = vld [vmem:[#allocation2 + $0x1] sm:$0xf] }
 0x295   : > { %1329 = vmatpush3.bf16.msra.mxu1 %v1328_v40  ;;  %1280 = vmatprep.mubr.msk.f32.mxu1 %vm1387_vm0, %v1388_v5  ;;  %v804_v52 = vld [vmem:[#allocation2 + $0x2] sm:$0xf] }
 0x296   : > { %1330 = vmatprep.subr.bf16.mxu1 %v1386_v3 }
 0x299   : > { %1332 = vmatpush3.bf16.msra.mxu1 %v1331_v44 }
 0x29a   : > { %1333 = vmatprep.subr.bf16.mxu1 %v1386_v3 }
 0x29c   : > { %1281 = vmatmul.mubr.msk.f32.vlgmr.msra.gmra.mrb[0].mxu1 %vm650_vm6, %v725_v50 }
 0x29d   : > { %1335 = vmatpush3.bf16.msra.mxu1 %v1334_v47  ;;  %1291 = vmatprep.mubr.msk.f32.mxu1 %vm1387_vm0, %v1388_v5 }
 0x29e   : > { %1336 = vmatprep.subr.bf16.mxu1 %v1386_v3 }
 0x2a1   : > { %1338 = vmatpush3.bf16.msra.mxu1 %v1337_v51 }
 0x2a4   : > { %1292 = vmatmul.mubr.msk.f32.vlgmr.msra.gmra.mrb[0].mxu1 %vm650_vm6, %v804_v52 }
 0x377   : > { %v878_v57 = vpop.f32.mrb[0].mxu1 }
 0x378   : > { %v1350_v58 = vadd.f32 %v1207_v56, %v878_v57  ;;  %v1293_v59 = vpop.f32.mrb[1].mxu1 }
 0x37a   : > { %v885_v60 = vmax.f32 %v1350_v58, 0.0 }
 0x37c   : > { %886 = vst.msk [vmem:[#allocation3 + $0x1] sm:$0xf] %vm629_vm4, %v885_v60 }
 0x383   : > { %v895_v0 = vld [vmem:[#allocation3] sm:$0xf] }
 0x384   : > { %1299 = vmatmul.mubr.msk.f32.vlgmr.msra.gmra.mrb[2].mxu0 %vm439_vm1, %v895_v0  ;;  %v972_v6 = vld [vmem:[#allocation3 + $0x1] sm:$0xf] }
 0x385   : > { %1344 = vmatpush3.bf16.msra.mxu0 %v1343_v63  ;;  %1305 = vmatprep.mubr.msk.f32.mxu0 %vm1387_vm0, %v1388_v5  ;;  %v1049_v7 = vld [vmem:[#allocation3 + $0x2] sm:$0xf] }
 0x386   : > { %1345 = vmatprep.subr.bf16.mxu0 %v1386_v3  ;;  %v1211_v3 = vld [vmem:[%s1616_s11] ss:$0 sm:$0xff] }
 0x38c   : > { %1306 = vmatmul.mubr.msk.f32.vlgmr.msra.gmra.mrb[2].mxu0 %vm439_vm1, %v972_v6 }
 0x38d   : > { %1347 = vmatpush3.bf16.msra.mxu0 %v1346_v4  ;;  %1312 = vmatprep.mubr.msk.f32.mxu0 %vm1387_vm0, %v1388_v5 }
 0x394   : > { %1313 = vmatmul.mubr.msk.f32.vlgmr.msra.gmra.mrb[2].mxu0 %vm439_vm1, %v1049_v7 }
 0x467   : > { %v1121_v8 = vpop.f32.mrb[2].mxu0 }
 0x468   : > { %v1351_v9 = vadd.f32 %v1211_v3, %v1121_v8  ;;  %v1314_v10 = vpop.f32.mrb[3].mxu0 }
 0x46a   : > { %v1126_v11 = vmax.f32 %v1351_v9, 0.0 }
 0x46c   : > { %1127 = vst.msk [vmem:[%s427_s19] sm:$0xf] %vm629_vm4, %v1126_v11 }
 0x46d PF: > { %s24_s23 = sadd.s32 1, %s1384_s23  }
 0x46e   : > { %p21_p4 = scmp.ge.s32.totalorder %s24_s23, 4  }
 0x470   :  { %23 = sbr.rel (!%p21_p4) target bundleno = 3 (0x3), region = 101 }

// kernel: beliefppg_forward.25
= control target key start
LH: loop header
LB: loop body
LE: loop exit
PB: predicated region body
PF: predicated region fallthrough
CT: control target
= control target key end

     0   :  { %s1412_s23 = smov 0   ;;  %s1541_s0 = inlined_call_operand.vmem [shape: f32[2,8,16], index: 0, kind: input, shape index: {}]   ;;  %s1542_s1 = inlined_call_operand.vmem [shape: f32[2,8,8], index: 1, kind: input, shape index: {}]   ;;  %s1543_s2 = inlined_call_operand.vmem [shape: f32[8,4], index: 2, kind: input, shape index: {}]   ;;  %s1544_s3 = inlined_call_operand.vmem [shape: f32[1,4], index: 3, kind: input, shape index: {}]   ;;  %s1545_s4 = inlined_call_operand.vmem [shape: f32[16,4], index: 4, kind: input, shape index: {}]   ;;  %s1546_s5 = inlined_call_operand.vmem [shape: f32[1,4], index: 5, kind: input, shape index: {}]   ;;  %s1547_s6 = inlined_call_operand.vmem [shape: f32[1,4], index: 6, kind: input, shape index: {}]   ;;  %s1548_s7 = inlined_call_operand.<no memory space> [shape: f32[1,1], index: 7, kind: input, shape index: {}]   ;;  %s1549_s8 = inlined_call_operand.vmem [shape: f32[72,8], index: 8, kind: input, shape index: {}]   ;;  %s1550_s9 = inlined_call_operand.vmem [shape: f32[1,8], index: 9, kind: input, shape index: {}]   ;;  %s1551_s10 = inlined_call_operand.vmem [shape: f32[24,8], index: 10, kind: input, shape index: {}]   ;;  %s1552_s11 = inlined_call_operand.vmem [shape: f32[1,8], index: 11, kind: input, shape index: {}]   ;;  %s1553_s12 = inlined_call_operand.vmem [shape: f32[2,8,8], index: 12, kind: output, shape index: {}]  }
   0x1   :  { %v17_v0 = vstv %s1548_s7 }
   0x2   :  { %18 = vst [vmem:[#allocation4] sm:$0x1] %v17_v0 }
   0x3 LB: > { %s1188_s24 = sadd.s32 4294967295, %s1337_s23   ;;  %p1192_p0 = scmp.ge.s32.totalorder %s1337_s23, 1  ;;  %s1337_s23 = sphi %s1412_s23, %s24_s23  }
   0x4   : > { %p372_p1 = scmp.lt.s32.totalorder %s1337_s23, 3 }
   0x6   : > { %p373_p2 = pnand %p1192_p0, %p372_p1 }
   0x7   : > { %v430_v1 = vld [vmem:[%s1543_s2] sm:$0xff] (!%p373_p2)  ;;  %p416_p3 = scmp.lt.s32.totalorder (!%p373_p2), %s1188_s24, 1  ;;  %vm438_vm0 = vcmask (!%p373_p2), 64512   ;;  %v1339_v2 = vmov (!%p373_p2), 0.0   ;;  %vm1340_vm1 = vmmov (!%p373_p2), 0   ;;  %v513_v4 = vld [vmem:[%s1545_s4 + $0x8] sm:$0xff] (!%p373_p2) }
   0x8   : > { %376 = sbr.rel (%p373_p2) target bundleno = 1133 (0x46d), region = 68  ;;  %1235 = vmatprep.subr.mxu0 (!%p373_p2), %v1339_v2  ;;  %1237 = vmatprep.mubr.msk.f32.mxu0 (!%p373_p2), %vm1340_vm1, %v1339_v2  ;;  %880 = vst.msk [vmem:[#allocation3] sm:$0xff] (!%p373_p2), %vm438_vm0, %v1339_v2  ;;  %v512_v3 = vld [vmem:[%s1545_s4] sm:$0xff] (!%p373_p2)  ;;  %v1341_v5 = vmov (!%p373_p2), 0.0|0.0   ;;  %vm521_vm2 = vcmask (!%p373_p2), 130048   ;;  %vm605_vm3 = vcmask (!%p373_p2), 31744  }
   0x9   : > { %1236 = vmatpush3.msra.mxu0 (!%p373_p2), %v430_v1  ;;  %1292 = vmatprep.subr.bf16.mxu1 (!%p373_p2), %v1341_v5  ;;  %v1290_v6 = vpack.c.bf16 (!%p373_p2), %v513_v4, %v512_v3  ;;  %v1196_v9 = vld [vmem:[%s1544_s3] ss:$0 sm:$0xff] (!%p373_p2)  ;;  %v1342_v19 = vmov (!%p373_p2), 0   ;;  %vm627_vm4 = vcmask (!%p373_p2), 195584   ;;  %vm629_vm5 = vcmask (!%p373_p2), 189440   ;;  %v648_v28 = vld [vmem:[%s1549_s8 + $0x8] sm:$0xff] (!%p373_p2) }
   0xa   : > { %1289 = vmatprep.subr.bf16.mxu0 (!%p373_p2), %v1341_v5  ;;  %1253 = vmatprep.mubr.msk.f32.mxu1 (!%p373_p2), %vm1340_vm1, %v1339_v2  ;;  %v1198_v10 = vld [vmem:[%s1546_s5] ss:$0 sm:$0xff] (!%p373_p2)  ;;  %628 = vst.msk [vmem:[#allocation2] sm:$0xff] (!%p373_p2), %vm627_vm4, %v1339_v2  ;;  %v649_v30 = vld [vmem:[%s1549_s8 + $0x10] sm:$0xff] (!%p373_p2)  ;;  %s1343_s14 = smov (!%p373_p2), 16   ;;  %vm636_vm6 = vcmask (!%p373_p2), 195712  }
   0xb   : > { %v1301_v11 = vadd.f32 (!%p373_p2), %v1198_v10, %v1196_v9  ;;  %v1200_v15 = vld [vmem:[%s1547_s6] ss:$0 sm:$0xff] (!%p373_p2)  ;;  %1328 = vset.pattern.permute.xlu0 (!%p373_p2), %v1342_v19  ;;  %630 = vst.msk [vmem:[#allocation2 + $0x8] sm:$0x3] (!%p373_p2), %vm629_vm5, %v1339_v2  ;;  %v725_v34 = vld [vmem:[%s1549_s8 + $0x18] sm:$0xff] (!%p373_p2)  ;;  %v727_v38 = vld [vmem:[%s1549_s8 + $0x28] sm:$0xff] (!%p373_p2) }
   0xc   : > { %v1201_v20 = vld [vmem:[#allocation4] ss:$0 sm:$0xff] (!%p373_p2)  ;;  %v803_v39 = vld [vmem:[%s1549_s8 + $0x30] sm:$0xff] (!%p373_p2)  ;;  %v804_v40 = vld [vmem:[%s1549_s8 + $0x38] sm:$0xff] (!%p373_p2)  ;;  %vm881_vm7 = vcmask (!%p373_p2), 58368  }
   0xd   : > { %v647_v27 = vld [vmem:[%s1549_s8] sm:$0xff] (!%p373_p2)  ;;  %v1299_v41 = vpack.c.bf16 (!%p373_p2), %v804_v40, %v803_v39  ;;  %882 = vst.msk [vmem:[#allocation3 + $0x8] sm:$0x3] (!%p373_p2), %vm881_vm7, %v1339_v2  ;;  %v970_v51 = vld [vmem:[%s1551_s10 + $0x8] sm:$0xff] (!%p373_p2)  ;;  %v1046_v53 = vld [vmem:[%s1551_s10 + $0x10] sm:$0xff] (!%p373_p2) }
   0xe   : > { %v1293_v29 = vpack.c.bf16 (!%p373_p2), %v648_v28, %v647_v27  ;;  %v726_v35 = vld [vmem:[%s1549_s8 + $0x20] sm:$0xff] (!%p373_p2) }
   0xf   : > { %s1555_s24 = smov (!%p416_p3, %s1188_s24), 1  ;;  %v1296_v36 = vpack.c.bf16 %v726_v35, %v725_v34  ;;  %v805_v43 = vld [vmem:[%s1549_s8 + $0x40] sm:$0xff] }
  0x10   : > { %s1438_s30 = sshll.u32 %s1555_s24, 3  ;;  %1294 = vmatpush3.bf16.msra.mxu1 %v1293_v29  ;;  %v894_v45 = vld [vmem:[%s1551_s10] sm:$0xff] }
  0x11   : > { %s423_s15 = scalar_lea.vmem %s1542_s1, %s1438_s30  ;;  %s419_s18 = scalar_lea.vmem %s1541_s0, %s1438_s30  ;;  %1251 = vmatprep.subr.mxu1 %v1339_v2  ;;  %v1202_v46 = vld [vmem:[%s1550_s9] ss:$0 sm:$0xff] }
  0x12   : > { %v429_v7 = vld [vmem:[%s423_s15] sm:$0xff]  ;;  %s427_s22 = scalar_lea.vmem %s1553_s12, %s1438_s30 }
  0x13   : > { %1238 = vmatmul.mubr.msk.f32.vlgmr.msra.gmra.mrb[0].mxu0 %vm438_vm0, %v429_v7  ;;  %v428_v8 = vld [vmem:[%s419_s18] sm:$0xff] }
  0x14   : > { %1291 = vmatpush3.bf16.msra.mxu0 %v1290_v6  ;;  %1244 = vmatprep.mubr.msk.f32.mxu0 %vm1340_vm1, %v1339_v2  ;;  %631 = vst.msk [vmem:[#allocation2 + $0x1] sm:$0xff] %vm521_vm2, %v428_v8  ;;  %v1206_v56 = vld [vmem:[%s1552_s11] ss:$0 sm:$0xff] }
  0x15   : > { %1274 = vmatprep.subr.mxu0 %v1339_v2  ;;  %1252 = vmatpush3.msra.mxu1 %v649_v30 }
  0x16   : > { %1295 = vmatprep.subr.bf16.mxu1 %v1341_v5 }
  0x1b   : > { %1245 = vmatmul.mubr.msk.f32.vlgmr.msra.gmra.mrb[0].mxu0 %vm521_vm2, %v428_v8 }
  0x1c   : > { %1276 = vmatprep.mubr.msk.f32.mxu0 %vm1340_vm1, %v1339_v2  ;;  %1275 = vmatpush3.msra.mxu0 %v894_v45 }
  0x1d   : > { %1279 = vmatprep.subr.mxu0 %v1339_v2 }
  0xee   : > { %v591_v12 = vpop.f32.mrb[0].mxu0 }
  0xef   : > { %v1302_v13 = vadd.f32 %v1301_v11, %v591_v12  ;;  %v1246_v14 = vpop.f32.mrb[1].mxu0 }
  0xf1   : > { %v596_v16 = vmax.f32 %v1302_v13, 0.0 }
  0xf3   : > { %v604_v17 = vmul.f32 %v1200_v15, %v596_v16 }
  0xf5   : > { %v606_v18 = vsel %vm605_vm3, %v604_v17, 0.0 }
  0xf6   : > { %607 = vadd.xlane.f32.xlu0 %v606_v18 }
 0x183   : > { %v608_v21 = vpop.xlane.xlu0 %607 }
 0x184   : > { %v616_v22 = vadd.f32 %v1201_v20, %v608_v21 }
 0x186   : > { %v617_v23 = vmul.f32 0.5, %v616_v22 }
 0x188   : > { %1329 = vtanh.f32 %v617_v23 }
 0x192   : > { %v1330_v24 = vpop.eup %1329 }
 0x193   : > { %v619_v25 = vadd.f32 1.0, %v1330_v24 }
 0x195   : > { %v620_v26 = vmul.f32 0.5, %v619_v25 }
 0x197   : > { %623 = vperm.xlu0 %1328, %v620_v26  }
 0x216   : > { %v624_v31 = vpop.permute.xlu0 %623 }
 0x217   : > { %v626_v32 = vmul.f32 %v624_v31, %v429_v7 }
 0x219   : > { %633 = vrot.lane.b32.xlu1 %v626_v32, %s1343_s14 }
 0x28b   : > { %v634_v33 = vpop.permute.xlu1 %633 }
 0x28c   : > { %637 = vst.msk [vmem:[#allocation2 + $0x1] sm:$0xff] %vm636_vm6, %v634_v33 }
 0x293   : > { %v646_v37 = vld [vmem:[#allocation2] sm:$0xff] }
 0x294   : > { %1254 = vmatmul.mubr.msk.f32.vlgmr.msra.gmra.mrb[0].mxu1 %vm627_vm4, %v646_v37  ;;  %v724_v42 = vld [vmem:[#allocation2 + $0x1] sm:$0xff] }
 0x295   : > { %1297 = vmatpush3.bf16.msra.mxu1 %v1296_v36  ;;  %1262 = vmatprep.mubr.msk.f32.mxu1 %vm1340_vm1, %v1339_v2  ;;  %v802_v44 = vld [vmem:[#allocation2 + $0x2] sm:$0xff] }
 0x296   : > { %1260 = vmatprep.subr.mxu1 %v1339_v2 }
 0x299   : > { %1261 = vmatpush3.msra.mxu1 %v727_v38 }
 0x29a   : > { %1298 = vmatprep.subr.bf16.mxu1 %v1341_v5 }
 0x29c   : > { %1263 = vmatmul.mubr.msk.f32.vlgmr.msra.gmra.mrb[0].mxu1 %vm627_vm4, %v724_v42 }
 0x29d   : > { %1300 = vmatpush3.bf16.msra.mxu1 %v1299_v41  ;;  %1271 = vmatprep.mubr.msk.f32.mxu1 %vm1340_vm1, %v1339_v2 }
 0x29e   : > { %1269 = vmatprep.subr.mxu1 %v1339_v2 }
 0x2a1   : > { %1270 = vmatpush3.msra.mxu1 %v805_v43 }
 0x2a4   : > { %1272 = vmatmul.mubr.msk.f32.vlgmr.msra.gmra.mrb[0].mxu1 %vm627_vm4, %v802_v44 }
 0x377   : > { %v875_v47 = vpop.f32.mrb[0].mxu1 }
 0x378   : > { %v1303_v48 = vadd.f32 %v1202_v46, %v875_v47  ;;  %v1273_v49 = vpop.f32.mrb[1].mxu1 }
 0x37a   : > { %v883_v50 = vmax.f32 %v1303_v48, 0.0 }
 0x37c   : > { %884 = vst.msk [vmem:[#allocation3 + $0x1] sm:$0xff] %vm438_vm0, %v883_v50 }
 0x383   : > { %v893_v52 = vld [vmem:[#allocation3] sm:$0xff] }
 0x384   : > { %1277 = vmatmul.mubr.msk.f32.vlgmr.msra.gmra.mrb[2].mxu0 %vm438_vm0, %v893_v52  ;;  %v969_v54 = vld [vmem:[#allocation3 + $0x1] sm:$0xff] }
 0x385   : > { %1280 = vmatpush3.msra.mxu0 %v970_v51  ;;  %1281 = vmatprep.mubr.msk.f32.mxu0 %vm1340_vm1, %v1339_v2  ;;  %v1045_v55 = vld [vmem:[#allocation3 + $0x2] sm:$0xff] }
 0x386   : > { %1284 = vmatprep.subr.mxu0 %v1339_v2 }
 0x38c   : > { %1282 = vmatmul.mubr.msk.f32.vlgmr.msra.gmra.mrb[2].mxu0 %vm438_vm0, %v969_v54 }
 0x38d   : > { %1285 = vmatpush3.msra.mxu0 %v1046_v53  ;;  %1286 = vmatprep.mubr.msk.f32.mxu0 %vm1340_vm1, %v1339_v2 }
 0x394   : > { %1287 = vmatmul.mubr.msk.f32.vlgmr.msra.gmra.mrb[2].mxu0 %vm438_vm0, %v1045_v55 }
 0x467   : > { %v1116_v57 = vpop.f32.mrb[2].mxu0 }
 0x468   : > { %v1304_v58 = vadd.f32 %v1206_v56, %v1116_v57  ;;  %v1288_v59 = vpop.f32.mrb[3].mxu0 }
 0x46a   : > { %v1121_v60 = vmax.f32 %v1304_v58, 0.0 }
 0x46c   : > { %1122 = vst.msk [vmem:[%s427_s22] sm:$0xff] %vm438_vm0, %v1121_v60 }
 0x46d PF: > { %s24_s23 = sadd.s32 1, %s1337_s23  }
 0x46e   : > { %p21_p4 = scmp.ge.s32.totalorder %s24_s23, 4  }
 0x470   :  { %23 = sbr.rel (!%p21_p4) target bundleno = 3 (0x3), region = 101 }

// kernel: beliefppg_forward.23
= control target key start
LH: loop header
LB: loop body
LE: loop exit
PB: predicated region body
PF: predicated region fallthrough
CT: control target
= control target key end

     0   :  { %v2713_v3 = vmov 0.0   ;;  %vm177_vm0 = vcmask 130048   ;;  %v253_v32 = vlaneseq  ;;  %vm102_vm1 = vcmask 523264   ;;  %s3360_s2 = inlined_call_operand.vmem [shape: f32[64,256], index: 2, kind: input, shape index: {}]   ;;  %s3361_s1 = inlined_call_operand.vmem [shape: f32[16,256], index: 1, kind: input, shape index: {}]   ;;  %s3362_s0 = inlined_call_operand.vmem [shape: f32[4,2,16], index: 0, kind: input, shape index: {}]   ;;  %s3363_s3 = inlined_call_operand.vmem [shape: f32[1,256], index: 3, kind: input, shape index: {}]   ;;  %s3364_s5 = inlined_call_operand.vmem [shape: f32[64,256], index: 5, kind: input, shape index: {}]   ;;  %s3365_s4 = inlined_call_operand.vmem [shape: f32[64,256], index: 4, kind: input, shape index: {}]   ;;  %s3366_s6 = inlined_call_operand.vmem [shape: f32[1,256], index: 6, kind: input, shape index: {}]   ;;  %s3367_s7 = inlined_call_operand.vmem [shape: f32[64,32], index: 7, kind: input, shape index: {}]   ;;  %s3368_s9 = inlined_call_operand.vmem [shape: f32[2,2,16], index: 9, kind: input, shape index: {}]   ;;  %s3369_s10 = inlined_call_operand.vmem [shape: f32[32,16], index: 10, kind: input, shape index: {}]   ;;  %s3370_s12 = inlined_call_operand.vmem [shape: f32[32,16], index: 12, kind: input, shape index: {}]   ;;  %s3371_s8 = inlined_call_operand.vmem [shape: f32[1,32], index: 8, kind: input, shape index: {}]   ;;  %s3372_s11 = inlined_call_operand.vmem [shape: f32[1,16], index: 11, kind: input, shape index: {}]   ;;  %s3373_s13 = inlined_call_operand.vmem [shape: f32[1,16], index: 13, kind: input, shape index: {}]   ;;  %s3374_s14 = inlined_call_operand.vmem [shape: f32[2,2,16], index: 14, kind: output, shape index: {}]  }
   0x1   :  { %v52_v0 = vld [vmem:[%s3360_s2 + $0x8] sm:$0xff]  ;;  %v54_v1 = vld [vmem:[%s3360_s2 + $0x18] sm:$0xff]  ;;  %v51_v2 = vld [vmem:[%s3360_s2] sm:$0xff]  ;;  %170 = vmatprep.mubr.f32.mxu0 %v2713_v3  ;;  %347 = vmatprep.mubr.f32.mxu1 %v2713_v3  ;;  %vm2716_vm2 = vmmov 0   ;;  %vm1575_vm4 = vcmask 1040384   ;;  %vm1899_vm5 = vcmask 123904  }
   0x2   :  { %v2805_v4 = vpack.c.bf16 %v54_v1, %v52_v0  ;;  %v53_v5 = vld [vmem:[%s3360_s2 + $0x10] sm:$0xff]  ;;  %v56_v6 = vld [vmem:[%s3360_s2 + $0x28] sm:$0xff]  ;;  %v58_v7 = vld [vmem:[%s3360_s2 + $0x38] sm:$0xff]  ;;  %v2902_v33 = vshrl.u32 %v253_v32, 7 }
   0x3   :  { %v2816_v8 = vpack.c.bf16 %v53_v5, %v51_v2  ;;  %v2818_v9 = vpack.c.bf16 %v58_v7, %v56_v6  ;;  %v55_v10 = vld [vmem:[%s3360_s2 + $0x20] sm:$0xff]  ;;  %v57_v11 = vld [vmem:[%s3360_s2 + $0x30] sm:$0xff]  ;;  %v60_v12 = vld [vmem:[%s3360_s2 + $0x48] sm:$0xff] }
   0x4   :  { %2380 = vmatprep.subr.bf16.mxu0 %v2805_v4  ;;  %v62_v13 = vld [vmem:[%s3360_s2 + $0x58] sm:$0xff]  ;;  %v2834_v14 = vpack.c.bf16 %v57_v11, %v55_v10  ;;  %v59_v16 = vld [vmem:[%s3360_s2 + $0x40] sm:$0xff]  ;;  %v61_v17 = vld [vmem:[%s3360_s2 + $0x50] sm:$0xff]  ;;  %v255_v34 = vsub.s32 0, %v2902_v33  ;;  %v259_v37 = vsub.s32 1, %v2902_v33 }
   0x5   :  { %2382 = vmatpush1.bf16.msra.mxu0 %v2816_v8  ;;  %v2837_v15 = vpack.c.bf16 %v62_v13, %v60_v12  ;;  %v64_v18 = vld [vmem:[%s3360_s2 + $0x68] sm:$0xff]  ;;  %v66_v19 = vld [vmem:[%s3360_s2 + $0x78] sm:$0xff]  ;;  %v2852_v20 = vpack.c.bf16 %v61_v17, %v59_v16  ;;  %v63_v22 = vld [vmem:[%s3360_s2 + $0x60] sm:$0xff] }
   0x6   :  { %2384 = vmatprep.subr.bf16.mxu0 %v2818_v9  ;;  %v2855_v21 = vpack.c.bf16 %v66_v19, %v64_v18  ;;  %v65_v23 = vld [vmem:[%s3360_s2 + $0x70] sm:$0xff]  ;;  %v48_v24 = vld [vmem:[%s3361_s1 + $0x8] sm:$0xff]  ;;  %v50_v25 = vld [vmem:[%s3361_s1 + $0x18] sm:$0xff] }
   0x7   :  { %v2870_v26 = vpack.c.bf16 %v65_v23, %v63_v22  ;;  %v2873_v27 = vpack.c.bf16 %v50_v25, %v48_v24  ;;  %v47_v28 = vld [vmem:[%s3361_s1] sm:$0xff]  ;;  %v49_v29 = vld [vmem:[%s3361_s1 + $0x10] sm:$0xff]  ;;  %v85_v49 = vld [vmem:[%s3364_s5 + $0x8] sm:$0xff] }
   0x8   :  { %v2882_v30 = vpack.c.bf16 %v49_v29, %v47_v28  ;;  %v101_v31 = vld [vmem:[%s3362_s0] sm:$0x3]  ;;  %v87_v50 = vld [vmem:[%s3364_s5 + $0x18] sm:$0xff]  ;;  %v86_v53 = vld [vmem:[%s3364_s5 + $0x10] sm:$0xff] }
   0x9   :  { %2386 = vmatpush1.bf16.msra.mxu0 %v2834_v14  ;;  %v67_v35 = vld [vmem:[%s3363_s3] sm:$0x3]  ;;  %s2714_s3 = smov 64   ;;  %v2935_v52 = vpack.c.bf16 %v87_v50, %v85_v49  ;;  %v89_v54 = vld [vmem:[%s3364_s5 + $0x28] sm:$0xff]  ;;  %v91_v55 = vld [vmem:[%s3364_s5 + $0x38] sm:$0xff] }
   0xa   :  { %2388 = vmatprep.subr.bf16.mxu0 %v2837_v15  ;;  %v2910_v36 = vrot.slane %v67_v35, %v255_v34  ;;  %v2916_v41 = vrot.slane %v67_v35, %v259_v37  ;;  %v84_v51 = vld [vmem:[%s3364_s5] sm:$0xff]  ;;  %v2948_v57 = vpack.c.bf16 %v91_v55, %v89_v54  ;;  %v90_v59 = vld [vmem:[%s3364_s5 + $0x30] sm:$0xff]  ;;  %v93_v60 = vld [vmem:[%s3364_s5 + $0x48] sm:$0xff] }
   0xb   :  { %v2946_v56 = vpack.c.bf16 %v86_v53, %v84_v51  ;;  %v88_v58 = vld [vmem:[%s3364_s5 + $0x20] sm:$0xff]  ;;  %2400 = vmatprep.subr.bf16.mxu1 %v2935_v52  ;;  %v95_v61 = vld [vmem:[%s3364_s5 + $0x58] sm:$0xff]  ;;  %v94_v1 = vld [vmem:[%s3364_s5 + $0x50] sm:$0xff] }
   0xc   :  { %v2964_v62 = vpack.c.bf16 %v90_v59, %v88_v58  ;;  %v2967_v63 = vpack.c.bf16 %v95_v61, %v93_v60  ;;  %v92_v0 = vld [vmem:[%s3364_s5 + $0x40] sm:$0xff]  ;;  %v97_v2 = vld [vmem:[%s3364_s5 + $0x68] sm:$0xff]  ;;  %v99_v5 = vld [vmem:[%s3364_s5 + $0x78] sm:$0xff] }
   0xd   :  { %2390 = vmatpush1.bf16.msra.mxu0 %v2852_v20  ;;  %2402 = vmatpush1.bf16.msra.mxu1 %v2946_v56  ;;  %v2982_v6 = vpack.c.bf16 %v94_v1, %v92_v0  ;;  %v2985_v7 = vpack.c.bf16 %v99_v5, %v97_v2  ;;  %v96_v10 = vld [vmem:[%s3364_s5 + $0x60] sm:$0xff]  ;;  %v98_v11 = vld [vmem:[%s3364_s5 + $0x70] sm:$0xff]  ;;  %v69_v12 = vld [vmem:[%s3365_s4 + $0x8] sm:$0xff] }
   0xe   :  { %2392 = vmatprep.subr.bf16.mxu0 %v2855_v21  ;;  %2404 = vmatprep.subr.bf16.mxu1 %v2948_v57  ;;  %v71_v13 = vld [vmem:[%s3365_s4 + $0x18] sm:$0xff]  ;;  %v3000_v16 = vpack.c.bf16 %v98_v11, %v96_v10  ;;  %v68_v18 = vld [vmem:[%s3365_s4] sm:$0xff]  ;;  %v70_v19 = vld [vmem:[%s3365_s4 + $0x10] sm:$0xff] }
   0xf   :  { %v3003_v17 = vpack.c.bf16 %v71_v13, %v69_v12  ;;  %v73_v22 = vld [vmem:[%s3365_s4 + $0x28] sm:$0xff]  ;;  %v75_v23 = vld [vmem:[%s3365_s4 + $0x38] sm:$0xff]  ;;  %v3018_v24 = vpack.c.bf16 %v70_v19, %v68_v18  ;;  %v72_v28 = vld [vmem:[%s3365_s4 + $0x20] sm:$0xff] }
  0x10   :  { %v3021_v25 = vpack.c.bf16 %v75_v23, %v73_v22  ;;  %v74_v29 = vld [vmem:[%s3365_s4 + $0x30] sm:$0xff]  ;;  %v79_v32 = vld [vmem:[%s3365_s4 + $0x58] sm:$0xff] }
  0x11   :  { %2394 = vmatpush1.bf16.msra.mxu0 %v2870_v26  ;;  %2406 = vmatpush1.bf16.msra.mxu1 %v2964_v62  ;;  %v3037_v35 = vpack.c.bf16 %v74_v29, %v72_v28  ;;  %v82_v49 = vld [vmem:[%s3365_s4 + $0x70] sm:$0xff] }
  0x12   :  { %2396 = vmatprep.subr.bf16.mxu0 %v2873_v27  ;;  %2408 = vmatprep.subr.bf16.mxu1 %v2967_v63 }
  0x14   :  { %171 = vmatmul.mubr.f32.vlgmr.msra.gmra.mrb[0].mxu0 %v2713_v3 }
  0x15   :  { %2398 = vmatpush1.bf16.msra.mxu0 %v2882_v30  ;;  %245 = vmatprep.mubr.f32.mxu0 %v2713_v3 }
  0x16   :  { %2432 = vmatprep.subr.bf16.mxu0 %v2805_v4  ;;  %2410 = vmatpush1.bf16.msra.mxu1 %v2982_v6 }
  0x17   :  { %2412 = vmatprep.subr.bf16.mxu1 %v2985_v7 }
  0x1a   :  { %2414 = vmatpush1.bf16.msra.mxu1 %v3000_v16 }
  0x1b   :  { %2416 = vmatprep.subr.bf16.mxu1 %v3003_v17 }
  0x1c   :  { %2238 = vmatmul.mubr.msk.f32.vlgmr.msra.gmra.mrb[0].mxu0 %vm177_vm0, %v101_v31  ;;  %v77_v31 = vld [vmem:[%s3365_s4 + $0x48] sm:$0xff] }
  0x1d   :  { %2434 = vmatpush1.bf16.msra.mxu0 %v2816_v8  ;;  %527 = vmatprep.mubr.f32.mxu0 %v2713_v3 }
  0x1e   :  { %2436 = vmatprep.subr.bf16.mxu0 %v2818_v9  ;;  %348 = vmatmul.mubr.f32.vlgmr.msra.gmra.mrb[0].mxu1 %v2713_v3 }
  0x1f   :  { %2418 = vmatpush1.bf16.msra.mxu1 %v3018_v24  ;;  %423 = vmatprep.mubr.f32.mxu1 %v2713_v3 }
  0x20   :  { %2420 = vmatprep.subr.bf16.mxu1 %v3021_v25 }
  0x21   :  { %2438 = vmatpush1.bf16.msra.mxu0 %v2834_v14 }
  0x22   :  { %2440 = vmatprep.subr.bf16.mxu0 %v2837_v15 }
  0x23   :  { %2422 = vmatpush1.bf16.msra.mxu1 %v3037_v35 }
  0x25   :  { %2442 = vmatpush1.bf16.msra.mxu0 %v2852_v20 }
  0x26   :  { %2444 = vmatprep.subr.bf16.mxu0 %v2855_v21 }
  0x29   :  { %2446 = vmatpush1.bf16.msra.mxu0 %v2870_v26 }
  0x2a   :  { %2448 = vmatprep.subr.bf16.mxu0 %v2873_v27 }
  0xef   :  { %v247_v38 = vpop.f32.mrb[0].mxu0 }
  0xf0   :  { %v263_v39 = vadd.f32 %v2910_v36, %v247_v38  ;;  %v249_v40 = vpop.f32.mrb[1].mxu0  ;;  %v3041_v38 = vpack.c.bf16 %v79_v32, %v77_v31 }
  0xf1   :  { %v2919_v43 = vadd.f32 %v2916_v41, %v249_v40  ;;  %v78_v40 = vld [vmem:[%s3365_s4 + $0x50] sm:$0xff] }
  0xf2   :  { %v265_v42 = vmul.f32 0.5, %v263_v39  ;;  %v76_v39 = vld [vmem:[%s3365_s4 + $0x40] sm:$0xff]  ;;  %2424 = vmatprep.subr.bf16.mxu1 %v3041_v38 }
  0xf3   :  { %v270_v51 = vmul.f32 0.5, %v2919_v43 }
  0xf4   :  { %2645 = vtanh.f32 %v265_v42  ;;  %v81_v42 = vld [vmem:[%s3365_s4 + $0x68] sm:$0xff] }
  0xf5   :  { %2647 = vtanh.f32 %v2919_v43  ;;  %v2240_v43 = vld [vmem:[%s3362_s0 + $0x2] sm:$0x3] }
  0xf6   :  { %2649 = vtanh.f32 %v270_v51 }
  0xfe   :  { %v2646_v44 = vpop.eup %2645 }
  0xff   :  { %v267_v45 = vadd.f32 1.0, %v2646_v44  ;;  %v2648_v47 = vpop.eup %2647  ;;  %v83_v44 = vld [vmem:[%s3365_s4 + $0x78] sm:$0xff] }
 0x100   :  { %v2650_v58 = vpop.eup %2649 }
 0x101   :  { %v2922_v46 = vmul.f32 0.5, %v267_v45  ;;  %v3056_v45 = vpack.c.bf16 %v78_v40, %v76_v39  ;;  %v272_v59 = vadd.f32 1.0, %v2650_v58 }
 0x103   :  { %v275_v48 = vmul.f32 %v2648_v47, %v2922_v46  ;;  %v3059_v47 = vpack.c.bf16 %v83_v44, %v81_v42  ;;  %2426 = vmatpush1.bf16.msra.mxu1 %v3056_v45  ;;  %v274_v53 = vmul.f32 0.0, %v2922_v46  ;;  %v273_v60 = vmul.f32 0.5, %v272_v59  ;;  %v100_v46 = vld [vmem:[%s3366_s6] sm:$0x3] }
 0x104   :  { %v3111_v2 = vrot.slane %v100_v46, %v255_v34  ;;  %v3116_v12 = vrot.slane %v100_v46, %v259_v37 }
 0x105   :  { %277 = vrot.lane.b32.xlu0 %v275_v48, %s2714_s3  ;;  %v80_v48 = vld [vmem:[%s3365_s4 + $0x60] sm:$0xff]  ;;  %2428 = vmatprep.subr.bf16.mxu1 %v3059_v47 }
 0x106   :  { %v3068_v50 = vpack.c.bf16 %v82_v49, %v80_v48 }
 0x108   :  { %2430 = vmatpush1.bf16.msra.mxu1 %v3068_v50 }
 0x109   :  { %2452 = vmatprep.subr.bf16.mxu1 %v2935_v52 }
 0x177   :  { %v278_v54 = vpop.permute.xlu0 %277 }
 0x178   :  { %v3075_v55 = vadd.f32 %v278_v54, %v274_v53 }
 0x17a   :  { %2651 = vtanh.f32 %v3075_v55 }
 0x184   :  { %v2652_v61 = vpop.eup %2651 }
 0x185   :  { %v282_v0 = vmul.f32 %v2652_v61, %v273_v60 }
 0x187   :  { %355 = vrot.lane.b32.xlu0 %v282_v0, %s2714_s3 }
 0x1f9   :  { %v356_v1 = vpop.permute.xlu0 %355 }
 0x1fa   :  { %2239 = vmatmul.mubr.msk.f32.vlgmr.msra.gmra.mrb[0].mxu1 %vm102_vm1, %v356_v1  ;;  %2241 = vmatmul.mubr.msk.f32.vlgmr.msra.gmra.mrb[2].mxu0 %vm102_vm1, %v356_v1 }
 0x1fb   :  { %2450 = vmatpush1.bf16.msra.mxu0 %v2882_v30  ;;  %601 = vmatprep.mubr.f32.mxu0 %v2713_v3 }
 0x1fc   :  { %2454 = vmatpush1.bf16.msra.mxu1 %v2946_v56  ;;  %2484 = vmatprep.subr.bf16.mxu0 %v2805_v4 }
 0x1fd   :  { %2456 = vmatprep.subr.bf16.mxu1 %v2948_v57  ;;  %697 = vmatprep.mubr.f32.mxu1 %v2713_v3 }
 0x200   :  { %2458 = vmatpush1.bf16.msra.mxu1 %v2964_v62 }
 0x201   :  { %2460 = vmatprep.subr.bf16.mxu1 %v2967_v63 }
 0x202   :  { %2242 = vmatmul.mubr.msk.f32.vlgmr.msra.gmra.mrb[2].mxu0 %vm177_vm0, %v2240_v43 }
 0x203   :  { %2486 = vmatpush1.bf16.msra.mxu0 %v2816_v8  ;;  %866 = vmatprep.mubr.f32.mxu0 %v2713_v3 }
 0x204   :  { %2462 = vmatpush1.bf16.msra.mxu1 %v2982_v6  ;;  %2488 = vmatprep.subr.bf16.mxu0 %v2818_v9 }
 0x205   :  { %2464 = vmatprep.subr.bf16.mxu1 %v2985_v7 }
 0x207   :  { %2490 = vmatpush1.bf16.msra.mxu0 %v2834_v14 }
 0x208   :  { %2466 = vmatpush1.bf16.msra.mxu1 %v3000_v16  ;;  %2492 = vmatprep.subr.bf16.mxu0 %v2837_v15 }
 0x209   :  { %2468 = vmatprep.subr.bf16.mxu1 %v3003_v17 }
 0x20b   :  { %2494 = vmatpush1.bf16.msra.mxu0 %v2852_v20 }
 0x20c   :  { %2496 = vmatprep.subr.bf16.mxu0 %v2855_v21 }
 0x20f   :  { %2498 = vmatpush1.bf16.msra.mxu0 %v2870_v26 }
 0x210   :  { %2500 = vmatprep.subr.bf16.mxu0 %v2873_v27 }
 0x2cd   :  { %v425_v5 = vpop.f32.mrb[0].mxu1 }
 0x2ce   :  { %v441_v10 = vadd.f32 %v3111_v2, %v425_v5  ;;  %v427_v11 = vpop.f32.mrb[1].mxu1 }
 0x2cf   :  { %v442_v18 = vadd.f32 %v3116_v12, %v427_v11 }
 0x2d0   :  { %v443_v13 = vmul.f32 0.5, %v441_v10 }
 0x2d1   :  { %v448_v49 = vmul.f32 0.5, %v442_v18 }
 0x2d2   :  { %2653 = vtanh.f32 %v443_v13 }
 0x2d3   :  { %2655 = vtanh.f32 %v442_v18 }
 0x2d5   :  { %v603_v19 = vpop.f32.mrb[2].mxu0 }
 0x2d6   :  { %v608_v22 = vadd.f32 %v603_v19, %v2910_v36  ;;  %v605_v23 = vpop.f32.mrb[3].mxu0 }
 0x2d7   :  { %v609_v34 = vadd.f32 %v605_v23, %v2916_v41  ;;  %v2245_v23 = vld [vmem:[%s3362_s0 + $0x4] sm:$0x3] }
 0x2d8   :  { %v610_v28 = vmul.f32 0.5, %v608_v22 }
 0x2d9   :  { %v615_v51 = vmul.f32 0.5, %v609_v34 }
 0x2da   :  { %2657 = vtanh.f32 %v610_v28 }
 0x2db   :  { %2659 = vtanh.f32 %v609_v34 }
 0x2dc   :  { %v2654_v29 = vpop.eup %2653  ;;  %2661 = vtanh.f32 %v448_v49 }
 0x2dd   :  { %v445_v31 = vadd.f32 1.0, %v2654_v29  ;;  %v2656_v33 = vpop.eup %2655  ;;  %2663 = vtanh.f32 %v615_v51 }
 0x2df   :  { %v446_v32 = vmul.f32 0.5, %v445_v31 }
 0x2e1   :  { %v453_v37 = vmul.f32 %v2656_v33, %v446_v32  ;;  %v452_v53 = vmul.f32 0.0, %v446_v32 }
 0x2e3   :  { %455 = vrot.lane.b32.xlu1 %v453_v37, %s2714_s3 }
 0x2e4   :  { %v2658_v39 = vpop.eup %2657 }
 0x2e5   :  { %v612_v40 = vadd.f32 1.0, %v2658_v39  ;;  %v2660_v44 = vpop.eup %2659 }
 0x2e6   :  { %v2662_v59 = vpop.eup %2661 }
 0x2e7   :  { %v613_v42 = vmul.f32 0.5, %v612_v40  ;;  %v450_v61 = vadd.f32 1.0, %v2662_v59  ;;  %v2664_v43 = vpop.eup %2663 }
 0x2e8   :  { %v617_v11 = vadd.f32 1.0, %v2664_v43 }
 0x2e9   :  { %v620_v48 = vmul.f32 %v2660_v44, %v613_v42  ;;  %v619_v60 = vmul.f32 %v613_v42, %v3075_v55  ;;  %v451_v46 = vmul.f32 0.5, %v450_v61 }
 0x2ea   :  { %v618_v13 = vmul.f32 0.5, %v617_v11 }
 0x2eb   :  { %622 = vrot.lane.b32.xlu1 %v620_v48, %s2714_s3 }
 0x355   :  { %v456_v54 = vpop.permute.xlu1 %455 }
 0x356   :  { %v3123_v58 = vadd.f32 %v456_v54, %v452_v53 }
 0x358   :  { %2665 = vtanh.f32 %v3123_v58 }
 0x35d   :  { %v623_v0 = vpop.permute.xlu1 %622 }
 0x35e   :  { %v3127_v1 = vadd.f32 %v623_v0, %v619_v60 }
 0x360   :  { %2667 = vtanh.f32 %v3127_v1 }
 0x362   :  { %v2666_v5 = vpop.eup %2665 }
 0x363   :  { %v460_v10 = vmul.f32 %v2666_v5, %v451_v46 }
 0x365   :  { %629 = vrot.lane.b32.xlu0 %v460_v10, %s2714_s3 }
 0x36a   :  { %v2668_v18 = vpop.eup %2667 }
 0x36b   :  { %v627_v19 = vmul.f32 %v2668_v18, %v618_v13 }
 0x36d   :  { %705 = vrot.lane.b32.xlu1 %v627_v19, %s2714_s3 }
 0x3d7   :  { %v630_v22 = vpop.permute.xlu0 %629 }
 0x3d8   :  { %2243 = vmatmul.mubr.msk.f32.vlgmr.msra.gmra.mrb[2].mxu1 %vm102_vm1, %v630_v22 }
 0x3d9   :  { %2470 = vmatpush1.bf16.msra.mxu1 %v3018_v24  ;;  %773 = vmatprep.mubr.f32.mxu1 %v2713_v3 }
 0x3da   :  { %2472 = vmatprep.subr.bf16.mxu1 %v3021_v25 }
 0x3dd   :  { %2474 = vmatpush1.bf16.msra.mxu1 %v3037_v35 }
 0x3de   :  { %2476 = vmatprep.subr.bf16.mxu1 %v3041_v38 }
 0x3df   :  { %v706_v55 = vpop.permute.xlu1 %705 }
 0x3e0   :  { %2246 = vmatmul.mubr.msk.f32.vlgmr.msra.gmra.mrb[4].mxu0 %vm102_vm1, %v706_v55 }
 0x3e1   :  { %2478 = vmatpush1.bf16.msra.mxu1 %v3056_v45  ;;  %2502 = vmatpush1.bf16.msra.mxu0 %v2882_v30 }
 0x3e2   :  { %2480 = vmatprep.subr.bf16.mxu1 %v3059_v47  ;;  %940 = vmatprep.mubr.f32.mxu0 %v2713_v3 }
 0x3e3   :  { %2504 = vmatprep.subr.bf16.mxu0 %v2935_v52 }
 0x3e5   :  { %2482 = vmatpush1.bf16.msra.mxu1 %v3068_v50 }
 0x3e6   :  { %2536 = vmatprep.subr.bf16.mxu1 %v2805_v4 }
 0x3e8   :  { %2244 = vmatmul.mubr.msk.f32.vlgmr.msra.gmra.mrb[2].mxu1 %vm102_vm1, %v706_v55  ;;  %2247 = vmatmul.mubr.msk.f32.vlgmr.msra.gmra.mrb[4].mxu0 %vm177_vm0, %v2245_v23  ;;  %v2250_v55 = vld [vmem:[%s3362_s0 + $0x6] sm:$0x3] }
 0x3e9   :  { %2506 = vmatpush1.bf16.msra.mxu0 %v2946_v56  ;;  %2538 = vmatpush1.bf16.msra.mxu1 %v2816_v8 }
 0x3ea   :  { %2508 = vmatprep.subr.bf16.mxu0 %v2948_v57  ;;  %2540 = vmatprep.subr.bf16.mxu1 %v2818_v9 }
 0x3eb   :  { %1036 = vmatprep.mubr.f32.mxu0 %v2713_v3  ;;  %1205 = vmatprep.mubr.f32.mxu1 %v2713_v3 }
 0x3ed   :  { %2510 = vmatpush1.bf16.msra.mxu0 %v2964_v62  ;;  %2542 = vmatpush1.bf16.msra.mxu1 %v2834_v14 }
 0x3ee   :  { %2512 = vmatprep.subr.bf16.mxu0 %v2967_v63  ;;  %2544 = vmatprep.subr.bf16.mxu1 %v2837_v15 }
 0x3f1   :  { %2514 = vmatpush1.bf16.msra.mxu0 %v2982_v6  ;;  %2546 = vmatpush1.bf16.msra.mxu1 %v2852_v20 }
 0x3f2   :  { %2516 = vmatprep.subr.bf16.mxu0 %v2985_v7  ;;  %2548 = vmatprep.subr.bf16.mxu1 %v2855_v21 }
 0x3f5   :  { %2518 = vmatpush1.bf16.msra.mxu0 %v3000_v16  ;;  %2550 = vmatpush1.bf16.msra.mxu1 %v2870_v26 }
 0x3f6   :  { %2520 = vmatprep.subr.bf16.mxu0 %v3003_v17  ;;  %2552 = vmatprep.subr.bf16.mxu1 %v2873_v27 }
 0x4bb   :  { %v775_v4 = vpop.f32.mrb[2].mxu1  ;;  %v942_v8 = vpop.f32.mrb[4].mxu0 }
 0x4bc   :  { %v780_v9 = vadd.f32 %v775_v4, %v3111_v2  ;;  %v777_v14 = vpop.f32.mrb[3].mxu1  ;;  %v947_v15 = vadd.f32 %v942_v8, %v2910_v36  ;;  %v944_v20 = vpop.f32.mrb[5].mxu0 }
 0x4bd   :  { %v781_v21 = vadd.f32 %v777_v14, %v3116_v12  ;;  %v948_v26 = vadd.f32 %v944_v20, %v2916_v41 }
 0x4be   :  { %v782_v28 = vmul.f32 0.5, %v780_v9  ;;  %v949_v34 = vmul.f32 0.5, %v947_v15 }
 0x4bf   :  { %v787_v48 = vmul.f32 0.5, %v781_v21  ;;  %v954_v49 = vmul.f32 0.5, %v948_v26 }
 0x4c0   :  { %2669 = vtanh.f32 %v782_v28 }
 0x4c1   :  { %2671 = vtanh.f32 %v949_v34 }
 0x4c2   :  { %2673 = vtanh.f32 %v781_v21 }
 0x4c3   :  { %2675 = vtanh.f32 %v948_v26 }
 0x4c4   :  { %2677 = vtanh.f32 %v787_v48 }
 0x4c5   :  { %2679 = vtanh.f32 %v954_v49 }
 0x4ca   :  { %v2670_v29 = vpop.eup %2669 }
 0x4cb   :  { %v784_v27 = vadd.f32 1.0, %v2670_v29  ;;  %v2672_v31 = vpop.eup %2671 }
 0x4cc   :  { %v951_v33 = vadd.f32 1.0, %v2672_v31  ;;  %v2674_v37 = vpop.eup %2673 }
 0x4cd   :  { %v785_v32 = vmul.f32 0.5, %v784_v27  ;;  %v2676_v42 = vpop.eup %2675 }
 0x4ce   :  { %v952_v39 = vmul.f32 0.5, %v951_v33  ;;  %v2678_v0 = vpop.eup %2677 }
 0x4cf   :  { %v792_v40 = vmul.f32 %v2674_v37, %v785_v32  ;;  %v791_v51 = vmul.f32 %v785_v32, %v3123_v58  ;;  %v2680_v43 = vpop.eup %2679  ;;  %v789_v46 = vadd.f32 1.0, %v2678_v0 }
 0x4d0   :  { %v959_v44 = vmul.f32 %v2676_v42, %v952_v39  ;;  %v958_v59 = vmul.f32 %v952_v39, %v3127_v1  ;;  %v956_v5 = vadd.f32 1.0, %v2680_v43 }
 0x4d1   :  { %794 = vrot.lane.b32.xlu0 %v792_v40, %s2714_s3  ;;  %v790_v10 = vmul.f32 0.5, %v789_v46 }
 0x4d2   :  { %961 = vrot.lane.b32.xlu1 %v959_v44, %s2714_s3  ;;  %v957_v58 = vmul.f32 0.5, %v956_v5 }
 0x543   :  { %v795_v53 = vpop.permute.xlu0 %794 }
 0x544   :  { %v3176_v54 = vadd.f32 %v795_v53, %v791_v51  ;;  %v962_v60 = vpop.permute.xlu1 %961 }
 0x545   :  { %v3180_v61 = vadd.f32 %v962_v60, %v958_v59 }
 0x546   :  { %2681 = vtanh.f32 %v3176_v54 }
 0x547   :  { %2683 = vtanh.f32 %v3180_v61 }
 0x550   :  { %v2682_v11 = vpop.eup %2681 }
 0x551   :  { %v799_v13 = vmul.f32 %v2682_v11, %v790_v10  ;;  %v2684_v18 = vpop.eup %2683  ;;  %v1481_v11 = vld [vmem:[%s3367_s7 + $0x18] sm:$0xff] }
 0x552   :  { %v966_v19 = vmul.f32 %v2684_v18, %v957_v58  ;;  %v1482_v58 = vld [vmem:[%s3367_s7 + $0x20] sm:$0xff]  ;;  %v1483_v18 = vld [vmem:[%s3367_s7 + $0x28] sm:$0xff] }
 0x553   :  { %968 = vrot.lane.b32.xlu0 %v799_v13, %s2714_s3 }
 0x554   :  { %1044 = vrot.lane.b32.xlu1 %v966_v19, %s2714_s3  ;;  %v2594_v19 = vpack.c.bf16 %v1483_v18, %v1482_v58 }
 0x5c5   :  { %v969_v1 = vpop.permute.xlu0 %968 }
 0x5c6   :  { %2248 = vmatmul.mubr.msk.f32.vlgmr.msra.gmra.mrb[6].mxu0 %vm102_vm1, %v969_v1  ;;  %v1045_v22 = vpop.permute.xlu1 %1044  ;;  %v1484_v1 = vld [vmem:[%s3367_s7 + $0x30] sm:$0xff] }
 0x5c7   :  { %2522 = vmatpush1.bf16.msra.mxu0 %v3018_v24  ;;  %1112 = vmatprep.mubr.f32.mxu0 %v2713_v3 }
 0x5c8   :  { %2251 = vmatmul.mubr.msk.f32.vlgmr.msra.gmra.mrb[4].mxu1 %vm102_vm1, %v1045_v22  ;;  %2524 = vmatprep.subr.bf16.mxu0 %v3021_v25 }
 0x5c9   :  { %2554 = vmatpush1.bf16.msra.mxu1 %v2882_v30  ;;  %1279 = vmatprep.mubr.f32.mxu1 %v2713_v3 }
 0x5ca   :  { %2556 = vmatprep.subr.bf16.mxu1 %v2935_v52 }
 0x5cb   :  { %2526 = vmatpush1.bf16.msra.mxu0 %v3037_v35 }
 0x5cc   :  { %2528 = vmatprep.subr.bf16.mxu0 %v3041_v38 }
 0x5cf   :  { %2530 = vmatpush1.bf16.msra.mxu0 %v3056_v45 }
 0x5d0   :  { %2252 = vmatmul.mubr.msk.f32.vlgmr.msra.gmra.mrb[4].mxu1 %vm177_vm0, %v2250_v55  ;;  %2532 = vmatprep.subr.bf16.mxu0 %v3059_v47 }
 0x5d1   :  { %2558 = vmatpush1.bf16.msra.mxu1 %v2946_v56  ;;  %1375 = vmatprep.mubr.f32.mxu1 %v2713_v3 }
 0x5d2   :  { %2560 = vmatprep.subr.bf16.mxu1 %v2948_v57 }
 0x5d3   :  { %2534 = vmatpush1.bf16.msra.mxu0 %v3068_v50 }
 0x5d5   :  { %2562 = vmatpush1.bf16.msra.mxu1 %v2964_v62 }
 0x5d6   :  { %2249 = vmatmul.mubr.msk.f32.vlgmr.msra.gmra.mrb[6].mxu0 %vm102_vm1, %v1045_v22  ;;  %2564 = vmatprep.subr.bf16.mxu1 %v2967_v63  ;;  %v1485_v22 = vld [vmem:[%s3367_s7 + $0x38] sm:$0xff] }
 0x5d7   :  { %2320 = vmatprep.mubr.msk.f32.mxu0 %vm2716_vm2, %v2713_v3  ;;  %v2597_v55 = vpack.c.bf16 %v1485_v22, %v1484_v1 }
 0x5d9   :  { %2566 = vmatpush1.bf16.msra.mxu1 %v2982_v6 }
 0x5da   :  { %2568 = vmatprep.subr.bf16.mxu1 %v2985_v7 }
 0x5dd   :  { %2570 = vmatpush1.bf16.msra.mxu1 %v3000_v16 }
 0x5de   :  { %2572 = vmatprep.subr.bf16.mxu1 %v3003_v17 }
 0x6a3   :  { %v1281_v30 = vpop.f32.mrb[4].mxu1 }
 0x6a4   :  { %v1286_v52 = vadd.f32 %v1281_v30, %v2910_v36  ;;  %v1283_v56 = vpop.f32.mrb[5].mxu1 }
 0x6a5   :  { %v1287_v62 = vadd.f32 %v1283_v56, %v2916_v41 }
 0x6a6   :  { %v1288_v57 = vmul.f32 0.5, %v1286_v52 }
 0x6a7   :  { %v1293_v34 = vmul.f32 0.5, %v1287_v62 }
 0x6a8   :  { %2685 = vtanh.f32 %v1288_v57 }
 0x6a9   :  { %v1114_v23 = vpop.f32.mrb[6].mxu0  ;;  %2687 = vtanh.f32 %v1287_v62  ;;  %v3276_v62 = vld [vmem:[%s3368_s9] sm:$0x3] }
 0x6aa   :  { %v1119_v4 = vadd.f32 %v1114_v23, %v3111_v2  ;;  %v1116_v63 = vpop.f32.mrb[7].mxu0 }
 0x6ab   :  { %v1120_v7 = vadd.f32 %v1116_v63, %v3116_v12 }
 0x6ac   :  { %v1121_v6 = vmul.f32 0.5, %v1119_v4  ;;  %v1573_v4 = vrot.slane %v3276_v62, 7 }
 0x6ad   :  { %v1126_v21 = vmul.f32 0.5, %v1120_v7 }
 0x6ae   :  { %2689 = vtanh.f32 %v1121_v6 }
 0x6af   :  { %2691 = vtanh.f32 %v1120_v7 }
 0x6b0   :  { %2693 = vtanh.f32 %v1293_v34  ;;  %v1739_v34 = vld [vmem:[%s3370_s12] sm:$0xff] }
 0x6b1   :  { %2695 = vtanh.f32 %v1126_v21  ;;  %v1740_v21 = vld [vmem:[%s3370_s12 + $0x8] sm:$0xff] }
 0x6b2   :  { %v2686_v16 = vpop.eup %2685 }
 0x6b3   :  { %v1290_v17 = vadd.f32 1.0, %v2686_v16  ;;  %v2688_v9 = vpop.eup %2687  ;;  %v3282_v16 = vld [vmem:[%s3368_s9 + $0x2] sm:$0x3] }
 0x6b5   :  { %v1291_v8 = vmul.f32 0.5, %v1290_v17 }
 0x6b7   :  { %v1298_v36 = vmul.f32 %v2688_v9, %v1291_v8  ;;  %v1297_v26 = vmul.f32 %v1291_v8, %v3180_v61  ;;  %v1907_v8 = vrot.slane %v3282_v16, 7 }
 0x6b8   :  { %v2690_v14 = vpop.eup %2689 }
 0x6b9   :  { %v1123_v15 = vadd.f32 1.0, %v2690_v14  ;;  %1300 = vrot.lane.b32.xlu1 %v1298_v36, %s2714_s3  ;;  %v2692_v20 = vpop.eup %2691  ;;  %v1583_v36 = vld [vmem:[%s3369_s10 + $0x10] sm:$0xff]  ;;  %v1584_v14 = vld [vmem:[%s3369_s10 + $0x18] sm:$0xff] }
 0x6ba   :  { %v2694_v31 = vpop.eup %2693 }
 0x6bb   :  { %v1124_v41 = vmul.f32 0.5, %v1123_v15  ;;  %v1295_v39 = vadd.f32 1.0, %v2694_v31  ;;  %v2696_v40 = vpop.eup %2695  ;;  %v2600_v15 = vpack.c.bf16 %v1584_v14, %v1583_v36 }
 0x6bc   :  { %v1128_v48 = vadd.f32 1.0, %v2696_v40 }
 0x6bd   :  { %v1131_v28 = vmul.f32 %v2692_v20, %v1124_v41  ;;  %v1130_v32 = vmul.f32 %v1124_v41, %v3176_v54  ;;  %v1296_v42 = vmul.f32 0.5, %v1295_v39  ;;  %v1581_v41 = vld [vmem:[%s3369_s10] sm:$0xff]  ;;  %v1582_v20 = vld [vmem:[%s3369_s10 + $0x8] sm:$0xff] }
 0x6be   :  { %v1129_v51 = vmul.f32 0.5, %v1128_v48 }
 0x6bf   :  { %1133 = vrot.lane.b32.xlu0 %v1131_v28, %s2714_s3  ;;  %v2603_v28 = vpack.c.bf16 %v1582_v20, %v1581_v41 }
 0x72b   :  { %v1301_v29 = vpop.permute.xlu1 %1300 }
 0x72c   :  { %v1303_v27 = vadd.f32 %v1301_v29, %v1297_v26  ;;  %v2609_v26 = vpack.c.bf16 %v1740_v21, %v1739_v34  ;;  %v2255_v29 = vld [vmem:[%s3371_s8] ss:$0 sm:$0xff]  ;;  %s2718_s8 = smov 112  }
 0x72e   :  { %2697 = vtanh.f32 %v1303_v27 }
 0x731   :  { %v1134_v33 = vpop.permute.xlu0 %1133 }
 0x732   :  { %v3220_v37 = vadd.f32 %v1134_v33, %v1130_v32  ;;  %v1741_v33 = vld [vmem:[%s3370_s12 + $0x10] sm:$0xff] }
 0x734   :  { %2699 = vtanh.f32 %v3220_v37 }
 0x738   :  { %v2698_v44 = vpop.eup %2697 }
 0x739   :  { %v1305_v49 = vmul.f32 %v2698_v44, %v1296_v42 }
 0x73b   :  { %1383 = vrot.lane.b32.xlu1 %v1305_v49, %s2714_s3 }
 0x73e   :  { %v2700_v53 = vpop.eup %2699 }
 0x73f   :  { %v1138_v59 = vmul.f32 %v2700_v53, %v1129_v51 }
 0x741   :  { %1307 = vrot.lane.b32.xlu0 %v1138_v59, %s2714_s3 }
 0x7ad   :  { %v1384_v54 = vpop.permute.xlu1 %1383 }
 0x7b3   :  { %v1308_v60 = vpop.permute.xlu0 %1307 }
 0x7b4   :  { %2253 = vmatmul.mubr.msk.f32.vlgmr.msra.gmra.mrb[6].mxu1 %vm102_vm1, %v1308_v60 }
 0x7b5   :  { %2574 = vmatpush1.bf16.msra.mxu1 %v3018_v24  ;;  %1451 = vmatprep.mubr.f32.mxu1 %v2713_v3 }
 0x7b6   :  { %2576 = vmatprep.subr.bf16.mxu1 %v3021_v25 }
 0x7b9   :  { %2578 = vmatpush1.bf16.msra.mxu1 %v3037_v35 }
 0x7ba   :  { %2580 = vmatprep.subr.bf16.mxu1 %v3041_v38 }
 0x7bd   :  { %2582 = vmatpush1.bf16.msra.mxu1 %v3056_v45 }
 0x7be   :  { %2584 = vmatprep.subr.bf16.mxu1 %v3059_v47  ;;  %v2715_v47 = vmov 0.0|0.0  }
 0x7bf   :  { %2587 = vmatprep.subr.bf16.mxu0 %v2715_v47 }
 0x7c1   :  { %2586 = vmatpush1.bf16.msra.mxu1 %v3068_v50  ;;  %v1478_v50 = vld [vmem:[%s3367_s7] sm:$0xff] }
 0x7c2   :  { %2608 = vmatprep.subr.bf16.mxu1 %v2715_v47 }
 0x7c4   :  { %2254 = vmatmul.mubr.msk.f32.vlgmr.msra.gmra.mrb[6].mxu1 %vm102_vm1, %v1384_v54 }
 0x7c5   :  { %2348 = vmatprep.mubr.msk.f32.mxu1 %vm2716_vm2, %v2713_v3  ;;  %2610 = vmatpush3.bf16.msra.mxu1 %v2609_v26 }
 0x7c6   :  { %2614 = vmatprep.subr.bf16.mxu1 %v2715_v47 }
 0x897   :  { %v1453_v61 = vpop.f32.mrb[6].mxu1 }
 0x898   :  { %v1458_v24 = vadd.f32 %v1453_v61, %v3111_v2  ;;  %v1455_v0 = vpop.f32.mrb[7].mxu1  ;;  %v1479_v2 = vld [vmem:[%s3367_s7 + $0x8] sm:$0xff] }
 0x899   :  { %v1459_v25 = vadd.f32 %v1455_v0, %v3116_v12  ;;  %v1480_v12 = vld [vmem:[%s3367_s7 + $0x10] sm:$0xff]  ;;  %v2588_v10 = vpack.c.bf16 %v1479_v2, %v1478_v50  ;;  %s2717_s7 = smov 16  }
 0x89a   :  { %v1460_v43 = vmul.f32 0.5, %v1458_v24  ;;  %v2591_v13 = vpack.c.bf16 %v1481_v11, %v1480_v12 }
 0x89b   :  { %2589 = vmatpush3.bf16.msra.mxu0 %v2588_v10  ;;  %v1465_v30 = vmul.f32 0.5, %v1459_v25 }
 0x89c   :  { %2701 = vtanh.f32 %v1460_v43  ;;  %2590 = vmatprep.subr.bf16.mxu0 %v2715_v47 }
 0x89d   :  { %2703 = vtanh.f32 %v1459_v25 }
 0x89e   :  { %2705 = vtanh.f32 %v1465_v30 }
 0x89f   :  { %2592 = vmatpush3.bf16.msra.mxu0 %v2591_v13 }
 0x8a0   :  { %2593 = vmatprep.subr.bf16.mxu0 %v2715_v47 }
 0x8a3   :  { %2595 = vmatpush3.bf16.msra.mxu0 %v2594_v19 }
 0x8a4   :  { %2596 = vmatprep.subr.bf16.mxu0 %v2715_v47 }
 0x8a6   :  { %v2702_v35 = vpop.eup %2701 }
 0x8a7   :  { %v1462_v38 = vadd.f32 1.0, %v2702_v35  ;;  %v2704_v45 = vpop.eup %2703  ;;  %2598 = vmatpush3.bf16.msra.mxu0 %v2597_v55 }
 0x8a8   :  { %2599 = vmatprep.subr.bf16.mxu0 %v2715_v47  ;;  %v2706_v23 = vpop.eup %2705 }
 0x8a9   :  { %v1463_v46 = vmul.f32 0.5, %v1462_v38  ;;  %v1467_v63 = vadd.f32 1.0, %v2706_v23 }
 0x8ab   :  { %v1470_v5 = vmul.f32 %v2704_v45, %v1463_v46  ;;  %v1469_v52 = vmul.f32 %v1463_v46, %v3220_v37  ;;  %v1468_v6 = vmul.f32 0.5, %v1467_v63  ;;  %v1742_v37 = vld [vmem:[%s3370_s12 + $0x18] sm:$0xff] }
 0x8ac   :  { %v2606_v42 = vpack.c.bf16 %v1742_v37, %v1741_v33 }
 0x8ad   :  { %1472 = vrot.lane.b32.xlu0 %v1470_v5, %s2714_s3 }
 0x8b1   :  { %1577 = vrot.lane.b32.xlu0 %v1573_v4, %s2717_s7 }
 0x91f   :  { %v1473_v56 = vpop.permute.xlu0 %1472 }
 0x920   :  { %v1475_v57 = vadd.f32 %v1473_v56, %v1469_v52 }
 0x922   :  { %2707 = vtanh.f32 %v1475_v57 }
 0x923   :  { %v1578_v40 = vpop.permute.xlu0 %1577 }
 0x92c   :  { %v2708_v7 = vpop.eup %2707 }
 0x92d   :  { %v1477_v17 = vmul.f32 %v2708_v7, %v1468_v6 }
 0x92f   :  { %1494 = vrot.lane.b32.xlu1 %v1477_v17, %s2714_s3 }
 0x933   :  { %1910 = vrot.lane.b32.xlu1 %v1907_v8, %s2717_s7 }
 0x9a1   :  { %v1495_v9 = vpop.permute.xlu1 %1494 }
 0x9a2   :  { %2321 = vmatmul.mubr.msk.f32.vlgmr.msra.gmra.mrb[8].mxu0 %vm102_vm1, %v1495_v9 }
 0x9a3   :  { %2327 = vmatprep.mubr.msk.f32.mxu0 %vm2716_vm2, %v2713_v3  ;;  %2601 = vmatpush3.bf16.msra.mxu0 %v2600_v15 }
 0x9a4   :  { %2602 = vmatprep.subr.bf16.mxu0 %v2715_v47 }
 0x9a5   :  { %v1911_v48 = vpop.permute.xlu1 %1910 }
 0x9a6   :  { %2328 = vmatmul.mubr.msk.f32.vlgmr.msra.gmra.mrb[10].mxu0 %vm177_vm0, %v3276_v62 }
 0x9a7   :  { %2604 = vmatpush3.bf16.msra.mxu0 %v2603_v28  ;;  %2334 = vmatprep.mubr.msk.f32.mxu0 %vm2716_vm2, %v2713_v3 }
 0x9a8   :  { %2605 = vmatprep.subr.bf16.mxu0 %v2715_v47 }
 0xa75   :  { %v1564_v27 = vpop.f32.mrb[8].mxu0 }
 0xa76   :  { %v1565_v31 = vadd.f32 %v2255_v29, %v1564_v27  ;;  %v2322_v32 = vpop.f32.mrb[9].mxu0 }
 0xa78   :  { %vm1568_vm3 = vcmp.gt.f32.partialorder %v1565_v31, 0.0  ;;  %v1569_v39 = vmul.f32 0.01, %v1565_v31 }
 0xa79   :  { %v1653_v54 = vpop.f32.mrb[10].mxu0 }
 0xa7a   :  { %v1570_v44 = vsel %vm1568_vm3, %v1565_v31, %v1569_v39  ;;  %v2329_v61 = vpop.f32.mrb[11].mxu0 }
 0xa7b   :  { %v1576_v49 = vsel %vm1575_vm4, %v1570_v44, %v1573_v4  ;;  %v1580_v51 = vsel %vm1575_vm4, %v1570_v44, %v1578_v40  ;;  %v1904_v53 = vrot.slane %v1570_v44, 1 }
 0xa7c   :  { %2335 = vmatmul.mubr.msk.f32.vlgmr.msra.gmra.mrb[12].mxu0 %vm177_vm0, %v1576_v49  ;;  %1814 = vrot.lane.b32.xlu0 %v1580_v51, %s2718_s8 }
 0xa7d   :  { %v1913_v59 = vsel %vm1575_vm4, %v1904_v53, %v1911_v48  ;;  %2607 = vmatpush3.bf16.msra.mxu0 %v2606_v42  ;;  %2341 = vmatprep.mubr.msk.f32.mxu0 %vm2716_vm2, %v2713_v3  ;;  %v1909_v60 = vsel %vm1575_vm4, %v1904_v53, %v1907_v8 }
 0xa7e   :  { %2147 = vrot.lane.b32.xlu1 %v1913_v59, %s2718_s8  ;;  %2611 = vmatprep.subr.bf16.mxu0 %v2715_v47 }
 0xa80   :  { %2342 = vmatmul.mubr.msk.f32.vlgmr.msra.gmra.mrb[14].mxu0 %vm177_vm0, %v3276_v62 }
 0xa81   :  { %2613 = vmatpush3.bf16.msra.mxu0 %v2600_v15  ;;  %2355 = vmatprep.mubr.msk.f32.mxu0 %vm2716_vm2, %v2713_v3 }
 0xa82   :  { %2617 = vmatprep.subr.bf16.mxu0 %v2715_v47 }
 0xa84   :  { %2356 = vmatmul.mubr.msk.f32.vlgmr.msra.gmra.mrb[16].mxu0 %vm177_vm0, %v3282_v16 }
 0xa85   :  { %2619 = vmatpush3.bf16.msra.mxu0 %v2606_v42  ;;  %2369 = vmatprep.mubr.msk.f32.mxu0 %vm2716_vm2, %v2713_v3 }
 0xa88   :  { %2370 = vmatmul.mubr.msk.f32.vlgmr.msra.gmra.mrb[18].mxu0 %vm177_vm0, %v3282_v16 }
 0xaee   :  { %v1815_v24 = vpop.permute.xlu0 %1814 }
 0xaef   :  { %2349 = vmatmul.mubr.msk.f32.vlgmr.msra.gmra.mrb[8].mxu1 %vm177_vm0, %v1815_v24 }
 0xaf0   :  { %2616 = vmatpush3.bf16.msra.mxu1 %v2603_v28  ;;  %2362 = vmatprep.mubr.msk.f32.mxu1 %vm2716_vm2, %v2713_v3  ;;  %v2148_v0 = vpop.permute.xlu1 %2147 }
 0xaf1   :  { %2620 = vmatprep.subr.bf16.mxu1 %v2715_v47  ;;  %v2259_v47 = vld [vmem:[%s3372_s11] ss:$0 sm:$0xff] }
 0xaf3   :  { %2363 = vmatmul.mubr.msk.f32.vlgmr.msra.gmra.mrb[10].mxu1 %vm177_vm0, %v1909_v60 }
 0xaf4   :  { %2622 = vmatpush3.bf16.msra.mxu1 %v2609_v26  ;;  %2376 = vmatprep.mubr.msk.f32.mxu1 %vm2716_vm2, %v2713_v3  ;;  %v2262_v3 = vld [vmem:[%s3373_s13] ss:$0 sm:$0xff] }
 0xaf7   :  { %2377 = vmatmul.mubr.msk.f32.vlgmr.msra.gmra.mrb[12].mxu1 %vm177_vm0, %v2148_v0 }
 0xb4f   :  { %v1726_v43 = vpop.f32.mrb[12].mxu0 }
 0xb50   :  { %v1727_v25 = vadd.f32 %v1726_v43, %v1653_v54  ;;  %v2336_v35 = vpop.f32.mrb[13].mxu0 }
 0xb52   :  { %v1737_v12 = vadd.f32 %v2259_v47, %v1727_v25 }
 0xb53   :  { %v1809_v38 = vpop.f32.mrb[14].mxu0 }
 0xb54   :  { %v2343_v46 = vpop.f32.mrb[15].mxu0  ;;  %2709 = vtanh.f32 %v1737_v12 }
 0xb57   :  { %v1986_v45 = vpop.f32.mrb[16].mxu0 }
 0xb58   :  { %v2357_v5 = vpop.f32.mrb[17].mxu0 }
 0xb5b   :  { %v2142_v50 = vpop.f32.mrb[18].mxu0 }
 0xb5c   :  { %v2371_v2 = vpop.f32.mrb[19].mxu0 }
 0xb5e   :  { %v2710_v55 = vpop.eup %2709 }
 0xbc2   :  { %v1884_v10 = vpop.f32.mrb[8].mxu1 }
 0xbc3   :  { %v1885_v11 = vadd.f32 %v1884_v10, %v1809_v38  ;;  %v2350_v13 = vpop.f32.mrb[9].mxu1 }
 0xbc5   :  { %v1895_v58 = vadd.f32 %v2262_v3, %v1885_v11 }
 0xbc6   :  { %v2059_v18 = vpop.f32.mrb[10].mxu1 }
 0xbc7   :  { %v1896_v19 = vmax.f32 %v1895_v58, 0.0  ;;  %v2060_v1 = vadd.f32 %v2059_v18, %v1986_v45  ;;  %v2364_v22 = vpop.f32.mrb[11].mxu1 }
 0xbc9   :  { %v1897_v30 = vmul.f32 %v2710_v55, %v1896_v19  ;;  %v2070_v52 = vadd.f32 %v2259_v47, %v2060_v1 }
 0xbca   :  { %v2217_v56 = vpop.f32.mrb[12].mxu1 }
 0xbcb   :  { %v1898_v57 = vadd.f32 %v1897_v30, %v3276_v62  ;;  %2711 = vtanh.f32 %v2070_v52  ;;  %v2218_v23 = vadd.f32 %v2217_v56, %v2142_v50  ;;  %v2378_v4 = vpop.f32.mrb[13].mxu1 }
 0xbcd   :  { %1900 = vst.msk [vmem:[%s3374_s14] sm:$0x3] %vm1899_vm5, %v1898_v57  ;;  %v2228_v63 = vadd.f32 %v2262_v3, %v2218_v23 }
 0xbcf   :  { %v2229_v6 = vmax.f32 %v2228_v63, 0.0 }
 0xbd5   :  { %v2712_v7 = vpop.eup %2711 }
 0xbd6   :  { %v2230_v17 = vmul.f32 %v2712_v7, %v2229_v6 }
 0xbd8   :  { %v2231_v8 = vadd.f32 %v3282_v16, %v2230_v17 }
 0xbda   :  { %2270 = vst.msk [vmem:[%s3374_s14 + $0x2] sm:$0x3] %vm1899_vm5, %v2231_v8 }

// kernel: beliefppg_forward.26
= control target key start
LH: loop header
LB: loop body
LE: loop exit
PB: predicated region body
PF: predicated region fallthrough
CT: control target
= control target key end

     0   :  { %s1575_s23 = smov 0   ;;  %s1707_s0 = inlined_call_operand.vmem [shape: f32[2,16,8], index: 0, kind: input, shape index: {}]   ;;  %s1708_s1 = inlined_call_operand.vmem [shape: f32[2,16,4], index: 1, kind: input, shape index: {}]   ;;  %s1709_s2 = inlined_call_operand.vmem [shape: f32[4,2], index: 2, kind: input, shape index: {}]   ;;  %s1710_s3 = inlined_call_operand.vmem [shape: f32[1,2], index: 3, kind: input, shape index: {}]   ;;  %s1711_s4 = inlined_call_operand.vmem [shape: f32[8,2], index: 4, kind: input, shape index: {}]   ;;  %s1712_s5 = inlined_call_operand.vmem [shape: f32[1,2], index: 5, kind: input, shape index: {}]   ;;  %s1713_s6 = inlined_call_operand.vmem [shape: f32[1,2], index: 6, kind: input, shape index: {}]   ;;  %s1714_s7 = inlined_call_operand.<no memory space> [shape: f32[1,1], index: 7, kind: input, shape index: {}]   ;;  %s1715_s8 = inlined_call_operand.vmem [shape: f32[36,4], index: 8, kind: input, shape index: {}]   ;;  %s1716_s9 = inlined_call_operand.vmem [shape: f32[1,4], index: 9, kind: input, shape index: {}]   ;;  %s1717_s10 = inlined_call_operand.vmem [shape: f32[12,4], index: 10, kind: input, shape index: {}]   ;;  %s1718_s11 = inlined_call_operand.vmem [shape: f32[1,4], index: 11, kind: input, shape index: {}]   ;;  %s1719_s12 = inlined_call_operand.vmem [shape: f32[2,16,4], index: 12, kind: output, shape index: {}]  }
   0x1   :  { %v17_v0 = vstv %s1714_s7 }
   0x2   :  { %18 = vst [vmem:[#allocation4] sm:$0x1] %v17_v0 }
   0x3 LB: > { %s1323_s24 = sadd.s32 4294967295, %s1501_s23   ;;  %p1327_p0 = scmp.ge.s32.totalorder %s1501_s23, 1  ;;  %s1501_s23 = sphi %s1575_s23, %s24_s23  }
   0x4   : > { %p374_p1 = scmp.lt.s32.totalorder %s1501_s23, 3 }
   0x6   : > { %p375_p2 = pnand %p1327_p0, %p374_p1 }
   0x7   : > { %v440_v1 = vld [vmem:[%s1709_s2] sm:$0xf] (!%p375_p2)  ;;  %vm455_vm0 = vcmask (!%p375_p2), 1043456   ;;  %p421_p3 = scmp.lt.s32.totalorder (!%p375_p2), %s1323_s24, 1  ;;  %vm448_vm1 = vcmask (!%p375_p2), 31744   ;;  %vm542_vm2 = vcmask (!%p375_p2), 64512  }
   0x8   : > { %378 = sbr.rel (%p375_p2) target bundleno = 1138 (0x472), region = 68  ;;  %v534_v2 = vld [vmem:[%s1711_s4] sm:$0xff] (!%p375_p2)  ;;  %1395 = vmatprep.subr.msk.mxu1 (!%p375_p2), %vm455_vm0, %v440_v1  ;;  %vm637_vm3 = vcmask (!%p375_p2), 15360   ;;  %v1503_v26 = vmov (!%p375_p2), 0   ;;  %vm673_vm4 = vcmask (!%p375_p2), 97280   ;;  %v1504_v40 = vmov (!%p375_p2), 0.0  }
   0x9   : > { %1400 = vmatprep.subr.mxu0 (!%p375_p2), %v534_v2  ;;  %1396 = vmatpush3.msk.msra.mxu1 (!%p375_p2), %vm455_vm0, %v440_v1  ;;  %v1334_v7 = vld [vmem:[%s1710_s3] ss:$0 sm:$0xff] (!%p375_p2)  ;;  %v1342_v27 = vld [vmem:[#allocation4] ss:$0 sm:$0xff] (!%p375_p2)  ;;  %674 = vst.msk [vmem:[#allocation2] sm:$0xff] (!%p375_p2), %vm673_vm4, %v1504_v40  ;;  %675 = vst.msk [vmem:[#allocation2 + $0x8] sm:$0xff] (!%p375_p2), %vm673_vm4, %v1504_v40 }
   0xa   : > { %1401 = vmatpush3.msra.mxu0 (!%p375_p2), %v534_v2  ;;  %v1338_v13 = vld [vmem:[%s1712_s5] ss:$0 sm:$0xff] (!%p375_p2)  ;;  %1489 = vset.pattern.permute.xlu1 (!%p375_p2), %v1503_v26  ;;  %969 = vst.msk [vmem:[#allocation3] sm:$0xff] (!%p375_p2), %vm448_vm1, %v1504_v40  ;;  %970 = vst.msk [vmem:[#allocation3 + $0x8] sm:$0xff] (!%p375_p2), %vm448_vm1, %v1504_v40  ;;  %vm676_vm5 = vcmask (!%p375_p2), 91136   ;;  %vm1505_vm6 = vmmov (!%p375_p2), 1  }
   0xb   : > { %v1341_v19 = vld [vmem:[%s1713_s6] ss:$0 sm:$0xff] (!%p375_p2)  ;;  %1490 = vset.pattern.permute.xlu0 (!%p375_p2), %v1503_v26  ;;  %677 = vst.msk [vmem:[#allocation2 + $0x10] sm:$0x3] (!%p375_p2), %vm676_vm5, %v1504_v40  ;;  %v702_v42 = vld [vmem:[%s1715_s8 + $0x8] sm:$0xf] (!%p375_p2)  ;;  %vm1633_vm7 = vmpackc.low (!%p375_p2), %vm455_vm0, %vm1505_vm6 }
   0xc   : > { %v701_v41 = vld [vmem:[%s1715_s8] sm:$0xff] (!%p375_p2)  ;;  %v791_v45 = vld [vmem:[%s1715_s8 + $0xc] sm:$0xff] (!%p375_p2)  ;;  %v792_v46 = vld [vmem:[%s1715_s8 + $0x14] sm:$0xf] (!%p375_p2)  ;;  %s1506_s14 = smov (!%p375_p2), 8   ;;  %vm688_vm8 = vcmask (!%p375_p2), 97344  }
   0xd   : > { %v1441_v43 = vpack.c.bf16 (!%p375_p2), %v702_v42, %v701_v41  ;;  %v1447_v47 = vpack.c.bf16 (!%p375_p2), %v792_v46, %v791_v45  ;;  %v881_v55 = vld [vmem:[%s1715_s8 + $0x18] sm:$0xff] (!%p375_p2)  ;;  %v882_v56 = vld [vmem:[%s1715_s8 + $0x20] sm:$0xf] (!%p375_p2)  ;;  %vm971_vm9 = vcmask (!%p375_p2), 25600   ;;  %v1076_v0 = vld [vmem:[%s1717_s10 + $0x4] sm:$0xf] (!%p375_p2) }
   0xe   : > { %v1453_v57 = vpack.c.bf16 (!%p375_p2), %v882_v56, %v881_v55  ;;  %972 = vst.msk [vmem:[#allocation3 + $0x10] sm:$0x3] (!%p375_p2), %vm971_vm9, %v1504_v40  ;;  %v987_v63 = vld [vmem:[%s1717_s10] sm:$0xf] (!%p375_p2) }
   0xf   : > { %s1723_s24 = smov (!%p421_p3, %s1323_s24), 1  ;;  %1443 = vmatprep.subr.msk.bf16.mxu1 %vm1633_vm7, %v1441_v43  ;;  %1426 = vmatprep.subr.msk.mxu0 %vm455_vm0, %v987_v63  ;;  %v1343_v1 = vld [vmem:[%s1716_s9] ss:$0 sm:$0xff] }
  0x10   : > { %s1591_s28 = sshll.u32 %s1723_s24, 4 }
  0x11   : > { %s430_s13 = scalar_lea.vmem %s1708_s1, %s1591_s28  ;;  %s425_s16 = scalar_lea.vmem %s1707_s0, %s1591_s28 }
  0x12   : > { %v1597_v3 = vld [vmem:[%s430_s13] sm:$0xff]  ;;  %v1599_v4 = vld [vmem:[%s430_s13 + $0x8] sm:$0xff] }
  0x13   : > { %1397 = vmatprep.mubr.msk.f32.mxu1 %vm448_vm1, %v1597_v3  ;;  %v436_v5 = vld [vmem:[%s425_s16] sm:$0xff]  ;;  %v437_v6 = vld [vmem:[%s425_s16 + $0x8] sm:$0xff] }
  0x14   : > { %1398 = vmatmul.mubr.msk.f32.vlgmr.msra.gmra.mrb[0].mxu1 %vm448_vm1, %v1599_v4  ;;  %1402 = vmatprep.mubr.msk.f32.mxu0 %vm542_vm2, %v436_v5  ;;  %678 = vst.msk [vmem:[#allocation2 + $0x1] sm:$0xff] %vm542_vm2, %v436_v5  ;;  %679 = vst.msk [vmem:[#allocation2 + $0x9] sm:$0xff] %vm542_vm2, %v437_v6 }
  0x15   : > { %1403 = vmatmul.mubr.msk.f32.vlgmr.msra.gmra.mrb[0].mxu0 %vm542_vm2, %v437_v6  ;;  %1446 = vmatpush3.bf16.msk.msra.mxu1 %vm1633_vm7, %v1441_v43 }
  0x16   : > { %1449 = vmatprep.subr.msk.bf16.mxu1 %vm1633_vm7, %v1447_v47  ;;  %1427 = vmatpush3.msk.msra.mxu0 %vm455_vm0, %v987_v63 }
  0x17   : > { %1431 = vmatprep.subr.msk.mxu0 %vm455_vm0, %v1076_v0 }
  0xe7   : > { %v1399_v8 = vpop.f32.mrb[0].mxu1 }
  0xe8   : > { %v531_v9 = vadd.f32 %v1399_v8, %v1334_v7  ;;  %v525_v10 = vpop.f32.mrb[1].mxu1  ;;  %v1404_v11 = vpop.f32.mrb[0].mxu0 }
  0xe9   : > { %v526_v12 = vadd.f32 %v1334_v7, %v525_v10  ;;  %v615_v14 = vpop.f32.mrb[1].mxu0  ;;  %v1165_v10 = vld [vmem:[%s1717_s10 + $0x8] sm:$0xf] }
  0xea   : > { %v1460_v15 = vadd.f32 %v1404_v11, %v531_v9 }
  0xeb   : > { %v1463_v16 = vadd.f32 %v615_v14, %v526_v12 }
  0xec   : > { %v1461_v17 = vadd.f32 %v1460_v15, %v1338_v13  ;;  %v1353_v15 = vld [vmem:[%s1718_s11] ss:$0 sm:$0xff] }
  0xed   : > { %v1464_v18 = vadd.f32 %v1463_v16, %v1338_v13 }
  0xee   : > { %v627_v20 = vmax.f32 %v1461_v17, 0.0 }
  0xef   : > { %v626_v21 = vmax.f32 %v1464_v18, 0.0 }
  0xf0   : > { %v636_v24 = vmul.f32 %v1341_v19, %v627_v20 }
  0xf1   : > { %v635_v22 = vmul.f32 %v1341_v19, %v626_v21 }
  0xf2   : > { %v641_v25 = vsel %vm637_vm3, %v636_v24, 0.0 }
  0xf3   : > { %v638_v23 = vsel %vm637_vm3, %v635_v22, 0.0 }
  0xf4   : > { %639 = vadd.xlane.f32.xlu0 %v638_v23 }
  0xf8   : > { %642 = vadd.xlane.f32.xlu0 %v641_v25 }
 0x181   : > { %v640_v28 = vpop.xlane.xlu0 %639 }
 0x182   : > { %v651_v29 = vadd.f32 %v1342_v27, %v640_v28 }
 0x184   : > { %v653_v30 = vmul.f32 0.5, %v651_v29 }
 0x185   : > { %v643_v31 = vpop.xlane.xlu0 %642 }
 0x186   : > { %1491 = vtanh.f32 %v653_v30  ;;  %v652_v32 = vadd.f32 %v1342_v27, %v643_v31 }
 0x188   : > { %v654_v33 = vmul.f32 0.5, %v652_v32 }
 0x18a   : > { %1493 = vtanh.f32 %v654_v33 }
 0x190   : > { %v1492_v34 = vpop.eup %1491 }
 0x191   : > { %v657_v35 = vadd.f32 1.0, %v1492_v34 }
 0x193   : > { %v659_v36 = vmul.f32 0.5, %v657_v35 }
 0x194   : > { %v1494_v37 = vpop.eup %1493 }
 0x195   : > { %v658_v38 = vadd.f32 1.0, %v1494_v37  ;;  %663 = vperm.xlu1 %1489, %v659_v36  }
 0x197   : > { %v660_v39 = vmul.f32 0.5, %v658_v38 }
 0x199   : > { %668 = vperm.xlu1 %1489, %v660_v39  }
 0x214   : > { %v664_v48 = vpop.permute.xlu1 %663 }
 0x215   : > { %v671_v49 = vmul.f32 %v664_v48, %v1597_v3 }
 0x217   : > { %682 = vrot.lane.b32.xlu0 %v671_v49, %s1506_s14 }
 0x218   : > { %v669_v50 = vpop.permute.xlu1 %668 }
 0x219   : > { %v672_v51 = vmul.f32 %v669_v50, %v1599_v4 }
 0x21b   : > { %684 = vrot.lane.b32.xlu1 %v672_v51, %s1506_s14  ;;  %s435_s14 = scalar_lea.vmem %s1719_s12, %s1591_s28 }
 0x289   : > { %v683_v52 = vpop.permute.xlu0 %682 }
 0x28a   : > { %689 = vst.msk [vmem:[#allocation2 + $0x1] sm:$0xff] %vm688_vm8, %v683_v52 }
 0x28d   : > { %v685_v53 = vpop.permute.xlu1 %684 }
 0x28e   : > { %690 = vst.msk [vmem:[#allocation2 + $0x9] sm:$0xff] %vm688_vm8, %v685_v53 }
 0x291   : > { %v699_v54 = vld [vmem:[#allocation2] sm:$0xff] }
 0x292   : > { %1409 = vmatprep.mubr.msk.f32.mxu1 %vm673_vm4, %v699_v54  ;;  %v789_v59 = vld [vmem:[#allocation2 + $0x1] sm:$0xff] }
 0x295   : > { %v700_v58 = vld [vmem:[#allocation2 + $0x8] sm:$0xff] }
 0x296   : > { %1410 = vmatmul.mubr.msk.f32.vlgmr.msra.gmra.mrb[2].mxu1 %vm673_vm4, %v700_v58  ;;  %v790_v60 = vld [vmem:[#allocation2 + $0x9] sm:$0xff] }
 0x297   : > { %1452 = vmatpush3.bf16.msk.msra.mxu1 %vm1633_vm7, %v1447_v47  ;;  %1416 = vmatprep.mubr.msk.f32.mxu1 %vm673_vm4, %v789_v59  ;;  %v879_v61 = vld [vmem:[#allocation2 + $0x2] sm:$0xff]  ;;  %v880_v62 = vld [vmem:[#allocation2 + $0xa] sm:$0xff] }
 0x298   : > { %1455 = vmatprep.subr.msk.bf16.mxu1 %vm1633_vm7, %v1453_v57 }
 0x29e   : > { %1417 = vmatmul.mubr.msk.f32.vlgmr.msra.gmra.mrb[2].mxu1 %vm673_vm4, %v790_v60 }
 0x29f   : > { %1458 = vmatpush3.bf16.msk.msra.mxu1 %vm1633_vm7, %v1453_v57  ;;  %1423 = vmatprep.mubr.msk.f32.mxu1 %vm673_vm4, %v879_v61 }
 0x2a6   : > { %1424 = vmatmul.mubr.msk.f32.vlgmr.msra.gmra.mrb[2].mxu1 %vm673_vm4, %v880_v62 }
 0x379   : > { %v1425_v2 = vpop.f32.mrb[2].mxu1 }
 0x37a   : > { %v1465_v3 = vadd.f32 %v1425_v2, %v1343_v1  ;;  %v958_v4 = vpop.f32.mrb[3].mxu1 }
 0x37b   : > { %v1466_v5 = vadd.f32 %v1343_v1, %v958_v4 }
 0x37c   : > { %v974_v6 = vmax.f32 %v1465_v3, 0.0 }
 0x37d   : > { %v973_v7 = vmax.f32 %v1466_v5, 0.0 }
 0x37e   : > { %976 = vst.msk [vmem:[#allocation3 + $0x9] sm:$0xff] %vm448_vm1, %v974_v6 }
 0x37f   : > { %975 = vst.msk [vmem:[#allocation3 + $0x1] sm:$0xff] %vm448_vm1, %v973_v7 }
 0x385   : > { %v1075_v12 = vld [vmem:[#allocation3 + $0x9] sm:$0xff] }
 0x386   : > { %v985_v8 = vld [vmem:[#allocation3] sm:$0xff]  ;;  %v986_v9 = vld [vmem:[#allocation3 + $0x8] sm:$0xff] }
 0x387   : > { %1428 = vmatprep.mubr.msk.f32.mxu0 %vm448_vm1, %v985_v8  ;;  %v1074_v11 = vld [vmem:[#allocation3 + $0x1] sm:$0xff]  ;;  %v1164_v14 = vld [vmem:[#allocation3 + $0xa] sm:$0xff] }
 0x388   : > { %1429 = vmatmul.mubr.msk.f32.vlgmr.msra.gmra.mrb[2].mxu0 %vm448_vm1, %v986_v9  ;;  %v1163_v13 = vld [vmem:[#allocation3 + $0x2] sm:$0xff] }
 0x389   : > { %1432 = vmatpush3.msk.msra.mxu0 %vm455_vm0, %v1076_v0  ;;  %1433 = vmatprep.mubr.msk.f32.mxu0 %vm448_vm1, %v1074_v11 }
 0x38a   : > { %1436 = vmatprep.subr.msk.mxu0 %vm455_vm0, %v1165_v10 }
 0x390   : > { %1434 = vmatmul.mubr.msk.f32.vlgmr.msra.gmra.mrb[2].mxu0 %vm448_vm1, %v1075_v12 }
 0x391   : > { %1437 = vmatpush3.msk.msra.mxu0 %vm455_vm0, %v1165_v10  ;;  %1438 = vmatprep.mubr.msk.f32.mxu0 %vm448_vm1, %v1163_v13 }
 0x398   : > { %1439 = vmatmul.mubr.msk.f32.vlgmr.msra.gmra.mrb[2].mxu0 %vm448_vm1, %v1164_v14 }
 0x46b   : > { %v1440_v16 = vpop.f32.mrb[2].mxu0 }
 0x46c   : > { %v1467_v17 = vadd.f32 %v1440_v16, %v1353_v15  ;;  %v1241_v18 = vpop.f32.mrb[3].mxu0 }
 0x46d   : > { %v1468_v19 = vadd.f32 %v1353_v15, %v1241_v18 }
 0x46e   : > { %v1253_v20 = vmax.f32 %v1467_v17, 0.0 }
 0x46f   : > { %v1252_v21 = vmax.f32 %v1468_v19, 0.0 }
 0x470   : > { %1255 = vst.msk [vmem:[%s435_s14 + $0x8] sm:$0xff] %vm448_vm1, %v1253_v20 }
 0x471   : > { %1254 = vst.msk [vmem:[%s435_s14] sm:$0xff] %vm448_vm1, %v1252_v21 }
 0x472 PF: > { %s24_s23 = sadd.s32 1, %s1501_s23  }
 0x473   : > { %p21_p4 = scmp.ge.s32.totalorder %s24_s23, 4  }
 0x475   :  { %23 = sbr.rel (!%p21_p4) target bundleno = 3 (0x3), region = 101 }

// kernel: beliefppg_forward.27
= control target key start
LH: loop header
LB: loop body
LE: loop exit
PB: predicated region body
PF: predicated region fallthrough
CT: control target
= control target key end

     0   :  { %s220_s0 = inlined_call_operand.vmem [shape: f32[4,2,16], index: 0, kind: input, shape index: {}]   ;;  %s221_s1 = inlined_call_operand.vmem [shape: f32[4,1,1], index: 1, kind: input, shape index: {}]   ;;  %s222_s2 = inlined_call_operand.<no memory space> [shape: f32[1,1], index: 2, kind: input, shape index: {}]   ;;  %s223_s3 = inlined_call_operand.hbm [shape: f32[2,16], index: 3, kind: output, shape index: {}]  }
   0x1   :  { %v8_v0 = vstv %s222_s2 }
   0x2   :  { %9 = vst [vmem:[#allocation2] sm:$0x1] %v8_v0 }
   0x3   :  { %v117_v1 = vld [vmem:[%s221_s1 + $0x1] ss:$0 sm:$0xff]  ;;  %v114_v2 = vld [vmem:[%s221_s1] ss:$0 sm:$0xff]  ;;  %v156_v3 = vmov 0  }
   0x4   :  { %127 = vset.pattern.permute.xlu1 %v156_v3  ;;  %126 = vset.pattern.permute.xlu0 %v156_v3  ;;  %v120_v4 = vld [vmem:[%s221_s1 + $0x2] ss:$0 sm:$0xff] }
   0x5   :  { %51 = vperm.xlu1 %127, %v117_v1   ;;  %36 = vperm.xlu0 %126, %v114_v2  }
   0x9   :  { %v113_v5 = vld [vmem:[#allocation2] ss:$0 sm:$0xff] }
   0xa   :  { %10 = vsyncpa [#allocation4], 0  ;;  %66 = vperm.xlu1 %127, %v120_v4   ;;  %24 = vperm.xlu0 %126, %v113_v5   ;;  %v123_v6 = vld [vmem:[%s221_s1 + $0x3] ss:$0 sm:$0xff]  ;;  %v28_v8 = vld [vmem:[%s220_s0] sm:$0x3] }
   0xb   :  { %v115_v10 = vld [vmem:[%s220_s0 + $0x2] sm:$0x3]  ;;  %v118_v12 = vld [vmem:[%s220_s0 + $0x4] sm:$0x3]  ;;  %v121_v17 = vld [vmem:[%s220_s0 + $0x6] sm:$0x3] }
   0xc   :  { %vm86_vm0 = vcmask 123904   ;;  %s157_s0 = smov [#allocation3]  }
   0xd   :  { %s105_s28 = sshll.u32 %s157_s0, 4  ;;  %s106_s28 = int_to_ptr.vmem [resolvable:$true] %s105_s28 }
   0xe   :  { %81 = vperm.xlu0 %126, %v123_v6   ;;  %s132_s29 = scalar_lea.vmem %s106_s28, 32  ;;  %p137_p1 = scmp.lt.s32.totalorder %s106_s28, %s106_s28 }
   0xf   :  { %p133_p0 = scmp.ne.s32.totalorder %s106_s28, %s132_s29  ;;  %p138_p2 = scmp.lt.s32.totalorder %s132_s29, %s132_s29 }
  0x11   :  { %p139_p3 = por %p138_p2, %p137_p1 }
  0x13   :  { %p140_p4 = pnand %p139_p3, %p133_p0 }
  0x84   :  { %v52_v7 = vpop.permute.xlu1 %51  ;;  %v37_v9 = vpop.permute.xlu0 %36 }
  0x85   :  { %v39_v11 = vmul.f32 %v37_v9, %v28_v8  ;;  %v54_v15 = vmul.f32 %v115_v10, %v52_v7 }
  0x89   :  { %v67_v13 = vpop.permute.xlu1 %66  ;;  %v25_v14 = vpop.permute.xlu0 %24 }
  0x8a   :  { %v40_v16 = vadd.f32 %v39_v11, %v25_v14  ;;  %v69_v18 = vmul.f32 %v118_v12, %v67_v13 }
  0x8c   :  { %v55_v19 = vadd.f32 %v54_v15, %v40_v16 }
  0x8d   :  { %v82_v20 = vpop.permute.xlu0 %81 }
  0x8e   :  { %v84_v21 = vmul.f32 %v121_v17, %v82_v20  ;;  %v70_v22 = vadd.f32 %v69_v18, %v55_v19 }
  0x90   :  { %v85_v23 = vadd.f32 %v84_v21, %v70_v22 }
  0x92   :  { %v87_v24 = vsel %vm86_vm0, %v85_v23, -inf }
  0x93   :  { %88 = vmax.xlane.f32.xlu1 %v87_v24 }
 0x120   :  { %v89_v25 = vpop.xlane.xlu1 %88 }
 0x121   :  { %v90_v26 = vsub.f32 %v85_v23, %v89_v25 }
 0x123   :  { %v91_v27 = vmul.f32 1.442695, %v90_v26 }
 0x125   :  { %128 = vpow2.f32 %v91_v27 }
 0x12f   :  { %v129_v28 = vpop.eup %128 }
 0x130   :  { %v93_v29 = vsel %vm86_vm0, %v129_v28, 0.0 }
 0x131   :  { %94 = vadd.xlane.f32.xlu0 %v93_v29 }
 0x1be   :  { %v95_v30 = vpop.xlane.xlu0 %94 }
 0x1bf   :  { %130 = vrcp.f32 %v95_v30 }
 0x1c9   :  { %v131_v31 = vpop.eup %130 }
 0x1ca   :  { %v97_v32 = vmul.f32 %v131_v31, %v129_v28 }
 0x1cc   :  { %98 = vst.msk [vmem:[#allocation3] sm:$0x3] %vm86_vm0, %v97_v32 }
 0x1cd   :  { %143 = shalt.err (!%p140_p4)
}
 0x1ce   :  { %s144_s5 = scalar_lea.hbm %s223_s3, 32 }
 0x1cf   :  { %p145_p5 = scmp.ne.s32.totalorder %s223_s3, %s144_s5  ;;  %p148_p6 = scmp.lt.u32.totalorder %s144_s5, %s223_s3 }
 0x1d1   :  { %p150_p7 = pnand %p148_p6, %p145_p5 }
 0x1d3   :  { %153 = shalt.err (!%p150_p7)
}
 0x1d4   :  { %108 = dma.vmem_to_hbm [thread:$0]  %s106_s28, 32, %s223_s3, [#allocation4]  }
 0x1d5   :  { %154 = dma.done.wait [#allocation4], 32  }
 0x1d6   :  { %155 = vsyncadd [#allocation4], 4294967264 }
 0x1d7   :  { %112 = vsyncpa [#allocation4], 1 }

</bundles_post_ra>
